<compile_context>
chip_gen: v6e
topology: v6e:2x2x1
jax: 0.10.0
libtpu: 0.0.40
codegen_flags: <defaults>
</compile_context>

<pallas_src>
import functools
import math

import jax
import jax.numpy as jnp
from jax.experimental import pallas as pl
from jax.experimental.pallas import tpu as pltpu


# ----------------------------------------------------------------------------
# Fused encoder kernel
# ----------------------------------------------------------------------------
def _layernorm(z, g, b, eps=1e-5):
    mu = jnp.mean(z, axis=-1, keepdims=True)
    var = jnp.mean(jnp.square(z - mu), axis=-1, keepdims=True)
    return (z - mu) * jax.lax.rsqrt(var + eps) * g + b


def _encoder_kernel(x_ref, wq_ref, bq_ref, wkvs_ref, bkvs_ref, wo_ref, bo_ref,
                    g1_ref, b1_ref, w1_ref, bf1_ref, w2_ref, bf2_ref,
                    g2_ref, b2_ref, gn_ref, bn_ref,
                    xo_ref, series_ref, prior_ref, sigma_ref,
                    *, n_layers, n_heads, d_model, d_head, bb, seq_len):
    L, D, H, E = seq_len, d_model, n_heads, d_head
    scale = 1.0 / math.sqrt(E)
    ln3 = math.log(3.0)
    c0 = 1.0 / math.sqrt(2.0 * math.pi)

    # |i - j|^2 distance matrix generated on-chip (no HBM input / DMA).
    rowi = jax.lax.broadcasted_iota(jnp.int32, (L, L), 0)
    coli = jax.lax.broadcasted_iota(jnp.int32, (L, L), 1)
    dist_sq = jnp.square((rowi - coli).astype(jnp.float32))

    xs = x_ref[...]                                   # (bb*L, D) stacked batch rows

    for l in range(n_layers):                         # static unroll over layers
        wq_l = wq_ref[l]
        wo_l = wo_ref[l]
        wkvs_l = wkvs_ref[l]
        bkvs_l = bkvs_ref[l]

        # Q projection for the whole batch block: one (Bb*L, D)@(D, D) matmul.
        q_all = jnp.dot(xs, wq_l, preferred_element_type=jnp.float32) + bq_ref[l]

        attn_rows = []
        for bi in range(bb):                          # per-sample attention
            xs_b = xs[bi * L:(bi + 1) * L, :]         # sublane slice (free)
            q_b = q_all[bi * L:(bi + 1) * L, :]       # sublane slice (free)

            # Transposed fused K|V|sigma projection: (PK, D) x (L, D)^T -> (PK, L).
            # Per-head K/V/sigma slices then fall on sublane boundaries.
            kvs_t = jax.lax.dot_general(
                wkvs_l, xs_b, (((1,), (1,)), ((), ())),
                preferred_element_type=jnp.float32) + bkvs_l

            # sigma = 3 ** (sigmoid(5 s) + 1e-5) - 1, all heads at once: (H, L).
            sig = jnp.exp(ln3 * (jax.nn.sigmoid(5.0 * kvs_t[2 * D:2 * D + H, :])
                                 + 1e-5)) - 1.0
            sigma_ref[bi, l] = sig                    # one (H, L) store per (b, l)

            attn_acc = jnp.zeros((L, D), jnp.float32)
            for h in range(H):                        # static unroll over heads
                kT = kvs_t[h * E:(h + 1) * E, :]              # (E, L) sublane slice
                vT = kvs_t[D + h * E:D + (h + 1) * E, :]      # (E, L) sublane slice
                q_h = q_b[:, h * E:(h + 1) * E]               # (L, E) lane slice (Q only)

                # series = softmax(scale * Q K^T) over keys — standard-form matmul.
                scores = jnp.dot(q_h, kT,
                                 preferred_element_type=jnp.float32) * scale
                scores = scores - jnp.max(scores, axis=-1, keepdims=True)
                ex = jnp.exp(scores)
                series_h = ex / jnp.sum(ex, axis=-1, keepdims=True)   # exact divide

                # prior computed TRANSPOSED (sigma varies along columns), using
                # symmetry of |i-j|; the wrapper un-transposes.  Exact reciprocal.
                inv_sig = 1.0 / sig[h:h + 1, :]                       # (1, L)
                prior_t = (c0 * inv_sig) * jnp.exp(
                    -dist_sq * (0.5 * inv_sig * inv_sig))

                # Lane-dense packed outputs: heads along lanes, last dim H*L.
                series_ref[bi, l, :, h * L:(h + 1) * L] = series_h
                prior_ref[bi, l, :, h * L:(h + 1) * L] = prior_t

                # attention output, with Wo folded per head (no lane concat).
                attn_h = jax.lax.dot_general(
                    series_h, vT, (((1,), (1,)), ((), ())),
                    preferred_element_type=jnp.float32)               # (L, E)
                attn_acc = attn_acc + jnp.dot(
                    attn_h, wo_l[h * E:(h + 1) * E, :],
                    preferred_element_type=jnp.float32)
            attn_rows.append(attn_acc)

        attn = attn_rows[0] if bb == 1 else jnp.concatenate(attn_rows, axis=0)
        attn = attn + bo_ref[l]

        # x = norm1(x + attention(x))   (dropout = identity at eval)
        x1 = _layernorm(xs + attn, g1_ref[l], b1_ref[l])

        # FFN: two pointwise Conv1d (== Linear over D), ReLU — stacked over Bb*L.
        y = jnp.dot(x1, w1_ref[l], preferred_element_type=jnp.float32) + bf1_ref[l]
        y = jnp.maximum(y, 0.0)
        y = jnp.dot(y, w2_ref[l], preferred_element_type=jnp.float32) + bf2_ref[l]

        # x = norm2(x1 + ffn(x1))
        xs = _layernorm(x1 + y, g2_ref[l], b2_ref[l])

    # Encoder-level final norm (self.norm).
    xo_ref[...] = _layernorm(xs, gn_ref[...], bn_ref[...])


# ----------------------------------------------------------------------------
# Wrapper: weight packing + single pallas_call
# ----------------------------------------------------------------------------
def _pack_kvs_transposed(lp, d_model, n_heads):
    """Pack [Wk | Wv | Ws] pre-transposed as (PK, D), PK padded to 8 sublanes."""
    width = 2 * d_model + n_heads
    PK = ((width + 7) // 8) * 8
    w = jnp.zeros((PK, d_model), jnp.float32)
    w = (w.at[0:d_model, :].set(lp["Wk"].T)
          .at[d_model:2 * d_model, :].set(lp["Wv"].T)
          .at[2 * d_model:width, :].set(lp["Ws"].T))
    b = jnp.zeros((PK, 1), jnp.float32)
    b = (b.at[0:d_model, 0].set(lp["bk"])
          .at[d_model:2 * d_model, 0].set(lp["bv"])
          .at[2 * d_model:width, 0].set(lp["bs"]))
    return w, b


def _pick_batch_block(B, L, target_rows=128):
    # Largest divisor of B with Bb*L <= target_rows (fills the MXU M dim).
    # NOTE: on v7x prefer B // Bb >= 2 when B is large so both TCs get work.
    bb = 1
    for cand in range(1, B + 1):
        if B % cand == 0 and cand * L <= target_rows:
            bb = cand
    return bb


def encoder_forward(x, params):
    B, L, D = x.shape
    layers = params["layers"]
    NL = len(layers)
    H = layers[0]["n_heads"]
    E = D // H
    d_ff = layers[0]["W1"].shape[1]

    wq = jnp.stack([lp["Wq"] for lp in layers])                        # (NL, D, D)
    bq = jnp.stack([lp["bq"] for lp in layers]).reshape(NL, 1, D)
    packed = [_pack_kvs_transposed(lp, D, H) for lp in layers]
    PK = packed[0][0].shape[0]
    wkvs = jnp.stack([p[0] for p in packed])                           # (NL, PK, D)
    bkvs = jnp.stack([p[1] for p in packed])                           # (NL, PK, 1)
    wo = jnp.stack([lp["Wo"] for lp in layers])                        # (NL, D, D)
    bo = jnp.stack([lp["bo"] for lp in layers]).reshape(NL, 1, D)
    g1 = jnp.stack([lp["g1"] for lp in layers]).reshape(NL, 1, D)
    bt1 = jnp.stack([lp["bt1"] for lp in layers]).reshape(NL, 1, D)
    w1 = jnp.stack([lp["W1"] for lp in layers])                        # (NL, D, dff)
    bf1 = jnp.stack([lp["bf1"] for lp in layers]).reshape(NL, 1, d_ff)
    w2 = jnp.stack([lp["W2"] for lp in layers])                        # (NL, dff, D)
    bf2 = jnp.stack([lp["bf2"] for lp in layers]).reshape(NL, 1, D)
    g2 = jnp.stack([lp["g2"] for lp in layers]).reshape(NL, 1, D)
    bt2 = jnp.stack([lp["bt2"] for lp in layers]).reshape(NL, 1, D)
    gn = params["gn"].reshape(1, D)
    bn = params["bn"].reshape(1, D)

    Bb = _pick_batch_block(B, L)
    M = Bb * L
    grid = (B // Bb,)

    def full(shape):
        # Whole-array block, constant index_map: weights stay resident in VMEM
        # across the (parallel) batch grid — no per-step re-DMA.
        return pl.BlockSpec(shape, lambda b: (0,) * len(shape))

    in_specs = [
        pl.BlockSpec((M, D), lambda b: (b, 0)),                        # x (stacked rows)
        full((NL, D, D)), full((NL, 1, D)),                            # Wq, bq
        full((NL, PK, D)), full((NL, PK, 1)),                          # [Wk|Wv|Ws]^T, bias
        full((NL, D, D)), full((NL, 1, D)),                            # Wo, bo
        full((NL, 1, D)), full((NL, 1, D)),                            # g1, b1
        full((NL, D, d_ff)), full((NL, 1, d_ff)),                      # W1, bf1
        full((NL, d_ff, D)), full((NL, 1, D)),                         # W2, bf2
        full((NL, 1, D)), full((NL, 1, D)),                            # g2, b2
        full((1, D)), full((1, D)),                                    # gn, bn
    ]
    out_specs = (
        pl.BlockSpec((M, D), lambda b: (b, 0)),
        pl.BlockSpec((Bb, NL, L, H * L), lambda b: (b, 0, 0, 0)),      # series (lane-dense)
        pl.BlockSpec((Bb, NL, L, H * L), lambda b: (b, 0, 0, 0)),      # prior^T (lane-dense)
        pl.BlockSpec((Bb, NL, H, L), lambda b: (b, 0, 0, 0)),          # sigma
    )
    out_shape = (
        jax.ShapeDtypeStruct((B * L, D), jnp.float32),
        jax.ShapeDtypeStruct((B, NL, L, H * L), jnp.float32),
        jax.ShapeDtypeStruct((B, NL, L, H * L), jnp.float32),
        jax.ShapeDtypeStruct((B, NL, H, L), jnp.float32),
    )

    kernel = functools.partial(_encoder_kernel, n_layers=NL, n_heads=H,
                               d_model=D, d_head=E, bb=Bb, seq_len=L)

    xo, series_pk, prior_pk, sigma_pk = pl.pallas_call(
        kernel,
        grid=grid,
        in_specs=in_specs,
        out_specs=out_specs,
        out_shape=out_shape,
        compiler_params=pltpu.CompilerParams(
            dimension_semantics=("parallel",),
            vmem_limit_bytes=48 * 1024 * 1024),    # explicit, with v7x headroom
    )(x.reshape(B * L, D), wq, bq, wkvs, bkvs, wo, bo, g1, bt1, w1, bf1,
      w2, bf2, g2, bt2, gn, bn)

    xo = xo.reshape(B, L, D)
    # Unpack lane-packed heads: series_pk[b, l, i, h*L + j] = series[b, l, h, i, j]
    series = series_pk.reshape(B, NL, L, H, L).transpose(0, 1, 3, 2, 4)
    # prior was computed transposed: prior_pk[b, l, r, h*L + c] = prior[b, l, h, c, r]
    prior = prior_pk.reshape(B, NL, L, H, L).transpose(0, 1, 3, 4, 2)
    series_list = [series[:, i] for i in range(NL)]
    prior_list = [prior[:, i] for i in range(NL)]
    # sigma is a pure column broadcast in the reference (repeat over last dim).
    sigma_list = [jnp.broadcast_to(sigma_pk[:, i][..., None], (B, H, L, L))
                  for i in range(NL)]
    return xo, series_list, prior_list, sigma_list


# ----------------------------------------------------------------------------
# Deterministic parameter construction
# ----------------------------------------------------------------------------
def make_params(key, n_layers, d_model, n_heads, d_ff):
    def dense(k, fan_in, fan_out):
        return (jax.random.normal(k, (fan_in, fan_out), jnp.float32)
                * (1.0 / math.sqrt(fan_in)))

    layers = []
    for _ in range(n_layers):
        key, *ks = jax.random.split(key, 8)
        layers.append(dict(
            n_heads=n_heads,
            Wq=dense(ks[0], d_model, d_model), bq=jnp.zeros((d_model,), jnp.float32),
            Wk=dense(ks[1], d_model, d_model), bk=jnp.zeros((d_model,), jnp.float32),
            Wv=dense(ks[2], d_model, d_model), bv=jnp.zeros((d_model,), jnp.float32),
            Ws=dense(ks[3], d_model, n_heads), bs=jnp.zeros((n_heads,), jnp.float32),
            Wo=dense(ks[4], d_model, d_model), bo=jnp.zeros((d_model,), jnp.float32),
            W1=dense(ks[5], d_model, d_ff),    bf1=jnp.zeros((d_ff,), jnp.float32),
            W2=dense(ks[6], d_ff, d_model),    bf2=jnp.zeros((d_model,), jnp.float32),
            g1=jnp.ones((d_model,), jnp.float32),  bt1=jnp.zeros((d_model,), jnp.float32),
            g2=jnp.ones((d_model,), jnp.float32),  bt2=jnp.zeros((d_model,), jnp.float32),
        ))
    return dict(layers=layers,
                gn=jnp.ones((d_model,), jnp.float32),
                bn=jnp.zeros((d_model,), jnp.float32))


if __name__ == "__main__":
    B, L, D, H, D_FF, N_LAYERS = 2, 32, 32, 4, 64, 2

    key = jax.random.PRNGKey(0)
    key, kx = jax.random.split(key)
    x = jax.random.normal(kx, (B, L, D), jnp.float32)

    params = make_params(key, N_LAYERS, D, H, D_FF)

    # TODO(synk): dropout layers in the PyTorch EncoderLayer are identity in eval
    # mode; training-mode (PRNG-based) dropout is not implemented here.
    out, series_list, prior_list, sigma_list = encoder_forward(x, params)
    jax.block_until_ready(out)
    for t in series_list + prior_list + sigma_list:
        jax.block_until_ready(t)

    assert out.shape == (B, L, D)
    assert len(series_list) == N_LAYERS
    assert series_list[0].shape == (B, H, L, L)
    assert prior_list[0].shape == (B, H, L, L)
    assert sigma_list[0].shape == (B, H, L, L)
    print("KERNEL_OK")
</pallas_src>

<mosaic_0001>
module attributes {stable_mosaic.version = 11 : i64} {
  func.func @_encoder_kernel(%arg0: i32, %arg1: memref<64x32xf32, #tpu.memory_space<vmem>>, %arg2: memref<2x32x32xf32, #tpu.memory_space<vmem>>, %arg3: memref<2x1x32xf32, #tpu.memory_space<vmem>>, %arg4: memref<2x72x32xf32, #tpu.memory_space<vmem>>, %arg5: memref<2x72x1xf32, #tpu.memory_space<vmem>>, %arg6: memref<2x32x32xf32, #tpu.memory_space<vmem>>, %arg7: memref<2x1x32xf32, #tpu.memory_space<vmem>>, %arg8: memref<2x1x32xf32, #tpu.memory_space<vmem>>, %arg9: memref<2x1x32xf32, #tpu.memory_space<vmem>>, %arg10: memref<2x32x64xf32, #tpu.memory_space<vmem>>, %arg11: memref<2x1x64xf32, #tpu.memory_space<vmem>>, %arg12: memref<2x64x32xf32, #tpu.memory_space<vmem>>, %arg13: memref<2x1x32xf32, #tpu.memory_space<vmem>>, %arg14: memref<2x1x32xf32, #tpu.memory_space<vmem>>, %arg15: memref<2x1x32xf32, #tpu.memory_space<vmem>>, %arg16: memref<1x32xf32, #tpu.memory_space<vmem>>, %arg17: memref<1x32xf32, #tpu.memory_space<vmem>>, %arg18: memref<64x32xf32, #tpu.memory_space<vmem>>, %arg19: memref<2x2x32x128xf32, #tpu.memory_space<vmem>>, %arg20: memref<2x2x32x128xf32, #tpu.memory_space<vmem>>, %arg21: memref<2x2x4x32xf32, #tpu.memory_space<vmem>>) attributes {dimension_semantics = [#tpu.dimension_semantics<parallel>], iteration_bounds = array<i64: 1>, scalar_prefetch = 0 : i64, scratch_operands = 0 : i64, tpu.core_type = #tpu.core_type<tc>, window_params = [{transform_indices = @transform_0, window_bounds = array<i64: 64, 32>}, {pipeline_mode = #tpu.pipeline_mode<synchronous>, transform_indices = @transform_1, window_bounds = array<i64: 2, 32, 32>}, {pipeline_mode = #tpu.pipeline_mode<synchronous>, transform_indices = @transform_2, window_bounds = array<i64: 2, 1, 32>}, {pipeline_mode = #tpu.pipeline_mode<synchronous>, transform_indices = @transform_3, window_bounds = array<i64: 2, 72, 32>}, {pipeline_mode = #tpu.pipeline_mode<synchronous>, transform_indices = @transform_4, window_bounds = array<i64: 2, 72, 1>}, {pipeline_mode = #tpu.pipeline_mode<synchronous>, transform_indices = @transform_5, window_bounds = array<i64: 2, 32, 32>}, {pipeline_mode = #tpu.pipeline_mode<synchronous>, transform_indices = @transform_6, window_bounds = array<i64: 2, 1, 32>}, {pipeline_mode = #tpu.pipeline_mode<synchronous>, transform_indices = @transform_7, window_bounds = array<i64: 2, 1, 32>}, {pipeline_mode = #tpu.pipeline_mode<synchronous>, transform_indices = @transform_8, window_bounds = array<i64: 2, 1, 32>}, {pipeline_mode = #tpu.pipeline_mode<synchronous>, transform_indices = @transform_9, window_bounds = array<i64: 2, 32, 64>}, {pipeline_mode = #tpu.pipeline_mode<synchronous>, transform_indices = @transform_10, window_bounds = array<i64: 2, 1, 64>}, {pipeline_mode = #tpu.pipeline_mode<synchronous>, transform_indices = @transform_11, window_bounds = array<i64: 2, 64, 32>}, {pipeline_mode = #tpu.pipeline_mode<synchronous>, transform_indices = @transform_12, window_bounds = array<i64: 2, 1, 32>}, {pipeline_mode = #tpu.pipeline_mode<synchronous>, transform_indices = @transform_13, window_bounds = array<i64: 2, 1, 32>}, {pipeline_mode = #tpu.pipeline_mode<synchronous>, transform_indices = @transform_14, window_bounds = array<i64: 2, 1, 32>}, {pipeline_mode = #tpu.pipeline_mode<synchronous>, transform_indices = @transform_15, window_bounds = array<i64: 1, 32>}, {pipeline_mode = #tpu.pipeline_mode<synchronous>, transform_indices = @transform_16, window_bounds = array<i64: 1, 32>}, {transform_indices = @transform_17, window_bounds = array<i64: 64, 32>}, {transform_indices = @transform_18, window_bounds = array<i64: 2, 2, 32, 128>}, {transform_indices = @transform_19, window_bounds = array<i64: 2, 2, 32, 128>}, {transform_indices = @transform_20, window_bounds = array<i64: 2, 2, 4, 32>}]} {
    %0 = tpu.iota {dimensions = array<i32: 0>} : vector<32x32xi32>
    %1 = tpu.iota {dimensions = array<i32: 1>} : vector<32x32xi32>
    %2 = arith.subi %0, %1 : vector<32x32xi32>
    %3 = arith.sitofp %2 : vector<32x32xi32> to vector<32x32xf32>
    %4 = arith.mulf %3, %3 : vector<32x32xf32>
    %c0 = arith.constant 0 : index
    %c0_0 = arith.constant 0 : index
    %5 = vector.load %arg1[%c0, %c0_0] : memref<64x32xf32, #tpu.memory_space<vmem>>, vector<64x32xf32>
    %c0_1 = arith.constant 0 : index
    %c0_2 = arith.constant 0 : index
    %c0_3 = arith.constant 0 : index
    %6 = vector.load %arg2[%c0_1, %c0_2, %c0_3] : memref<2x32x32xf32, #tpu.memory_space<vmem>>, vector<1x32x32xf32>
    %7 = vector.shape_cast %6 : vector<1x32x32xf32> to vector<32x32xf32>
    %c0_4 = arith.constant 0 : index
    %c0_5 = arith.constant 0 : index
    %c0_6 = arith.constant 0 : index
    %8 = vector.load %arg6[%c0_4, %c0_5, %c0_6] : memref<2x32x32xf32, #tpu.memory_space<vmem>>, vector<1x32x32xf32>
    %9 = vector.shape_cast %8 : vector<1x32x32xf32> to vector<32x32xf32>
    %c0_7 = arith.constant 0 : index
    %c0_8 = arith.constant 0 : index
    %c0_9 = arith.constant 0 : index
    %10 = vector.load %arg4[%c0_7, %c0_8, %c0_9] : memref<2x72x32xf32, #tpu.memory_space<vmem>>, vector<1x72x32xf32>
    %11 = vector.shape_cast %10 : vector<1x72x32xf32> to vector<72x32xf32>
    %c0_10 = arith.constant 0 : index
    %c0_11 = arith.constant 0 : index
    %c0_12 = arith.constant 0 : index
    %12 = vector.load %arg5[%c0_10, %c0_11, %c0_12] : memref<2x72x1xf32, #tpu.memory_space<vmem>>, vector<1x72x1xf32>
    %13 = vector.shape_cast %12 : vector<1x72x1xf32> to vector<72x1xf32>
    %cst = arith.constant dense<0.000000e+00> : vector<64x32xf32>
    %14 = tpu.matmul %5, %7, %cst {dimension_numbers = #tpu.dot_dimension_numbers<[1], [0], [0], [1], [0, 0, 1, 1], [], []>} : vector<64x32xf32>, vector<32x32xf32>, vector<64x32xf32> -> vector<64x32xf32>
    %c0_13 = arith.constant 0 : index
    %c0_14 = arith.constant 0 : index
    %c0_15 = arith.constant 0 : index
    %15 = vector.load %arg3[%c0_13, %c0_14, %c0_15] : memref<2x1x32xf32, #tpu.memory_space<vmem>>, vector<1x1x32xf32>
    %16 = vector.shape_cast %15 : vector<1x1x32xf32> to vector<1x32xf32>
    %17 = vector.broadcast %16 : vector<1x32xf32> to vector<64x32xf32>
    %18 = arith.addf %14, %17 : vector<64x32xf32>
    %19 = vector.extract_strided_slice %5 {offsets = [0, 0], sizes = [32, 32], strides = [1, 1]} : vector<64x32xf32> to vector<32x32xf32>
    %20 = vector.extract_strided_slice %18 {offsets = [0, 0], sizes = [32, 32], strides = [1, 1]} : vector<64x32xf32> to vector<32x32xf32>
    %cst_16 = arith.constant dense<0.000000e+00> : vector<72x32xf32>
    %21 = tpu.matmul %11, %19, %cst_16 {dimension_numbers = #tpu.dot_dimension_numbers<[1], [1], [0], [0], [0, 0, 1, 0], [], []>} : vector<72x32xf32>, vector<32x32xf32>, vector<72x32xf32> -> vector<72x32xf32>
    %22 = vector.broadcast %13 : vector<72x1xf32> to vector<72x32xf32>
    %23 = arith.addf %21, %22 : vector<72x32xf32>
    %24 = vector.extract_strided_slice %23 {offsets = [64, 0], sizes = [4, 32], strides = [1, 1]} : vector<72x32xf32> to vector<4x32xf32>
    %cst_17 = arith.constant 5.000000e+00 : f32
    %25 = vector.broadcast %cst_17 : f32 to vector<4x32xf32>
    %26 = arith.mulf %25, %24 : vector<4x32xf32>
    %27 = arith.negf %26 : vector<4x32xf32>
    %28 = math.exp %27 : vector<4x32xf32>
    %cst_18 = arith.constant 1.000000e+00 : f32
    %29 = vector.broadcast %cst_18 : f32 to vector<4x32xf32>
    %30 = arith.addf %29, %28 : vector<4x32xf32>
    %31 = arith.divf %29, %30 : vector<4x32xf32>
    %cst_19 = arith.constant 9.99999974E-6 : f32
    %32 = vector.broadcast %cst_19 : f32 to vector<4x32xf32>
    %33 = arith.addf %31, %32 : vector<4x32xf32>
    %cst_20 = arith.constant 1.09861231 : f32
    %34 = vector.broadcast %cst_20 : f32 to vector<4x32xf32>
    %35 = arith.mulf %34, %33 : vector<4x32xf32>
    %36 = math.exp %35 : vector<4x32xf32>
    %cst_21 = arith.constant 1.000000e+00 : f32
    %37 = vector.broadcast %cst_21 : f32 to vector<4x32xf32>
    %38 = arith.subf %36, %37 : vector<4x32xf32>
    %c0_22 = arith.constant 0 : index
    %c0_23 = arith.constant 0 : index
    %c0_24 = arith.constant 0 : index
    %c0_25 = arith.constant 0 : index
    %39 = vector.load %arg21[%c0_22, %c0_23, %c0_24, %c0_25] : memref<2x2x4x32xf32, #tpu.memory_space<vmem>>, vector<1x1x4x32xf32>
    %40 = vector.shape_cast %39 : vector<1x1x4x32xf32> to vector<4x32xf32>
    %41 = vector.shape_cast %38 : vector<4x32xf32> to vector<1x1x4x32xf32>
    tpu.vector_store %arg21[%c0_22, %c0_23, %c0_24, %c0_25], %41 {strides = array<i32>} : memref<2x2x4x32xf32, #tpu.memory_space<vmem>>, vector<1x1x4x32xf32>,
    %cst_26 = arith.constant 0.000000e+00 : f32
    %42 = vector.broadcast %cst_26 : f32 to vector<32x32xf32>
    %43 = vector.extract_strided_slice %23 {offsets = [0, 0], sizes = [8, 32], strides = [1, 1]} : vector<72x32xf32> to vector<8x32xf32>
    %44 = vector.extract_strided_slice %23 {offsets = [32, 0], sizes = [8, 32], strides = [1, 1]} : vector<72x32xf32> to vector<8x32xf32>
    %45 = vector.extract_strided_slice %20 {offsets = [0, 0], sizes = [32, 8], strides = [1, 1]} : vector<32x32xf32> to vector<32x8xf32>
    %cst_27 = arith.constant dense<0.000000e+00> : vector<32x32xf32>
    %46 = tpu.matmul %45, %43, %cst_27 {dimension_numbers = #tpu.dot_dimension_numbers<[1], [0], [0], [1], [0, 0, 1, 1], [], []>} : vector<32x8xf32>, vector<8x32xf32>, vector<32x32xf32> -> vector<32x32xf32>
    %cst_28 = arith.constant 0.353553385 : f32
    %47 = vector.broadcast %cst_28 : f32 to vector<32x32xf32>
    %48 = arith.mulf %46, %47 : vector<32x32xf32>
    %cst_29 = arith.constant dense<0xFF800000> : vector<32xf32>
    %49 = vector.multi_reduction <maximumf>, %48, %cst_29 [1] : vector<32x32xf32> to vector<32xf32>
    %50 = vector.shape_cast %49 : vector<32xf32> to vector<32x1xf32>
    %51 = vector.broadcast %50 : vector<32x1xf32> to vector<32x32xf32>
    %52 = arith.subf %48, %51 : vector<32x32xf32>
    %53 = math.exp %52 : vector<32x32xf32>
    %cst_30 = arith.constant dense<0.000000e+00> : vector<32xf32>
    %54 = vector.multi_reduction <add>, %53, %cst_30 [1] : vector<32x32xf32> to vector<32xf32>
    %55 = vector.shape_cast %54 : vector<32xf32> to vector<32x1xf32>
    %56 = vector.broadcast %55 : vector<32x1xf32> to vector<32x32xf32>
    %57 = arith.divf %53, %56 : vector<32x32xf32>
    %58 = vector.extract_strided_slice %38 {offsets = [0, 0], sizes = [1, 32], strides = [1, 1]} : vector<4x32xf32> to vector<1x32xf32>
    %cst_31 = arith.constant 1.000000e+00 : f32
    %59 = vector.broadcast %cst_31 : f32 to vector<1x32xf32>
    %60 = arith.divf %59, %58 : vector<1x32xf32>
    %cst_32 = arith.constant 0.398942292 : f32
    %61 = vector.broadcast %cst_32 : f32 to vector<1x32xf32>
    %62 = arith.mulf %61, %60 : vector<1x32xf32>
    %cst_33 = arith.constant 0.000000e+00 : f32
    %63 = vector.broadcast %cst_33 : f32 to vector<32x32xf32>
    %64 = arith.subf %63, %4 : vector<32x32xf32>
    %cst_34 = arith.constant 5.000000e-01 : f32
    %65 = vector.broadcast %cst_34 : f32 to vector<1x32xf32>
    %66 = arith.mulf %65, %60 : vector<1x32xf32>
    %67 = arith.mulf %66, %60 : vector<1x32xf32>
    %68 = vector.broadcast %67 : vector<1x32xf32> to vector<32x32xf32>
    %69 = arith.mulf %64, %68 : vector<32x32xf32>
    %70 = math.exp %69 : vector<32x32xf32>
    %71 = vector.broadcast %62 : vector<1x32xf32> to vector<32x32xf32>
    %72 = arith.mulf %71, %70 : vector<32x32xf32>
    %c0_35 = arith.constant 0 : index
    %c0_36 = arith.constant 0 : index
    %c0_37 = arith.constant 0 : index
    %c0_38 = arith.constant 0 : index
    %73 = vector.load %arg19[%c0_35, %c0_36, %c0_37, %c0_38] : memref<2x2x32x128xf32, #tpu.memory_space<vmem>>, vector<1x1x32x32xf32>
    %74 = vector.shape_cast %73 : vector<1x1x32x32xf32> to vector<32x32xf32>
    %75 = vector.shape_cast %57 : vector<32x32xf32> to vector<1x1x32x32xf32>
    tpu.vector_store %arg19[%c0_35, %c0_36, %c0_37, %c0_38], %75 {strides = array<i32>} : memref<2x2x32x128xf32, #tpu.memory_space<vmem>>, vector<1x1x32x32xf32>,
    %c0_39 = arith.constant 0 : index
    %c0_40 = arith.constant 0 : index
    %c0_41 = arith.constant 0 : index
    %c0_42 = arith.constant 0 : index
    %76 = vector.load %arg20[%c0_39, %c0_40, %c0_41, %c0_42] : memref<2x2x32x128xf32, #tpu.memory_space<vmem>>, vector<1x1x32x32xf32>
    %77 = vector.shape_cast %76 : vector<1x1x32x32xf32> to vector<32x32xf32>
    %78 = vector.shape_cast %72 : vector<32x32xf32> to vector<1x1x32x32xf32>
    tpu.vector_store %arg20[%c0_39, %c0_40, %c0_41, %c0_42], %78 {strides = array<i32>} : memref<2x2x32x128xf32, #tpu.memory_space<vmem>>, vector<1x1x32x32xf32>,
    %cst_43 = arith.constant dense<0.000000e+00> : vector<32x8xf32>
    %79 = tpu.matmul %57, %44, %cst_43 {dimension_numbers = #tpu.dot_dimension_numbers<[1], [1], [0], [0], [0, 0, 1, 0], [], []>} : vector<32x32xf32>, vector<8x32xf32>, vector<32x8xf32> -> vector<32x8xf32>
    %80 = vector.extract_strided_slice %9 {offsets = [0, 0], sizes = [8, 32], strides = [1, 1]} : vector<32x32xf32> to vector<8x32xf32>
    %cst_44 = arith.constant dense<0.000000e+00> : vector<32x32xf32>
    %81 = tpu.matmul %79, %80, %cst_44 {dimension_numbers = #tpu.dot_dimension_numbers<[1], [0], [0], [1], [0, 0, 1, 1], [], []>} : vector<32x8xf32>, vector<8x32xf32>, vector<32x32xf32> -> vector<32x32xf32>
    %82 = arith.addf %42, %81 : vector<32x32xf32>
    %83 = vector.extract_strided_slice %23 {offsets = [8, 0], sizes = [8, 32], strides = [1, 1]} : vector<72x32xf32> to vector<8x32xf32>
    %84 = vector.extract_strided_slice %23 {offsets = [40, 0], sizes = [8, 32], strides = [1, 1]} : vector<72x32xf32> to vector<8x32xf32>
    %85 = vector.extract_strided_slice %20 {offsets = [0, 8], sizes = [32, 8], strides = [1, 1]} : vector<32x32xf32> to vector<32x8xf32>
    %cst_45 = arith.constant dense<0.000000e+00> : vector<32x32xf32>
    %86 = tpu.matmul %85, %83, %cst_45 {dimension_numbers = #tpu.dot_dimension_numbers<[1], [0], [0], [1], [0, 0, 1, 1], [], []>} : vector<32x8xf32>, vector<8x32xf32>, vector<32x32xf32> -> vector<32x32xf32>
    %cst_46 = arith.constant 0.353553385 : f32
    %87 = vector.broadcast %cst_46 : f32 to vector<32x32xf32>
    %88 = arith.mulf %86, %87 : vector<32x32xf32>
    %cst_47 = arith.constant dense<0xFF800000> : vector<32xf32>
    %89 = vector.multi_reduction <maximumf>, %88, %cst_47 [1] : vector<32x32xf32> to vector<32xf32>
    %90 = vector.shape_cast %89 : vector<32xf32> to vector<32x1xf32>
    %91 = vector.broadcast %90 : vector<32x1xf32> to vector<32x32xf32>
    %92 = arith.subf %88, %91 : vector<32x32xf32>
    %93 = math.exp %92 : vector<32x32xf32>
    %cst_48 = arith.constant dense<0.000000e+00> : vector<32xf32>
    %94 = vector.multi_reduction <add>, %93, %cst_48 [1] : vector<32x32xf32> to vector<32xf32>
    %95 = vector.shape_cast %94 : vector<32xf32> to vector<32x1xf32>
    %96 = vector.broadcast %95 : vector<32x1xf32> to vector<32x32xf32>
    %97 = arith.divf %93, %96 : vector<32x32xf32>
    %98 = vector.extract_strided_slice %38 {offsets = [1, 0], sizes = [1, 32], strides = [1, 1]} : vector<4x32xf32> to vector<1x32xf32>
    %cst_49 = arith.constant 1.000000e+00 : f32
    %99 = vector.broadcast %cst_49 : f32 to vector<1x32xf32>
    %100 = arith.divf %99, %98 : vector<1x32xf32>
    %cst_50 = arith.constant 0.398942292 : f32
    %101 = vector.broadcast %cst_50 : f32 to vector<1x32xf32>
    %102 = arith.mulf %101, %100 : vector<1x32xf32>
    %cst_51 = arith.constant 0.000000e+00 : f32
    %103 = vector.broadcast %cst_51 : f32 to vector<32x32xf32>
    %104 = arith.subf %103, %4 : vector<32x32xf32>
    %cst_52 = arith.constant 5.000000e-01 : f32
    %105 = vector.broadcast %cst_52 : f32 to vector<1x32xf32>
    %106 = arith.mulf %105, %100 : vector<1x32xf32>
    %107 = arith.mulf %106, %100 : vector<1x32xf32>
    %108 = vector.broadcast %107 : vector<1x32xf32> to vector<32x32xf32>
    %109 = arith.mulf %104, %108 : vector<32x32xf32>
    %110 = math.exp %109 : vector<32x32xf32>
    %111 = vector.broadcast %102 : vector<1x32xf32> to vector<32x32xf32>
    %112 = arith.mulf %111, %110 : vector<32x32xf32>
    %c0_53 = arith.constant 0 : index
    %c0_54 = arith.constant 0 : index
    %c0_55 = arith.constant 0 : index
    %c32 = arith.constant 32 : index
    %113 = vector.load %arg19[%c0_53, %c0_54, %c0_55, %c32] : memref<2x2x32x128xf32, #tpu.memory_space<vmem>>, vector<1x1x32x32xf32>
    %114 = vector.shape_cast %113 : vector<1x1x32x32xf32> to vector<32x32xf32>
    %115 = vector.shape_cast %97 : vector<32x32xf32> to vector<1x1x32x32xf32>
    tpu.vector_store %arg19[%c0_53, %c0_54, %c0_55, %c32], %115 {strides = array<i32>} : memref<2x2x32x128xf32, #tpu.memory_space<vmem>>, vector<1x1x32x32xf32>,
    %c0_56 = arith.constant 0 : index
    %c0_57 = arith.constant 0 : index
    %c0_58 = arith.constant 0 : index
    %c32_59 = arith.constant 32 : index
    %116 = vector.load %arg20[%c0_56, %c0_57, %c0_58, %c32_59] : memref<2x2x32x128xf32, #tpu.memory_space<vmem>>, vector<1x1x32x32xf32>
    %117 = vector.shape_cast %116 : vector<1x1x32x32xf32> to vector<32x32xf32>
    %118 = vector.shape_cast %112 : vector<32x32xf32> to vector<1x1x32x32xf32>
    tpu.vector_store %arg20[%c0_56, %c0_57, %c0_58, %c32_59], %118 {strides = array<i32>} : memref<2x2x32x128xf32, #tpu.memory_space<vmem>>, vector<1x1x32x32xf32>,
    %cst_60 = arith.constant dense<0.000000e+00> : vector<32x8xf32>
    %119 = tpu.matmul %97, %84, %cst_60 {dimension_numbers = #tpu.dot_dimension_numbers<[1], [1], [0], [0], [0, 0, 1, 0], [], []>} : vector<32x32xf32>, vector<8x32xf32>, vector<32x8xf32> -> vector<32x8xf32>
    %120 = vector.extract_strided_slice %9 {offsets = [8, 0], sizes = [8, 32], strides = [1, 1]} : vector<32x32xf32> to vector<8x32xf32>
    %cst_61 = arith.constant dense<0.000000e+00> : vector<32x32xf32>
    %121 = tpu.matmul %119, %120, %cst_61 {dimension_numbers = #tpu.dot_dimension_numbers<[1], [0], [0], [1], [0, 0, 1, 1], [], []>} : vector<32x8xf32>, vector<8x32xf32>, vector<32x32xf32> -> vector<32x32xf32>
    %122 = arith.addf %82, %121 : vector<32x32xf32>
    %123 = vector.extract_strided_slice %23 {offsets = [16, 0], sizes = [8, 32], strides = [1, 1]} : vector<72x32xf32> to vector<8x32xf32>
    %124 = vector.extract_strided_slice %23 {offsets = [48, 0], sizes = [8, 32], strides = [1, 1]} : vector<72x32xf32> to vector<8x32xf32>
    %125 = vector.extract_strided_slice %20 {offsets = [0, 16], sizes = [32, 8], strides = [1, 1]} : vector<32x32xf32> to vector<32x8xf32>
    %cst_62 = arith.constant dense<0.000000e+00> : vector<32x32xf32>
    %126 = tpu.matmul %125, %123, %cst_62 {dimension_numbers = #tpu.dot_dimension_numbers<[1], [0], [0], [1], [0, 0, 1, 1], [], []>} : vector<32x8xf32>, vector<8x32xf32>, vector<32x32xf32> -> vector<32x32xf32>
    %cst_63 = arith.constant 0.353553385 : f32
    %127 = vector.broadcast %cst_63 : f32 to vector<32x32xf32>
    %128 = arith.mulf %126, %127 : vector<32x32xf32>
    %cst_64 = arith.constant dense<0xFF800000> : vector<32xf32>
    %129 = vector.multi_reduction <maximumf>, %128, %cst_64 [1] : vector<32x32xf32> to vector<32xf32>
    %130 = vector.shape_cast %129 : vector<32xf32> to vector<32x1xf32>
    %131 = vector.broadcast %130 : vector<32x1xf32> to vector<32x32xf32>
    %132 = arith.subf %128, %131 : vector<32x32xf32>
    %133 = math.exp %132 : vector<32x32xf32>
    %cst_65 = arith.constant dense<0.000000e+00> : vector<32xf32>
    %134 = vector.multi_reduction <add>, %133, %cst_65 [1] : vector<32x32xf32> to vector<32xf32>
    %135 = vector.shape_cast %134 : vector<32xf32> to vector<32x1xf32>
    %136 = vector.broadcast %135 : vector<32x1xf32> to vector<32x32xf32>
    %137 = arith.divf %133, %136 : vector<32x32xf32>
    %138 = vector.extract_strided_slice %38 {offsets = [2, 0], sizes = [1, 32], strides = [1, 1]} : vector<4x32xf32> to vector<1x32xf32>
    %cst_66 = arith.constant 1.000000e+00 : f32
    %139 = vector.broadcast %cst_66 : f32 to vector<1x32xf32>
    %140 = arith.divf %139, %138 : vector<1x32xf32>
    %cst_67 = arith.constant 0.398942292 : f32
    %141 = vector.broadcast %cst_67 : f32 to vector<1x32xf32>
    %142 = arith.mulf %141, %140 : vector<1x32xf32>
    %cst_68 = arith.constant 0.000000e+00 : f32
    %143 = vector.broadcast %cst_68 : f32 to vector<32x32xf32>
    %144 = arith.subf %143, %4 : vector<32x32xf32>
    %cst_69 = arith.constant 5.000000e-01 : f32
    %145 = vector.broadcast %cst_69 : f32 to vector<1x32xf32>
    %146 = arith.mulf %145, %140 : vector<1x32xf32>
    %147 = arith.mulf %146, %140 : vector<1x32xf32>
    %148 = vector.broadcast %147 : vector<1x32xf32> to vector<32x32xf32>
    %149 = arith.mulf %144, %148 : vector<32x32xf32>
    %150 = math.exp %149 : vector<32x32xf32>
    %151 = vector.broadcast %142 : vector<1x32xf32> to vector<32x32xf32>
    %152 = arith.mulf %151, %150 : vector<32x32xf32>
    %c0_70 = arith.constant 0 : index
    %c0_71 = arith.constant 0 : index
    %c0_72 = arith.constant 0 : index
    %c64 = arith.constant 64 : index
    %153 = vector.load %arg19[%c0_70, %c0_71, %c0_72, %c64] : memref<2x2x32x128xf32, #tpu.memory_space<vmem>>, vector<1x1x32x32xf32>
    %154 = vector.shape_cast %153 : vector<1x1x32x32xf32> to vector<32x32xf32>
    %155 = vector.shape_cast %137 : vector<32x32xf32> to vector<1x1x32x32xf32>
    tpu.vector_store %arg19[%c0_70, %c0_71, %c0_72, %c64], %155 {strides = array<i32>} : memref<2x2x32x128xf32, #tpu.memory_space<vmem>>, vector<1x1x32x32xf32>,
    %c0_73 = arith.constant 0 : index
    %c0_74 = arith.constant 0 : index
    %c0_75 = arith.constant 0 : index
    %c64_76 = arith.constant 64 : index
    %156 = vector.load %arg20[%c0_73, %c0_74, %c0_75, %c64_76] : memref<2x2x32x128xf32, #tpu.memory_space<vmem>>, vector<1x1x32x32xf32>
    %157 = vector.shape_cast %156 : vector<1x1x32x32xf32> to vector<32x32xf32>
    %158 = vector.shape_cast %152 : vector<32x32xf32> to vector<1x1x32x32xf32>
    tpu.vector_store %arg20[%c0_73, %c0_74, %c0_75, %c64_76], %158 {strides = array<i32>} : memref<2x2x32x128xf32, #tpu.memory_space<vmem>>, vector<1x1x32x32xf32>,
    %cst_77 = arith.constant dense<0.000000e+00> : vector<32x8xf32>
    %159 = tpu.matmul %137, %124, %cst_77 {dimension_numbers = #tpu.dot_dimension_numbers<[1], [1], [0], [0], [0, 0, 1, 0], [], []>} : vector<32x32xf32>, vector<8x32xf32>, vector<32x8xf32> -> vector<32x8xf32>
    %160 = vector.extract_strided_slice %9 {offsets = [16, 0], sizes = [8, 32], strides = [1, 1]} : vector<32x32xf32> to vector<8x32xf32>
    %cst_78 = arith.constant dense<0.000000e+00> : vector<32x32xf32>
    %161 = tpu.matmul %159, %160, %cst_78 {dimension_numbers = #tpu.dot_dimension_numbers<[1], [0], [0], [1], [0, 0, 1, 1], [], []>} : vector<32x8xf32>, vector<8x32xf32>, vector<32x32xf32> -> vector<32x32xf32>
    %162 = arith.addf %122, %161 : vector<32x32xf32>
    %163 = vector.extract_strided_slice %23 {offsets = [24, 0], sizes = [8, 32], strides = [1, 1]} : vector<72x32xf32> to vector<8x32xf32>
    %164 = vector.extract_strided_slice %23 {offsets = [56, 0], sizes = [8, 32], strides = [1, 1]} : vector<72x32xf32> to vector<8x32xf32>
    %165 = vector.extract_strided_slice %20 {offsets = [0, 24], sizes = [32, 8], strides = [1, 1]} : vector<32x32xf32> to vector<32x8xf32>
    %cst_79 = arith.constant dense<0.000000e+00> : vector<32x32xf32>
    %166 = tpu.matmul %165, %163, %cst_79 {dimension_numbers = #tpu.dot_dimension_numbers<[1], [0], [0], [1], [0, 0, 1, 1], [], []>} : vector<32x8xf32>, vector<8x32xf32>, vector<32x32xf32> -> vector<32x32xf32>
    %cst_80 = arith.constant 0.353553385 : f32
    %167 = vector.broadcast %cst_80 : f32 to vector<32x32xf32>
    %168 = arith.mulf %166, %167 : vector<32x32xf32>
    %cst_81 = arith.constant dense<0xFF800000> : vector<32xf32>
    %169 = vector.multi_reduction <maximumf>, %168, %cst_81 [1] : vector<32x32xf32> to vector<32xf32>
    %170 = vector.shape_cast %169 : vector<32xf32> to vector<32x1xf32>
    %171 = vector.broadcast %170 : vector<32x1xf32> to vector<32x32xf32>
    %172 = arith.subf %168, %171 : vector<32x32xf32>
    %173 = math.exp %172 : vector<32x32xf32>
    %cst_82 = arith.constant dense<0.000000e+00> : vector<32xf32>
    %174 = vector.multi_reduction <add>, %173, %cst_82 [1] : vector<32x32xf32> to vector<32xf32>
    %175 = vector.shape_cast %174 : vector<32xf32> to vector<32x1xf32>
    %176 = vector.broadcast %175 : vector<32x1xf32> to vector<32x32xf32>
    %177 = arith.divf %173, %176 : vector<32x32xf32>
    %178 = vector.extract_strided_slice %38 {offsets = [3, 0], sizes = [1, 32], strides = [1, 1]} : vector<4x32xf32> to vector<1x32xf32>
    %cst_83 = arith.constant 1.000000e+00 : f32
    %179 = vector.broadcast %cst_83 : f32 to vector<1x32xf32>
    %180 = arith.divf %179, %178 : vector<1x32xf32>
    %cst_84 = arith.constant 0.398942292 : f32
    %181 = vector.broadcast %cst_84 : f32 to vector<1x32xf32>
    %182 = arith.mulf %181, %180 : vector<1x32xf32>
    %cst_85 = arith.constant 0.000000e+00 : f32
    %183 = vector.broadcast %cst_85 : f32 to vector<32x32xf32>
    %184 = arith.subf %183, %4 : vector<32x32xf32>
    %cst_86 = arith.constant 5.000000e-01 : f32
    %185 = vector.broadcast %cst_86 : f32 to vector<1x32xf32>
    %186 = arith.mulf %185, %180 : vector<1x32xf32>
    %187 = arith.mulf %186, %180 : vector<1x32xf32>
    %188 = vector.broadcast %187 : vector<1x32xf32> to vector<32x32xf32>
    %189 = arith.mulf %184, %188 : vector<32x32xf32>
    %190 = math.exp %189 : vector<32x32xf32>
    %191 = vector.broadcast %182 : vector<1x32xf32> to vector<32x32xf32>
    %192 = arith.mulf %191, %190 : vector<32x32xf32>
    %c0_87 = arith.constant 0 : index
    %c0_88 = arith.constant 0 : index
    %c0_89 = arith.constant 0 : index
    %c96 = arith.constant 96 : index
    %193 = vector.load %arg19[%c0_87, %c0_88, %c0_89, %c96] : memref<2x2x32x128xf32, #tpu.memory_space<vmem>>, vector<1x1x32x32xf32>
    %194 = vector.shape_cast %193 : vector<1x1x32x32xf32> to vector<32x32xf32>
    %195 = vector.shape_cast %177 : vector<32x32xf32> to vector<1x1x32x32xf32>
    tpu.vector_store %arg19[%c0_87, %c0_88, %c0_89, %c96], %195 {strides = array<i32>} : memref<2x2x32x128xf32, #tpu.memory_space<vmem>>, vector<1x1x32x32xf32>,
    %c0_90 = arith.constant 0 : index
    %c0_91 = arith.constant 0 : index
    %c0_92 = arith.constant 0 : index
    %c96_93 = arith.constant 96 : index
    %196 = vector.load %arg20[%c0_90, %c0_91, %c0_92, %c96_93] : memref<2x2x32x128xf32, #tpu.memory_space<vmem>>, vector<1x1x32x32xf32>
    %197 = vector.shape_cast %196 : vector<1x1x32x32xf32> to vector<32x32xf32>
    %198 = vector.shape_cast %192 : vector<32x32xf32> to vector<1x1x32x32xf32>
    tpu.vector_store %arg20[%c0_90, %c0_91, %c0_92, %c96_93], %198 {strides = array<i32>} : memref<2x2x32x128xf32, #tpu.memory_space<vmem>>, vector<1x1x32x32xf32>,
    %cst_94 = arith.constant dense<0.000000e+00> : vector<32x8xf32>
    %199 = tpu.matmul %177, %164, %cst_94 {dimension_numbers = #tpu.dot_dimension_numbers<[1], [1], [0], [0], [0, 0, 1, 0], [], []>} : vector<32x32xf32>, vector<8x32xf32>, vector<32x8xf32> -> vector<32x8xf32>
    %200 = vector.extract_strided_slice %9 {offsets = [24, 0], sizes = [8, 32], strides = [1, 1]} : vector<32x32xf32> to vector<8x32xf32>
    %cst_95 = arith.constant dense<0.000000e+00> : vector<32x32xf32>
    %201 = tpu.matmul %199, %200, %cst_95 {dimension_numbers = #tpu.dot_dimension_numbers<[1], [0], [0], [1], [0, 0, 1, 1], [], []>} : vector<32x8xf32>, vector<8x32xf32>, vector<32x32xf32> -> vector<32x32xf32>
    %202 = arith.addf %162, %201 : vector<32x32xf32>
    %203 = vector.extract_strided_slice %5 {offsets = [32, 0], sizes = [32, 32], strides = [1, 1]} : vector<64x32xf32> to vector<32x32xf32>
    %204 = vector.extract_strided_slice %18 {offsets = [32, 0], sizes = [32, 32], strides = [1, 1]} : vector<64x32xf32> to vector<32x32xf32>
    %cst_96 = arith.constant dense<0.000000e+00> : vector<72x32xf32>
    %205 = tpu.matmul %11, %203, %cst_96 {dimension_numbers = #tpu.dot_dimension_numbers<[1], [1], [0], [0], [0, 0, 1, 0], [], []>} : vector<72x32xf32>, vector<32x32xf32>, vector<72x32xf32> -> vector<72x32xf32>
    %206 = vector.broadcast %13 : vector<72x1xf32> to vector<72x32xf32>
    %207 = arith.addf %205, %206 : vector<72x32xf32>
    %208 = vector.extract_strided_slice %207 {offsets = [64, 0], sizes = [4, 32], strides = [1, 1]} : vector<72x32xf32> to vector<4x32xf32>
    %cst_97 = arith.constant 5.000000e+00 : f32
    %209 = vector.broadcast %cst_97 : f32 to vector<4x32xf32>
    %210 = arith.mulf %209, %208 : vector<4x32xf32>
    %211 = arith.negf %210 : vector<4x32xf32>
    %212 = math.exp %211 : vector<4x32xf32>
    %cst_98 = arith.constant 1.000000e+00 : f32
    %213 = vector.broadcast %cst_98 : f32 to vector<4x32xf32>
    %214 = arith.addf %213, %212 : vector<4x32xf32>
    %215 = arith.divf %213, %214 : vector<4x32xf32>
    %cst_99 = arith.constant 9.99999974E-6 : f32
    %216 = vector.broadcast %cst_99 : f32 to vector<4x32xf32>
    %217 = arith.addf %215, %216 : vector<4x32xf32>
    %cst_100 = arith.constant 1.09861231 : f32
    %218 = vector.broadcast %cst_100 : f32 to vector<4x32xf32>
    %219 = arith.mulf %218, %217 : vector<4x32xf32>
    %220 = math.exp %219 : vector<4x32xf32>
    %cst_101 = arith.constant 1.000000e+00 : f32
    %221 = vector.broadcast %cst_101 : f32 to vector<4x32xf32>
    %222 = arith.subf %220, %221 : vector<4x32xf32>
    %c1 = arith.constant 1 : index
    %c0_102 = arith.constant 0 : index
    %c0_103 = arith.constant 0 : index
    %c0_104 = arith.constant 0 : index
    %223 = vector.load %arg21[%c1, %c0_102, %c0_103, %c0_104] : memref<2x2x4x32xf32, #tpu.memory_space<vmem>>, vector<1x1x4x32xf32>
    %224 = vector.shape_cast %223 : vector<1x1x4x32xf32> to vector<4x32xf32>
    %225 = vector.shape_cast %222 : vector<4x32xf32> to vector<1x1x4x32xf32>
    tpu.vector_store %arg21[%c1, %c0_102, %c0_103, %c0_104], %225 {strides = array<i32>} : memref<2x2x4x32xf32, #tpu.memory_space<vmem>>, vector<1x1x4x32xf32>,
    %cst_105 = arith.constant 0.000000e+00 : f32
    %226 = vector.broadcast %cst_105 : f32 to vector<32x32xf32>
    %227 = vector.extract_strided_slice %207 {offsets = [0, 0], sizes = [8, 32], strides = [1, 1]} : vector<72x32xf32> to vector<8x32xf32>
    %228 = vector.extract_strided_slice %207 {offsets = [32, 0], sizes = [8, 32], strides = [1, 1]} : vector<72x32xf32> to vector<8x32xf32>
    %229 = vector.extract_strided_slice %204 {offsets = [0, 0], sizes = [32, 8], strides = [1, 1]} : vector<32x32xf32> to vector<32x8xf32>
    %cst_106 = arith.constant dense<0.000000e+00> : vector<32x32xf32>
    %230 = tpu.matmul %229, %227, %cst_106 {dimension_numbers = #tpu.dot_dimension_numbers<[1], [0], [0], [1], [0, 0, 1, 1], [], []>} : vector<32x8xf32>, vector<8x32xf32>, vector<32x32xf32> -> vector<32x32xf32>
    %cst_107 = arith.constant 0.353553385 : f32
    %231 = vector.broadcast %cst_107 : f32 to vector<32x32xf32>
    %232 = arith.mulf %230, %231 : vector<32x32xf32>
    %cst_108 = arith.constant dense<0xFF800000> : vector<32xf32>
    %233 = vector.multi_reduction <maximumf>, %232, %cst_108 [1] : vector<32x32xf32> to vector<32xf32>
    %234 = vector.shape_cast %233 : vector<32xf32> to vector<32x1xf32>
    %235 = vector.broadcast %234 : vector<32x1xf32> to vector<32x32xf32>
    %236 = arith.subf %232, %235 : vector<32x32xf32>
    %237 = math.exp %236 : vector<32x32xf32>
    %cst_109 = arith.constant dense<0.000000e+00> : vector<32xf32>
    %238 = vector.multi_reduction <add>, %237, %cst_109 [1] : vector<32x32xf32> to vector<32xf32>
    %239 = vector.shape_cast %238 : vector<32xf32> to vector<32x1xf32>
    %240 = vector.broadcast %239 : vector<32x1xf32> to vector<32x32xf32>
    %241 = arith.divf %237, %240 : vector<32x32xf32>
    %242 = vector.extract_strided_slice %222 {offsets = [0, 0], sizes = [1, 32], strides = [1, 1]} : vector<4x32xf32> to vector<1x32xf32>
    %cst_110 = arith.constant 1.000000e+00 : f32
    %243 = vector.broadcast %cst_110 : f32 to vector<1x32xf32>
    %244 = arith.divf %243, %242 : vector<1x32xf32>
    %cst_111 = arith.constant 0.398942292 : f32
    %245 = vector.broadcast %cst_111 : f32 to vector<1x32xf32>
    %246 = arith.mulf %245, %244 : vector<1x32xf32>
    %cst_112 = arith.constant 0.000000e+00 : f32
    %247 = vector.broadcast %cst_112 : f32 to vector<32x32xf32>
    %248 = arith.subf %247, %4 : vector<32x32xf32>
    %cst_113 = arith.constant 5.000000e-01 : f32
    %249 = vector.broadcast %cst_113 : f32 to vector<1x32xf32>
    %250 = arith.mulf %249, %244 : vector<1x32xf32>
    %251 = arith.mulf %250, %244 : vector<1x32xf32>
    %252 = vector.broadcast %251 : vector<1x32xf32> to vector<32x32xf32>
    %253 = arith.mulf %248, %252 : vector<32x32xf32>
    %254 = math.exp %253 : vector<32x32xf32>
    %255 = vector.broadcast %246 : vector<1x32xf32> to vector<32x32xf32>
    %256 = arith.mulf %255, %254 : vector<32x32xf32>
    %c1_114 = arith.constant 1 : index
    %c0_115 = arith.constant 0 : index
    %c0_116 = arith.constant 0 : index
    %c0_117 = arith.constant 0 : index
    %257 = vector.load %arg19[%c1_114, %c0_115, %c0_116, %c0_117] : memref<2x2x32x128xf32, #tpu.memory_space<vmem>>, vector<1x1x32x32xf32>
    %258 = vector.shape_cast %257 : vector<1x1x32x32xf32> to vector<32x32xf32>
    %259 = vector.shape_cast %241 : vector<32x32xf32> to vector<1x1x32x32xf32>
    tpu.vector_store %arg19[%c1_114, %c0_115, %c0_116, %c0_117], %259 {strides = array<i32>} : memref<2x2x32x128xf32, #tpu.memory_space<vmem>>, vector<1x1x32x32xf32>,
    %c1_118 = arith.constant 1 : index
    %c0_119 = arith.constant 0 : index
    %c0_120 = arith.constant 0 : index
    %c0_121 = arith.constant 0 : index
    %260 = vector.load %arg20[%c1_118, %c0_119, %c0_120, %c0_121] : memref<2x2x32x128xf32, #tpu.memory_space<vmem>>, vector<1x1x32x32xf32>
    %261 = vector.shape_cast %260 : vector<1x1x32x32xf32> to vector<32x32xf32>
    %262 = vector.shape_cast %256 : vector<32x32xf32> to vector<1x1x32x32xf32>
    tpu.vector_store %arg20[%c1_118, %c0_119, %c0_120, %c0_121], %262 {strides = array<i32>} : memref<2x2x32x128xf32, #tpu.memory_space<vmem>>, vector<1x1x32x32xf32>,
    %cst_122 = arith.constant dense<0.000000e+00> : vector<32x8xf32>
    %263 = tpu.matmul %241, %228, %cst_122 {dimension_numbers = #tpu.dot_dimension_numbers<[1], [1], [0], [0], [0, 0, 1, 0], [], []>} : vector<32x32xf32>, vector<8x32xf32>, vector<32x8xf32> -> vector<32x8xf32>
    %264 = vector.extract_strided_slice %9 {offsets = [0, 0], sizes = [8, 32], strides = [1, 1]} : vector<32x32xf32> to vector<8x32xf32>
    %cst_123 = arith.constant dense<0.000000e+00> : vector<32x32xf32>
    %265 = tpu.matmul %263, %264, %cst_123 {dimension_numbers = #tpu.dot_dimension_numbers<[1], [0], [0], [1], [0, 0, 1, 1], [], []>} : vector<32x8xf32>, vector<8x32xf32>, vector<32x32xf32> -> vector<32x32xf32>
    %266 = arith.addf %226, %265 : vector<32x32xf32>
    %267 = vector.extract_strided_slice %207 {offsets = [8, 0], sizes = [8, 32], strides = [1, 1]} : vector<72x32xf32> to vector<8x32xf32>
    %268 = vector.extract_strided_slice %207 {offsets = [40, 0], sizes = [8, 32], strides = [1, 1]} : vector<72x32xf32> to vector<8x32xf32>
    %269 = vector.extract_strided_slice %204 {offsets = [0, 8], sizes = [32, 8], strides = [1, 1]} : vector<32x32xf32> to vector<32x8xf32>
    %cst_124 = arith.constant dense<0.000000e+00> : vector<32x32xf32>
    %270 = tpu.matmul %269, %267, %cst_124 {dimension_numbers = #tpu.dot_dimension_numbers<[1], [0], [0], [1], [0, 0, 1, 1], [], []>} : vector<32x8xf32>, vector<8x32xf32>, vector<32x32xf32> -> vector<32x32xf32>
    %cst_125 = arith.constant 0.353553385 : f32
    %271 = vector.broadcast %cst_125 : f32 to vector<32x32xf32>
    %272 = arith.mulf %270, %271 : vector<32x32xf32>
    %cst_126 = arith.constant dense<0xFF800000> : vector<32xf32>
    %273 = vector.multi_reduction <maximumf>, %272, %cst_126 [1] : vector<32x32xf32> to vector<32xf32>
    %274 = vector.shape_cast %273 : vector<32xf32> to vector<32x1xf32>
    %275 = vector.broadcast %274 : vector<32x1xf32> to vector<32x32xf32>
    %276 = arith.subf %272, %275 : vector<32x32xf32>
    %277 = math.exp %276 : vector<32x32xf32>
    %cst_127 = arith.constant dense<0.000000e+00> : vector<32xf32>
    %278 = vector.multi_reduction <add>, %277, %cst_127 [1] : vector<32x32xf32> to vector<32xf32>
    %279 = vector.shape_cast %278 : vector<32xf32> to vector<32x1xf32>
    %280 = vector.broadcast %279 : vector<32x1xf32> to vector<32x32xf32>
    %281 = arith.divf %277, %280 : vector<32x32xf32>
    %282 = vector.extract_strided_slice %222 {offsets = [1, 0], sizes = [1, 32], strides = [1, 1]} : vector<4x32xf32> to vector<1x32xf32>
    %cst_128 = arith.constant 1.000000e+00 : f32
    %283 = vector.broadcast %cst_128 : f32 to vector<1x32xf32>
    %284 = arith.divf %283, %282 : vector<1x32xf32>
    %cst_129 = arith.constant 0.398942292 : f32
    %285 = vector.broadcast %cst_129 : f32 to vector<1x32xf32>
    %286 = arith.mulf %285, %284 : vector<1x32xf32>
    %cst_130 = arith.constant 0.000000e+00 : f32
    %287 = vector.broadcast %cst_130 : f32 to vector<32x32xf32>
    %288 = arith.subf %287, %4 : vector<32x32xf32>
    %cst_131 = arith.constant 5.000000e-01 : f32
    %289 = vector.broadcast %cst_131 : f32 to vector<1x32xf32>
    %290 = arith.mulf %289, %284 : vector<1x32xf32>
    %291 = arith.mulf %290, %284 : vector<1x32xf32>
    %292 = vector.broadcast %291 : vector<1x32xf32> to vector<32x32xf32>
    %293 = arith.mulf %288, %292 : vector<32x32xf32>
    %294 = math.exp %293 : vector<32x32xf32>
    %295 = vector.broadcast %286 : vector<1x32xf32> to vector<32x32xf32>
    %296 = arith.mulf %295, %294 : vector<32x32xf32>
    %c1_132 = arith.constant 1 : index
    %c0_133 = arith.constant 0 : index
    %c0_134 = arith.constant 0 : index
    %c32_135 = arith.constant 32 : index
    %297 = vector.load %arg19[%c1_132, %c0_133, %c0_134, %c32_135] : memref<2x2x32x128xf32, #tpu.memory_space<vmem>>, vector<1x1x32x32xf32>
    %298 = vector.shape_cast %297 : vector<1x1x32x32xf32> to vector<32x32xf32>
    %299 = vector.shape_cast %281 : vector<32x32xf32> to vector<1x1x32x32xf32>
    tpu.vector_store %arg19[%c1_132, %c0_133, %c0_134, %c32_135], %299 {strides = array<i32>} : memref<2x2x32x128xf32, #tpu.memory_space<vmem>>, vector<1x1x32x32xf32>,
    %c1_136 = arith.constant 1 : index
    %c0_137 = arith.constant 0 : index
    %c0_138 = arith.constant 0 : index
    %c32_139 = arith.constant 32 : index
    %300 = vector.load %arg20[%c1_136, %c0_137, %c0_138, %c32_139] : memref<2x2x32x128xf32, #tpu.memory_space<vmem>>, vector<1x1x32x32xf32>
    %301 = vector.shape_cast %300 : vector<1x1x32x32xf32> to vector<32x32xf32>
    %302 = vector.shape_cast %296 : vector<32x32xf32> to vector<1x1x32x32xf32>
    tpu.vector_store %arg20[%c1_136, %c0_137, %c0_138, %c32_139], %302 {strides = array<i32>} : memref<2x2x32x128xf32, #tpu.memory_space<vmem>>, vector<1x1x32x32xf32>,
    %cst_140 = arith.constant dense<0.000000e+00> : vector<32x8xf32>
    %303 = tpu.matmul %281, %268, %cst_140 {dimension_numbers = #tpu.dot_dimension_numbers<[1], [1], [0], [0], [0, 0, 1, 0], [], []>} : vector<32x32xf32>, vector<8x32xf32>, vector<32x8xf32> -> vector<32x8xf32>
    %304 = vector.extract_strided_slice %9 {offsets = [8, 0], sizes = [8, 32], strides = [1, 1]} : vector<32x32xf32> to vector<8x32xf32>
    %cst_141 = arith.constant dense<0.000000e+00> : vector<32x32xf32>
    %305 = tpu.matmul %303, %304, %cst_141 {dimension_numbers = #tpu.dot_dimension_numbers<[1], [0], [0], [1], [0, 0, 1, 1], [], []>} : vector<32x8xf32>, vector<8x32xf32>, vector<32x32xf32> -> vector<32x32xf32>
    %306 = arith.addf %266, %305 : vector<32x32xf32>
    %307 = vector.extract_strided_slice %207 {offsets = [16, 0], sizes = [8, 32], strides = [1, 1]} : vector<72x32xf32> to vector<8x32xf32>
    %308 = vector.extract_strided_slice %207 {offsets = [48, 0], sizes = [8, 32], strides = [1, 1]} : vector<72x32xf32> to vector<8x32xf32>
    %309 = vector.extract_strided_slice %204 {offsets = [0, 16], sizes = [32, 8], strides = [1, 1]} : vector<32x32xf32> to vector<32x8xf32>
    %cst_142 = arith.constant dense<0.000000e+00> : vector<32x32xf32>
    %310 = tpu.matmul %309, %307, %cst_142 {dimension_numbers = #tpu.dot_dimension_numbers<[1], [0], [0], [1], [0, 0, 1, 1], [], []>} : vector<32x8xf32>, vector<8x32xf32>, vector<32x32xf32> -> vector<32x32xf32>
    %cst_143 = arith.constant 0.353553385 : f32
    %311 = vector.broadcast %cst_143 : f32 to vector<32x32xf32>
    %312 = arith.mulf %310, %311 : vector<32x32xf32>
    %cst_144 = arith.constant dense<0xFF800000> : vector<32xf32>
    %313 = vector.multi_reduction <maximumf>, %312, %cst_144 [1] : vector<32x32xf32> to vector<32xf32>
    %314 = vector.shape_cast %313 : vector<32xf32> to vector<32x1xf32>
    %315 = vector.broadcast %314 : vector<32x1xf32> to vector<32x32xf32>
    %316 = arith.subf %312, %315 : vector<32x32xf32>
    %317 = math.exp %316 : vector<32x32xf32>
    %cst_145 = arith.constant dense<0.000000e+00> : vector<32xf32>
    %318 = vector.multi_reduction <add>, %317, %cst_145 [1] : vector<32x32xf32> to vector<32xf32>
    %319 = vector.shape_cast %318 : vector<32xf32> to vector<32x1xf32>
    %320 = vector.broadcast %319 : vector<32x1xf32> to vector<32x32xf32>
    %321 = arith.divf %317, %320 : vector<32x32xf32>
    %322 = vector.extract_strided_slice %222 {offsets = [2, 0], sizes = [1, 32], strides = [1, 1]} : vector<4x32xf32> to vector<1x32xf32>
    %cst_146 = arith.constant 1.000000e+00 : f32
    %323 = vector.broadcast %cst_146 : f32 to vector<1x32xf32>
    %324 = arith.divf %323, %322 : vector<1x32xf32>
    %cst_147 = arith.constant 0.398942292 : f32
    %325 = vector.broadcast %cst_147 : f32 to vector<1x32xf32>
    %326 = arith.mulf %325, %324 : vector<1x32xf32>
    %cst_148 = arith.constant 0.000000e+00 : f32
    %327 = vector.broadcast %cst_148 : f32 to vector<32x32xf32>
    %328 = arith.subf %327, %4 : vector<32x32xf32>
    %cst_149 = arith.constant 5.000000e-01 : f32
    %329 = vector.broadcast %cst_149 : f32 to vector<1x32xf32>
    %330 = arith.mulf %329, %324 : vector<1x32xf32>
    %331 = arith.mulf %330, %324 : vector<1x32xf32>
    %332 = vector.broadcast %331 : vector<1x32xf32> to vector<32x32xf32>
    %333 = arith.mulf %328, %332 : vector<32x32xf32>
    %334 = math.exp %333 : vector<32x32xf32>
    %335 = vector.broadcast %326 : vector<1x32xf32> to vector<32x32xf32>
    %336 = arith.mulf %335, %334 : vector<32x32xf32>
    %c1_150 = arith.constant 1 : index
    %c0_151 = arith.constant 0 : index
    %c0_152 = arith.constant 0 : index
    %c64_153 = arith.constant 64 : index
    %337 = vector.load %arg19[%c1_150, %c0_151, %c0_152, %c64_153] : memref<2x2x32x128xf32, #tpu.memory_space<vmem>>, vector<1x1x32x32xf32>
    %338 = vector.shape_cast %337 : vector<1x1x32x32xf32> to vector<32x32xf32>
    %339 = vector.shape_cast %321 : vector<32x32xf32> to vector<1x1x32x32xf32>
    tpu.vector_store %arg19[%c1_150, %c0_151, %c0_152, %c64_153], %339 {strides = array<i32>} : memref<2x2x32x128xf32, #tpu.memory_space<vmem>>, vector<1x1x32x32xf32>,
    %c1_154 = arith.constant 1 : index
    %c0_155 = arith.constant 0 : index
    %c0_156 = arith.constant 0 : index
    %c64_157 = arith.constant 64 : index
    %340 = vector.load %arg20[%c1_154, %c0_155, %c0_156, %c64_157] : memref<2x2x32x128xf32, #tpu.memory_space<vmem>>, vector<1x1x32x32xf32>
    %341 = vector.shape_cast %340 : vector<1x1x32x32xf32> to vector<32x32xf32>
    %342 = vector.shape_cast %336 : vector<32x32xf32> to vector<1x1x32x32xf32>
    tpu.vector_store %arg20[%c1_154, %c0_155, %c0_156, %c64_157], %342 {strides = array<i32>} : memref<2x2x32x128xf32, #tpu.memory_space<vmem>>, vector<1x1x32x32xf32>,
    %cst_158 = arith.constant dense<0.000000e+00> : vector<32x8xf32>
    %343 = tpu.matmul %321, %308, %cst_158 {dimension_numbers = #tpu.dot_dimension_numbers<[1], [1], [0], [0], [0, 0, 1, 0], [], []>} : vector<32x32xf32>, vector<8x32xf32>, vector<32x8xf32> -> vector<32x8xf32>
    %344 = vector.extract_strided_slice %9 {offsets = [16, 0], sizes = [8, 32], strides = [1, 1]} : vector<32x32xf32> to vector<8x32xf32>
    %cst_159 = arith.constant dense<0.000000e+00> : vector<32x32xf32>
    %345 = tpu.matmul %343, %344, %cst_159 {dimension_numbers = #tpu.dot_dimension_numbers<[1], [0], [0], [1], [0, 0, 1, 1], [], []>} : vector<32x8xf32>, vector<8x32xf32>, vector<32x32xf32> -> vector<32x32xf32>
    %346 = arith.addf %306, %345 : vector<32x32xf32>
    %347 = vector.extract_strided_slice %207 {offsets = [24, 0], sizes = [8, 32], strides = [1, 1]} : vector<72x32xf32> to vector<8x32xf32>
    %348 = vector.extract_strided_slice %207 {offsets = [56, 0], sizes = [8, 32], strides = [1, 1]} : vector<72x32xf32> to vector<8x32xf32>
    %349 = vector.extract_strided_slice %204 {offsets = [0, 24], sizes = [32, 8], strides = [1, 1]} : vector<32x32xf32> to vector<32x8xf32>
    %cst_160 = arith.constant dense<0.000000e+00> : vector<32x32xf32>
    %350 = tpu.matmul %349, %347, %cst_160 {dimension_numbers = #tpu.dot_dimension_numbers<[1], [0], [0], [1], [0, 0, 1, 1], [], []>} : vector<32x8xf32>, vector<8x32xf32>, vector<32x32xf32> -> vector<32x32xf32>
    %cst_161 = arith.constant 0.353553385 : f32
    %351 = vector.broadcast %cst_161 : f32 to vector<32x32xf32>
    %352 = arith.mulf %350, %351 : vector<32x32xf32>
    %cst_162 = arith.constant dense<0xFF800000> : vector<32xf32>
    %353 = vector.multi_reduction <maximumf>, %352, %cst_162 [1] : vector<32x32xf32> to vector<32xf32>
    %354 = vector.shape_cast %353 : vector<32xf32> to vector<32x1xf32>
    %355 = vector.broadcast %354 : vector<32x1xf32> to vector<32x32xf32>
    %356 = arith.subf %352, %355 : vector<32x32xf32>
    %357 = math.exp %356 : vector<32x32xf32>
    %cst_163 = arith.constant dense<0.000000e+00> : vector<32xf32>
    %358 = vector.multi_reduction <add>, %357, %cst_163 [1] : vector<32x32xf32> to vector<32xf32>
    %359 = vector.shape_cast %358 : vector<32xf32> to vector<32x1xf32>
    %360 = vector.broadcast %359 : vector<32x1xf32> to vector<32x32xf32>
    %361 = arith.divf %357, %360 : vector<32x32xf32>
    %362 = vector.extract_strided_slice %222 {offsets = [3, 0], sizes = [1, 32], strides = [1, 1]} : vector<4x32xf32> to vector<1x32xf32>
    %cst_164 = arith.constant 1.000000e+00 : f32
    %363 = vector.broadcast %cst_164 : f32 to vector<1x32xf32>
    %364 = arith.divf %363, %362 : vector<1x32xf32>
    %cst_165 = arith.constant 0.398942292 : f32
    %365 = vector.broadcast %cst_165 : f32 to vector<1x32xf32>
    %366 = arith.mulf %365, %364 : vector<1x32xf32>
    %cst_166 = arith.constant 0.000000e+00 : f32
    %367 = vector.broadcast %cst_166 : f32 to vector<32x32xf32>
    %368 = arith.subf %367, %4 : vector<32x32xf32>
    %cst_167 = arith.constant 5.000000e-01 : f32
    %369 = vector.broadcast %cst_167 : f32 to vector<1x32xf32>
    %370 = arith.mulf %369, %364 : vector<1x32xf32>
    %371 = arith.mulf %370, %364 : vector<1x32xf32>
    %372 = vector.broadcast %371 : vector<1x32xf32> to vector<32x32xf32>
    %373 = arith.mulf %368, %372 : vector<32x32xf32>
    %374 = math.exp %373 : vector<32x32xf32>
    %375 = vector.broadcast %366 : vector<1x32xf32> to vector<32x32xf32>
    %376 = arith.mulf %375, %374 : vector<32x32xf32>
    %c1_168 = arith.constant 1 : index
    %c0_169 = arith.constant 0 : index
    %c0_170 = arith.constant 0 : index
    %c96_171 = arith.constant 96 : index
    %377 = vector.load %arg19[%c1_168, %c0_169, %c0_170, %c96_171] : memref<2x2x32x128xf32, #tpu.memory_space<vmem>>, vector<1x1x32x32xf32>
    %378 = vector.shape_cast %377 : vector<1x1x32x32xf32> to vector<32x32xf32>
    %379 = vector.shape_cast %361 : vector<32x32xf32> to vector<1x1x32x32xf32>
    tpu.vector_store %arg19[%c1_168, %c0_169, %c0_170, %c96_171], %379 {strides = array<i32>} : memref<2x2x32x128xf32, #tpu.memory_space<vmem>>, vector<1x1x32x32xf32>,
    %c1_172 = arith.constant 1 : index
    %c0_173 = arith.constant 0 : index
    %c0_174 = arith.constant 0 : index
    %c96_175 = arith.constant 96 : index
    %380 = vector.load %arg20[%c1_172, %c0_173, %c0_174, %c96_175] : memref<2x2x32x128xf32, #tpu.memory_space<vmem>>, vector<1x1x32x32xf32>
    %381 = vector.shape_cast %380 : vector<1x1x32x32xf32> to vector<32x32xf32>
    %382 = vector.shape_cast %376 : vector<32x32xf32> to vector<1x1x32x32xf32>
    tpu.vector_store %arg20[%c1_172, %c0_173, %c0_174, %c96_175], %382 {strides = array<i32>} : memref<2x2x32x128xf32, #tpu.memory_space<vmem>>, vector<1x1x32x32xf32>,
    %cst_176 = arith.constant dense<0.000000e+00> : vector<32x8xf32>
    %383 = tpu.matmul %361, %348, %cst_176 {dimension_numbers = #tpu.dot_dimension_numbers<[1], [1], [0], [0], [0, 0, 1, 0], [], []>} : vector<32x32xf32>, vector<8x32xf32>, vector<32x8xf32> -> vector<32x8xf32>
    %384 = vector.extract_strided_slice %9 {offsets = [24, 0], sizes = [8, 32], strides = [1, 1]} : vector<32x32xf32> to vector<8x32xf32>
    %cst_177 = arith.constant dense<0.000000e+00> : vector<32x32xf32>
    %385 = tpu.matmul %383, %384, %cst_177 {dimension_numbers = #tpu.dot_dimension_numbers<[1], [0], [0], [1], [0, 0, 1, 1], [], []>} : vector<32x8xf32>, vector<8x32xf32>, vector<32x32xf32> -> vector<32x32xf32>
    %386 = arith.addf %346, %385 : vector<32x32xf32>
    %387 = tpu.concatenate %202, %386 in 0 : vector<32x32xf32>, vector<32x32xf32> -> vector<64x32xf32>
    %c0_178 = arith.constant 0 : index
    %c0_179 = arith.constant 0 : index
    %c0_180 = arith.constant 0 : index
    %388 = vector.load %arg7[%c0_178, %c0_179, %c0_180] : memref<2x1x32xf32, #tpu.memory_space<vmem>>, vector<1x1x32xf32>
    %389 = vector.shape_cast %388 : vector<1x1x32xf32> to vector<1x32xf32>
    %390 = vector.broadcast %389 : vector<1x32xf32> to vector<64x32xf32>
    %391 = arith.addf %387, %390 : vector<64x32xf32>
    %392 = arith.addf %5, %391 : vector<64x32xf32>
    %c0_181 = arith.constant 0 : index
    %c0_182 = arith.constant 0 : index
    %c0_183 = arith.constant 0 : index
    %393 = vector.load %arg8[%c0_181, %c0_182, %c0_183] : memref<2x1x32xf32, #tpu.memory_space<vmem>>, vector<1x1x32xf32>
    %394 = vector.shape_cast %393 : vector<1x1x32xf32> to vector<1x32xf32>
    %c0_184 = arith.constant 0 : index
    %c0_185 = arith.constant 0 : index
    %c0_186 = arith.constant 0 : index
    %395 = vector.load %arg9[%c0_184, %c0_185, %c0_186] : memref<2x1x32xf32, #tpu.memory_space<vmem>>, vector<1x1x32xf32>
    %396 = vector.shape_cast %395 : vector<1x1x32xf32> to vector<1x32xf32>
    %cst_187 = arith.constant dense<0.000000e+00> : vector<64xf32>
    %397 = vector.multi_reduction <add>, %392, %cst_187 [1] : vector<64x32xf32> to vector<64xf32>
    %398 = vector.shape_cast %397 : vector<64xf32> to vector<64x1xf32>
    %cst_188 = arith.constant 3.200000e+01 : f32
    %399 = vector.broadcast %cst_188 : f32 to vector<64x1xf32>
    %400 = arith.divf %398, %399 : vector<64x1xf32>
    %401 = vector.broadcast %400 : vector<64x1xf32> to vector<64x32xf32>
    %402 = arith.subf %392, %401 : vector<64x32xf32>
    %403 = arith.mulf %402, %402 : vector<64x32xf32>
    %cst_189 = arith.constant dense<0.000000e+00> : vector<64xf32>
    %404 = vector.multi_reduction <add>, %403, %cst_189 [1] : vector<64x32xf32> to vector<64xf32>
    %405 = vector.shape_cast %404 : vector<64xf32> to vector<64x1xf32>
    %cst_190 = arith.constant 3.200000e+01 : f32
    %406 = vector.broadcast %cst_190 : f32 to vector<64x1xf32>
    %407 = arith.divf %405, %406 : vector<64x1xf32>
    %408 = vector.broadcast %400 : vector<64x1xf32> to vector<64x32xf32>
    %409 = arith.subf %392, %408 : vector<64x32xf32>
    %cst_191 = arith.constant 9.99999974E-6 : f32
    %410 = vector.broadcast %cst_191 : f32 to vector<64x1xf32>
    %411 = arith.addf %407, %410 : vector<64x1xf32>
    %412 = math.rsqrt %411 : vector<64x1xf32>
    %413 = vector.broadcast %412 : vector<64x1xf32> to vector<64x32xf32>
    %414 = arith.mulf %409, %413 : vector<64x32xf32>
    %415 = vector.broadcast %394 : vector<1x32xf32> to vector<64x32xf32>
    %416 = arith.mulf %414, %415 : vector<64x32xf32>
    %417 = vector.broadcast %396 : vector<1x32xf32> to vector<64x32xf32>
    %418 = arith.addf %416, %417 : vector<64x32xf32>
    %c0_192 = arith.constant 0 : index
    %c0_193 = arith.constant 0 : index
    %c0_194 = arith.constant 0 : index
    %419 = vector.load %arg10[%c0_192, %c0_193, %c0_194] : memref<2x32x64xf32, #tpu.memory_space<vmem>>, vector<1x32x64xf32>
    %420 = vector.shape_cast %419 : vector<1x32x64xf32> to vector<32x64xf32>
    %cst_195 = arith.constant dense<0.000000e+00> : vector<64x64xf32>
    %421 = tpu.matmul %418, %420, %cst_195 {dimension_numbers = #tpu.dot_dimension_numbers<[1], [0], [0], [1], [0, 0, 1, 1], [], []>} : vector<64x32xf32>, vector<32x64xf32>, vector<64x64xf32> -> vector<64x64xf32>
    %c0_196 = arith.constant 0 : index
    %c0_197 = arith.constant 0 : index
    %c0_198 = arith.constant 0 : index
    %422 = vector.load %arg11[%c0_196, %c0_197, %c0_198] : memref<2x1x64xf32, #tpu.memory_space<vmem>>, vector<1x1x64xf32>
    %423 = vector.shape_cast %422 : vector<1x1x64xf32> to vector<1x64xf32>
    %424 = vector.broadcast %423 : vector<1x64xf32> to vector<64x64xf32>
    %425 = arith.addf %421, %424 : vector<64x64xf32>
    %cst_199 = arith.constant 0.000000e+00 : f32
    %426 = vector.broadcast %cst_199 : f32 to vector<64x64xf32>
    %427 = arith.maximumf %425, %426 : vector<64x64xf32>
    %c0_200 = arith.constant 0 : index
    %c0_201 = arith.constant 0 : index
    %c0_202 = arith.constant 0 : index
    %428 = vector.load %arg12[%c0_200, %c0_201, %c0_202] : memref<2x64x32xf32, #tpu.memory_space<vmem>>, vector<1x64x32xf32>
    %429 = vector.shape_cast %428 : vector<1x64x32xf32> to vector<64x32xf32>
    %cst_203 = arith.constant dense<0.000000e+00> : vector<64x32xf32>
    %430 = tpu.matmul %427, %429, %cst_203 {dimension_numbers = #tpu.dot_dimension_numbers<[1], [0], [0], [1], [0, 0, 1, 1], [], []>} : vector<64x64xf32>, vector<64x32xf32>, vector<64x32xf32> -> vector<64x32xf32>
    %c0_204 = arith.constant 0 : index
    %c0_205 = arith.constant 0 : index
    %c0_206 = arith.constant 0 : index
    %431 = vector.load %arg13[%c0_204, %c0_205, %c0_206] : memref<2x1x32xf32, #tpu.memory_space<vmem>>, vector<1x1x32xf32>
    %432 = vector.shape_cast %431 : vector<1x1x32xf32> to vector<1x32xf32>
    %433 = vector.broadcast %432 : vector<1x32xf32> to vector<64x32xf32>
    %434 = arith.addf %430, %433 : vector<64x32xf32>
    %435 = arith.addf %418, %434 : vector<64x32xf32>
    %c0_207 = arith.constant 0 : index
    %c0_208 = arith.constant 0 : index
    %c0_209 = arith.constant 0 : index
    %436 = vector.load %arg14[%c0_207, %c0_208, %c0_209] : memref<2x1x32xf32, #tpu.memory_space<vmem>>, vector<1x1x32xf32>
    %437 = vector.shape_cast %436 : vector<1x1x32xf32> to vector<1x32xf32>
    %c0_210 = arith.constant 0 : index
    %c0_211 = arith.constant 0 : index
    %c0_212 = arith.constant 0 : index
    %438 = vector.load %arg15[%c0_210, %c0_211, %c0_212] : memref<2x1x32xf32, #tpu.memory_space<vmem>>, vector<1x1x32xf32>
    %439 = vector.shape_cast %438 : vector<1x1x32xf32> to vector<1x32xf32>
    %cst_213 = arith.constant dense<0.000000e+00> : vector<64xf32>
    %440 = vector.multi_reduction <add>, %435, %cst_213 [1] : vector<64x32xf32> to vector<64xf32>
    %441 = vector.shape_cast %440 : vector<64xf32> to vector<64x1xf32>
    %cst_214 = arith.constant 3.200000e+01 : f32
    %442 = vector.broadcast %cst_214 : f32 to vector<64x1xf32>
    %443 = arith.divf %441, %442 : vector<64x1xf32>
    %444 = vector.broadcast %443 : vector<64x1xf32> to vector<64x32xf32>
    %445 = arith.subf %435, %444 : vector<64x32xf32>
    %446 = arith.mulf %445, %445 : vector<64x32xf32>
    %cst_215 = arith.constant dense<0.000000e+00> : vector<64xf32>
    %447 = vector.multi_reduction <add>, %446, %cst_215 [1] : vector<64x32xf32> to vector<64xf32>
    %448 = vector.shape_cast %447 : vector<64xf32> to vector<64x1xf32>
    %cst_216 = arith.constant 3.200000e+01 : f32
    %449 = vector.broadcast %cst_216 : f32 to vector<64x1xf32>
    %450 = arith.divf %448, %449 : vector<64x1xf32>
    %451 = vector.broadcast %443 : vector<64x1xf32> to vector<64x32xf32>
    %452 = arith.subf %435, %451 : vector<64x32xf32>
    %cst_217 = arith.constant 9.99999974E-6 : f32
    %453 = vector.broadcast %cst_217 : f32 to vector<64x1xf32>
    %454 = arith.addf %450, %453 : vector<64x1xf32>
    %455 = math.rsqrt %454 : vector<64x1xf32>
    %456 = vector.broadcast %455 : vector<64x1xf32> to vector<64x32xf32>
    %457 = arith.mulf %452, %456 : vector<64x32xf32>
    %458 = vector.broadcast %437 : vector<1x32xf32> to vector<64x32xf32>
    %459 = arith.mulf %457, %458 : vector<64x32xf32>
    %460 = vector.broadcast %439 : vector<1x32xf32> to vector<64x32xf32>
    %461 = arith.addf %459, %460 : vector<64x32xf32>
    %c1_218 = arith.constant 1 : index
    %c0_219 = arith.constant 0 : index
    %c0_220 = arith.constant 0 : index
    %462 = vector.load %arg2[%c1_218, %c0_219, %c0_220] : memref<2x32x32xf32, #tpu.memory_space<vmem>>, vector<1x32x32xf32>
    %463 = vector.shape_cast %462 : vector<1x32x32xf32> to vector<32x32xf32>
    %c1_221 = arith.constant 1 : index
    %c0_222 = arith.constant 0 : index
    %c0_223 = arith.constant 0 : index
    %464 = vector.load %arg6[%c1_221, %c0_222, %c0_223] : memref<2x32x32xf32, #tpu.memory_space<vmem>>, vector<1x32x32xf32>
    %465 = vector.shape_cast %464 : vector<1x32x32xf32> to vector<32x32xf32>
    %c1_224 = arith.constant 1 : index
    %c0_225 = arith.constant 0 : index
    %c0_226 = arith.constant 0 : index
    %466 = vector.load %arg4[%c1_224, %c0_225, %c0_226] : memref<2x72x32xf32, #tpu.memory_space<vmem>>, vector<1x72x32xf32>
    %467 = vector.shape_cast %466 : vector<1x72x32xf32> to vector<72x32xf32>
    %c1_227 = arith.constant 1 : index
    %c0_228 = arith.constant 0 : index
    %c0_229 = arith.constant 0 : index
    %468 = vector.load %arg5[%c1_227, %c0_228, %c0_229] : memref<2x72x1xf32, #tpu.memory_space<vmem>>, vector<1x72x1xf32>
    %469 = vector.shape_cast %468 : vector<1x72x1xf32> to vector<72x1xf32>
    %cst_230 = arith.constant dense<0.000000e+00> : vector<64x32xf32>
    %470 = tpu.matmul %461, %463, %cst_230 {dimension_numbers = #tpu.dot_dimension_numbers<[1], [0], [0], [1], [0, 0, 1, 1], [], []>} : vector<64x32xf32>, vector<32x32xf32>, vector<64x32xf32> -> vector<64x32xf32>
    %c1_231 = arith.constant 1 : index
    %c0_232 = arith.constant 0 : index
    %c0_233 = arith.constant 0 : index
    %471 = vector.load %arg3[%c1_231, %c0_232, %c0_233] : memref<2x1x32xf32, #tpu.memory_space<vmem>>, vector<1x1x32xf32>
    %472 = vector.shape_cast %471 : vector<1x1x32xf32> to vector<1x32xf32>
    %473 = vector.broadcast %472 : vector<1x32xf32> to vector<64x32xf32>
    %474 = arith.addf %470, %473 : vector<64x32xf32>
    %475 = vector.extract_strided_slice %461 {offsets = [0, 0], sizes = [32, 32], strides = [1, 1]} : vector<64x32xf32> to vector<32x32xf32>
    %476 = vector.extract_strided_slice %474 {offsets = [0, 0], sizes = [32, 32], strides = [1, 1]} : vector<64x32xf32> to vector<32x32xf32>
    %cst_234 = arith.constant dense<0.000000e+00> : vector<72x32xf32>
    %477 = tpu.matmul %467, %475, %cst_234 {dimension_numbers = #tpu.dot_dimension_numbers<[1], [1], [0], [0], [0, 0, 1, 0], [], []>} : vector<72x32xf32>, vector<32x32xf32>, vector<72x32xf32> -> vector<72x32xf32>
    %478 = vector.broadcast %469 : vector<72x1xf32> to vector<72x32xf32>
    %479 = arith.addf %477, %478 : vector<72x32xf32>
    %480 = vector.extract_strided_slice %479 {offsets = [64, 0], sizes = [4, 32], strides = [1, 1]} : vector<72x32xf32> to vector<4x32xf32>
    %cst_235 = arith.constant 5.000000e+00 : f32
    %481 = vector.broadcast %cst_235 : f32 to vector<4x32xf32>
    %482 = arith.mulf %481, %480 : vector<4x32xf32>
    %483 = arith.negf %482 : vector<4x32xf32>
    %484 = math.exp %483 : vector<4x32xf32>
    %cst_236 = arith.constant 1.000000e+00 : f32
    %485 = vector.broadcast %cst_236 : f32 to vector<4x32xf32>
    %486 = arith.addf %485, %484 : vector<4x32xf32>
    %487 = arith.divf %485, %486 : vector<4x32xf32>
    %cst_237 = arith.constant 9.99999974E-6 : f32
    %488 = vector.broadcast %cst_237 : f32 to vector<4x32xf32>
    %489 = arith.addf %487, %488 : vector<4x32xf32>
    %cst_238 = arith.constant 1.09861231 : f32
    %490 = vector.broadcast %cst_238 : f32 to vector<4x32xf32>
    %491 = arith.mulf %490, %489 : vector<4x32xf32>
    %492 = math.exp %491 : vector<4x32xf32>
    %cst_239 = arith.constant 1.000000e+00 : f32
    %493 = vector.broadcast %cst_239 : f32 to vector<4x32xf32>
    %494 = arith.subf %492, %493 : vector<4x32xf32>
    %c0_240 = arith.constant 0 : index
    %c1_241 = arith.constant 1 : index
    %c0_242 = arith.constant 0 : index
    %c0_243 = arith.constant 0 : index
    %495 = vector.load %arg21[%c0_240, %c1_241, %c0_242, %c0_243] : memref<2x2x4x32xf32, #tpu.memory_space<vmem>>, vector<1x1x4x32xf32>
    %496 = vector.shape_cast %495 : vector<1x1x4x32xf32> to vector<4x32xf32>
    %497 = vector.shape_cast %494 : vector<4x32xf32> to vector<1x1x4x32xf32>
    tpu.vector_store %arg21[%c0_240, %c1_241, %c0_242, %c0_243], %497 {strides = array<i32>} : memref<2x2x4x32xf32, #tpu.memory_space<vmem>>, vector<1x1x4x32xf32>,
    %cst_244 = arith.constant 0.000000e+00 : f32
    %498 = vector.broadcast %cst_244 : f32 to vector<32x32xf32>
    %499 = vector.extract_strided_slice %479 {offsets = [0, 0], sizes = [8, 32], strides = [1, 1]} : vector<72x32xf32> to vector<8x32xf32>
    %500 = vector.extract_strided_slice %479 {offsets = [32, 0], sizes = [8, 32], strides = [1, 1]} : vector<72x32xf32> to vector<8x32xf32>
    %501 = vector.extract_strided_slice %476 {offsets = [0, 0], sizes = [32, 8], strides = [1, 1]} : vector<32x32xf32> to vector<32x8xf32>
    %cst_245 = arith.constant dense<0.000000e+00> : vector<32x32xf32>
    %502 = tpu.matmul %501, %499, %cst_245 {dimension_numbers = #tpu.dot_dimension_numbers<[1], [0], [0], [1], [0, 0, 1, 1], [], []>} : vector<32x8xf32>, vector<8x32xf32>, vector<32x32xf32> -> vector<32x32xf32>
    %cst_246 = arith.constant 0.353553385 : f32
    %503 = vector.broadcast %cst_246 : f32 to vector<32x32xf32>
    %504 = arith.mulf %502, %503 : vector<32x32xf32>
    %cst_247 = arith.constant dense<0xFF800000> : vector<32xf32>
    %505 = vector.multi_reduction <maximumf>, %504, %cst_247 [1] : vector<32x32xf32> to vector<32xf32>
    %506 = vector.shape_cast %505 : vector<32xf32> to vector<32x1xf32>
    %507 = vector.broadcast %506 : vector<32x1xf32> to vector<32x32xf32>
    %508 = arith.subf %504, %507 : vector<32x32xf32>
    %509 = math.exp %508 : vector<32x32xf32>
    %cst_248 = arith.constant dense<0.000000e+00> : vector<32xf32>
    %510 = vector.multi_reduction <add>, %509, %cst_248 [1] : vector<32x32xf32> to vector<32xf32>
    %511 = vector.shape_cast %510 : vector<32xf32> to vector<32x1xf32>
    %512 = vector.broadcast %511 : vector<32x1xf32> to vector<32x32xf32>
    %513 = arith.divf %509, %512 : vector<32x32xf32>
    %514 = vector.extract_strided_slice %494 {offsets = [0, 0], sizes = [1, 32], strides = [1, 1]} : vector<4x32xf32> to vector<1x32xf32>
    %cst_249 = arith.constant 1.000000e+00 : f32
    %515 = vector.broadcast %cst_249 : f32 to vector<1x32xf32>
    %516 = arith.divf %515, %514 : vector<1x32xf32>
    %cst_250 = arith.constant 0.398942292 : f32
    %517 = vector.broadcast %cst_250 : f32 to vector<1x32xf32>
    %518 = arith.mulf %517, %516 : vector<1x32xf32>
    %cst_251 = arith.constant 0.000000e+00 : f32
    %519 = vector.broadcast %cst_251 : f32 to vector<32x32xf32>
    %520 = arith.subf %519, %4 : vector<32x32xf32>
    %cst_252 = arith.constant 5.000000e-01 : f32
    %521 = vector.broadcast %cst_252 : f32 to vector<1x32xf32>
    %522 = arith.mulf %521, %516 : vector<1x32xf32>
    %523 = arith.mulf %522, %516 : vector<1x32xf32>
    %524 = vector.broadcast %523 : vector<1x32xf32> to vector<32x32xf32>
    %525 = arith.mulf %520, %524 : vector<32x32xf32>
    %526 = math.exp %525 : vector<32x32xf32>
    %527 = vector.broadcast %518 : vector<1x32xf32> to vector<32x32xf32>
    %528 = arith.mulf %527, %526 : vector<32x32xf32>
    %c0_253 = arith.constant 0 : index
    %c1_254 = arith.constant 1 : index
    %c0_255 = arith.constant 0 : index
    %c0_256 = arith.constant 0 : index
    %529 = vector.load %arg19[%c0_253, %c1_254, %c0_255, %c0_256] : memref<2x2x32x128xf32, #tpu.memory_space<vmem>>, vector<1x1x32x32xf32>
    %530 = vector.shape_cast %529 : vector<1x1x32x32xf32> to vector<32x32xf32>
    %531 = vector.shape_cast %513 : vector<32x32xf32> to vector<1x1x32x32xf32>
    tpu.vector_store %arg19[%c0_253, %c1_254, %c0_255, %c0_256], %531 {strides = array<i32>} : memref<2x2x32x128xf32, #tpu.memory_space<vmem>>, vector<1x1x32x32xf32>,
    %c0_257 = arith.constant 0 : index
    %c1_258 = arith.constant 1 : index
    %c0_259 = arith.constant 0 : index
    %c0_260 = arith.constant 0 : index
    %532 = vector.load %arg20[%c0_257, %c1_258, %c0_259, %c0_260] : memref<2x2x32x128xf32, #tpu.memory_space<vmem>>, vector<1x1x32x32xf32>
    %533 = vector.shape_cast %532 : vector<1x1x32x32xf32> to vector<32x32xf32>
    %534 = vector.shape_cast %528 : vector<32x32xf32> to vector<1x1x32x32xf32>
    tpu.vector_store %arg20[%c0_257, %c1_258, %c0_259, %c0_260], %534 {strides = array<i32>} : memref<2x2x32x128xf32, #tpu.memory_space<vmem>>, vector<1x1x32x32xf32>,
    %cst_261 = arith.constant dense<0.000000e+00> : vector<32x8xf32>
    %535 = tpu.matmul %513, %500, %cst_261 {dimension_numbers = #tpu.dot_dimension_numbers<[1], [1], [0], [0], [0, 0, 1, 0], [], []>} : vector<32x32xf32>, vector<8x32xf32>, vector<32x8xf32> -> vector<32x8xf32>
    %536 = vector.extract_strided_slice %465 {offsets = [0, 0], sizes = [8, 32], strides = [1, 1]} : vector<32x32xf32> to vector<8x32xf32>
    %cst_262 = arith.constant dense<0.000000e+00> : vector<32x32xf32>
    %537 = tpu.matmul %535, %536, %cst_262 {dimension_numbers = #tpu.dot_dimension_numbers<[1], [0], [0], [1], [0, 0, 1, 1], [], []>} : vector<32x8xf32>, vector<8x32xf32>, vector<32x32xf32> -> vector<32x32xf32>
    %538 = arith.addf %498, %537 : vector<32x32xf32>
    %539 = vector.extract_strided_slice %479 {offsets = [8, 0], sizes = [8, 32], strides = [1, 1]} : vector<72x32xf32> to vector<8x32xf32>
    %540 = vector.extract_strided_slice %479 {offsets = [40, 0], sizes = [8, 32], strides = [1, 1]} : vector<72x32xf32> to vector<8x32xf32>
    %541 = vector.extract_strided_slice %476 {offsets = [0, 8], sizes = [32, 8], strides = [1, 1]} : vector<32x32xf32> to vector<32x8xf32>
    %cst_263 = arith.constant dense<0.000000e+00> : vector<32x32xf32>
    %542 = tpu.matmul %541, %539, %cst_263 {dimension_numbers = #tpu.dot_dimension_numbers<[1], [0], [0], [1], [0, 0, 1, 1], [], []>} : vector<32x8xf32>, vector<8x32xf32>, vector<32x32xf32> -> vector<32x32xf32>
    %cst_264 = arith.constant 0.353553385 : f32
    %543 = vector.broadcast %cst_264 : f32 to vector<32x32xf32>
    %544 = arith.mulf %542, %543 : vector<32x32xf32>
    %cst_265 = arith.constant dense<0xFF800000> : vector<32xf32>
    %545 = vector.multi_reduction <maximumf>, %544, %cst_265 [1] : vector<32x32xf32> to vector<32xf32>
    %546 = vector.shape_cast %545 : vector<32xf32> to vector<32x1xf32>
    %547 = vector.broadcast %546 : vector<32x1xf32> to vector<32x32xf32>
    %548 = arith.subf %544, %547 : vector<32x32xf32>
    %549 = math.exp %548 : vector<32x32xf32>
    %cst_266 = arith.constant dense<0.000000e+00> : vector<32xf32>
    %550 = vector.multi_reduction <add>, %549, %cst_266 [1] : vector<32x32xf32> to vector<32xf32>
    %551 = vector.shape_cast %550 : vector<32xf32> to vector<32x1xf32>
    %552 = vector.broadcast %551 : vector<32x1xf32> to vector<32x32xf32>
    %553 = arith.divf %549, %552 : vector<32x32xf32>
    %554 = vector.extract_strided_slice %494 {offsets = [1, 0], sizes = [1, 32], strides = [1, 1]} : vector<4x32xf32> to vector<1x32xf32>
    %cst_267 = arith.constant 1.000000e+00 : f32
    %555 = vector.broadcast %cst_267 : f32 to vector<1x32xf32>
    %556 = arith.divf %555, %554 : vector<1x32xf32>
    %cst_268 = arith.constant 0.398942292 : f32
    %557 = vector.broadcast %cst_268 : f32 to vector<1x32xf32>
    %558 = arith.mulf %557, %556 : vector<1x32xf32>
    %cst_269 = arith.constant 0.000000e+00 : f32
    %559 = vector.broadcast %cst_269 : f32 to vector<32x32xf32>
    %560 = arith.subf %559, %4 : vector<32x32xf32>
    %cst_270 = arith.constant 5.000000e-01 : f32
    %561 = vector.broadcast %cst_270 : f32 to vector<1x32xf32>
    %562 = arith.mulf %561, %556 : vector<1x32xf32>
    %563 = arith.mulf %562, %556 : vector<1x32xf32>
    %564 = vector.broadcast %563 : vector<1x32xf32> to vector<32x32xf32>
    %565 = arith.mulf %560, %564 : vector<32x32xf32>
    %566 = math.exp %565 : vector<32x32xf32>
    %567 = vector.broadcast %558 : vector<1x32xf32> to vector<32x32xf32>
    %568 = arith.mulf %567, %566 : vector<32x32xf32>
    %c0_271 = arith.constant 0 : index
    %c1_272 = arith.constant 1 : index
    %c0_273 = arith.constant 0 : index
    %c32_274 = arith.constant 32 : index
    %569 = vector.load %arg19[%c0_271, %c1_272, %c0_273, %c32_274] : memref<2x2x32x128xf32, #tpu.memory_space<vmem>>, vector<1x1x32x32xf32>
    %570 = vector.shape_cast %569 : vector<1x1x32x32xf32> to vector<32x32xf32>
    %571 = vector.shape_cast %553 : vector<32x32xf32> to vector<1x1x32x32xf32>
    tpu.vector_store %arg19[%c0_271, %c1_272, %c0_273, %c32_274], %571 {strides = array<i32>} : memref<2x2x32x128xf32, #tpu.memory_space<vmem>>, vector<1x1x32x32xf32>,
    %c0_275 = arith.constant 0 : index
    %c1_276 = arith.constant 1 : index
    %c0_277 = arith.constant 0 : index
    %c32_278 = arith.constant 32 : index
    %572 = vector.load %arg20[%c0_275, %c1_276, %c0_277, %c32_278] : memref<2x2x32x128xf32, #tpu.memory_space<vmem>>, vector<1x1x32x32xf32>
    %573 = vector.shape_cast %572 : vector<1x1x32x32xf32> to vector<32x32xf32>
    %574 = vector.shape_cast %568 : vector<32x32xf32> to vector<1x1x32x32xf32>
    tpu.vector_store %arg20[%c0_275, %c1_276, %c0_277, %c32_278], %574 {strides = array<i32>} : memref<2x2x32x128xf32, #tpu.memory_space<vmem>>, vector<1x1x32x32xf32>,
    %cst_279 = arith.constant dense<0.000000e+00> : vector<32x8xf32>
    %575 = tpu.matmul %553, %540, %cst_279 {dimension_numbers = #tpu.dot_dimension_numbers<[1], [1], [0], [0], [0, 0, 1, 0], [], []>} : vector<32x32xf32>, vector<8x32xf32>, vector<32x8xf32> -> vector<32x8xf32>
    %576 = vector.extract_strided_slice %465 {offsets = [8, 0], sizes = [8, 32], strides = [1, 1]} : vector<32x32xf32> to vector<8x32xf32>
    %cst_280 = arith.constant dense<0.000000e+00> : vector<32x32xf32>
    %577 = tpu.matmul %575, %576, %cst_280 {dimension_numbers = #tpu.dot_dimension_numbers<[1], [0], [0], [1], [0, 0, 1, 1], [], []>} : vector<32x8xf32>, vector<8x32xf32>, vector<32x32xf32> -> vector<32x32xf32>
    %578 = arith.addf %538, %577 : vector<32x32xf32>
    %579 = vector.extract_strided_slice %479 {offsets = [16, 0], sizes = [8, 32], strides = [1, 1]} : vector<72x32xf32> to vector<8x32xf32>
    %580 = vector.extract_strided_slice %479 {offsets = [48, 0], sizes = [8, 32], strides = [1, 1]} : vector<72x32xf32> to vector<8x32xf32>
    %581 = vector.extract_strided_slice %476 {offsets = [0, 16], sizes = [32, 8], strides = [1, 1]} : vector<32x32xf32> to vector<32x8xf32>
    %cst_281 = arith.constant dense<0.000000e+00> : vector<32x32xf32>
    %582 = tpu.matmul %581, %579, %cst_281 {dimension_numbers = #tpu.dot_dimension_numbers<[1], [0], [0], [1], [0, 0, 1, 1], [], []>} : vector<32x8xf32>, vector<8x32xf32>, vector<32x32xf32> -> vector<32x32xf32>
    %cst_282 = arith.constant 0.353553385 : f32
    %583 = vector.broadcast %cst_282 : f32 to vector<32x32xf32>
    %584 = arith.mulf %582, %583 : vector<32x32xf32>
    %cst_283 = arith.constant dense<0xFF800000> : vector<32xf32>
    %585 = vector.multi_reduction <maximumf>, %584, %cst_283 [1] : vector<32x32xf32> to vector<32xf32>
    %586 = vector.shape_cast %585 : vector<32xf32> to vector<32x1xf32>
    %587 = vector.broadcast %586 : vector<32x1xf32> to vector<32x32xf32>
    %588 = arith.subf %584, %587 : vector<32x32xf32>
    %589 = math.exp %588 : vector<32x32xf32>
    %cst_284 = arith.constant dense<0.000000e+00> : vector<32xf32>
    %590 = vector.multi_reduction <add>, %589, %cst_284 [1] : vector<32x32xf32> to vector<32xf32>
    %591 = vector.shape_cast %590 : vector<32xf32> to vector<32x1xf32>
    %592 = vector.broadcast %591 : vector<32x1xf32> to vector<32x32xf32>
    %593 = arith.divf %589, %592 : vector<32x32xf32>
    %594 = vector.extract_strided_slice %494 {offsets = [2, 0], sizes = [1, 32], strides = [1, 1]} : vector<4x32xf32> to vector<1x32xf32>
    %cst_285 = arith.constant 1.000000e+00 : f32
    %595 = vector.broadcast %cst_285 : f32 to vector<1x32xf32>
    %596 = arith.divf %595, %594 : vector<1x32xf32>
    %cst_286 = arith.constant 0.398942292 : f32
    %597 = vector.broadcast %cst_286 : f32 to vector<1x32xf32>
    %598 = arith.mulf %597, %596 : vector<1x32xf32>
    %cst_287 = arith.constant 0.000000e+00 : f32
    %599 = vector.broadcast %cst_287 : f32 to vector<32x32xf32>
    %600 = arith.subf %599, %4 : vector<32x32xf32>
    %cst_288 = arith.constant 5.000000e-01 : f32
    %601 = vector.broadcast %cst_288 : f32 to vector<1x32xf32>
    %602 = arith.mulf %601, %596 : vector<1x32xf32>
    %603 = arith.mulf %602, %596 : vector<1x32xf32>
    %604 = vector.broadcast %603 : vector<1x32xf32> to vector<32x32xf32>
    %605 = arith.mulf %600, %604 : vector<32x32xf32>
    %606 = math.exp %605 : vector<32x32xf32>
    %607 = vector.broadcast %598 : vector<1x32xf32> to vector<32x32xf32>
    %608 = arith.mulf %607, %606 : vector<32x32xf32>
    %c0_289 = arith.constant 0 : index
    %c1_290 = arith.constant 1 : index
    %c0_291 = arith.constant 0 : index
    %c64_292 = arith.constant 64 : index
    %609 = vector.load %arg19[%c0_289, %c1_290, %c0_291, %c64_292] : memref<2x2x32x128xf32, #tpu.memory_space<vmem>>, vector<1x1x32x32xf32>
    %610 = vector.shape_cast %609 : vector<1x1x32x32xf32> to vector<32x32xf32>
    %611 = vector.shape_cast %593 : vector<32x32xf32> to vector<1x1x32x32xf32>
    tpu.vector_store %arg19[%c0_289, %c1_290, %c0_291, %c64_292], %611 {strides = array<i32>} : memref<2x2x32x128xf32, #tpu.memory_space<vmem>>, vector<1x1x32x32xf32>,
    %c0_293 = arith.constant 0 : index
    %c1_294 = arith.constant 1 : index
    %c0_295 = arith.constant 0 : index
    %c64_296 = arith.constant 64 : index
    %612 = vector.load %arg20[%c0_293, %c1_294, %c0_295, %c64_296] : memref<2x2x32x128xf32, #tpu.memory_space<vmem>>, vector<1x1x32x32xf32>
    %613 = vector.shape_cast %612 : vector<1x1x32x32xf32> to vector<32x32xf32>
    %614 = vector.shape_cast %608 : vector<32x32xf32> to vector<1x1x32x32xf32>
    tpu.vector_store %arg20[%c0_293, %c1_294, %c0_295, %c64_296], %614 {strides = array<i32>} : memref<2x2x32x128xf32, #tpu.memory_space<vmem>>, vector<1x1x32x32xf32>,
    %cst_297 = arith.constant dense<0.000000e+00> : vector<32x8xf32>
    %615 = tpu.matmul %593, %580, %cst_297 {dimension_numbers = #tpu.dot_dimension_numbers<[1], [1], [0], [0], [0, 0, 1, 0], [], []>} : vector<32x32xf32>, vector<8x32xf32>, vector<32x8xf32> -> vector<32x8xf32>
    %616 = vector.extract_strided_slice %465 {offsets = [16, 0], sizes = [8, 32], strides = [1, 1]} : vector<32x32xf32> to vector<8x32xf32>
    %cst_298 = arith.constant dense<0.000000e+00> : vector<32x32xf32>
    %617 = tpu.matmul %615, %616, %cst_298 {dimension_numbers = #tpu.dot_dimension_numbers<[1], [0], [0], [1], [0, 0, 1, 1], [], []>} : vector<32x8xf32>, vector<8x32xf32>, vector<32x32xf32> -> vector<32x32xf32>
    %618 = arith.addf %578, %617 : vector<32x32xf32>
    %619 = vector.extract_strided_slice %479 {offsets = [24, 0], sizes = [8, 32], strides = [1, 1]} : vector<72x32xf32> to vector<8x32xf32>
    %620 = vector.extract_strided_slice %479 {offsets = [56, 0], sizes = [8, 32], strides = [1, 1]} : vector<72x32xf32> to vector<8x32xf32>
    %621 = vector.extract_strided_slice %476 {offsets = [0, 24], sizes = [32, 8], strides = [1, 1]} : vector<32x32xf32> to vector<32x8xf32>
    %cst_299 = arith.constant dense<0.000000e+00> : vector<32x32xf32>
    %622 = tpu.matmul %621, %619, %cst_299 {dimension_numbers = #tpu.dot_dimension_numbers<[1], [0], [0], [1], [0, 0, 1, 1], [], []>} : vector<32x8xf32>, vector<8x32xf32>, vector<32x32xf32> -> vector<32x32xf32>
    %cst_300 = arith.constant 0.353553385 : f32
    %623 = vector.broadcast %cst_300 : f32 to vector<32x32xf32>
    %624 = arith.mulf %622, %623 : vector<32x32xf32>
    %cst_301 = arith.constant dense<0xFF800000> : vector<32xf32>
    %625 = vector.multi_reduction <maximumf>, %624, %cst_301 [1] : vector<32x32xf32> to vector<32xf32>
    %626 = vector.shape_cast %625 : vector<32xf32> to vector<32x1xf32>
    %627 = vector.broadcast %626 : vector<32x1xf32> to vector<32x32xf32>
    %628 = arith.subf %624, %627 : vector<32x32xf32>
    %629 = math.exp %628 : vector<32x32xf32>
    %cst_302 = arith.constant dense<0.000000e+00> : vector<32xf32>
    %630 = vector.multi_reduction <add>, %629, %cst_302 [1] : vector<32x32xf32> to vector<32xf32>
    %631 = vector.shape_cast %630 : vector<32xf32> to vector<32x1xf32>
    %632 = vector.broadcast %631 : vector<32x1xf32> to vector<32x32xf32>
    %633 = arith.divf %629, %632 : vector<32x32xf32>
    %634 = vector.extract_strided_slice %494 {offsets = [3, 0], sizes = [1, 32], strides = [1, 1]} : vector<4x32xf32> to vector<1x32xf32>
    %cst_303 = arith.constant 1.000000e+00 : f32
    %635 = vector.broadcast %cst_303 : f32 to vector<1x32xf32>
    %636 = arith.divf %635, %634 : vector<1x32xf32>
    %cst_304 = arith.constant 0.398942292 : f32
    %637 = vector.broadcast %cst_304 : f32 to vector<1x32xf32>
    %638 = arith.mulf %637, %636 : vector<1x32xf32>
    %cst_305 = arith.constant 0.000000e+00 : f32
    %639 = vector.broadcast %cst_305 : f32 to vector<32x32xf32>
    %640 = arith.subf %639, %4 : vector<32x32xf32>
    %cst_306 = arith.constant 5.000000e-01 : f32
    %641 = vector.broadcast %cst_306 : f32 to vector<1x32xf32>
    %642 = arith.mulf %641, %636 : vector<1x32xf32>
    %643 = arith.mulf %642, %636 : vector<1x32xf32>
    %644 = vector.broadcast %643 : vector<1x32xf32> to vector<32x32xf32>
    %645 = arith.mulf %640, %644 : vector<32x32xf32>
    %646 = math.exp %645 : vector<32x32xf32>
    %647 = vector.broadcast %638 : vector<1x32xf32> to vector<32x32xf32>
    %648 = arith.mulf %647, %646 : vector<32x32xf32>
    %c0_307 = arith.constant 0 : index
    %c1_308 = arith.constant 1 : index
    %c0_309 = arith.constant 0 : index
    %c96_310 = arith.constant 96 : index
    %649 = vector.load %arg19[%c0_307, %c1_308, %c0_309, %c96_310] : memref<2x2x32x128xf32, #tpu.memory_space<vmem>>, vector<1x1x32x32xf32>
    %650 = vector.shape_cast %649 : vector<1x1x32x32xf32> to vector<32x32xf32>
    %651 = vector.shape_cast %633 : vector<32x32xf32> to vector<1x1x32x32xf32>
    tpu.vector_store %arg19[%c0_307, %c1_308, %c0_309, %c96_310], %651 {strides = array<i32>} : memref<2x2x32x128xf32, #tpu.memory_space<vmem>>, vector<1x1x32x32xf32>,
    %c0_311 = arith.constant 0 : index
    %c1_312 = arith.constant 1 : index
    %c0_313 = arith.constant 0 : index
    %c96_314 = arith.constant 96 : index
    %652 = vector.load %arg20[%c0_311, %c1_312, %c0_313, %c96_314] : memref<2x2x32x128xf32, #tpu.memory_space<vmem>>, vector<1x1x32x32xf32>
    %653 = vector.shape_cast %652 : vector<1x1x32x32xf32> to vector<32x32xf32>
    %654 = vector.shape_cast %648 : vector<32x32xf32> to vector<1x1x32x32xf32>
    tpu.vector_store %arg20[%c0_311, %c1_312, %c0_313, %c96_314], %654 {strides = array<i32>} : memref<2x2x32x128xf32, #tpu.memory_space<vmem>>, vector<1x1x32x32xf32>,
    %cst_315 = arith.constant dense<0.000000e+00> : vector<32x8xf32>
    %655 = tpu.matmul %633, %620, %cst_315 {dimension_numbers = #tpu.dot_dimension_numbers<[1], [1], [0], [0], [0, 0, 1, 0], [], []>} : vector<32x32xf32>, vector<8x32xf32>, vector<32x8xf32> -> vector<32x8xf32>
    %656 = vector.extract_strided_slice %465 {offsets = [24, 0], sizes = [8, 32], strides = [1, 1]} : vector<32x32xf32> to vector<8x32xf32>
    %cst_316 = arith.constant dense<0.000000e+00> : vector<32x32xf32>
    %657 = tpu.matmul %655, %656, %cst_316 {dimension_numbers = #tpu.dot_dimension_numbers<[1], [0], [0], [1], [0, 0, 1, 1], [], []>} : vector<32x8xf32>, vector<8x32xf32>, vector<32x32xf32> -> vector<32x32xf32>
    %658 = arith.addf %618, %657 : vector<32x32xf32>
    %659 = vector.extract_strided_slice %461 {offsets = [32, 0], sizes = [32, 32], strides = [1, 1]} : vector<64x32xf32> to vector<32x32xf32>
    %660 = vector.extract_strided_slice %474 {offsets = [32, 0], sizes = [32, 32], strides = [1, 1]} : vector<64x32xf32> to vector<32x32xf32>
    %cst_317 = arith.constant dense<0.000000e+00> : vector<72x32xf32>
    %661 = tpu.matmul %467, %659, %cst_317 {dimension_numbers = #tpu.dot_dimension_numbers<[1], [1], [0], [0], [0, 0, 1, 0], [], []>} : vector<72x32xf32>, vector<32x32xf32>, vector<72x32xf32> -> vector<72x32xf32>
    %662 = vector.broadcast %469 : vector<72x1xf32> to vector<72x32xf32>
    %663 = arith.addf %661, %662 : vector<72x32xf32>
    %664 = vector.extract_strided_slice %663 {offsets = [64, 0], sizes = [4, 32], strides = [1, 1]} : vector<72x32xf32> to vector<4x32xf32>
    %cst_318 = arith.constant 5.000000e+00 : f32
    %665 = vector.broadcast %cst_318 : f32 to vector<4x32xf32>
    %666 = arith.mulf %665, %664 : vector<4x32xf32>
    %667 = arith.negf %666 : vector<4x32xf32>
    %668 = math.exp %667 : vector<4x32xf32>
    %cst_319 = arith.constant 1.000000e+00 : f32
    %669 = vector.broadcast %cst_319 : f32 to vector<4x32xf32>
    %670 = arith.addf %669, %668 : vector<4x32xf32>
    %671 = arith.divf %669, %670 : vector<4x32xf32>
    %cst_320 = arith.constant 9.99999974E-6 : f32
    %672 = vector.broadcast %cst_320 : f32 to vector<4x32xf32>
    %673 = arith.addf %671, %672 : vector<4x32xf32>
    %cst_321 = arith.constant 1.09861231 : f32
    %674 = vector.broadcast %cst_321 : f32 to vector<4x32xf32>
    %675 = arith.mulf %674, %673 : vector<4x32xf32>
    %676 = math.exp %675 : vector<4x32xf32>
    %cst_322 = arith.constant 1.000000e+00 : f32
    %677 = vector.broadcast %cst_322 : f32 to vector<4x32xf32>
    %678 = arith.subf %676, %677 : vector<4x32xf32>
    %c1_323 = arith.constant 1 : index
    %c1_324 = arith.constant 1 : index
    %c0_325 = arith.constant 0 : index
    %c0_326 = arith.constant 0 : index
    %679 = vector.load %arg21[%c1_323, %c1_324, %c0_325, %c0_326] : memref<2x2x4x32xf32, #tpu.memory_space<vmem>>, vector<1x1x4x32xf32>
    %680 = vector.shape_cast %679 : vector<1x1x4x32xf32> to vector<4x32xf32>
    %681 = vector.shape_cast %678 : vector<4x32xf32> to vector<1x1x4x32xf32>
    tpu.vector_store %arg21[%c1_323, %c1_324, %c0_325, %c0_326], %681 {strides = array<i32>} : memref<2x2x4x32xf32, #tpu.memory_space<vmem>>, vector<1x1x4x32xf32>,
    %cst_327 = arith.constant 0.000000e+00 : f32
    %682 = vector.broadcast %cst_327 : f32 to vector<32x32xf32>
    %683 = vector.extract_strided_slice %663 {offsets = [0, 0], sizes = [8, 32], strides = [1, 1]} : vector<72x32xf32> to vector<8x32xf32>
    %684 = vector.extract_strided_slice %663 {offsets = [32, 0], sizes = [8, 32], strides = [1, 1]} : vector<72x32xf32> to vector<8x32xf32>
    %685 = vector.extract_strided_slice %660 {offsets = [0, 0], sizes = [32, 8], strides = [1, 1]} : vector<32x32xf32> to vector<32x8xf32>
    %cst_328 = arith.constant dense<0.000000e+00> : vector<32x32xf32>
    %686 = tpu.matmul %685, %683, %cst_328 {dimension_numbers = #tpu.dot_dimension_numbers<[1], [0], [0], [1], [0, 0, 1, 1], [], []>} : vector<32x8xf32>, vector<8x32xf32>, vector<32x32xf32> -> vector<32x32xf32>
    %cst_329 = arith.constant 0.353553385 : f32
    %687 = vector.broadcast %cst_329 : f32 to vector<32x32xf32>
    %688 = arith.mulf %686, %687 : vector<32x32xf32>
    %cst_330 = arith.constant dense<0xFF800000> : vector<32xf32>
    %689 = vector.multi_reduction <maximumf>, %688, %cst_330 [1] : vector<32x32xf32> to vector<32xf32>
    %690 = vector.shape_cast %689 : vector<32xf32> to vector<32x1xf32>
    %691 = vector.broadcast %690 : vector<32x1xf32> to vector<32x32xf32>
    %692 = arith.subf %688, %691 : vector<32x32xf32>
    %693 = math.exp %692 : vector<32x32xf32>
    %cst_331 = arith.constant dense<0.000000e+00> : vector<32xf32>
    %694 = vector.multi_reduction <add>, %693, %cst_331 [1] : vector<32x32xf32> to vector<32xf32>
    %695 = vector.shape_cast %694 : vector<32xf32> to vector<32x1xf32>
    %696 = vector.broadcast %695 : vector<32x1xf32> to vector<32x32xf32>
    %697 = arith.divf %693, %696 : vector<32x32xf32>
    %698 = vector.extract_strided_slice %678 {offsets = [0, 0], sizes = [1, 32], strides = [1, 1]} : vector<4x32xf32> to vector<1x32xf32>
    %cst_332 = arith.constant 1.000000e+00 : f32
    %699 = vector.broadcast %cst_332 : f32 to vector<1x32xf32>
    %700 = arith.divf %699, %698 : vector<1x32xf32>
    %cst_333 = arith.constant 0.398942292 : f32
    %701 = vector.broadcast %cst_333 : f32 to vector<1x32xf32>
    %702 = arith.mulf %701, %700 : vector<1x32xf32>
    %cst_334 = arith.constant 0.000000e+00 : f32
    %703 = vector.broadcast %cst_334 : f32 to vector<32x32xf32>
    %704 = arith.subf %703, %4 : vector<32x32xf32>
    %cst_335 = arith.constant 5.000000e-01 : f32
    %705 = vector.broadcast %cst_335 : f32 to vector<1x32xf32>
    %706 = arith.mulf %705, %700 : vector<1x32xf32>
    %707 = arith.mulf %706, %700 : vector<1x32xf32>
    %708 = vector.broadcast %707 : vector<1x32xf32> to vector<32x32xf32>
    %709 = arith.mulf %704, %708 : vector<32x32xf32>
    %710 = math.exp %709 : vector<32x32xf32>
    %711 = vector.broadcast %702 : vector<1x32xf32> to vector<32x32xf32>
    %712 = arith.mulf %711, %710 : vector<32x32xf32>
    %c1_336 = arith.constant 1 : index
    %c1_337 = arith.constant 1 : index
    %c0_338 = arith.constant 0 : index
    %c0_339 = arith.constant 0 : index
    %713 = vector.load %arg19[%c1_336, %c1_337, %c0_338, %c0_339] : memref<2x2x32x128xf32, #tpu.memory_space<vmem>>, vector<1x1x32x32xf32>
    %714 = vector.shape_cast %713 : vector<1x1x32x32xf32> to vector<32x32xf32>
    %715 = vector.shape_cast %697 : vector<32x32xf32> to vector<1x1x32x32xf32>
    tpu.vector_store %arg19[%c1_336, %c1_337, %c0_338, %c0_339], %715 {strides = array<i32>} : memref<2x2x32x128xf32, #tpu.memory_space<vmem>>, vector<1x1x32x32xf32>,
    %c1_340 = arith.constant 1 : index
    %c1_341 = arith.constant 1 : index
    %c0_342 = arith.constant 0 : index
    %c0_343 = arith.constant 0 : index
    %716 = vector.load %arg20[%c1_340, %c1_341, %c0_342, %c0_343] : memref<2x2x32x128xf32, #tpu.memory_space<vmem>>, vector<1x1x32x32xf32>
    %717 = vector.shape_cast %716 : vector<1x1x32x32xf32> to vector<32x32xf32>
    %718 = vector.shape_cast %712 : vector<32x32xf32> to vector<1x1x32x32xf32>
    tpu.vector_store %arg20[%c1_340, %c1_341, %c0_342, %c0_343], %718 {strides = array<i32>} : memref<2x2x32x128xf32, #tpu.memory_space<vmem>>, vector<1x1x32x32xf32>,
    %cst_344 = arith.constant dense<0.000000e+00> : vector<32x8xf32>
    %719 = tpu.matmul %697, %684, %cst_344 {dimension_numbers = #tpu.dot_dimension_numbers<[1], [1], [0], [0], [0, 0, 1, 0], [], []>} : vector<32x32xf32>, vector<8x32xf32>, vector<32x8xf32> -> vector<32x8xf32>
    %720 = vector.extract_strided_slice %465 {offsets = [0, 0], sizes = [8, 32], strides = [1, 1]} : vector<32x32xf32> to vector<8x32xf32>
    %cst_345 = arith.constant dense<0.000000e+00> : vector<32x32xf32>
    %721 = tpu.matmul %719, %720, %cst_345 {dimension_numbers = #tpu.dot_dimension_numbers<[1], [0], [0], [1], [0, 0, 1, 1], [], []>} : vector<32x8xf32>, vector<8x32xf32>, vector<32x32xf32> -> vector<32x32xf32>
    %722 = arith.addf %682, %721 : vector<32x32xf32>
    %723 = vector.extract_strided_slice %663 {offsets = [8, 0], sizes = [8, 32], strides = [1, 1]} : vector<72x32xf32> to vector<8x32xf32>
    %724 = vector.extract_strided_slice %663 {offsets = [40, 0], sizes = [8, 32], strides = [1, 1]} : vector<72x32xf32> to vector<8x32xf32>
    %725 = vector.extract_strided_slice %660 {offsets = [0, 8], sizes = [32, 8], strides = [1, 1]} : vector<32x32xf32> to vector<32x8xf32>
    %cst_346 = arith.constant dense<0.000000e+00> : vector<32x32xf32>
    %726 = tpu.matmul %725, %723, %cst_346 {dimension_numbers = #tpu.dot_dimension_numbers<[1], [0], [0], [1], [0, 0, 1, 1], [], []>} : vector<32x8xf32>, vector<8x32xf32>, vector<32x32xf32> -> vector<32x32xf32>
    %cst_347 = arith.constant 0.353553385 : f32
    %727 = vector.broadcast %cst_347 : f32 to vector<32x32xf32>
    %728 = arith.mulf %726, %727 : vector<32x32xf32>
    %cst_348 = arith.constant dense<0xFF800000> : vector<32xf32>
    %729 = vector.multi_reduction <maximumf>, %728, %cst_348 [1] : vector<32x32xf32> to vector<32xf32>
    %730 = vector.shape_cast %729 : vector<32xf32> to vector<32x1xf32>
    %731 = vector.broadcast %730 : vector<32x1xf32> to vector<32x32xf32>
    %732 = arith.subf %728, %731 : vector<32x32xf32>
    %733 = math.exp %732 : vector<32x32xf32>
    %cst_349 = arith.constant dense<0.000000e+00> : vector<32xf32>
    %734 = vector.multi_reduction <add>, %733, %cst_349 [1] : vector<32x32xf32> to vector<32xf32>
    %735 = vector.shape_cast %734 : vector<32xf32> to vector<32x1xf32>
    %736 = vector.broadcast %735 : vector<32x1xf32> to vector<32x32xf32>
    %737 = arith.divf %733, %736 : vector<32x32xf32>
    %738 = vector.extract_strided_slice %678 {offsets = [1, 0], sizes = [1, 32], strides = [1, 1]} : vector<4x32xf32> to vector<1x32xf32>
    %cst_350 = arith.constant 1.000000e+00 : f32
    %739 = vector.broadcast %cst_350 : f32 to vector<1x32xf32>
    %740 = arith.divf %739, %738 : vector<1x32xf32>
    %cst_351 = arith.constant 0.398942292 : f32
    %741 = vector.broadcast %cst_351 : f32 to vector<1x32xf32>
    %742 = arith.mulf %741, %740 : vector<1x32xf32>
    %cst_352 = arith.constant 0.000000e+00 : f32
    %743 = vector.broadcast %cst_352 : f32 to vector<32x32xf32>
    %744 = arith.subf %743, %4 : vector<32x32xf32>
    %cst_353 = arith.constant 5.000000e-01 : f32
    %745 = vector.broadcast %cst_353 : f32 to vector<1x32xf32>
    %746 = arith.mulf %745, %740 : vector<1x32xf32>
    %747 = arith.mulf %746, %740 : vector<1x32xf32>
    %748 = vector.broadcast %747 : vector<1x32xf32> to vector<32x32xf32>
    %749 = arith.mulf %744, %748 : vector<32x32xf32>
    %750 = math.exp %749 : vector<32x32xf32>
    %751 = vector.broadcast %742 : vector<1x32xf32> to vector<32x32xf32>
    %752 = arith.mulf %751, %750 : vector<32x32xf32>
    %c1_354 = arith.constant 1 : index
    %c1_355 = arith.constant 1 : index
    %c0_356 = arith.constant 0 : index
    %c32_357 = arith.constant 32 : index
    %753 = vector.load %arg19[%c1_354, %c1_355, %c0_356, %c32_357] : memref<2x2x32x128xf32, #tpu.memory_space<vmem>>, vector<1x1x32x32xf32>
    %754 = vector.shape_cast %753 : vector<1x1x32x32xf32> to vector<32x32xf32>
    %755 = vector.shape_cast %737 : vector<32x32xf32> to vector<1x1x32x32xf32>
    tpu.vector_store %arg19[%c1_354, %c1_355, %c0_356, %c32_357], %755 {strides = array<i32>} : memref<2x2x32x128xf32, #tpu.memory_space<vmem>>, vector<1x1x32x32xf32>,
    %c1_358 = arith.constant 1 : index
    %c1_359 = arith.constant 1 : index
    %c0_360 = arith.constant 0 : index
    %c32_361 = arith.constant 32 : index
    %756 = vector.load %arg20[%c1_358, %c1_359, %c0_360, %c32_361] : memref<2x2x32x128xf32, #tpu.memory_space<vmem>>, vector<1x1x32x32xf32>
    %757 = vector.shape_cast %756 : vector<1x1x32x32xf32> to vector<32x32xf32>
    %758 = vector.shape_cast %752 : vector<32x32xf32> to vector<1x1x32x32xf32>
    tpu.vector_store %arg20[%c1_358, %c1_359, %c0_360, %c32_361], %758 {strides = array<i32>} : memref<2x2x32x128xf32, #tpu.memory_space<vmem>>, vector<1x1x32x32xf32>,
    %cst_362 = arith.constant dense<0.000000e+00> : vector<32x8xf32>
    %759 = tpu.matmul %737, %724, %cst_362 {dimension_numbers = #tpu.dot_dimension_numbers<[1], [1], [0], [0], [0, 0, 1, 0], [], []>} : vector<32x32xf32>, vector<8x32xf32>, vector<32x8xf32> -> vector<32x8xf32>
    %760 = vector.extract_strided_slice %465 {offsets = [8, 0], sizes = [8, 32], strides = [1, 1]} : vector<32x32xf32> to vector<8x32xf32>
    %cst_363 = arith.constant dense<0.000000e+00> : vector<32x32xf32>
    %761 = tpu.matmul %759, %760, %cst_363 {dimension_numbers = #tpu.dot_dimension_numbers<[1], [0], [0], [1], [0, 0, 1, 1], [], []>} : vector<32x8xf32>, vector<8x32xf32>, vector<32x32xf32> -> vector<32x32xf32>
    %762 = arith.addf %722, %761 : vector<32x32xf32>
    %763 = vector.extract_strided_slice %663 {offsets = [16, 0], sizes = [8, 32], strides = [1, 1]} : vector<72x32xf32> to vector<8x32xf32>
    %764 = vector.extract_strided_slice %663 {offsets = [48, 0], sizes = [8, 32], strides = [1, 1]} : vector<72x32xf32> to vector<8x32xf32>
    %765 = vector.extract_strided_slice %660 {offsets = [0, 16], sizes = [32, 8], strides = [1, 1]} : vector<32x32xf32> to vector<32x8xf32>
    %cst_364 = arith.constant dense<0.000000e+00> : vector<32x32xf32>
    %766 = tpu.matmul %765, %763, %cst_364 {dimension_numbers = #tpu.dot_dimension_numbers<[1], [0], [0], [1], [0, 0, 1, 1], [], []>} : vector<32x8xf32>, vector<8x32xf32>, vector<32x32xf32> -> vector<32x32xf32>
    %cst_365 = arith.constant 0.353553385 : f32
    %767 = vector.broadcast %cst_365 : f32 to vector<32x32xf32>
    %768 = arith.mulf %766, %767 : vector<32x32xf32>
    %cst_366 = arith.constant dense<0xFF800000> : vector<32xf32>
    %769 = vector.multi_reduction <maximumf>, %768, %cst_366 [1] : vector<32x32xf32> to vector<32xf32>
    %770 = vector.shape_cast %769 : vector<32xf32> to vector<32x1xf32>
    %771 = vector.broadcast %770 : vector<32x1xf32> to vector<32x32xf32>
    %772 = arith.subf %768, %771 : vector<32x32xf32>
    %773 = math.exp %772 : vector<32x32xf32>
    %cst_367 = arith.constant dense<0.000000e+00> : vector<32xf32>
    %774 = vector.multi_reduction <add>, %773, %cst_367 [1] : vector<32x32xf32> to vector<32xf32>
    %775 = vector.shape_cast %774 : vector<32xf32> to vector<32x1xf32>
    %776 = vector.broadcast %775 : vector<32x1xf32> to vector<32x32xf32>
    %777 = arith.divf %773, %776 : vector<32x32xf32>
    %778 = vector.extract_strided_slice %678 {offsets = [2, 0], sizes = [1, 32], strides = [1, 1]} : vector<4x32xf32> to vector<1x32xf32>
    %cst_368 = arith.constant 1.000000e+00 : f32
    %779 = vector.broadcast %cst_368 : f32 to vector<1x32xf32>
    %780 = arith.divf %779, %778 : vector<1x32xf32>
    %cst_369 = arith.constant 0.398942292 : f32
    %781 = vector.broadcast %cst_369 : f32 to vector<1x32xf32>
    %782 = arith.mulf %781, %780 : vector<1x32xf32>
    %cst_370 = arith.constant 0.000000e+00 : f32
    %783 = vector.broadcast %cst_370 : f32 to vector<32x32xf32>
    %784 = arith.subf %783, %4 : vector<32x32xf32>
    %cst_371 = arith.constant 5.000000e-01 : f32
    %785 = vector.broadcast %cst_371 : f32 to vector<1x32xf32>
    %786 = arith.mulf %785, %780 : vector<1x32xf32>
    %787 = arith.mulf %786, %780 : vector<1x32xf32>
    %788 = vector.broadcast %787 : vector<1x32xf32> to vector<32x32xf32>
    %789 = arith.mulf %784, %788 : vector<32x32xf32>
    %790 = math.exp %789 : vector<32x32xf32>
    %791 = vector.broadcast %782 : vector<1x32xf32> to vector<32x32xf32>
    %792 = arith.mulf %791, %790 : vector<32x32xf32>
    %c1_372 = arith.constant 1 : index
    %c1_373 = arith.constant 1 : index
    %c0_374 = arith.constant 0 : index
    %c64_375 = arith.constant 64 : index
    %793 = vector.load %arg19[%c1_372, %c1_373, %c0_374, %c64_375] : memref<2x2x32x128xf32, #tpu.memory_space<vmem>>, vector<1x1x32x32xf32>
    %794 = vector.shape_cast %793 : vector<1x1x32x32xf32> to vector<32x32xf32>
    %795 = vector.shape_cast %777 : vector<32x32xf32> to vector<1x1x32x32xf32>
    tpu.vector_store %arg19[%c1_372, %c1_373, %c0_374, %c64_375], %795 {strides = array<i32>} : memref<2x2x32x128xf32, #tpu.memory_space<vmem>>, vector<1x1x32x32xf32>,
    %c1_376 = arith.constant 1 : index
    %c1_377 = arith.constant 1 : index
    %c0_378 = arith.constant 0 : index
    %c64_379 = arith.constant 64 : index
    %796 = vector.load %arg20[%c1_376, %c1_377, %c0_378, %c64_379] : memref<2x2x32x128xf32, #tpu.memory_space<vmem>>, vector<1x1x32x32xf32>
    %797 = vector.shape_cast %796 : vector<1x1x32x32xf32> to vector<32x32xf32>
    %798 = vector.shape_cast %792 : vector<32x32xf32> to vector<1x1x32x32xf32>
    tpu.vector_store %arg20[%c1_376, %c1_377, %c0_378, %c64_379], %798 {strides = array<i32>} : memref<2x2x32x128xf32, #tpu.memory_space<vmem>>, vector<1x1x32x32xf32>,
    %cst_380 = arith.constant dense<0.000000e+00> : vector<32x8xf32>
    %799 = tpu.matmul %777, %764, %cst_380 {dimension_numbers = #tpu.dot_dimension_numbers<[1], [1], [0], [0], [0, 0, 1, 0], [], []>} : vector<32x32xf32>, vector<8x32xf32>, vector<32x8xf32> -> vector<32x8xf32>
    %800 = vector.extract_strided_slice %465 {offsets = [16, 0], sizes = [8, 32], strides = [1, 1]} : vector<32x32xf32> to vector<8x32xf32>
    %cst_381 = arith.constant dense<0.000000e+00> : vector<32x32xf32>
    %801 = tpu.matmul %799, %800, %cst_381 {dimension_numbers = #tpu.dot_dimension_numbers<[1], [0], [0], [1], [0, 0, 1, 1], [], []>} : vector<32x8xf32>, vector<8x32xf32>, vector<32x32xf32> -> vector<32x32xf32>
    %802 = arith.addf %762, %801 : vector<32x32xf32>
    %803 = vector.extract_strided_slice %663 {offsets = [24, 0], sizes = [8, 32], strides = [1, 1]} : vector<72x32xf32> to vector<8x32xf32>
    %804 = vector.extract_strided_slice %663 {offsets = [56, 0], sizes = [8, 32], strides = [1, 1]} : vector<72x32xf32> to vector<8x32xf32>
    %805 = vector.extract_strided_slice %660 {offsets = [0, 24], sizes = [32, 8], strides = [1, 1]} : vector<32x32xf32> to vector<32x8xf32>
    %cst_382 = arith.constant dense<0.000000e+00> : vector<32x32xf32>
    %806 = tpu.matmul %805, %803, %cst_382 {dimension_numbers = #tpu.dot_dimension_numbers<[1], [0], [0], [1], [0, 0, 1, 1], [], []>} : vector<32x8xf32>, vector<8x32xf32>, vector<32x32xf32> -> vector<32x32xf32>
    %cst_383 = arith.constant 0.353553385 : f32
    %807 = vector.broadcast %cst_383 : f32 to vector<32x32xf32>
    %808 = arith.mulf %806, %807 : vector<32x32xf32>
    %cst_384 = arith.constant dense<0xFF800000> : vector<32xf32>
    %809 = vector.multi_reduction <maximumf>, %808, %cst_384 [1] : vector<32x32xf32> to vector<32xf32>
    %810 = vector.shape_cast %809 : vector<32xf32> to vector<32x1xf32>
    %811 = vector.broadcast %810 : vector<32x1xf32> to vector<32x32xf32>
    %812 = arith.subf %808, %811 : vector<32x32xf32>
    %813 = math.exp %812 : vector<32x32xf32>
    %cst_385 = arith.constant dense<0.000000e+00> : vector<32xf32>
    %814 = vector.multi_reduction <add>, %813, %cst_385 [1] : vector<32x32xf32> to vector<32xf32>
    %815 = vector.shape_cast %814 : vector<32xf32> to vector<32x1xf32>
    %816 = vector.broadcast %815 : vector<32x1xf32> to vector<32x32xf32>
    %817 = arith.divf %813, %816 : vector<32x32xf32>
    %818 = vector.extract_strided_slice %678 {offsets = [3, 0], sizes = [1, 32], strides = [1, 1]} : vector<4x32xf32> to vector<1x32xf32>
    %cst_386 = arith.constant 1.000000e+00 : f32
    %819 = vector.broadcast %cst_386 : f32 to vector<1x32xf32>
    %820 = arith.divf %819, %818 : vector<1x32xf32>
    %cst_387 = arith.constant 0.398942292 : f32
    %821 = vector.broadcast %cst_387 : f32 to vector<1x32xf32>
    %822 = arith.mulf %821, %820 : vector<1x32xf32>
    %cst_388 = arith.constant 0.000000e+00 : f32
    %823 = vector.broadcast %cst_388 : f32 to vector<32x32xf32>
    %824 = arith.subf %823, %4 : vector<32x32xf32>
    %cst_389 = arith.constant 5.000000e-01 : f32
    %825 = vector.broadcast %cst_389 : f32 to vector<1x32xf32>
    %826 = arith.mulf %825, %820 : vector<1x32xf32>
    %827 = arith.mulf %826, %820 : vector<1x32xf32>
    %828 = vector.broadcast %827 : vector<1x32xf32> to vector<32x32xf32>
    %829 = arith.mulf %824, %828 : vector<32x32xf32>
    %830 = math.exp %829 : vector<32x32xf32>
    %831 = vector.broadcast %822 : vector<1x32xf32> to vector<32x32xf32>
    %832 = arith.mulf %831, %830 : vector<32x32xf32>
    %c1_390 = arith.constant 1 : index
    %c1_391 = arith.constant 1 : index
    %c0_392 = arith.constant 0 : index
    %c96_393 = arith.constant 96 : index
    %833 = vector.load %arg19[%c1_390, %c1_391, %c0_392, %c96_393] : memref<2x2x32x128xf32, #tpu.memory_space<vmem>>, vector<1x1x32x32xf32>
    %834 = vector.shape_cast %833 : vector<1x1x32x32xf32> to vector<32x32xf32>
    %835 = vector.shape_cast %817 : vector<32x32xf32> to vector<1x1x32x32xf32>
    tpu.vector_store %arg19[%c1_390, %c1_391, %c0_392, %c96_393], %835 {strides = array<i32>} : memref<2x2x32x128xf32, #tpu.memory_space<vmem>>, vector<1x1x32x32xf32>,
    %c1_394 = arith.constant 1 : index
    %c1_395 = arith.constant 1 : index
    %c0_396 = arith.constant 0 : index
    %c96_397 = arith.constant 96 : index
    %836 = vector.load %arg20[%c1_394, %c1_395, %c0_396, %c96_397] : memref<2x2x32x128xf32, #tpu.memory_space<vmem>>, vector<1x1x32x32xf32>
    %837 = vector.shape_cast %836 : vector<1x1x32x32xf32> to vector<32x32xf32>
    %838 = vector.shape_cast %832 : vector<32x32xf32> to vector<1x1x32x32xf32>
    tpu.vector_store %arg20[%c1_394, %c1_395, %c0_396, %c96_397], %838 {strides = array<i32>} : memref<2x2x32x128xf32, #tpu.memory_space<vmem>>, vector<1x1x32x32xf32>,
    %cst_398 = arith.constant dense<0.000000e+00> : vector<32x8xf32>
    %839 = tpu.matmul %817, %804, %cst_398 {dimension_numbers = #tpu.dot_dimension_numbers<[1], [1], [0], [0], [0, 0, 1, 0], [], []>} : vector<32x32xf32>, vector<8x32xf32>, vector<32x8xf32> -> vector<32x8xf32>
    %840 = vector.extract_strided_slice %465 {offsets = [24, 0], sizes = [8, 32], strides = [1, 1]} : vector<32x32xf32> to vector<8x32xf32>
    %cst_399 = arith.constant dense<0.000000e+00> : vector<32x32xf32>
    %841 = tpu.matmul %839, %840, %cst_399 {dimension_numbers = #tpu.dot_dimension_numbers<[1], [0], [0], [1], [0, 0, 1, 1], [], []>} : vector<32x8xf32>, vector<8x32xf32>, vector<32x32xf32> -> vector<32x32xf32>
    %842 = arith.addf %802, %841 : vector<32x32xf32>
    %843 = tpu.concatenate %658, %842 in 0 : vector<32x32xf32>, vector<32x32xf32> -> vector<64x32xf32>
    %c1_400 = arith.constant 1 : index
    %c0_401 = arith.constant 0 : index
    %c0_402 = arith.constant 0 : index
    %844 = vector.load %arg7[%c1_400, %c0_401, %c0_402] : memref<2x1x32xf32, #tpu.memory_space<vmem>>, vector<1x1x32xf32>
    %845 = vector.shape_cast %844 : vector<1x1x32xf32> to vector<1x32xf32>
    %846 = vector.broadcast %845 : vector<1x32xf32> to vector<64x32xf32>
    %847 = arith.addf %843, %846 : vector<64x32xf32>
    %848 = arith.addf %461, %847 : vector<64x32xf32>
    %c1_403 = arith.constant 1 : index
    %c0_404 = arith.constant 0 : index
    %c0_405 = arith.constant 0 : index
    %849 = vector.load %arg8[%c1_403, %c0_404, %c0_405] : memref<2x1x32xf32, #tpu.memory_space<vmem>>, vector<1x1x32xf32>
    %850 = vector.shape_cast %849 : vector<1x1x32xf32> to vector<1x32xf32>
    %c1_406 = arith.constant 1 : index
    %c0_407 = arith.constant 0 : index
    %c0_408 = arith.constant 0 : index
    %851 = vector.load %arg9[%c1_406, %c0_407, %c0_408] : memref<2x1x32xf32, #tpu.memory_space<vmem>>, vector<1x1x32xf32>
    %852 = vector.shape_cast %851 : vector<1x1x32xf32> to vector<1x32xf32>
    %cst_409 = arith.constant dense<0.000000e+00> : vector<64xf32>
    %853 = vector.multi_reduction <add>, %848, %cst_409 [1] : vector<64x32xf32> to vector<64xf32>
    %854 = vector.shape_cast %853 : vector<64xf32> to vector<64x1xf32>
    %cst_410 = arith.constant 3.200000e+01 : f32
    %855 = vector.broadcast %cst_410 : f32 to vector<64x1xf32>
    %856 = arith.divf %854, %855 : vector<64x1xf32>
    %857 = vector.broadcast %856 : vector<64x1xf32> to vector<64x32xf32>
    %858 = arith.subf %848, %857 : vector<64x32xf32>
    %859 = arith.mulf %858, %858 : vector<64x32xf32>
    %cst_411 = arith.constant dense<0.000000e+00> : vector<64xf32>
    %860 = vector.multi_reduction <add>, %859, %cst_411 [1] : vector<64x32xf32> to vector<64xf32>
    %861 = vector.shape_cast %860 : vector<64xf32> to vector<64x1xf32>
    %cst_412 = arith.constant 3.200000e+01 : f32
    %862 = vector.broadcast %cst_412 : f32 to vector<64x1xf32>
    %863 = arith.divf %861, %862 : vector<64x1xf32>
    %864 = vector.broadcast %856 : vector<64x1xf32> to vector<64x32xf32>
    %865 = arith.subf %848, %864 : vector<64x32xf32>
    %cst_413 = arith.constant 9.99999974E-6 : f32
    %866 = vector.broadcast %cst_413 : f32 to vector<64x1xf32>
    %867 = arith.addf %863, %866 : vector<64x1xf32>
    %868 = math.rsqrt %867 : vector<64x1xf32>
    %869 = vector.broadcast %868 : vector<64x1xf32> to vector<64x32xf32>
    %870 = arith.mulf %865, %869 : vector<64x32xf32>
    %871 = vector.broadcast %850 : vector<1x32xf32> to vector<64x32xf32>
    %872 = arith.mulf %870, %871 : vector<64x32xf32>
    %873 = vector.broadcast %852 : vector<1x32xf32> to vector<64x32xf32>
    %874 = arith.addf %872, %873 : vector<64x32xf32>
    %c1_414 = arith.constant 1 : index
    %c0_415 = arith.constant 0 : index
    %c0_416 = arith.constant 0 : index
    %875 = vector.load %arg10[%c1_414, %c0_415, %c0_416] : memref<2x32x64xf32, #tpu.memory_space<vmem>>, vector<1x32x64xf32>
    %876 = vector.shape_cast %875 : vector<1x32x64xf32> to vector<32x64xf32>
    %cst_417 = arith.constant dense<0.000000e+00> : vector<64x64xf32>
    %877 = tpu.matmul %874, %876, %cst_417 {dimension_numbers = #tpu.dot_dimension_numbers<[1], [0], [0], [1], [0, 0, 1, 1], [], []>} : vector<64x32xf32>, vector<32x64xf32>, vector<64x64xf32> -> vector<64x64xf32>
    %c1_418 = arith.constant 1 : index
    %c0_419 = arith.constant 0 : index
    %c0_420 = arith.constant 0 : index
    %878 = vector.load %arg11[%c1_418, %c0_419, %c0_420] : memref<2x1x64xf32, #tpu.memory_space<vmem>>, vector<1x1x64xf32>
    %879 = vector.shape_cast %878 : vector<1x1x64xf32> to vector<1x64xf32>
    %880 = vector.broadcast %879 : vector<1x64xf32> to vector<64x64xf32>
    %881 = arith.addf %877, %880 : vector<64x64xf32>
    %cst_421 = arith.constant 0.000000e+00 : f32
    %882 = vector.broadcast %cst_421 : f32 to vector<64x64xf32>
    %883 = arith.maximumf %881, %882 : vector<64x64xf32>
    %c1_422 = arith.constant 1 : index
    %c0_423 = arith.constant 0 : index
    %c0_424 = arith.constant 0 : index
    %884 = vector.load %arg12[%c1_422, %c0_423, %c0_424] : memref<2x64x32xf32, #tpu.memory_space<vmem>>, vector<1x64x32xf32>
    %885 = vector.shape_cast %884 : vector<1x64x32xf32> to vector<64x32xf32>
    %cst_425 = arith.constant dense<0.000000e+00> : vector<64x32xf32>
    %886 = tpu.matmul %883, %885, %cst_425 {dimension_numbers = #tpu.dot_dimension_numbers<[1], [0], [0], [1], [0, 0, 1, 1], [], []>} : vector<64x64xf32>, vector<64x32xf32>, vector<64x32xf32> -> vector<64x32xf32>
    %c1_426 = arith.constant 1 : index
    %c0_427 = arith.constant 0 : index
    %c0_428 = arith.constant 0 : index
    %887 = vector.load %arg13[%c1_426, %c0_427, %c0_428] : memref<2x1x32xf32, #tpu.memory_space<vmem>>, vector<1x1x32xf32>
    %888 = vector.shape_cast %887 : vector<1x1x32xf32> to vector<1x32xf32>
    %889 = vector.broadcast %888 : vector<1x32xf32> to vector<64x32xf32>
    %890 = arith.addf %886, %889 : vector<64x32xf32>
    %891 = arith.addf %874, %890 : vector<64x32xf32>
    %c1_429 = arith.constant 1 : index
    %c0_430 = arith.constant 0 : index
    %c0_431 = arith.constant 0 : index
    %892 = vector.load %arg14[%c1_429, %c0_430, %c0_431] : memref<2x1x32xf32, #tpu.memory_space<vmem>>, vector<1x1x32xf32>
    %893 = vector.shape_cast %892 : vector<1x1x32xf32> to vector<1x32xf32>
    %c1_432 = arith.constant 1 : index
    %c0_433 = arith.constant 0 : index
    %c0_434 = arith.constant 0 : index
    %894 = vector.load %arg15[%c1_432, %c0_433, %c0_434] : memref<2x1x32xf32, #tpu.memory_space<vmem>>, vector<1x1x32xf32>
    %895 = vector.shape_cast %894 : vector<1x1x32xf32> to vector<1x32xf32>
    %cst_435 = arith.constant dense<0.000000e+00> : vector<64xf32>
    %896 = vector.multi_reduction <add>, %891, %cst_435 [1] : vector<64x32xf32> to vector<64xf32>
    %897 = vector.shape_cast %896 : vector<64xf32> to vector<64x1xf32>
    %cst_436 = arith.constant 3.200000e+01 : f32
    %898 = vector.broadcast %cst_436 : f32 to vector<64x1xf32>
    %899 = arith.divf %897, %898 : vector<64x1xf32>
    %900 = vector.broadcast %899 : vector<64x1xf32> to vector<64x32xf32>
    %901 = arith.subf %891, %900 : vector<64x32xf32>
    %902 = arith.mulf %901, %901 : vector<64x32xf32>
    %cst_437 = arith.constant dense<0.000000e+00> : vector<64xf32>
    %903 = vector.multi_reduction <add>, %902, %cst_437 [1] : vector<64x32xf32> to vector<64xf32>
    %904 = vector.shape_cast %903 : vector<64xf32> to vector<64x1xf32>
    %cst_438 = arith.constant 3.200000e+01 : f32
    %905 = vector.broadcast %cst_438 : f32 to vector<64x1xf32>
    %906 = arith.divf %904, %905 : vector<64x1xf32>
    %907 = vector.broadcast %899 : vector<64x1xf32> to vector<64x32xf32>
    %908 = arith.subf %891, %907 : vector<64x32xf32>
    %cst_439 = arith.constant 9.99999974E-6 : f32
    %909 = vector.broadcast %cst_439 : f32 to vector<64x1xf32>
    %910 = arith.addf %906, %909 : vector<64x1xf32>
    %911 = math.rsqrt %910 : vector<64x1xf32>
    %912 = vector.broadcast %911 : vector<64x1xf32> to vector<64x32xf32>
    %913 = arith.mulf %908, %912 : vector<64x32xf32>
    %914 = vector.broadcast %893 : vector<1x32xf32> to vector<64x32xf32>
    %915 = arith.mulf %913, %914 : vector<64x32xf32>
    %916 = vector.broadcast %895 : vector<1x32xf32> to vector<64x32xf32>
    %917 = arith.addf %915, %916 : vector<64x32xf32>
    %c0_440 = arith.constant 0 : index
    %c0_441 = arith.constant 0 : index
    %918 = vector.load %arg16[%c0_440, %c0_441] : memref<1x32xf32, #tpu.memory_space<vmem>>, vector<1x32xf32>
    %c0_442 = arith.constant 0 : index
    %c0_443 = arith.constant 0 : index
    %919 = vector.load %arg17[%c0_442, %c0_443] : memref<1x32xf32, #tpu.memory_space<vmem>>, vector<1x32xf32>
    %cst_444 = arith.constant dense<0.000000e+00> : vector<64xf32>
    %920 = vector.multi_reduction <add>, %917, %cst_444 [1] : vector<64x32xf32> to vector<64xf32>
    %921 = vector.shape_cast %920 : vector<64xf32> to vector<64x1xf32>
    %cst_445 = arith.constant 3.200000e+01 : f32
    %922 = vector.broadcast %cst_445 : f32 to vector<64x1xf32>
    %923 = arith.divf %921, %922 : vector<64x1xf32>
    %924 = vector.broadcast %923 : vector<64x1xf32> to vector<64x32xf32>
    %925 = arith.subf %917, %924 : vector<64x32xf32>
    %926 = arith.mulf %925, %925 : vector<64x32xf32>
    %cst_446 = arith.constant dense<0.000000e+00> : vector<64xf32>
    %927 = vector.multi_reduction <add>, %926, %cst_446 [1] : vector<64x32xf32> to vector<64xf32>
    %928 = vector.shape_cast %927 : vector<64xf32> to vector<64x1xf32>
    %cst_447 = arith.constant 3.200000e+01 : f32
    %929 = vector.broadcast %cst_447 : f32 to vector<64x1xf32>
    %930 = arith.divf %928, %929 : vector<64x1xf32>
    %931 = vector.broadcast %923 : vector<64x1xf32> to vector<64x32xf32>
    %932 = arith.subf %917, %931 : vector<64x32xf32>
    %cst_448 = arith.constant 9.99999974E-6 : f32
    %933 = vector.broadcast %cst_448 : f32 to vector<64x1xf32>
    %934 = arith.addf %930, %933 : vector<64x1xf32>
    %935 = math.rsqrt %934 : vector<64x1xf32>
    %936 = vector.broadcast %935 : vector<64x1xf32> to vector<64x32xf32>
    %937 = arith.mulf %932, %936 : vector<64x32xf32>
    %938 = vector.broadcast %918 : vector<1x32xf32> to vector<64x32xf32>
    %939 = arith.mulf %937, %938 : vector<64x32xf32>
    %940 = vector.broadcast %919 : vector<1x32xf32> to vector<64x32xf32>
    %941 = arith.addf %939, %940 : vector<64x32xf32>
    %c0_449 = arith.constant 0 : index
    %c0_450 = arith.constant 0 : index
    %942 = vector.load %arg18[%c0_449, %c0_450] : memref<64x32xf32, #tpu.memory_space<vmem>>, vector<64x32xf32>
    tpu.vector_store %arg18[%c0_449, %c0_450], %941 {strides = array<i32>} : memref<64x32xf32, #tpu.memory_space<vmem>>, vector<64x32xf32>,
    return
  }
  func.func @transform_0(%arg0: i32) -> (i32, i32) {
    %c0_i32 = arith.constant 0 : i32
    %c0_i32_0 = arith.constant 0 : i32
    return %arg0, %c0_i32 : i32, i32
  }
  func.func @transform_1(%arg0: i32) -> (i32, i32, i32) {
    %c0_i32 = arith.constant 0 : i32
    %c0_i32_0 = arith.constant 0 : i32
    %c0_i32_1 = arith.constant 0 : i32
    %c0_i32_2 = arith.constant 0 : i32
    return %c0_i32, %c0_i32_0, %c0_i32_1 : i32, i32, i32
  }
  func.func @transform_2(%arg0: i32) -> (i32, i32, i32) {
    %c0_i32 = arith.constant 0 : i32
    %c0_i32_0 = arith.constant 0 : i32
    %c0_i32_1 = arith.constant 0 : i32
    %c0_i32_2 = arith.constant 0 : i32
    return %c0_i32, %c0_i32_0, %c0_i32_1 : i32, i32, i32
  }
  func.func @transform_3(%arg0: i32) -> (i32, i32, i32) {
    %c0_i32 = arith.constant 0 : i32
    %c0_i32_0 = arith.constant 0 : i32
    %c0_i32_1 = arith.constant 0 : i32
    %c0_i32_2 = arith.constant 0 : i32
    return %c0_i32, %c0_i32_0, %c0_i32_1 : i32, i32, i32
  }
  func.func @transform_4(%arg0: i32) -> (i32, i32, i32) {
    %c0_i32 = arith.constant 0 : i32
    %c0_i32_0 = arith.constant 0 : i32
    %c0_i32_1 = arith.constant 0 : i32
    %c0_i32_2 = arith.constant 0 : i32
    return %c0_i32, %c0_i32_0, %c0_i32_1 : i32, i32, i32
  }
  func.func @transform_5(%arg0: i32) -> (i32, i32, i32) {
    %c0_i32 = arith.constant 0 : i32
    %c0_i32_0 = arith.constant 0 : i32
    %c0_i32_1 = arith.constant 0 : i32
    %c0_i32_2 = arith.constant 0 : i32
    return %c0_i32, %c0_i32_0, %c0_i32_1 : i32, i32, i32
  }
  func.func @transform_6(%arg0: i32) -> (i32, i32, i32) {
    %c0_i32 = arith.constant 0 : i32
    %c0_i32_0 = arith.constant 0 : i32
    %c0_i32_1 = arith.constant 0 : i32
    %c0_i32_2 = arith.constant 0 : i32
    return %c0_i32, %c0_i32_0, %c0_i32_1 : i32, i32, i32
  }
  func.func @transform_7(%arg0: i32) -> (i32, i32, i32) {
    %c0_i32 = arith.constant 0 : i32
    %c0_i32_0 = arith.constant 0 : i32
    %c0_i32_1 = arith.constant 0 : i32
    %c0_i32_2 = arith.constant 0 : i32
    return %c0_i32, %c0_i32_0, %c0_i32_1 : i32, i32, i32
  }
  func.func @transform_8(%arg0: i32) -> (i32, i32, i32) {
    %c0_i32 = arith.constant 0 : i32
    %c0_i32_0 = arith.constant 0 : i32
    %c0_i32_1 = arith.constant 0 : i32
    %c0_i32_2 = arith.constant 0 : i32
    return %c0_i32, %c0_i32_0, %c0_i32_1 : i32, i32, i32
  }
  func.func @transform_9(%arg0: i32) -> (i32, i32, i32) {
    %c0_i32 = arith.constant 0 : i32
    %c0_i32_0 = arith.constant 0 : i32
    %c0_i32_1 = arith.constant 0 : i32
    %c0_i32_2 = arith.constant 0 : i32
    return %c0_i32, %c0_i32_0, %c0_i32_1 : i32, i32, i32
  }
  func.func @transform_10(%arg0: i32) -> (i32, i32, i32) {
    %c0_i32 = arith.constant 0 : i32
    %c0_i32_0 = arith.constant 0 : i32
    %c0_i32_1 = arith.constant 0 : i32
    %c0_i32_2 = arith.constant 0 : i32
    return %c0_i32, %c0_i32_0, %c0_i32_1 : i32, i32, i32
  }
  func.func @transform_11(%arg0: i32) -> (i32, i32, i32) {
    %c0_i32 = arith.constant 0 : i32
    %c0_i32_0 = arith.constant 0 : i32
    %c0_i32_1 = arith.constant 0 : i32
    %c0_i32_2 = arith.constant 0 : i32
    return %c0_i32, %c0_i32_0, %c0_i32_1 : i32, i32, i32
  }
  func.func @transform_12(%arg0: i32) -> (i32, i32, i32) {
    %c0_i32 = arith.constant 0 : i32
    %c0_i32_0 = arith.constant 0 : i32
    %c0_i32_1 = arith.constant 0 : i32
    %c0_i32_2 = arith.constant 0 : i32
    return %c0_i32, %c0_i32_0, %c0_i32_1 : i32, i32, i32
  }
  func.func @transform_13(%arg0: i32) -> (i32, i32, i32) {
    %c0_i32 = arith.constant 0 : i32
    %c0_i32_0 = arith.constant 0 : i32
    %c0_i32_1 = arith.constant 0 : i32
    %c0_i32_2 = arith.constant 0 : i32
    return %c0_i32, %c0_i32_0, %c0_i32_1 : i32, i32, i32
  }
  func.func @transform_14(%arg0: i32) -> (i32, i32, i32) {
    %c0_i32 = arith.constant 0 : i32
    %c0_i32_0 = arith.constant 0 : i32
    %c0_i32_1 = arith.constant 0 : i32
    %c0_i32_2 = arith.constant 0 : i32
    return %c0_i32, %c0_i32_0, %c0_i32_1 : i32, i32, i32
  }
  func.func @transform_15(%arg0: i32) -> (i32, i32) {
    %c0_i32 = arith.constant 0 : i32
    %c0_i32_0 = arith.constant 0 : i32
    %c0_i32_1 = arith.constant 0 : i32
    return %c0_i32, %c0_i32_0 : i32, i32
  }
  func.func @transform_16(%arg0: i32) -> (i32, i32) {
    %c0_i32 = arith.constant 0 : i32
    %c0_i32_0 = arith.constant 0 : i32
    %c0_i32_1 = arith.constant 0 : i32
    return %c0_i32, %c0_i32_0 : i32, i32
  }
  func.func @transform_17(%arg0: i32) -> (i32, i32) {
    %c0_i32 = arith.constant 0 : i32
    %c0_i32_0 = arith.constant 0 : i32
    return %arg0, %c0_i32 : i32, i32
  }
  func.func @transform_18(%arg0: i32) -> (i32, i32, i32, i32) {
    %c0_i32 = arith.constant 0 : i32
    %c0_i32_0 = arith.constant 0 : i32
    %c0_i32_1 = arith.constant 0 : i32
    %c0_i32_2 = arith.constant 0 : i32
    return %arg0, %c0_i32, %c0_i32_0, %c0_i32_1 : i32, i32, i32, i32
  }
  func.func @transform_19(%arg0: i32) -> (i32, i32, i32, i32) {
    %c0_i32 = arith.constant 0 : i32
    %c0_i32_0 = arith.constant 0 : i32
    %c0_i32_1 = arith.constant 0 : i32
    %c0_i32_2 = arith.constant 0 : i32
    return %arg0, %c0_i32, %c0_i32_0, %c0_i32_1 : i32, i32, i32, i32
  }
  func.func @transform_20(%arg0: i32) -> (i32, i32, i32, i32) {
    %c0_i32 = arith.constant 0 : i32
    %c0_i32_0 = arith.constant 0 : i32
    %c0_i32_1 = arith.constant 0 : i32
    %c0_i32_2 = arith.constant 0 : i32
    return %arg0, %c0_i32, %c0_i32_0, %c0_i32_1 : i32, i32, i32, i32
  }
}

</mosaic_0001>

<bundles_post_ra>
// kernel: tpu_custom_call.1
= control target key start
LH: loop header
LB: loop body
LE: loop exit
PB: predicated region body
PF: predicated region fallthrough
CT: control target
= control target key end

     0   :  { %s13842_s0 = inlined_call_operand.vmem [shape: f32[64,32], index: 0, kind: input, shape index: {}]   ;;  %s13843_s1 = inlined_call_operand.vmem [shape: f32[2,32,32], index: 1, kind: input, shape index: {}]   ;;  %s13844_s2 = inlined_call_operand.vmem [shape: f32[2,1,32], index: 2, kind: input, shape index: {}]   ;;  %s13845_s3 = inlined_call_operand.vmem [shape: f32[2,72,32], index: 3, kind: input, shape index: {}]   ;;  %s13846_s4 = inlined_call_operand.vmem [shape: f32[2,72,1], index: 4, kind: input, shape index: {}]   ;;  %s13847_s5 = inlined_call_operand.vmem [shape: f32[2,32,32], index: 5, kind: input, shape index: {}]   ;;  %s13848_s6 = inlined_call_operand.vmem [shape: f32[2,1,32], index: 6, kind: input, shape index: {}]   ;;  %s13849_s7 = inlined_call_operand.vmem [shape: f32[2,1,32], index: 7, kind: input, shape index: {}]   ;;  %s13850_s8 = inlined_call_operand.vmem [shape: f32[2,1,32], index: 8, kind: input, shape index: {}]   ;;  %s13851_s9 = inlined_call_operand.vmem [shape: f32[2,32,64], index: 9, kind: input, shape index: {}]   ;;  %s13852_s10 = inlined_call_operand.vmem [shape: f32[2,1,64], index: 10, kind: input, shape index: {}]   ;;  %s13853_s11 = inlined_call_operand.vmem [shape: f32[2,64,32], index: 11, kind: input, shape index: {}]   ;;  %s13854_s12 = inlined_call_operand.vmem [shape: f32[2,1,32], index: 12, kind: input, shape index: {}]   ;;  %s13855_s13 = inlined_call_operand.vmem [shape: f32[2,1,32], index: 13, kind: input, shape index: {}]   ;;  %s13856_s14 = inlined_call_operand.vmem [shape: f32[2,1,32], index: 14, kind: input, shape index: {}]   ;;  %s13857_s15 = inlined_call_operand.vmem [shape: f32[1,32], index: 15, kind: input, shape index: {}]   ;;  %s13858_s16 = inlined_call_operand.vmem [shape: f32[1,32], index: 16, kind: input, shape index: {}]   ;;  %s13859_s17 = inlined_call_operand.vmem [shape: f32[64,32], index: 17, kind: output, shape index: {0}]   ;;  %s13860_s18 = inlined_call_operand.hbm [shape: f32[2,2,32,128], index: 18, kind: output, shape index: {1}]   ;;  %s13861_s19 = inlined_call_operand.hbm [shape: f32[2,2,32,128], index: 19, kind: output, shape index: {2}]   ;;  %s13862_s20 = inlined_call_operand.hbm [shape: f32[2,2,4,32], index: 20, kind: output, shape index: {3}]  }
   0x1   :  { %13923 = sst [smem:[#allocation65_spill]] %s13842_s0 }
   0x2   :  { %13924 = sst [smem:[#allocation66_spill]] %s13843_s1 }
   0x3   :  { %13925 = sst [smem:[#allocation67_spill]] %s13844_s2 }
   0x4   :  { %13926 = sst [smem:[#allocation68_spill]] %s13845_s3 }
   0x5   :  { %13927 = sst [smem:[#allocation69_spill]] %s13846_s4 }
   0x6   :  { %26 = vsyncpa [#allocation3], 0  ;;  %s13928_s23 = sld [smem:[#allocation66_spill]]  ;;  %vm122_vm0 = vcmask 261120   ;;  %v10879_v4 = vmov 0  }
   0x7   :  { %s13929_s26 = sld [smem:[#allocation65_spill]]  ;;  %10306 = vset.pattern.permute.xlu0 %v10879_v4  ;;  %10307 = vset.pattern.permute.xlu1 %v10879_v4 }
   0x8   :  { %s13930_s21 = sld [smem:[#allocation69_spill]] }
   0xc   :  { %v92_v0 = vld [vmem:[%s13928_s23 + $0x18] sm:$0xff]  ;;  %v91_v1 = vld [vmem:[%s13928_s23 + $0x10] sm:$0xff]  ;;  %v90_v3 = vld [vmem:[%s13928_s23 + $0x8] sm:$0xff] }
   0xd   :  { %9631 = vmatprep.subr.mxu1 %v92_v0  ;;  %v81_v2 = vld [vmem:[%s13929_s26] sm:$0xff] }
   0xe   :  { %9632 = vmatpush3.msra.mxu1 %v92_v0  ;;  %9639 = vmatprep.mubr.msk.f32.mxu1 %vm122_vm0, %v81_v2  ;;  %v89_v5 = vld [vmem:[%s13928_s23] sm:$0xff] }
   0xf   :  { %9633 = vmatprep.subr.mxu1 %v91_v1  ;;  %v106_v6 = vld [vmem:[%s13930_s21] sm:$0xff] }
  0x10   :  { %9634 = vmatpush3.msra.mxu1 %v91_v1 }
  0x11   :  { %27 = vsyncpa [#allocation5], 0  ;;  %9635 = vmatprep.subr.mxu1 %v90_v3  ;;  %254 = vperm.xlu0 %10306, %v106_v6   ;;  %v82_v7 = vld [vmem:[%s13929_s26 + $0x8] sm:$0xff]  ;;  %v84_v8 = vld [vmem:[%s13929_s26 + $0x18] sm:$0xff]  ;;  %v13868_v10 = vmov 0.0   ;;  %vm10881_vm1 = vmmov 0  }
  0x12   :  { %9636 = vmatpush3.msra.mxu1 %v90_v3  ;;  %v83_v9 = vld [vmem:[%s13929_s26 + $0x10] sm:$0xff]  ;;  %v11035_v11 = vld [vmem:[%s13929_s26 + $0x20] sm:$0xff]  ;;  %v11044_v12 = vld [vmem:[%s13929_s26 + $0x28] sm:$0xff]  ;;  %s13931_s25 = sld [smem:[#allocation68_spill]]  ;;  %vm448_vm2 = vcmask 64512   ;;  %s10882_s28 = smov 120  }
  0x13   :  { %9637 = vmatprep.subr.mxu1 %v89_v5  ;;  %v11050_v13 = vld [vmem:[%s13929_s26 + $0x30] sm:$0xff]  ;;  %v11060_v14 = vld [vmem:[%s13929_s26 + $0x38] sm:$0xff]  ;;  %s13932_s2 = sld [smem:[#allocation67_spill]]  ;;  %v107_v58 = vld [vmem:[%s13930_s21 + $0x8] sm:$0xff]  ;;  %s10883_s4 = smov 112   ;;  %vm4113_vm3 = vcmask 523264  }
  0x14   :  { %9638 = vmatpush3.msra.mxu1 %v89_v5  ;;  %v110_v62 = vld [vmem:[%s13930_s21 + $0x20] sm:$0xff]  ;;  %s13870_s22 = smov 104   ;;  %vm924_vm4 = vcmask 523520   ;;  %vm446_vm5 = vcmask 257024   ;;  %vm1428_vm6 = vcmask 785920   ;;  %vm1839_vm7 = vcmask 1048320  }
  0x15   :  { %9640 = vmatmul.mubr.msk.f32.vlgmr.msra.gmra.mxu1 %vm122_vm0, %v82_v7  ;;  %9651 = vmatprep.subr.mxu1 %v13868_v10 }
  0x16   :  { %9652 = vmatpush3.xpose.msk.msra.mxu1 %vm122_vm0, %v84_v8  ;;  %9642 = vmatprep.mubr.msk.f32.mxu1 %vm122_vm0, %v83_v9 }
  0x17   :  { %9653 = vmatprep.subr.mxu1 %v13868_v10 }
  0x18   :  { %v11071_v15 = vld [vmem:[%s13931_s25] sm:$0xff]  ;;  %v11080_v16 = vld [vmem:[%s13931_s25 + $0x8] sm:$0xff]  ;;  %v11089_v17 = vld [vmem:[%s13931_s25 + $0x10] sm:$0xff] }
  0x19   :  { %9643 = vmatmul.mubr.msk.f32.gmra.mxu1 %vm122_vm0, %v84_v8  ;;  %v11098_v18 = vld [vmem:[%s13931_s25 + $0x18] sm:$0xff]  ;;  %v11107_v19 = vld [vmem:[%s13931_s25 + $0x20] sm:$0xff]  ;;  %v11158_v53 = vld [vmem:[%s13931_s25 + $0x28] sm:$0xff] }
  0x1a   :  { %9654 = vmatpush3.xpose.msk.msra.mxu1 %vm122_vm0, %v83_v9  ;;  %9645 = vmatprep.mubr.msk.f32.mxu1 %vm122_vm0, %v11035_v11  ;;  %v11116_v21 = vld [vmem:[%s13932_s2] ss:$0 sm:$0xff]  ;;  %v11169_v56 = vld [vmem:[%s13931_s25 + $0x30] sm:$0xff]  ;;  %v11183_v60 = vld [vmem:[%s13931_s25 + $0x38] sm:$0xff] }
  0x1b   :  { %9655 = vmatprep.subr.mxu1 %v13868_v10  ;;  %v11195_v0 = vld [vmem:[%s13931_s25 + $0x40] sm:$0xff] }
  0x1d   :  { %9646 = vmatmul.mubr.msk.f32.gmra.mxu1 %vm122_vm0, %v11044_v12 }
  0x1e   :  { %9656 = vmatpush3.xpose.msk.msra.mxu1 %vm122_vm0, %v82_v7  ;;  %9648 = vmatprep.mubr.msk.f32.mxu1 %vm122_vm0, %v11050_v13 }
  0x1f   :  { %9657 = vmatprep.subr.mxu1 %v13868_v10 }
  0x21   :  { %9649 = vmatmul.mubr.msk.f32.gmra.mxu1 %vm122_vm0, %v11060_v14 }
  0x22   :  { %9658 = vmatpush3.xpose.msk.msra.mxu1 %vm122_vm0, %v81_v2  ;;  %9659 = vmatprep.mubr.msk.f32.mxu1 %vm10881_vm1, %v13868_v10 }
  0x25   :  { %9660 = vmatmul.mubr.msk.f32.vlgmr.msra.gmra.mxu1 %vm122_vm0, %v11071_v15 }
  0x26   :  { %9662 = vmatprep.mubr.msk.f32.mxu1 %vm10881_vm1, %v13868_v10 }
  0x29   :  { %9663 = vmatmul.mubr.msk.f32.gmra.mxu1 %vm122_vm0, %v11080_v16 }
  0x2a   :  { %9665 = vmatprep.mubr.msk.f32.mxu1 %vm10881_vm1, %v13868_v10 }
  0x2d   :  { %9666 = vmatmul.mubr.msk.f32.gmra.mxu1 %vm122_vm0, %v11089_v17 }
  0x2e   :  { %9668 = vmatprep.mubr.msk.f32.mxu1 %vm10881_vm1, %v13868_v10 }
  0x31   :  { %9669 = vmatmul.mubr.msk.f32.gmra.mxu1 %vm122_vm0, %v11098_v18 }
  0x32   :  { %9671 = vmatprep.mubr.msk.f32.mxu1 %vm10881_vm1, %v13868_v10 }
  0x35   :  { %9672 = vmatmul.mubr.msk.f32.gmra.mxu1 %vm122_vm0, %v11107_v19 }
  0x36   :  { %9674 = vmatprep.mubr.msk.f32.mxu1 %vm10881_vm1, %v13868_v10 }
  0x39   :  { %9675 = vmatmul.mubr.msk.f32.gmra.mxu1 %vm122_vm0, %v11158_v53 }
  0x3a   :  { %9677 = vmatprep.mubr.msk.f32.mxu1 %vm10881_vm1, %v13868_v10 }
  0x3d   :  { %9678 = vmatmul.mubr.msk.f32.gmra.mxu1 %vm122_vm0, %v11169_v56 }
  0x3e   :  { %9680 = vmatprep.mubr.msk.f32.mxu1 %vm10881_vm1, %v13868_v10 }
  0x41   :  { %9681 = vmatmul.mubr.msk.f32.gmra.mxu1 %vm122_vm0, %v11183_v60 }
  0x42   :  { %9683 = vmatprep.mubr.msk.f32.mxu1 %vm10881_vm1, %v13868_v10 }
  0x45   :  { %9684 = vmatmul.mubr.msk.f32.gmra.mxu1 %vm122_vm0, %v11195_v0 }
  0x8c   :  { %v11133_v32 = vpop.permute.xlu0 %254 }
  0xd5   :  { %v9641_v20 = vpop.f32.mrf.mxu1 }
  0xd6   :  { %v11137_v36 = vadd.f32 %v9641_v20, %v11116_v21 }
  0xd7   :  { %v213_v22 = vpop.f32.mrf.mxu1 }
  0xd8   :  { %v11119_v23 = vadd.f32 %v11116_v21, %v213_v22 }
  0xd9   :  { %v9644_v24 = vpop.f32.mrf.mxu1 }
  0xda   :  { %9688 = vmatprep.mubr.msk.f32.mxu0 %vm448_vm2, %v11119_v23  ;;  %v11147_v38 = vadd.f32 %v9644_v24, %v11116_v21 }
  0xdb   :  { %v223_v25 = vpop.f32.mrf.mxu1 }
  0xdc   :  { %v11140_v37 = vadd.f32 %v11116_v21, %v223_v25 }
  0xdd   :  { %v9647_v26 = vpop.f32.mrf.mxu1 }
  0xde   :  { %v11124_v27 = vadd.f32 %v9647_v26, %v11116_v21 }
  0xdf   :  { %v11126_v28 = vpop.f32.mrf.mxu1 }
  0xe1   :  { %v9650_v29 = vpop.f32.mrf.mxu1 }
  0xe2   :  { %v11129_v30 = vadd.f32 %v9650_v29, %v11116_v21 }
  0xe3   :  { %v11131_v31 = vpop.f32.mrf.mxu1 }
  0xe5   :  { %v390_v33 = vpop.f32.mrf.mxu1 }
  0xe6   :  { %v391_v34 = vadd.f32 %v390_v33, %v11133_v32 }
  0xe7   :  { %v9661_v35 = vpop.f32.mrf.mxu1 }
  0xe8   :  { %9686 = vmatprep.subr.mxu0 %v391_v34 }
  0xe9   :  { %9687 = vmatpush3.msra.mxu0 %v391_v34  ;;  %v395_v51 = vpop.f32.mrf.mxu1 }
  0xea   :  { %9689 = vmatmul.mubr.msk.f32.vlgmr.msra.gmra.mxu0 %vm448_vm2, %v11137_v36 }
  0xeb   :  { %9691 = vmatprep.mubr.msk.f32.mxu0 %vm448_vm2, %v11140_v37  ;;  %v9664_v52 = vpop.f32.mrf.mxu1 }
  0xed   :  { %v11160_v54 = vpop.f32.mrf.mxu1 }
  0xee   :  { %9692 = vmatmul.mubr.msk.f32.gmra.mxu0 %vm448_vm2, %v11147_v38 }
  0xef   :  { %v9667_v55 = vpop.f32.mrf.mxu1 }
  0xf1   :  { %v11171_v57 = vpop.f32.mrf.mxu1 }
  0xf3   :  { %v9670_v59 = vpop.f32.mrf.mxu1 }
  0xf5   :  { %v410_v61 = vpop.f32.mrf.mxu1 }
  0xf7   :  { %v9673_v63 = vpop.f32.mrf.mxu1 }
 0x1aa   :  { %v9690_v39 = vpop.f32.mrf.mxu0 }
 0x1ab   :  { %v547_v40 = vmul.f32 0.35355338, %v9690_v39 }
 0x1ac   :  { %v527_v41 = vpop.f32.mrf.mxu0 }
 0x1ad   :  { %v546_v42 = vmul.f32 0.35355338, %v527_v41  ;;  %v553_v43 = vsel %vm122_vm0, %v547_v40, -inf }
 0x1ae   :  { %554 = vmax.xlane.f32.xlu1 %v553_v43  ;;  %v9693_v44 = vpop.f32.mrf.mxu0 }
 0x1af   :  { %v550_v45 = vsel %vm122_vm0, %v546_v42, -inf  ;;  %v549_v48 = vmul.f32 0.35355338, %v9693_v44 }
 0x1b0   :  { %551 = vmax.xlane.f32.xlu0 %v550_v45  ;;  %v537_v46 = vpop.f32.mrf.mxu0 }
 0x1b1   :  { %v548_v47 = vmul.f32 0.35355338, %v537_v46  ;;  %v559_v50 = vsel %vm122_vm0, %v549_v48, -inf }
 0x1b3   :  { %v556_v49 = vsel %vm122_vm0, %v548_v47, -inf }
 0x1b4   :  { %557 = vmax.xlane.f32.xlu1 %v556_v49 }
 0x1b8   :  { %560 = vmax.xlane.f32.xlu1 %v559_v50 }
 0x1c6   :  { %259 = vperm.xlu0 %10306, %v107_v58  }
 0x1c9   :  { %274 = vperm.xlu1 %10307, %v110_v62  }
 0x1ca   :  { %741 = vrot.lane.b32.xlu0 %v11147_v38, %s10882_s28 }
 0x1cd   :  { %735 = vrot.lane.b32.xlu1 %v11119_v23, %s10882_s28 }
 0x1ce   :  { %1239 = vrot.lane.b32.xlu0 %v11119_v23, %s10883_s4 }
 0x1d1   :  { %737 = vrot.lane.b32.xlu1 %v11137_v36, %s10882_s28 }
 0x1d2   :  { %1243 = vrot.lane.b32.xlu0 %v11140_v37, %s10883_s4 }
 0x237   :  { %v555_v1 = vpop.xlane.xlu1 %554 }
 0x238   :  { %v563_v2 = vsub.f32 %v547_v40, %v555_v1 }
 0x239   :  { %v552_v3 = vpop.xlane.xlu0 %551 }
 0x23a   :  { %v568_v4 = vmul.f32 1.442695, %v563_v2  ;;  %v562_v5 = vsub.f32 %v546_v42, %v552_v3 }
 0x23c   :  { %10308 = vpow2.f32 %v568_v4  ;;  %v566_v6 = vmul.f32 1.442695, %v562_v5 }
 0x23d   :  { %v558_v7 = vpop.xlane.xlu1 %557 }
 0x23e   :  { %10310 = vpow2.f32 %v566_v6  ;;  %v564_v8 = vsub.f32 %v548_v47, %v558_v7  ;;  %v108_v47 = vld [vmem:[%s13930_s21 + $0x10] sm:$0xff] }
 0x240   :  { %v570_v24 = vmul.f32 1.442695, %v564_v8 }
 0x241   :  { %v11209_v9 = vpop.permute.xlu0 %259  ;;  %v561_v20 = vpop.xlane.xlu1 %560 }
 0x242   :  { %v565_v22 = vsub.f32 %v549_v48, %v561_v20  ;;  %v396_v34 = vadd.f32 %v395_v51, %v11209_v9  ;;  %v11233_v48 = vpop.f32.mrf.mxu1 }
 0x244   :  { %v572_v25 = vmul.f32 1.442695, %v565_v22  ;;  %v9676_v49 = vpop.f32.mrf.mxu1 }
 0x245   :  { %v11211_v26 = vpop.permute.xlu0 %741  ;;  %v11213_v29 = vpop.permute.xlu1 %274 }
 0x246   :  { %10312 = vpow2.f32 %v572_v25  ;;  %v411_v33 = vadd.f32 %v410_v61, %v11213_v29  ;;  %v11235_v50 = vpop.f32.mrf.mxu1 }
 0x247   :  { %10314 = vpow2.f32 %v570_v24 }
 0x248   :  { %9694 = vmatprep.subr.msk.mxu0 %vm122_vm0, %v411_v33  ;;  %v9679_v51 = vpop.f32.mrf.mxu1 }
 0x249   :  { %v10309_v35 = vpop.eup %10308  ;;  %v1240_v39 = vpop.permute.xlu0 %1239  ;;  %9695 = vmatpush3.xpose.msk.msra.mxu0 %vm122_vm0, %v411_v33 }
 0x24a   :  { %9702 = vmatprep.subr.mxu0 %v396_v34  ;;  %9736 = vmatprep.mubr.msk.f32.mxu1 %vm448_vm2, %v1240_v39  ;;  %v577_v40 = vsel %vm122_vm0, %v10309_v35, 0.0  ;;  %v11237_v52 = vpop.f32.mrf.mxu1  ;;  %v736_v58 = vpop.permute.xlu1 %735 }
 0x24b   :  { %v10311_v41 = vpop.eup %10310  ;;  %578 = vadd.xlane.f32.xlu1 %v577_v40 }
 0x24c   :  { %v574_v42 = vsel %vm122_vm0, %v10311_v41, 0.0  ;;  %v9682_v55 = vpop.f32.mrf.mxu1 }
 0x24d   :  { %v1244_v25 = vpop.permute.xlu0 %1243 }
 0x24e   :  { %v738_v59 = vpop.permute.xlu1 %737 }
 0x24f   :  { %575 = vadd.xlane.f32.xlu1 %v574_v42 }
 0x253   :  { %v10313_v43 = vpop.eup %10312 }
 0x254   :  { %v583_v44 = vsel %vm122_vm0, %v10313_v43, 0.0  ;;  %v10315_v45 = vpop.eup %10314 }
 0x255   :  { %584 = vadd.xlane.f32.xlu1 %v583_v44  ;;  %v580_v46 = vsel %vm122_vm0, %v10315_v45, 0.0 }
 0x259   :  { %581 = vadd.xlane.f32.xlu1 %v580_v46 }
 0x26a   :  { %739 = vrot.lane.b32.xlu1 %v11140_v37, %s10882_s28 }
 0x26e   :  { %264 = vperm.xlu1 %10307, %v108_v47  }
 0x272   :  { %1241 = vrot.lane.b32.xlu1 %v11137_v36, %s10883_s4 }
 0x276   :  { %1245 = vrot.lane.b32.xlu1 %v11147_v38, %s10883_s4 }
 0x2d4   :  { %v579_v61 = vpop.xlane.xlu1 %578 }
 0x2d5   :  { %10316 = vrcp.f32 %v579_v61 }
 0x2d8   :  { %v576_v62 = vpop.xlane.xlu1 %575 }
 0x2d9   :  { %10318 = vrcp.f32 %v576_v62 }
 0x2de   :  { %v585_v63 = vpop.xlane.xlu1 %584 }
 0x2df   :  { %10320 = vrcp.f32 %v585_v63 }
 0x2e2   :  { %v10317_v1 = vpop.eup %10316  ;;  %v582_v2 = vpop.xlane.xlu1 %581 }
 0x2e3   :  { %v589_v3 = vmul.f32 %v10317_v1, %v10309_v35  ;;  %10322 = vrcp.f32 %v582_v2 }
 0x2e5   :  { %628 = vst.msk [vmem:[#allocation2 + $0x8] sm:$0xff] %vm122_vm0, %v589_v3 }
 0x2e6   :  { %v10319_v4 = vpop.eup %10318  ;;  %v740_v5 = vpop.permute.xlu1 %739 }
 0x2e7   :  { %v587_v6 = vmul.f32 %v10319_v4, %v10311_v41 }
 0x2e9   :  { %9696 = vmatprep.mubr.msk.f32.mxu0 %vm122_vm0, %v587_v6  ;;  %627 = vst.msk [vmem:[#allocation2] sm:$0xff] %vm122_vm0, %v587_v6 }
 0x2ea   :  { %9697 = vmatmul.mubr.msk.f32.vlgmr.msra.gmra.mxu0 %vm122_vm0, %v589_v3  ;;  %v11243_v7 = vpop.permute.xlu1 %264 }
 0x2eb   :  { %9703 = vmatpush3.msra.mxu0 %v396_v34  ;;  %v401_v8 = vadd.f32 %v11160_v54, %v11243_v7  ;;  %v11259_v54 = vpop.f32.mrf.mxu1 }
 0x2ec   :  { %v10321_v20 = vpop.eup %10320 }
 0x2ed   :  { %9734 = vmatprep.subr.mxu1 %v401_v8  ;;  %v593_v22 = vmul.f32 %v10321_v20, %v10313_v43  ;;  %v9685_v34 = vpop.f32.mrf.mxu1 }
 0x2ee   :  { %9735 = vmatpush3.msra.mxu1 %v401_v8  ;;  %v1242_v24 = vpop.permute.xlu1 %1241 }
 0x2ef   :  { %9737 = vmatmul.mubr.msk.f32.vlgmr.msra.gmra.mxu1 %vm448_vm2, %v1242_v24  ;;  %630 = vst.msk [vmem:[#allocation2 + $0x18] sm:$0xff] %vm122_vm0, %v593_v22 }
 0x2f0   :  { %v10323_v33 = vpop.eup %10322  ;;  %9739 = vmatprep.mubr.msk.f32.mxu1 %vm448_vm2, %v1244_v25 }
 0x2f1   :  { %v591_v35 = vmul.f32 %v10323_v33, %v10315_v45 }
 0x2f2   :  { %v1246_v39 = vpop.permute.xlu1 %1245 }
 0x2f3   :  { %9699 = vmatprep.mubr.msk.f32.mxu0 %vm122_vm0, %v591_v35  ;;  %629 = vst.msk [vmem:[#allocation2 + $0x10] sm:$0xff] %vm122_vm0, %v591_v35  ;;  %9740 = vmatmul.mubr.msk.f32.gmra.mxu1 %vm448_vm2, %v1246_v39 }
 0x2f4   :  { %9700 = vmatmul.mubr.msk.f32.gmra.mxu0 %vm122_vm0, %v593_v22 }
 0x2f5   :  { %9704 = vmatprep.mubr.msk.f32.mxu0 %vm448_vm2, %v736_v58 }
 0x2f8   :  { %9705 = vmatmul.mubr.msk.f32.vlgmr.msra.gmra.mxu0 %vm448_vm2, %v738_v59 }
 0x2f9   :  { %9707 = vmatprep.mubr.msk.f32.mxu0 %vm448_vm2, %v740_v5 }
 0x2fc   :  { %9708 = vmatmul.mubr.msk.f32.gmra.mxu0 %vm448_vm2, %v11211_v26 }
 0x3aa   :  { %v11261_v40 = vpop.f32.mrf.mxu0 }
 0x3ac   :  { %v11263_v41 = vpop.f32.mrf.mxu0 }
 0x3b4   :  { %v11265_v42 = vpop.f32.mrf.mxu0 }
 0x3b6   :  { %v11267_v43 = vpop.f32.mrf.mxu0 }
 0x3b8   :  { %v9706_v44 = vpop.f32.mrf.mxu0 }
 0x3b9   :  { %v837_v45 = vmul.f32 0.35355338, %v9706_v44  ;;  %v9738_v44 = vpop.f32.mrf.mxu1 }
 0x3ba   :  { %v817_v46 = vpop.f32.mrf.mxu0 }
 0x3bb   :  { %v836_v47 = vmul.f32 0.35355338, %v817_v46  ;;  %v843_v49 = vsel %vm122_vm0, %v837_v45, -inf }
 0x3bc   :  { %844 = vmax.xlane.f32.xlu1 %v843_v49  ;;  %v9709_v51 = vpop.f32.mrf.mxu0 }
 0x3bd   :  { %v840_v26 = vsel %vm122_vm0, %v836_v47, -inf  ;;  %v839_v59 = vmul.f32 0.35355338, %v9709_v51 }
 0x3be   :  { %841 = vmax.xlane.f32.xlu0 %v840_v26  ;;  %v827_v55 = vpop.f32.mrf.mxu0 }
 0x3bf   :  { %v838_v58 = vmul.f32 0.35355338, %v827_v55  ;;  %v849_v62 = vsel %vm122_vm0, %v839_v59, -inf }
 0x3c1   :  { %v846_v61 = vsel %vm122_vm0, %v838_v58, -inf }
 0x3c2   :  { %847 = vmax.xlane.f32.xlu0 %v846_v61 }
 0x3c6   :  { %850 = vmax.xlane.f32.xlu0 %v849_v62 }
 0x445   :  { %v845_v63 = vpop.xlane.xlu1 %844 }
 0x446   :  { %v853_v1 = vsub.f32 %v837_v45, %v845_v63 }
 0x447   :  { %v842_v2 = vpop.xlane.xlu0 %841 }
 0x448   :  { %v858_v3 = vmul.f32 1.442695, %v853_v1  ;;  %v852_v4 = vsub.f32 %v836_v47, %v842_v2  ;;  %v1321_v47 = vpop.f32.mrf.mxu1  ;;  %v111_v1 = vld [vmem:[%s13930_s21 + $0x28] sm:$0xff] }
 0x449   :  { %v1340_v51 = vmul.f32 0.35355338, %v1321_v47 }
 0x44a   :  { %10324 = vpow2.f32 %v858_v3  ;;  %v856_v5 = vmul.f32 1.442695, %v852_v4  ;;  %v9741_v55 = vpop.f32.mrf.mxu1 }
 0x44b   :  { %v848_v6 = vpop.xlane.xlu0 %847  ;;  %v1343_v2 = vmul.f32 0.35355338, %v9741_v55 }
 0x44c   :  { %10326 = vpow2.f32 %v856_v5  ;;  %v854_v8 = vsub.f32 %v838_v58, %v848_v6  ;;  %v1341_v58 = vmul.f32 0.35355338, %v9738_v44  ;;  %v1331_v61 = vpop.f32.mrf.mxu1 }
 0x44d   :  { %v1342_v62 = vmul.f32 0.35355338, %v1331_v61  ;;  %v1353_v4 = vsel %vm122_vm0, %v1343_v2, -inf }
 0x44e   :  { %v860_v20 = vmul.f32 1.442695, %v854_v8  ;;  %v1347_v63 = vsel %vm122_vm0, %v1341_v58, -inf }
 0x44f   :  { %v851_v22 = vpop.xlane.xlu0 %850  ;;  %v1350_v3 = vsel %vm122_vm0, %v1342_v62, -inf }
 0x450   :  { %10328 = vpow2.f32 %v860_v20  ;;  %v855_v24 = vsub.f32 %v839_v59, %v851_v22  ;;  %v1344_v59 = vsel %vm122_vm0, %v1340_v51, -inf }
 0x452   :  { %v862_v25 = vmul.f32 1.442695, %v855_v24 }
 0x454   :  { %10330 = vpow2.f32 %v862_v25 }
 0x457   :  { %v10325_v33 = vpop.eup %10324 }
 0x458   :  { %v867_v35 = vsel %vm122_vm0, %v10325_v33, 0.0 }
 0x459   :  { %v10327_v39 = vpop.eup %10326  ;;  %868 = vadd.xlane.f32.xlu0 %v867_v35 }
 0x45a   :  { %v864_v34 = vsel %vm122_vm0, %v10327_v39, 0.0 }
 0x45b   :  { %865 = vadd.xlane.f32.xlu1 %v864_v34 }
 0x45d   :  { %v10329_v45 = vpop.eup %10328 }
 0x45e   :  { %v870_v46 = vsel %vm122_vm0, %v10329_v45, 0.0 }
 0x45f   :  { %871 = vadd.xlane.f32.xlu1 %v870_v46 }
 0x461   :  { %v10331_v49 = vpop.eup %10330 }
 0x462   :  { %v873_v26 = vsel %vm122_vm0, %v10331_v49, 0.0 }
 0x463   :  { %874 = vadd.xlane.f32.xlu0 %v873_v26 }
 0x467   :  { %1345 = vmax.xlane.f32.xlu0 %v1344_v59 }
 0x46b   :  { %1348 = vmax.xlane.f32.xlu0 %v1347_v63 }
 0x46f   :  { %1351 = vmax.xlane.f32.xlu0 %v1350_v3 }
 0x470   :  { %279 = vperm.xlu1 %10307, %v111_v1  }
 0x473   :  { %1354 = vmax.xlane.f32.xlu0 %v1353_v4 }
 0x4e2   :  { %v869_v5 = vpop.xlane.xlu0 %868 }
 0x4e3   :  { %10332 = vrcp.f32 %v869_v5 }
 0x4e4   :  { %v866_v6 = vpop.xlane.xlu1 %865 }
 0x4e5   :  { %10334 = vrcp.f32 %v866_v6 }
 0x4e8   :  { %v872_v8 = vpop.xlane.xlu1 %871 }
 0x4e9   :  { %10336 = vrcp.f32 %v872_v8 }
 0x4ec   :  { %v875_v20 = vpop.xlane.xlu0 %874  ;;  %v11284_v22 = vpop.permute.xlu1 %279 }
 0x4ed   :  { %10338 = vrcp.f32 %v875_v20  ;;  %v416_v24 = vadd.f32 %v11233_v48, %v11284_v22 }
 0x4ef   :  { %9710 = vmatprep.subr.msk.mxu0 %vm122_vm0, %v416_v24 }
 0x4f0   :  { %v1346_v25 = vpop.xlane.xlu0 %1345  ;;  %9711 = vmatpush3.xpose.msk.msra.mxu0 %vm122_vm0, %v416_v24  ;;  %v10333_v35 = vpop.eup %10332 }
 0x4f1   :  { %v1356_v34 = vsub.f32 %v1340_v51, %v1346_v25  ;;  %v11292_v26 = vmul.f32 %v10333_v35, %v10325_v33  ;;  %v112_v25 = vld [vmem:[%s13930_s21 + $0x30] sm:$0xff]  ;;  %v109_v35 = vld [vmem:[%s13930_s21 + $0x18] sm:$0xff] }
 0x4f2   :  { %v10335_v44 = vpop.eup %10334 }
 0x4f3   :  { %v1360_v46 = vmul.f32 1.442695, %v1356_v34  ;;  %v11290_v47 = vmul.f32 %v10335_v44, %v10327_v39  ;;  %v11334_v34 = vld [vmem:[%s13847_s5] sm:$0xff] }
 0x4f4   :  { %v1349_v55 = vpop.xlane.xlu0 %1348 }
 0x4f5   :  { %10340 = vpow2.f32 %v1360_v46  ;;  %v1357_v59 = vsub.f32 %v1341_v58, %v1349_v55  ;;  %9712 = vmatprep.mubr.msk.f32.mxu0 %vm122_vm0, %v11290_v47 }
 0x4f6   :  { %v10337_v48 = vpop.eup %10336  ;;  %9713 = vmatmul.mubr.msk.f32.vlgmr.msra.gmra.mxu0 %vm122_vm0, %v11292_v26 }
 0x4f7   :  { %v1362_v61 = vmul.f32 1.442695, %v1357_v59  ;;  %v11298_v63 = vmul.f32 %v10337_v48, %v10329_v45 }
 0x4f8   :  { %v1352_v51 = vpop.xlane.xlu0 %1351 }
 0x4f9   :  { %10342 = vpow2.f32 %v1362_v61  ;;  %v1358_v1 = vsub.f32 %v1342_v62, %v1352_v51  ;;  %9715 = vmatprep.mubr.msk.f32.mxu0 %vm122_vm0, %v11298_v63 }
 0x4fa   :  { %v10339_v33 = vpop.eup %10338 }
 0x4fb   :  { %v1364_v39 = vmul.f32 1.442695, %v1358_v1  ;;  %v11302_v3 = vmul.f32 %v10339_v33, %v10331_v49 }
 0x4fc   :  { %v1355_v58 = vpop.xlane.xlu0 %1354 }
 0x4fd   :  { %10344 = vpow2.f32 %v1364_v39  ;;  %v1359_v4 = vsub.f32 %v1343_v2, %v1355_v58  ;;  %9716 = vmatmul.mubr.msk.f32.gmra.mxu0 %vm122_vm0, %v11302_v3 }
 0x4ff   :  { %v1366_v5 = vmul.f32 1.442695, %v1359_v4 }
 0x501   :  { %10346 = vpow2.f32 %v1366_v5 }
 0x502   :  { %v10341_v45 = vpop.eup %10340 }
 0x503   :  { %v1368_v6 = vsel %vm122_vm0, %v10341_v45, 0.0 }
 0x504   :  { %1369 = vadd.xlane.f32.xlu1 %v1368_v6 }
 0x506   :  { %v10343_v62 = vpop.eup %10342 }
 0x507   :  { %v1371_v8 = vsel %vm122_vm0, %v10343_v62, 0.0 }
 0x508   :  { %1372 = vadd.xlane.f32.xlu0 %v1371_v8 }
 0x50a   :  { %v10345_v20 = vpop.eup %10344 }
 0x50b   :  { %v1374_v49 = vsel %vm122_vm0, %v10345_v20, 0.0 }
 0x50c   :  { %1375 = vadd.xlane.f32.xlu0 %v1374_v49 }
 0x50e   :  { %v10347_v24 = vpop.eup %10346 }
 0x50f   :  { %v1377_v2 = vsel %vm122_vm0, %v10347_v24, 0.0 }
 0x510   :  { %1378 = vadd.xlane.f32.xlu0 %v1377_v2 }
 0x515   :  { %1650 = vrot.lane.b32.xlu1 %v11119_v23, %s13870_s22  ;;  %v11327_v23 = vld [vmem:[%s13847_s5 + $0x8] sm:$0xff] }
 0x516   :  { %9718 = vmatprep.subr.mxu0 %v11327_v23 }
 0x517   :  { %9719 = vmatpush3.msra.mxu0 %v11327_v23 }
 0x518   :  { %9726 = vmatprep.subr.mxu0 %v11334_v34 }
 0x526   :  { %284 = vperm.xlu0 %10306, %v112_v25  }
 0x52a   :  { %269 = vperm.xlu0 %10306, %v109_v35  }
 0x52e   :  { %1652 = vrot.lane.b32.xlu0 %v11137_v36, %s13870_s22 }
 0x532   :  { %1654 = vrot.lane.b32.xlu0 %v11140_v37, %s13870_s22 }
 0x536   :  { %1656 = vrot.lane.b32.xlu0 %v11147_v38, %s13870_s22 }
 0x58d   :  { %v1370_v38 = vpop.xlane.xlu1 %1369 }
 0x58e   :  { %10348 = vrcp.f32 %v1370_v38 }
 0x591   :  { %v1373_v36 = vpop.xlane.xlu0 %1372 }
 0x592   :  { %10350 = vrcp.f32 %v1373_v36 }
 0x595   :  { %v1376_v37 = vpop.xlane.xlu0 %1375 }
 0x596   :  { %10352 = vrcp.f32 %v1376_v37 }
 0x599   :  { %v1379_v44 = vpop.xlane.xlu0 %1378 }
 0x59a   :  { %10354 = vrcp.f32 %v1379_v44 }
 0x5a1   :  { %v11337_v55 = vpop.permute.xlu0 %284 }
 0x5a2   :  { %v421_v48 = vadd.f32 %v11235_v50, %v11337_v55  ;;  %v10349_v50 = vpop.eup %10348 }
 0x5a3   :  { %v10351_v39 = vpop.eup %10350  ;;  %v11358_v58 = vmul.f32 %v10349_v50, %v10341_v45  ;;  %v1651_v45 = vpop.permute.xlu1 %1650 }
 0x5a4   :  { %v10353_v4 = vpop.eup %10352 }
 0x5a5   :  { %v11347_v1 = vpop.permute.xlu0 %269  ;;  %13933 = vst [vmem:[#allocation9_spill] sm:$0xff] %v11358_v58  ;;  %v11366_v5 = vmul.f32 %v10353_v4, %v10345_v20 }
 0x5a6   :  { %v406_v33 = vadd.f32 %v11171_v57, %v11347_v1  ;;  %v11364_v57 = vmul.f32 %v10351_v39, %v10343_v62  ;;  %v11383_v62 = vld [vmem:[%s13847_s5 + $0x10] sm:$0xff] }
 0x5a7   :  { %13935 = vst [vmem:[#allocation11_spill] sm:$0xff] %v11366_v5  ;;  %9750 = vmatprep.subr.mxu1 %v11383_v62 }
 0x5a8   :  { %13934 = vst [vmem:[#allocation10_spill] sm:$0xff] %v11364_v57  ;;  %9751 = vmatpush3.msra.mxu1 %v11383_v62 }
 0x5b6   :  { %v9714_v46 = vpop.f32.mrf.mxu0 }
 0x5b8   :  { %v1026_v59 = vpop.f32.mrf.mxu0 }
 0x5b9   :  { %9720 = vmatprep.mubr.msk.f32.mxu0 %vm448_vm2, %v1026_v59 }
 0x5ba   :  { %9721 = vmatmul.mubr.msk.f32.vlgmr.msra.gmra.mxu0 %vm448_vm2, %v9714_v46 }
 0x5bb   :  { %9727 = vmatpush3.msra.mxu0 %v11334_v34 }
 0x5bc   :  { %9742 = vmatprep.subr.msk.mxu0 %vm122_vm0, %v421_v48 }
 0x5bd   :  { %v9717_v61 = vpop.f32.mrf.mxu0 }
 0x5bf   :  { %v1036_v51 = vpop.f32.mrf.mxu0 }
 0x5c0   :  { %9723 = vmatprep.mubr.msk.f32.mxu0 %vm448_vm2, %v1036_v51 }
 0x5c1   :  { %9724 = vmatmul.mubr.msk.f32.gmra.mxu0 %vm448_vm2, %v9717_v61 }
 0x5c2   :  { %9728 = vmatprep.mubr.msk.f32.mxu0 %vm448_vm2, %v11263_v41  ;;  %v10355_v41 = vpop.eup %10354 }
 0x5c5   :  { %9729 = vmatmul.mubr.msk.f32.vlgmr.msra.gmra.mxu0 %vm448_vm2, %v11261_v40  ;;  %v1653_v40 = vpop.permute.xlu0 %1652 }
 0x5c6   :  { %9743 = vmatpush3.xpose.msk.msra.mxu0 %vm122_vm0, %v421_v48  ;;  %9731 = vmatprep.mubr.msk.f32.mxu0 %vm448_vm2, %v11267_v43  ;;  %v11372_v43 = vmul.f32 %v10355_v41, %v10347_v24 }
 0x5c7   :  { %9758 = vmatprep.subr.mxu0 %v406_v33 }
 0x5c8   :  { %13936 = vst [vmem:[#allocation12_spill] sm:$0xff] %v11372_v43 }
 0x5c9   :  { %9732 = vmatmul.mubr.msk.f32.gmra.mxu0 %vm448_vm2, %v11265_v42  ;;  %v1655_v42 = vpop.permute.xlu0 %1654 }
 0x5ca   :  { %9744 = vmatprep.mubr.msk.f32.mxu0 %vm122_vm0, %v11358_v58 }
 0x5cd   :  { %9745 = vmatmul.mubr.msk.f32.vlgmr.msra.gmra.mxu0 %vm122_vm0, %v11364_v57  ;;  %v1657_v6 = vpop.permute.xlu0 %1656 }
 0x5ce   :  { %9759 = vmatpush3.msra.mxu0 %v406_v33  ;;  %9747 = vmatprep.mubr.msk.f32.mxu0 %vm122_vm0, %v11366_v5 }
 0x5d1   :  { %9748 = vmatmul.mubr.msk.f32.gmra.mxu0 %vm122_vm0, %v11372_v43 }
 0x5d2   :  { %9760 = vmatprep.mubr.msk.f32.mxu0 %vm448_vm2, %v1651_v45 }
 0x5d5   :  { %9761 = vmatmul.mubr.msk.f32.vlgmr.msra.gmra.mxu0 %vm448_vm2, %v1653_v40 }
 0x5d6   :  { %9763 = vmatprep.mubr.msk.f32.mxu0 %vm448_vm2, %v1655_v42 }
 0x5d9   :  { %9764 = vmatmul.mubr.msk.f32.gmra.mxu0 %vm448_vm2, %v1657_v6 }
 0x67a   :  { %v9722_v8 = vpop.f32.mrf.mxu0 }
 0x67c   :  { %v11387_v20 = vpop.f32.mrf.mxu0 }
 0x681   :  { %v9725_v49 = vpop.f32.mrf.mxu0 }
 0x683   :  { %v11389_v24 = vpop.f32.mrf.mxu0 }
 0x685   :  { %v9730_v2 = vpop.f32.mrf.mxu0 }
 0x686   :  { %v1226_v25 = vadd.f32 %v9730_v2, %v9722_v8 }
 0x687   :  { %v11391_v35 = vpop.f32.mrf.mxu0 }
 0x689   :  { %v9733_v36 = vpop.f32.mrf.mxu0 }
 0x68a   :  { %v1236_v37 = vadd.f32 %v9733_v36, %v9725_v49 }
 0x68b   :  { %v11393_v44 = vpop.f32.mrf.mxu0 }
 0x68d   :  { %v9746_v38 = vpop.f32.mrf.mxu0 }
 0x68f   :  { %v1530_v46 = vpop.f32.mrf.mxu0 }
 0x690   :  { %9752 = vmatprep.mubr.msk.f32.mxu1 %vm448_vm2, %v1530_v46 }
 0x691   :  { %v9749_v59 = vpop.f32.mrf.mxu0  ;;  %9753 = vmatmul.mubr.msk.f32.vlgmr.msra.gmra.mxu1 %vm448_vm2, %v9746_v38 }
 0x693   :  { %v1540_v48 = vpop.f32.mrf.mxu0 }
 0x694   :  { %9755 = vmatprep.mubr.msk.f32.mxu1 %vm448_vm2, %v1540_v48 }
 0x695   :  { %9756 = vmatmul.mubr.msk.f32.gmra.mxu1 %vm448_vm2, %v9749_v59  ;;  %v9762_v61 = vpop.f32.mrf.mxu0 }
 0x696   :  { %v1752_v51 = vmul.f32 0.35355338, %v9762_v61 }
 0x697   :  { %v1732_v50 = vpop.f32.mrf.mxu0 }
 0x698   :  { %v1751_v33 = vmul.f32 0.35355338, %v1732_v50  ;;  %v1758_v39 = vsel %vm122_vm0, %v1752_v51, -inf }
 0x699   :  { %1759 = vmax.xlane.f32.xlu1 %v1758_v39  ;;  %v9765_v4 = vpop.f32.mrf.mxu0 }
 0x69a   :  { %v1755_v41 = vsel %vm122_vm0, %v1751_v33, -inf  ;;  %v1754_v42 = vmul.f32 0.35355338, %v9765_v4 }
 0x69b   :  { %1756 = vmax.xlane.f32.xlu0 %v1755_v41  ;;  %v1742_v40 = vpop.f32.mrf.mxu0 }
 0x69c   :  { %v1753_v45 = vmul.f32 0.35355338, %v1742_v40  ;;  %v1764_v8 = vsel %vm122_vm0, %v1754_v42, -inf }
 0x69e   :  { %v1761_v6 = vsel %vm122_vm0, %v1753_v45, -inf }
 0x69f   :  { %1762 = vmax.xlane.f32.xlu0 %v1761_v6 }
 0x6a3   :  { %1765 = vmax.xlane.f32.xlu0 %v1764_v8 }
 0x722   :  { %v1760_v49 = vpop.xlane.xlu1 %1759 }
 0x723   :  { %v1768_v2 = vsub.f32 %v1752_v51, %v1760_v49 }
 0x724   :  { %v1757_v36 = vpop.xlane.xlu0 %1756 }
 0x725   :  { %v1773_v38 = vmul.f32 1.442695, %v1768_v2  ;;  %v1767_v46 = vsub.f32 %v1751_v33, %v1757_v36 }
 0x727   :  { %10356 = vpow2.f32 %v1773_v38  ;;  %v1771_v59 = vmul.f32 1.442695, %v1767_v46 }
 0x728   :  { %v1763_v48 = vpop.xlane.xlu0 %1762 }
 0x729   :  { %10358 = vpow2.f32 %v1771_v59  ;;  %v1769_v61 = vsub.f32 %v1753_v45, %v1763_v48 }
 0x72b   :  { %v1775_v50 = vmul.f32 1.442695, %v1769_v61 }
 0x72c   :  { %v1766_v39 = vpop.xlane.xlu0 %1765 }
 0x72d   :  { %10360 = vpow2.f32 %v1775_v50  ;;  %v1770_v4 = vsub.f32 %v1754_v42, %v1766_v39  ;;  %v113_v42 = vld [vmem:[%s13930_s21 + $0x38] sm:$0xff] }
 0x72f   :  { %v1777_v41 = vmul.f32 1.442695, %v1770_v4 }
 0x731   :  { %10362 = vpow2.f32 %v1777_v41 }
 0x734   :  { %v10357_v40 = vpop.eup %10356 }
 0x735   :  { %v1782_v6 = vsel %vm122_vm0, %v10357_v40, 0.0 }
 0x736   :  { %v10359_v8 = vpop.eup %10358  ;;  %1783 = vadd.xlane.f32.xlu0 %v1782_v6 }
 0x737   :  { %v1779_v51 = vsel %vm122_vm0, %v10359_v8, 0.0 }
 0x738   :  { %1780 = vadd.xlane.f32.xlu1 %v1779_v51 }
 0x73a   :  { %v10361_v33 = vpop.eup %10360 }
 0x73b   :  { %v1785_v49 = vsel %vm122_vm0, %v10361_v33, 0.0 }
 0x73c   :  { %1786 = vadd.xlane.f32.xlu1 %v1785_v49 }
 0x73e   :  { %v10363_v2 = vpop.eup %10362 }
 0x73f   :  { %v1788_v45 = vsel %vm122_vm0, %v10363_v2, 0.0 }
 0x740   :  { %1789 = vadd.xlane.f32.xlu0 %v1788_v45 }
 0x74d   :  { %289 = vperm.xlu1 %10307, %v113_v42  }
 0x751   :  { %v9754_v36 = vpop.f32.mrf.mxu1 }
 0x752   :  { %v11410_v38 = vadd.f32 %v9754_v36, %v1226_v25 }
 0x753   :  { %v11412_v46 = vpop.f32.mrf.mxu1 }
 0x755   :  { %v9757_v59 = vpop.f32.mrf.mxu1 }
 0x756   :  { %v11414_v48 = vadd.f32 %v9757_v59, %v1236_v37 }
 0x7bf   :  { %v1784_v61 = vpop.xlane.xlu0 %1783 }
 0x7c0   :  { %10364 = vrcp.f32 %v1784_v61 }
 0x7c1   :  { %v1781_v50 = vpop.xlane.xlu1 %1780 }
 0x7c2   :  { %10366 = vrcp.f32 %v1781_v50 }
 0x7c5   :  { %v1787_v39 = vpop.xlane.xlu1 %1786 }
 0x7c6   :  { %10368 = vrcp.f32 %v1787_v39 }
 0x7c9   :  { %v11416_v4 = vpop.permute.xlu1 %289  ;;  %v1790_v41 = vpop.xlane.xlu0 %1789 }
 0x7ca   :  { %v426_v6 = vadd.f32 %v11237_v52, %v11416_v4  ;;  %10370 = vrcp.f32 %v1790_v41 }
 0x7cc   :  { %9766 = vmatprep.subr.msk.mxu1 %vm122_vm0, %v426_v6 }
 0x7cd   :  { %9767 = vmatpush3.xpose.msk.msra.mxu1 %vm122_vm0, %v426_v6  ;;  %v10365_v25 = vpop.eup %10364 }
 0x7ce   :  { %9782 = vmatprep.subr.mxu1 %v13868_v10  ;;  %v11425_v49 = vmul.f32 %v10365_v25, %v10357_v40 }
 0x7cf   :  { %v10367_v37 = vpop.eup %10366 }
 0x7d0   :  { %v11423_v51 = vmul.f32 %v10367_v37, %v10359_v8  ;;  %13938 = vst [vmem:[#allocation14_spill] sm:$0xff] %v11425_v49 }
 0x7d2   :  { %13937 = vst [vmem:[#allocation13_spill] sm:$0xff] %v11423_v51  ;;  %9768 = vmatprep.mubr.msk.f32.mxu1 %vm122_vm0, %v11423_v51 }
 0x7d3   :  { %v10369_v45 = vpop.eup %10368  ;;  %9769 = vmatmul.mubr.msk.f32.vlgmr.msra.gmra.mxu1 %vm122_vm0, %v11425_v49 }
 0x7d4   :  { %9783 = vmatpush3.xpose.msk.msra.mxu1 %vm122_vm0, %v11060_v14  ;;  %v11433_v52 = vmul.f32 %v10369_v45, %v10361_v33 }
 0x7d5   :  { %9784 = vmatprep.subr.mxu1 %v13868_v10 }
 0x7d6   :  { %13939 = vst [vmem:[#allocation15_spill] sm:$0xff] %v11433_v52  ;;  %9771 = vmatprep.mubr.msk.f32.mxu1 %vm122_vm0, %v11433_v52 }
 0x7d7   :  { %v10371_v8 = vpop.eup %10370 }
 0x7d8   :  { %9785 = vmatpush3.xpose.msk.msra.mxu1 %vm122_vm0, %v11050_v13  ;;  %v11440_v40 = vmul.f32 %v10371_v8, %v10363_v2 }
 0x7d9   :  { %9786 = vmatprep.subr.mxu1 %v13868_v10 }
 0x7da   :  { %13940 = vst [vmem:[#allocation16_spill] sm:$0xff] %v11440_v40  ;;  %9772 = vmatmul.mubr.msk.f32.gmra.mxu1 %vm122_vm0, %v11440_v40 }
 0x7db   :  { %9790 = vmatprep.mubr.msk.f32.mxu1 %vm10881_vm1, %v13868_v10 }
 0x7dc   :  { %9787 = vmatpush3.xpose.msk.msra.mxu1 %vm122_vm0, %v11044_v12  ;;  %v11493_v12 = vpop.f32.mrf.mxu1 }
 0x7dd   :  { %9788 = vmatprep.subr.mxu1 %v13868_v10 }
 0x7e0   :  { %9789 = vmatpush3.xpose.msk.msra.mxu1 %vm122_vm0, %v11035_v11  ;;  %v11489_v11 = vld [vmem:[%s13847_s5 + $0x18] sm:$0xff] }
 0x7e1   :  { %9774 = vmatprep.subr.mxu0 %v11489_v11 }
 0x7e2   :  { %9775 = vmatpush3.msra.mxu0 %v11489_v11 }
 0x7e3   :  { %9791 = vmatmul.mubr.msk.f32.vlgmr.msra.gmra.mxu1 %vm122_vm0, %v11071_v15 }
 0x7e4   :  { %9793 = vmatprep.mubr.msk.f32.mxu1 %vm10881_vm1, %v13868_v10 }
 0x7e7   :  { %9794 = vmatmul.mubr.msk.f32.gmra.mxu1 %vm122_vm0, %v11080_v16 }
 0x7e8   :  { %9796 = vmatprep.mubr.msk.f32.mxu1 %vm10881_vm1, %v13868_v10 }
 0x7eb   :  { %9797 = vmatmul.mubr.msk.f32.gmra.mxu1 %vm122_vm0, %v11089_v17  ;;  %v11499_v17 = vadd.f32 %v11116_v21, %v11126_v28 }
 0x7ec   :  { %9799 = vmatprep.mubr.msk.f32.mxu1 %vm10881_vm1, %v13868_v10 }
 0x7ef   :  { %9800 = vmatmul.mubr.msk.f32.gmra.mxu1 %vm122_vm0, %v11098_v18 }
 0x7f0   :  { %9802 = vmatprep.mubr.msk.f32.mxu1 %vm10881_vm1, %v13868_v10 }
 0x7f3   :  { %9803 = vmatmul.mubr.msk.f32.gmra.mxu1 %vm122_vm0, %v11107_v19 }
 0x7f4   :  { %9805 = vmatprep.mubr.msk.f32.mxu1 %vm10881_vm1, %v13868_v10 }
 0x7f7   :  { %9806 = vmatmul.mubr.msk.f32.gmra.mxu1 %vm122_vm0, %v11158_v53 }
 0x7f8   :  { %9808 = vmatprep.mubr.msk.f32.mxu1 %vm10881_vm1, %v13868_v10 }
 0x7fb   :  { %9809 = vmatmul.mubr.msk.f32.gmra.mxu1 %vm122_vm0, %v11169_v56  ;;  %v11508_v56 = vadd.f32 %v11116_v21, %v11131_v31 }
 0x7fc   :  { %9811 = vmatprep.mubr.msk.f32.mxu1 %vm10881_vm1, %v13868_v10 }
 0x7ff   :  { %9812 = vmatmul.mubr.msk.f32.gmra.mxu1 %vm122_vm0, %v11183_v60 }
 0x800   :  { %9814 = vmatprep.mubr.msk.f32.mxu1 %vm10881_vm1, %v13868_v10 }
 0x803   :  { %9815 = vmatmul.mubr.msk.f32.gmra.mxu1 %vm122_vm0, %v11195_v0 }
 0x893   :  { %v9770_v13 = vpop.f32.mrf.mxu1 }
 0x895   :  { %v1941_v14 = vpop.f32.mrf.mxu1 }
 0x896   :  { %9776 = vmatprep.mubr.msk.f32.mxu0 %vm448_vm2, %v1941_v14 }
 0x897   :  { %9777 = vmatmul.mubr.msk.f32.vlgmr.msra.gmra.mxu0 %vm448_vm2, %v9770_v13 }
 0x89a   :  { %v9773_v15 = vpop.f32.mrf.mxu1 }
 0x89c   :  { %v1951_v16 = vpop.f32.mrf.mxu1 }
 0x89d   :  { %9779 = vmatprep.mubr.msk.f32.mxu0 %vm448_vm2, %v1951_v16 }
 0x89e   :  { %9780 = vmatmul.mubr.msk.f32.gmra.mxu0 %vm448_vm2, %v9773_v15 }
 0x89f   :  { %9819 = vmatprep.mubr.msk.f32.mxu0 %vm448_vm2, %v11499_v17 }
 0x8a3   :  { %v2127_v18 = vpop.f32.mrf.mxu1 }
 0x8a4   :  { %v2128_v19 = vadd.f32 %v2127_v18, %v11133_v32 }
 0x8a5   :  { %v9792_v53 = vpop.f32.mrf.mxu1 }
 0x8a6   :  { %9817 = vmatprep.subr.mxu0 %v2128_v19 }
 0x8a7   :  { %v2132_v60 = vpop.f32.mrf.mxu1  ;;  %9818 = vmatpush3.msra.mxu0 %v2128_v19 }
 0x8a8   :  { %9820 = vmatmul.mubr.msk.f32.vlgmr.msra.gmra.mxu0 %vm448_vm2, %v11124_v27  ;;  %v11522_v59 = vadd.f32 %v2132_v60, %v11209_v9 }
 0x8a9   :  { %v9795_v28 = vpop.f32.mrf.mxu1  ;;  %9822 = vmatprep.mubr.msk.f32.mxu0 %vm448_vm2, %v11508_v56 }
 0x8ab   :  { %v2137_v0 = vpop.f32.mrf.mxu1 }
 0x8ac   :  { %v2138_v33 = vadd.f32 %v2137_v0, %v11243_v7  ;;  %9823 = vmatmul.mubr.msk.f32.gmra.mxu0 %vm448_vm2, %v11129_v30 }
 0x8ad   :  { %v9798_v32 = vpop.f32.mrf.mxu1 }
 0x8ae   :  { %9865 = vmatprep.subr.mxu1 %v2138_v33 }
 0x8af   :  { %v11517_v2 = vpop.f32.mrf.mxu1  ;;  %9866 = vmatpush3.msra.mxu1 %v2138_v33 }
 0x8b0   :  { %9881 = vmatprep.subr.mxu1 %v11383_v62 }
 0x8b1   :  { %v9801_v21 = vpop.f32.mrf.mxu1 }
 0x8b3   :  { %v2147_v31 = vpop.f32.mrf.mxu1 }
 0x8b4   :  { %v2148_v42 = vadd.f32 %v2147_v31, %v11213_v29 }
 0x8b5   :  { %v9804_v36 = vpop.f32.mrf.mxu1 }
 0x8b6   :  { %9825 = vmatprep.subr.msk.mxu0 %vm122_vm0, %v2148_v42 }
 0x8b7   :  { %v11525_v7 = vpop.f32.mrf.mxu1  ;;  %9826 = vmatpush3.xpose.msk.msra.mxu0 %vm122_vm0, %v2148_v42 }
 0x8b8   :  { %9833 = vmatprep.subr.mxu0 %v11522_v59 }
 0x8b9   :  { %v9807_v61 = vpop.f32.mrf.mxu1 }
 0x8bb   :  { %v11529_v50 = vpop.f32.mrf.mxu1 }
 0x8bd   :  { %v9810_v39 = vpop.f32.mrf.mxu1 }
 0x8bf   :  { %v11531_v41 = vpop.f32.mrf.mxu1 }
 0x8c1   :  { %v9813_v6 = vpop.f32.mrf.mxu1 }
 0x957   :  { %v9778_v29 = vpop.f32.mrf.mxu0 }
 0x958   :  { %v11534_v25 = vadd.f32 %v9778_v29, %v11410_v38 }
 0x959   :  { %v11536_v9 = vpop.f32.mrf.mxu0 }
 0x95e   :  { %v9781_v37 = vpop.f32.mrf.mxu0 }
 0x95f   :  { %v11539_v45 = vadd.f32 %v9781_v37, %v11414_v48 }
 0x960   :  { %v11541_v8 = vpop.f32.mrf.mxu0 }
 0x968   :  { %v9821_v13 = vpop.f32.mrf.mxu0 }
 0x969   :  { %v2283_v14 = vmul.f32 0.35355338, %v9821_v13 }
 0x96a   :  { %v2263_v15 = vpop.f32.mrf.mxu0 }
 0x96b   :  { %v2282_v16 = vmul.f32 0.35355338, %v2263_v15  ;;  %v2289_v18 = vsel %vm122_vm0, %v2283_v14, -inf }
 0x96c   :  { %2290 = vmax.xlane.f32.xlu0 %v2289_v18  ;;  %v9824_v19 = vpop.f32.mrf.mxu0 }
 0x96d   :  { %v2286_v38 = vsel %vm122_vm0, %v2282_v16, -inf  ;;  %v2285_v28 = vmul.f32 0.35355338, %v9824_v19 }
 0x96e   :  { %v2273_v53 = vpop.f32.mrf.mxu0 }
 0x96f   :  { %v2284_v60 = vmul.f32 0.35355338, %v2273_v53  ;;  %v2295_v48 = vsel %vm122_vm0, %v2285_v28, -inf }
 0x970   :  { %2287 = vmax.xlane.f32.xlu0 %v2286_v38 }
 0x971   :  { %v2292_v0 = vsel %vm122_vm0, %v2284_v60, -inf }
 0x974   :  { %2293 = vmax.xlane.f32.xlu0 %v2292_v0 }
 0x978   :  { %2296 = vmax.xlane.f32.xlu0 %v2295_v48 }
 0x9f5   :  { %v2291_v33 = vpop.xlane.xlu0 %2290 }
 0x9f6   :  { %v2299_v32 = vsub.f32 %v2283_v14, %v2291_v33 }
 0x9f8   :  { %v2304_v21 = vmul.f32 1.442695, %v2299_v32 }
 0x9f9   :  { %v2288_v31 = vpop.xlane.xlu0 %2287 }
 0x9fa   :  { %10372 = vpow2.f32 %v2304_v21  ;;  %v2298_v42 = vsub.f32 %v2282_v16, %v2288_v31 }
 0x9fc   :  { %v2302_v36 = vmul.f32 1.442695, %v2298_v42 }
 0x9fd   :  { %v2294_v61 = vpop.xlane.xlu0 %2293 }
 0x9fe   :  { %10374 = vpow2.f32 %v2302_v36  ;;  %v2300_v39 = vsub.f32 %v2284_v60, %v2294_v61  ;;  %v2153_v61 = vadd.f32 %v11525_v7, %v11284_v22  ;;  %v11583_v7 = vadd.f32 %v11531_v41, %v11416_v4 }
 0xa00   :  { %v2306_v37 = vmul.f32 1.442695, %v2300_v39 }
 0xa01   :  { %v2297_v6 = vpop.xlane.xlu0 %2296 }
 0xa02   :  { %v2301_v29 = vsub.f32 %v2285_v28, %v2297_v6 }
 0xa04   :  { %v2308_v13 = vmul.f32 1.442695, %v2301_v29 }
 0xa06   :  { %10376 = vpow2.f32 %v2308_v13 }
 0xa07   :  { %v10373_v15 = vpop.eup %10372  ;;  %10378 = vpow2.f32 %v2306_v37 }
 0xa08   :  { %v2313_v18 = vsel %vm122_vm0, %v10373_v15, 0.0 }
 0xa09   :  { %2314 = vadd.xlane.f32.xlu0 %v2313_v18 }
 0xa0b   :  { %v10375_v19 = vpop.eup %10374 }
 0xa0c   :  { %v2310_v14 = vsel %vm122_vm0, %v10375_v19, 0.0 }
 0xa0d   :  { %2311 = vadd.xlane.f32.xlu1 %v2310_v14 }
 0xa13   :  { %v10377_v53 = vpop.eup %10376 }
 0xa14   :  { %v2319_v16 = vsel %vm122_vm0, %v10377_v53, 0.0  ;;  %v10379_v38 = vpop.eup %10378 }
 0xa15   :  { %2320 = vadd.xlane.f32.xlu0 %v2319_v16  ;;  %v2316_v60 = vsel %vm122_vm0, %v10379_v38, 0.0 }
 0xa19   :  { %2317 = vadd.xlane.f32.xlu0 %v2316_v60 }
 0xa1e   :  { %2473 = vrot.lane.b32.xlu1 %v11508_v56, %s10882_s28 }
 0xa22   :  { %2978 = vrot.lane.b32.xlu1 %v11129_v30, %s10883_s4 }
 0xa2f   :  { %2469 = vrot.lane.b32.xlu0 %v11499_v17, %s10882_s28 }
 0xa33   :  { %2471 = vrot.lane.b32.xlu0 %v11124_v27, %s10882_s28 }
 0xa37   :  { %2475 = vrot.lane.b32.xlu0 %v11129_v30, %s10882_s28 }
 0xa3b   :  { %2972 = vrot.lane.b32.xlu0 %v11499_v17, %s10883_s4 }
 0xa3f   :  { %2974 = vrot.lane.b32.xlu0 %v11124_v27, %s10883_s4 }
 0xa43   :  { %2976 = vrot.lane.b32.xlu0 %v11508_v56, %s10883_s4 }
 0xa92   :  { %v2315_v28 = vpop.xlane.xlu0 %2314 }
 0xa93   :  { %10380 = vrcp.f32 %v2315_v28 }
 0xa96   :  { %v2312_v0 = vpop.xlane.xlu1 %2311 }
 0xa97   :  { %10382 = vrcp.f32 %v2312_v0 }
 0xa9a   :  { %v2474_v22 = vpop.permute.xlu1 %2473 }
 0xa9e   :  { %v2321_v48 = vpop.xlane.xlu0 %2320  ;;  %v2979_v14 = vpop.permute.xlu1 %2978 }
 0xa9f   :  { %10384 = vrcp.f32 %v2321_v48 }
 0xaa0   :  { %v10381_v33 = vpop.eup %10380 }
 0xaa1   :  { %v2325_v32 = vmul.f32 %v10381_v33, %v10373_v15 }
 0xaa2   :  { %v2318_v21 = vpop.xlane.xlu0 %2317 }
 0xaa3   :  { %2361 = vst.msk [vmem:[#allocation2 + $0x48] sm:$0xff] %vm122_vm0, %v2325_v32  ;;  %10386 = vrcp.f32 %v2318_v21 }
 0xaa4   :  { %v10383_v31 = vpop.eup %10382 }
 0xaa5   :  { %v2323_v42 = vmul.f32 %v10383_v31, %v10375_v19 }
 0xaa6   :  { %v2470_v36 = vpop.permute.xlu0 %2469 }
 0xaa7   :  { %9827 = vmatprep.mubr.msk.f32.mxu0 %vm122_vm0, %v2323_v42  ;;  %2360 = vst.msk [vmem:[#allocation2 + $0x40] sm:$0xff] %vm122_vm0, %v2323_v42 }
 0xaa8   :  { %9828 = vmatmul.mubr.msk.f32.vlgmr.msra.gmra.mxu0 %vm122_vm0, %v2325_v32 }
 0xaa9   :  { %9834 = vmatpush3.msra.mxu0 %v11522_v59 }
 0xaaa   :  { %9841 = vmatprep.subr.msk.mxu0 %vm122_vm0, %v2153_v61  ;;  %v2472_v39 = vpop.permute.xlu0 %2471 }
 0xaac   :  { %v10385_v6 = vpop.eup %10384 }
 0xaad   :  { %v2329_v29 = vmul.f32 %v10385_v6, %v10377_v53 }
 0xaae   :  { %v2476_v37 = vpop.permute.xlu0 %2475 }
 0xaaf   :  { %2363 = vst.msk [vmem:[#allocation2 + $0x58] sm:$0xff] %vm122_vm0, %v2329_v29 }
 0xab0   :  { %v10387_v13 = vpop.eup %10386 }
 0xab1   :  { %v2327_v15 = vmul.f32 %v10387_v13, %v10379_v38 }
 0xab2   :  { %v2973_v18 = vpop.permute.xlu0 %2972 }
 0xab3   :  { %9830 = vmatprep.mubr.msk.f32.mxu0 %vm122_vm0, %v2327_v15  ;;  %2362 = vst.msk [vmem:[#allocation2 + $0x50] sm:$0xff] %vm122_vm0, %v2327_v15  ;;  %9867 = vmatprep.mubr.msk.f32.mxu1 %vm448_vm2, %v2973_v18 }
 0xab4   :  { %9831 = vmatmul.mubr.msk.f32.gmra.mxu0 %vm122_vm0, %v2329_v29 }
 0xab5   :  { %9835 = vmatprep.mubr.msk.f32.mxu0 %vm448_vm2, %v2470_v36 }
 0xab6   :  { %v2975_v59 = vpop.permute.xlu0 %2974 }
 0xab7   :  { %9868 = vmatmul.mubr.msk.f32.vlgmr.msra.gmra.mxu1 %vm448_vm2, %v2975_v59 }
 0xab8   :  { %9882 = vmatpush3.msra.mxu1 %v11383_v62  ;;  %9836 = vmatmul.mubr.msk.f32.vlgmr.msra.gmra.mxu0 %vm448_vm2, %v2472_v39  ;;  %v11596_v62 = vpop.f32.mrf.mxu1 }
 0xab9   :  { %9842 = vmatpush3.xpose.msk.msra.mxu0 %vm122_vm0, %v2153_v61  ;;  %9897 = vmatprep.subr.msk.mxu1 %vm122_vm0, %v11583_v7  ;;  %13941 = vst [vmem:[#allocation17_spill] sm:$0xff] %v11596_v62 }
 0xaba   :  { %9838 = vmatprep.mubr.msk.f32.mxu0 %vm448_vm2, %v2474_v22  ;;  %v2977_v19 = vpop.permute.xlu0 %2976  ;;  %9849 = vmatprep.subr.mxu0 %v11327_v23  ;;  %v9816_v4 = vpop.f32.mrf.mxu1 }
 0xabb   :  { %9870 = vmatprep.mubr.msk.f32.mxu1 %vm448_vm2, %v2977_v19 }
 0xabc   :  { %9839 = vmatmul.mubr.msk.f32.gmra.mxu0 %vm448_vm2, %v2476_v37  ;;  %9871 = vmatmul.mubr.msk.f32.gmra.mxu1 %vm448_vm2, %v2979_v14 }
 0xb68   :  { %v11598_v41 = vpop.f32.mrf.mxu0 }
 0xb6a   :  { %v11600_v53 = vpop.f32.mrf.mxu0 }
 0xb74   :  { %v11602_v16 = vpop.f32.mrf.mxu0 }
 0xb76   :  { %v11604_v38 = vpop.f32.mrf.mxu0 }
 0xb78   :  { %v9837_v60 = vpop.f32.mrf.mxu0 }
 0xb79   :  { %v2571_v28 = vmul.f32 0.35355338, %v9837_v60 }
 0xb7a   :  { %v2551_v0 = vpop.f32.mrf.mxu0 }
 0xb7b   :  { %v2570_v48 = vmul.f32 0.35355338, %v2551_v0  ;;  %v2577_v33 = vsel %vm122_vm0, %v2571_v28, -inf  ;;  %v9869_v0 = vpop.f32.mrf.mxu1 }
 0xb7c   :  { %2578 = vmax.xlane.f32.xlu1 %v2577_v33  ;;  %v9840_v32 = vpop.f32.mrf.mxu0 }
 0xb7d   :  { %v2574_v21 = vsel %vm122_vm0, %v2570_v48, -inf  ;;  %v2573_v36 = vmul.f32 0.35355338, %v9840_v32  ;;  %v3054_v32 = vpop.f32.mrf.mxu1 }
 0xb7e   :  { %2575 = vmax.xlane.f32.xlu0 %v2574_v21  ;;  %v2561_v31 = vpop.f32.mrf.mxu0 }
 0xb7f   :  { %v2572_v42 = vmul.f32 0.35355338, %v2561_v31  ;;  %v2583_v39 = vsel %vm122_vm0, %v2573_v36, -inf  ;;  %v9872_v31 = vpop.f32.mrf.mxu1 }
 0xb81   :  { %v2580_v61 = vsel %vm122_vm0, %v2572_v42, -inf }
 0xb82   :  { %2581 = vmax.xlane.f32.xlu0 %v2580_v61 }
 0xb86   :  { %2584 = vmax.xlane.f32.xlu0 %v2583_v39  ;;  %v3073_v39 = vmul.f32 0.35355338, %v3054_v32 }
 0xc05   :  { %v2579_v6 = vpop.xlane.xlu1 %2578 }
 0xc06   :  { %v2587_v29 = vsub.f32 %v2571_v28, %v2579_v6  ;;  %v3064_v6 = vpop.f32.mrf.mxu1 }
 0xc07   :  { %v2576_v37 = vpop.xlane.xlu0 %2575 }
 0xc08   :  { %v2592_v13 = vmul.f32 1.442695, %v2587_v29  ;;  %v2586_v15 = vsub.f32 %v2570_v48, %v2576_v37  ;;  %v3074_v29 = vmul.f32 0.35355338, %v9869_v0  ;;  %v3075_v37 = vmul.f32 0.35355338, %v3064_v6 }
 0xc0a   :  { %10388 = vpow2.f32 %v2592_v13  ;;  %v2590_v18 = vmul.f32 1.442695, %v2586_v15  ;;  %v3077_v13 = vsel %vm122_vm0, %v3073_v39, -inf }
 0xc0b   :  { %v2582_v22 = vpop.xlane.xlu0 %2581 }
 0xc0c   :  { %10390 = vpow2.f32 %v2590_v18  ;;  %v2588_v59 = vsub.f32 %v2572_v42, %v2582_v22  ;;  %v3076_v18 = vmul.f32 0.35355338, %v9872_v31  ;;  %v3083_v22 = vsel %vm122_vm0, %v3075_v37, -inf }
 0xc0e   :  { %v2594_v19 = vmul.f32 1.442695, %v2588_v59  ;;  %v3080_v59 = vsel %vm122_vm0, %v3074_v29, -inf }
 0xc0f   :  { %v2585_v14 = vpop.xlane.xlu0 %2584 }
 0xc10   :  { %10392 = vpow2.f32 %v2594_v19  ;;  %v2589_v4 = vsub.f32 %v2573_v36, %v2585_v14  ;;  %v3086_v19 = vsel %vm122_vm0, %v3076_v18, -inf }
 0xc12   :  { %v2596_v60 = vmul.f32 1.442695, %v2589_v4 }
 0xc14   :  { %10394 = vpow2.f32 %v2596_v60 }
 0xc17   :  { %v10389_v33 = vpop.eup %10388 }
 0xc18   :  { %v2601_v21 = vsel %vm122_vm0, %v10389_v33, 0.0 }
 0xc19   :  { %v10391_v28 = vpop.eup %10390  ;;  %2602 = vadd.xlane.f32.xlu0 %v2601_v21 }
 0xc1a   :  { %v2598_v48 = vsel %vm122_vm0, %v10391_v28, 0.0 }
 0xc1b   :  { %2599 = vadd.xlane.f32.xlu1 %v2598_v48 }
 0xc1d   :  { %v10393_v61 = vpop.eup %10392 }
 0xc1e   :  { %v2604_v42 = vsel %vm122_vm0, %v10393_v61, 0.0 }
 0xc1f   :  { %2605 = vadd.xlane.f32.xlu1 %v2604_v42 }
 0xc21   :  { %v10395_v36 = vpop.eup %10394 }
 0xc22   :  { %v2607_v15 = vsel %vm122_vm0, %v10395_v36, 0.0 }
 0xc23   :  { %3078 = vmax.xlane.f32.xlu1 %v3077_v13  ;;  %2608 = vadd.xlane.f32.xlu0 %v2607_v15 }
 0xc27   :  { %3084 = vmax.xlane.f32.xlu1 %v3083_v22  ;;  %3081 = vmax.xlane.f32.xlu0 %v3080_v59 }
 0xc2b   :  { %3087 = vmax.xlane.f32.xlu0 %v3086_v19 }
 0xca2   :  { %v2603_v14 = vpop.xlane.xlu0 %2602 }
 0xca3   :  { %10396 = vrcp.f32 %v2603_v14 }
 0xca4   :  { %v2600_v4 = vpop.xlane.xlu1 %2599 }
 0xca5   :  { %10398 = vrcp.f32 %v2600_v4 }
 0xca8   :  { %v2606_v60 = vpop.xlane.xlu1 %2605 }
 0xca9   :  { %10400 = vrcp.f32 %v2606_v60 }
 0xcac   :  { %v3079_v0 = vpop.xlane.xlu1 %3078  ;;  %v2609_v32 = vpop.xlane.xlu0 %2608 }
 0xcad   :  { %v3089_v21 = vsub.f32 %v3073_v39, %v3079_v0  ;;  %10402 = vrcp.f32 %v2609_v32 }
 0xcaf   :  { %v3093_v48 = vmul.f32 1.442695, %v3089_v21 }
 0xcb0   :  { %v3085_v31 = vpop.xlane.xlu1 %3084  ;;  %v3082_v42 = vpop.xlane.xlu0 %3081 }
 0xcb1   :  { %v10397_v6 = vpop.eup %10396  ;;  %10404 = vpow2.f32 %v3093_v48  ;;  %v3091_v13 = vsub.f32 %v3075_v37, %v3085_v31  ;;  %v3090_v15 = vsub.f32 %v3074_v29, %v3082_v42 }
 0xcb2   :  { %v10399_v22 = vpop.eup %10398  ;;  %v11620_v14 = vmul.f32 %v10397_v6, %v10389_v33 }
 0xcb3   :  { %v3097_v59 = vmul.f32 1.442695, %v3091_v13  ;;  %v3095_v19 = vmul.f32 1.442695, %v3090_v15  ;;  %v11618_v10 = vmul.f32 %v10399_v22, %v10391_v28 }
 0xcb4   :  { %13943 = vst [vmem:[#allocation19_spill] sm:$0xff] %v11620_v14  ;;  %v3088_v4 = vpop.xlane.xlu0 %3087 }
 0xcb5   :  { %13942 = vst [vmem:[#allocation18_spill] sm:$0xff] %v11618_v10  ;;  %10406 = vpow2.f32 %v3097_v59  ;;  %v3092_v60 = vsub.f32 %v3076_v18, %v3088_v4  ;;  %9843 = vmatprep.mubr.msk.f32.mxu0 %vm122_vm0, %v11618_v10 }
 0xcb6   :  { %v10401_v39 = vpop.eup %10400  ;;  %10408 = vpow2.f32 %v3095_v19  ;;  %9844 = vmatmul.mubr.msk.f32.vlgmr.msra.gmra.mxu0 %vm122_vm0, %v11620_v14 }
 0xcb7   :  { %v3099_v37 = vmul.f32 1.442695, %v3092_v60  ;;  %v11626_v29 = vmul.f32 %v10401_v39, %v10393_v61  ;;  %9850 = vmatpush3.msra.mxu0 %v11327_v23 }
 0xcb8   :  { %9857 = vmatprep.subr.mxu0 %v11334_v34 }
 0xcb9   :  { %13944 = vst [vmem:[#allocation20_spill] sm:$0xff] %v11626_v29  ;;  %10410 = vpow2.f32 %v3099_v37  ;;  %9846 = vmatprep.mubr.msk.f32.mxu0 %vm122_vm0, %v11626_v29 }
 0xcba   :  { %v10403_v33 = vpop.eup %10402 }
 0xcbb   :  { %v11632_v28 = vmul.f32 %v10403_v33, %v10395_v36 }
 0xcbd   :  { %13945 = vst [vmem:[#allocation21_spill] sm:$0xff] %v11632_v28  ;;  %9847 = vmatmul.mubr.msk.f32.gmra.mxu0 %vm122_vm0, %v11632_v28 }
 0xcbe   :  { %v10405_v18 = vpop.eup %10404 }
 0xcbf   :  { %v3101_v0 = vsel %vm122_vm0, %v10405_v18, 0.0 }
 0xcc0   :  { %3102 = vadd.xlane.f32.xlu1 %v3101_v0 }
 0xcc2   :  { %v10407_v61 = vpop.eup %10406 }
 0xcc3   :  { %v10409_v32 = vpop.eup %10408  ;;  %v3107_v23 = vsel %vm122_vm0, %v10407_v61, 0.0 }
 0xcc4   :  { %3108 = vadd.xlane.f32.xlu1 %v3107_v23  ;;  %v3104_v21 = vsel %vm122_vm0, %v10409_v32, 0.0 }
 0xcc5   :  { %3105 = vadd.xlane.f32.xlu0 %v3104_v21 }
 0xcc6   :  { %v10411_v48 = vpop.eup %10410 }
 0xcc7   :  { %v3110_v31 = vsel %vm122_vm0, %v10411_v48, 0.0 }
 0xcc9   :  { %3111 = vadd.xlane.f32.xlu0 %v3110_v31 }
 0xcd5   :  { %3382 = vrot.lane.b32.xlu1 %v11499_v17, %s13870_s22  ;;  %v2158_v17 = vadd.f32 %v11529_v50, %v11337_v55  ;;  %v2143_v50 = vadd.f32 %v11517_v2, %v11347_v1 }
 0xcd9   :  { %3386 = vrot.lane.b32.xlu1 %v11508_v56, %s13870_s22 }
 0xcdd   :  { %3388 = vrot.lane.b32.xlu1 %v11129_v30, %s13870_s22 }
 0xcdf   :  { %3384 = vrot.lane.b32.xlu0 %v11124_v27, %s13870_s22 }
 0xd49   :  { %v3103_v36 = vpop.xlane.xlu1 %3102 }
 0xd4a   :  { %10412 = vrcp.f32 %v3103_v36 }
 0xd4d   :  { %v3109_v15 = vpop.xlane.xlu1 %3108 }
 0xd4e   :  { %v3106_v42 = vpop.xlane.xlu0 %3105 }
 0xd4f   :  { %10414 = vrcp.f32 %v3106_v42 }
 0xd50   :  { %10416 = vrcp.f32 %v3109_v15 }
 0xd52   :  { %v3112_v30 = vpop.xlane.xlu0 %3111 }
 0xd53   :  { %10418 = vrcp.f32 %v3112_v30 }
 0xd56   :  { %v3385_v19 = vpop.permute.xlu0 %3384 }
 0xd57   :  { %v10413_v55 = vpop.eup %10412 }
 0xd58   :  { %v11665_v22 = vmul.f32 %v10413_v55, %v10405_v18 }
 0xd5a   :  { %13946 = vst [vmem:[#allocation22_spill] sm:$0xff] %v11665_v22 }
 0xd76   :  { %v9845_v6 = vpop.f32.mrf.mxu0 }
 0xd78   :  { %v2759_v13 = vpop.f32.mrf.mxu0 }
 0xd79   :  { %9851 = vmatprep.mubr.msk.f32.mxu0 %vm448_vm2, %v2759_v13 }
 0xd7a   :  { %9852 = vmatmul.mubr.msk.f32.vlgmr.msra.gmra.mxu0 %vm448_vm2, %v9845_v6 }
 0xd7b   :  { %9858 = vmatpush3.msra.mxu0 %v11334_v34  ;;  %v10415_v34 = vpop.eup %10414 }
 0xd7c   :  { %9873 = vmatprep.subr.msk.mxu0 %vm122_vm0, %v2158_v17  ;;  %v10417_v59 = vpop.eup %10416  ;;  %v11671_v1 = vmul.f32 %v10415_v34, %v10409_v32 }
 0xd7d   :  { %v9848_v27 = vpop.f32.mrf.mxu0  ;;  %v10419_v2 = vpop.eup %10418 }
 0xd7e   :  { %13947 = vst [vmem:[#allocation23_spill] sm:$0xff] %v11671_v1 }
 0xd7f   :  { %v2769_v56 = vpop.f32.mrf.mxu0 }
 0xd80   :  { %9854 = vmatprep.mubr.msk.f32.mxu0 %vm448_vm2, %v2769_v56 }
 0xd81   :  { %9855 = vmatmul.mubr.msk.f32.gmra.mxu0 %vm448_vm2, %v9848_v27 }
 0xd82   :  { %9859 = vmatprep.mubr.msk.f32.mxu0 %vm448_vm2, %v11600_v53  ;;  %v11673_v53 = vmul.f32 %v10417_v59, %v10407_v61 }
 0xd84   :  { %13948 = vst [vmem:[#allocation24_spill] sm:$0xff] %v11673_v53 }
 0xd85   :  { %9860 = vmatmul.mubr.msk.f32.vlgmr.msra.gmra.mxu0 %vm448_vm2, %v11598_v41  ;;  %v3383_v41 = vpop.permute.xlu1 %3382 }
 0xd86   :  { %9874 = vmatpush3.xpose.msk.msra.mxu0 %vm122_vm0, %v2158_v17  ;;  %9862 = vmatprep.mubr.msk.f32.mxu0 %vm448_vm2, %v11604_v38  ;;  %v11679_v38 = vmul.f32 %v10419_v2, %v10411_v48 }
 0xd87   :  { %9889 = vmatprep.subr.mxu0 %v2143_v50 }
 0xd88   :  { %13949 = vst [vmem:[#allocation25_spill] sm:$0xff] %v11679_v38 }
 0xd89   :  { %9863 = vmatmul.mubr.msk.f32.gmra.mxu0 %vm448_vm2, %v11602_v16  ;;  %v3387_v16 = vpop.permute.xlu1 %3386 }
 0xd8a   :  { %9875 = vmatprep.mubr.msk.f32.mxu0 %vm122_vm0, %v11665_v22 }
 0xd8d   :  { %9876 = vmatmul.mubr.msk.f32.vlgmr.msra.gmra.mxu0 %vm122_vm0, %v11671_v1  ;;  %v3389_v4 = vpop.permute.xlu1 %3388 }
 0xd8e   :  { %9890 = vmatpush3.msra.mxu0 %v2143_v50  ;;  %9878 = vmatprep.mubr.msk.f32.mxu0 %vm122_vm0, %v11673_v53 }
 0xd8f   :  { %9905 = vmatprep.subr.mxu0 %v11489_v11 }
 0xd91   :  { %9879 = vmatmul.mubr.msk.f32.gmra.mxu0 %vm122_vm0, %v11679_v38 }
 0xd92   :  { %9891 = vmatprep.mubr.msk.f32.mxu0 %vm448_vm2, %v3383_v41 }
 0xd95   :  { %9892 = vmatmul.mubr.msk.f32.vlgmr.msra.gmra.mxu0 %vm448_vm2, %v3385_v19 }
 0xd96   :  { %9894 = vmatprep.mubr.msk.f32.mxu0 %vm448_vm2, %v3387_v16  ;;  %9906 = vmatpush3.msra.mxu0 %v11489_v11 }
 0xd99   :  { %9895 = vmatmul.mubr.msk.f32.gmra.mxu0 %vm448_vm2, %v3389_v4 }
 0xe3a   :  { %v9853_v60 = vpop.f32.mrf.mxu0 }
 0xe3c   :  { %v2856_v39 = vpop.f32.mrf.mxu0 }
 0xe41   :  { %v9856_v37 = vpop.f32.mrf.mxu0 }
 0xe43   :  { %v2866_v33 = vpop.f32.mrf.mxu0 }
 0xe45   :  { %v9861_v18 = vpop.f32.mrf.mxu0 }
 0xe46   :  { %v11689_v0 = vadd.f32 %v9861_v18, %v9853_v60 }
 0xe47   :  { %v2953_v61 = vpop.f32.mrf.mxu0 }
 0xe48   :  { %v11691_v32 = vadd.f32 %v2953_v61, %v2856_v39 }
 0xe49   :  { %v9864_v23 = vpop.f32.mrf.mxu0 }
 0xe4a   :  { %v11693_v21 = vadd.f32 %v9864_v23, %v9856_v37 }
 0xe4b   :  { %v2963_v48 = vpop.f32.mrf.mxu0 }
 0xe4c   :  { %v11695_v31 = vadd.f32 %v2963_v48, %v2866_v33  ;;  %v1221_v48 = vadd.f32 %v11391_v35, %v11387_v20  ;;  %v11721_v20 = vld [vmem:[%s13848_s6] ss:$0 sm:$0xff] }
 0xe4d   :  { %v9877_v11 = vpop.f32.mrf.mxu0 }
 0xe4f   :  { %v3262_v36 = vpop.f32.mrf.mxu0 }
 0xe50   :  { %9883 = vmatprep.mubr.msk.f32.mxu1 %vm448_vm2, %v3262_v36  ;;  %v1646_v36 = vadd.f32 %v11412_v46, %v1221_v48 }
 0xe51   :  { %v9880_v42 = vpop.f32.mrf.mxu0  ;;  %9884 = vmatmul.mubr.msk.f32.vlgmr.msra.gmra.mxu1 %vm448_vm2, %v9877_v11 }
 0xe52   :  { %9898 = vmatpush3.xpose.msk.msra.mxu1 %vm122_vm0, %v11583_v7 }
 0xe53   :  { %v3272_v6 = vpop.f32.mrf.mxu0 }
 0xe54   :  { %9886 = vmatprep.mubr.msk.f32.mxu1 %vm448_vm2, %v3272_v6  ;;  %v2057_v6 = vadd.f32 %v11536_v9, %v1646_v36 }
 0xe55   :  { %9887 = vmatmul.mubr.msk.f32.gmra.mxu1 %vm448_vm2, %v9880_v42  ;;  %v9893_v13 = vpop.f32.mrf.mxu0  ;;  %v1231_v42 = vadd.f32 %v11393_v44, %v11389_v24 }
 0xe56   :  { %v3484_v15 = vmul.f32 0.35355338, %v9893_v13  ;;  %v3799_v35 = vadd.f32 %v11721_v20, %v2057_v6 }
 0xe57   :  { %v3464_v17 = vpop.f32.mrf.mxu0 }
 0xe58   :  { %v3483_v30 = vmul.f32 0.35355338, %v3464_v17  ;;  %v3490_v27 = vsel %vm122_vm0, %v3484_v15, -inf }
 0xe59   :  { %3491 = vmax.xlane.f32.xlu1 %v3490_v27  ;;  %v9896_v56 = vpop.f32.mrf.mxu0 }
 0xe5a   :  { %v3487_v55 = vsel %vm122_vm0, %v3483_v30, -inf  ;;  %v3486_v59 = vmul.f32 0.35355338, %v9896_v56  ;;  %v10804_v56 = vld [vmem:[%s13929_s26] sm:$0xff] }
 0xe5b   :  { %3488 = vmax.xlane.f32.xlu0 %v3487_v55  ;;  %v3474_v50 = vpop.f32.mrf.mxu0  ;;  %v3807_v55 = vadd.f32 %v10804_v56, %v3799_v35 }
 0xe5c   :  { %v3485_v34 = vmul.f32 0.35355338, %v3474_v50  ;;  %v3496_v2 = vsel %vm122_vm0, %v3486_v59, -inf  ;;  %v10805_v50 = vld [vmem:[%s13929_s26 + $0x8] sm:$0xff] }
 0xe5e   :  { %v3493_v7 = vsel %vm122_vm0, %v3485_v34, -inf }
 0xe5f   :  { %3494 = vmax.xlane.f32.xlu0 %v3493_v7 }
 0xe63   :  { %3497 = vmax.xlane.f32.xlu0 %v3496_v2  ;;  %v10806_v2 = vld [vmem:[%s13929_s26 + $0x10] sm:$0xff] }
 0xee2   :  { %v3492_v41 = vpop.xlane.xlu1 %3491 }
 0xee3   :  { %v3500_v16 = vsub.f32 %v3484_v15, %v3492_v41  ;;  %v1648_v15 = vadd.f32 %v11493_v12, %v1231_v42  ;;  %v3800_v12 = vadd.f32 %v11721_v20, %v11534_v25  ;;  %v3802_v25 = vadd.f32 %v11721_v20, %v11539_v45  ;;  %v10807_v45 = vld [vmem:[%s13929_s26 + $0x18] sm:$0xff] }
 0xee4   :  { %v3489_v19 = vpop.xlane.xlu0 %3488 }
 0xee5   :  { %v3505_v4 = vmul.f32 1.442695, %v3500_v16  ;;  %v3499_v60 = vsub.f32 %v3483_v30, %v3489_v19  ;;  %v2059_v24 = vadd.f32 %v11541_v8, %v1648_v15 }
 0xee7   :  { %10420 = vpow2.f32 %v3505_v4  ;;  %v3503_v39 = vmul.f32 1.442695, %v3499_v60  ;;  %v3801_v9 = vadd.f32 %v11721_v20, %v2059_v24  ;;  %v3810_v4 = vadd.f32 %v10807_v45, %v3802_v25 }
 0xee8   :  { %v3495_v37 = vpop.xlane.xlu0 %3494 }
 0xee9   :  { %10422 = vpow2.f32 %v3503_v39  ;;  %v3501_v33 = vsub.f32 %v3485_v34, %v3495_v37  ;;  %v3808_v34 = vadd.f32 %v10805_v50, %v3800_v12  ;;  %v3809_v41 = vadd.f32 %v10806_v2, %v3801_v9 }
 0xeea   :  { %v3826_v60 = vsel %vm122_vm0, %v3810_v4, 0.0 }
 0xeeb   :  { %v3507_v18 = vmul.f32 1.442695, %v3501_v33  ;;  %v3820_v16 = vsel %vm122_vm0, %v3808_v34, 0.0  ;;  %v3823_v19 = vsel %vm122_vm0, %v3809_v41, 0.0 }
 0xeec   :  { %v3498_v61 = vpop.xlane.xlu0 %3497 }
 0xeed   :  { %10424 = vpow2.f32 %v3507_v18  ;;  %v3502_v23 = vsub.f32 %v3486_v59, %v3498_v61  ;;  %v3817_v59 = vsel %vm122_vm0, %v3807_v55, 0.0 }
 0xeef   :  { %v3509_v11 = vmul.f32 1.442695, %v3502_v23 }
 0xef1   :  { %10426 = vpow2.f32 %v3509_v11 }
 0xef4   :  { %v11713_v13 = vpop.eup %10420 }
 0xef5   :  { %v3514_v17 = vsel %vm122_vm0, %v11713_v13, 0.0 }
 0xef6   :  { %v10423_v30 = vpop.eup %10422  ;;  %3515 = vadd.xlane.f32.xlu0 %v3514_v17 }
 0xef7   :  { %v3511_v44 = vsel %vm122_vm0, %v10423_v30, 0.0 }
 0xef8   :  { %3512 = vadd.xlane.f32.xlu1 %v3511_v44 }
 0xefa   :  { %v11726_v46 = vpop.eup %10424 }
 0xefb   :  { %v3517_v27 = vsel %vm122_vm0, %v11726_v46, 0.0 }
 0xefc   :  { %3518 = vadd.xlane.f32.xlu1 %v3517_v27 }
 0xefe   :  { %v11736_v8 = vpop.eup %10426 }
 0xeff   :  { %v3520_v7 = vsel %vm122_vm0, %v11736_v8, 0.0 }
 0xf00   :  { %3818 = vadd.xlane.f32.xlu1 %v3817_v59  ;;  %3521 = vadd.xlane.f32.xlu0 %v3520_v7 }
 0xf04   :  { %3821 = vadd.xlane.f32.xlu0 %v3820_v16  ;;  %3824 = vadd.xlane.f32.xlu1 %v3823_v19 }
 0xf08   :  { %3827 = vadd.xlane.f32.xlu0 %v3826_v60 }
 0xf11   :  { %v9885_v39 = vpop.f32.mrf.mxu1 }
 0xf12   :  { %v11756_v37 = vadd.f32 %v9885_v39, %v11689_v0 }
 0xf13   :  { %v3359_v33 = vpop.f32.mrf.mxu1 }
 0xf14   :  { %v11759_v18 = vadd.f32 %v3359_v33, %v11691_v32  ;;  %v3950_v33 = vld [vmem:[%s13851_s9] sm:$0xff] }
 0xf15   :  { %v9888_v61 = vpop.f32.mrf.mxu1 }
 0xf16   :  { %v11762_v23 = vadd.f32 %v9888_v61, %v11693_v21  ;;  %v4105_v61 = vld [vmem:[%s13853_s11 + $0x38] sm:$0xff] }
 0xf17   :  { %9933 = vmatprep.subr.mxu0 %v4105_v61 }
 0xf7f   :  { %v3516_v48 = vpop.xlane.xlu0 %3515 }
 0xf80   :  { %10428 = vrcp.f32 %v3516_v48 }
 0xf81   :  { %v3513_v11 = vpop.xlane.xlu1 %3512 }
 0xf82   :  { %10430 = vrcp.f32 %v3513_v11 }
 0xf85   :  { %v3519_v36 = vpop.xlane.xlu1 %3518 }
 0xf86   :  { %10432 = vrcp.f32 %v3519_v36 }
 0xf89   :  { %v3819_v42 = vpop.xlane.xlu1 %3818  ;;  %v3522_v6 = vpop.xlane.xlu0 %3521 }
 0xf8a   :  { %v3842_v15 = vmul.f32 0.03125, %v3819_v42  ;;  %10434 = vrcp.f32 %v3522_v6 }
 0xf8c   :  { %v11764_v0 = vsub.f32 %v3807_v55, %v3842_v15 }
 0xf8d   :  { %v3822_v17 = vpop.xlane.xlu0 %3821  ;;  %v3825_v35 = vpop.xlane.xlu1 %3824 }
 0xf8e   :  { %v10429_v32 = vpop.eup %10428  ;;  %v3843_v24 = vmul.f32 0.03125, %v3822_v17  ;;  %v3844_v44 = vmul.f32 0.03125, %v3825_v35  ;;  %v3858_v21 = vmul.f32 %v11764_v0, %v11764_v0 }
 0xf8f   :  { %v10431_v12 = vpop.eup %10430  ;;  %v11776_v55 = vmul.f32 %v10429_v32, %v11713_v13 }
 0xf90   :  { %v11768_v9 = vsub.f32 %v3808_v34, %v3843_v24  ;;  %v11770_v27 = vsub.f32 %v3809_v41, %v3844_v44  ;;  %v3866_v56 = vsel %vm122_vm0, %v3858_v21, 0.0  ;;  %v11773_v50 = vmul.f32 %v10431_v12, %v10423_v30 }
 0xf91   :  { %13951 = vst [vmem:[#allocation27_spill] sm:$0xff] %v11776_v55  ;;  %v3828_v25 = vpop.xlane.xlu0 %3827  ;;  %3867 = vadd.xlane.f32.xlu1 %v3866_v56  ;;  %v11817_v56 = vld [vmem:[%s13849_s7] ss:$0 sm:$0xff] }
 0xf92   :  { %13950 = vst [vmem:[#allocation26_spill] sm:$0xff] %v11773_v50  ;;  %v3845_v59 = vmul.f32 0.03125, %v3828_v25  ;;  %9899 = vmatprep.mubr.msk.f32.mxu1 %vm122_vm0, %v11773_v50  ;;  %v3859_v7 = vmul.f32 %v11768_v9, %v11768_v9  ;;  %v3860_v34 = vmul.f32 %v11770_v27, %v11770_v27 }
 0xf93   :  { %v10433_v2 = vpop.eup %10432  ;;  %9900 = vmatmul.mubr.msk.f32.vlgmr.msra.gmra.mxu1 %vm122_vm0, %v11776_v55 }
 0xf94   :  { %v3853_v30 = vsub.f32 %v3810_v4, %v3845_v59  ;;  %v3869_v13 = vsel %vm122_vm0, %v3859_v7, 0.0  ;;  %v3872_v41 = vsel %vm122_vm0, %v3860_v34, 0.0  ;;  %v11789_v16 = vmul.f32 %v10433_v2, %v11726_v46  ;;  %v3953_v46 = vld [vmem:[%s13851_s9 + $0x18] sm:$0xff]  ;;  %v3952_v4 = vld [vmem:[%s13851_s9 + $0x10] sm:$0xff]  ;;  %v11823_v59 = vld [vmem:[%s13850_s8] ss:$0 sm:$0xff] }
 0xf95   :  { %3870 = vadd.xlane.f32.xlu0 %v3869_v13  ;;  %3873 = vadd.xlane.f32.xlu1 %v3872_v41 }
 0xf96   :  { %13952 = vst [vmem:[#allocation28_spill] sm:$0xff] %v11789_v16  ;;  %9902 = vmatprep.mubr.msk.f32.mxu1 %vm122_vm0, %v11789_v16  ;;  %v3861_v19 = vmul.f32 %v3853_v30, %v3853_v30  ;;  %9913 = vmatprep.subr.mxu1 %v3953_v46 }
 0xf97   :  { %v10435_v45 = vpop.eup %10434  ;;  %9914 = vmatpush3.msra.mxu1 %v3953_v46 }
 0xf98   :  { %v3875_v60 = vsel %vm122_vm0, %v3861_v19, 0.0  ;;  %v11795_v39 = vmul.f32 %v10435_v45, %v11736_v8  ;;  %9915 = vmatprep.subr.mxu1 %v3952_v4  ;;  %v3951_v8 = vld [vmem:[%s13851_s9 + $0x8] sm:$0xff] }
 0xf99   :  { %3876 = vadd.xlane.f32.xlu0 %v3875_v60  ;;  %9916 = vmatpush3.msra.mxu1 %v3952_v4 }
 0xf9a   :  { %13953 = vst [vmem:[#allocation29_spill] sm:$0xff] %v11795_v39  ;;  %9903 = vmatmul.mubr.msk.f32.gmra.mxu1 %vm122_vm0, %v11795_v39  ;;  %9917 = vmatprep.subr.mxu1 %v3951_v8 }
 0xf9b   :  { %9918 = vmatpush3.msra.mxu1 %v3951_v8 }
 0xf9c   :  { %9919 = vmatprep.subr.mxu1 %v3950_v33 }
 0xf9d   :  { %9920 = vmatpush3.msra.mxu1 %v3950_v33  ;;  %v3369_v33 = vpop.f32.mrf.mxu1 }
0x101a   :  { %v3868_v48 = vpop.xlane.xlu1 %3867 }
0x101b   :  { %v3890_v11 = vmul.f32 0.03125, %v3868_v48 }
0x101d   :  { %v3898_v36 = vadd.f32 1e-05, %v3890_v11  ;;  %v4104_v11 = vld [vmem:[%s13853_s11 + $0x30] sm:$0xff] }
0x101e   :  { %v3871_v42 = vpop.xlane.xlu0 %3870  ;;  %v3874_v6 = vpop.xlane.xlu1 %3873 }
0x101f   :  { %10436 = vrsqrt.f32 %v3898_v36  ;;  %v3891_v15 = vmul.f32 0.03125, %v3871_v42  ;;  %v3892_v17 = vmul.f32 0.03125, %v3874_v6  ;;  %v4103_v36 = vld [vmem:[%s13853_s11 + $0x28] sm:$0xff]  ;;  %v4102_v6 = vld [vmem:[%s13853_s11 + $0x20] sm:$0xff] }
0x1021   :  { %v3899_v35 = vadd.f32 1e-05, %v3891_v15  ;;  %v3900_v32 = vadd.f32 1e-05, %v3892_v17  ;;  %v4100_v17 = vld [vmem:[%s13853_s11 + $0x10] sm:$0xff] }
0x1022   :  { %v3877_v24 = vpop.xlane.xlu0 %3876 }
0x1023   :  { %10438 = vrsqrt.f32 %v3899_v35  ;;  %v3893_v44 = vmul.f32 0.03125, %v3877_v24  ;;  %v4099_v35 = vld [vmem:[%s13853_s11 + $0x8] sm:$0xff]  ;;  %v13954_v24 = vmov 0.0  }
0x1024   :  { %10440 = vrsqrt.f32 %v3900_v32  ;;  %v4098_v32 = vld [vmem:[%s13853_s11] sm:$0xff] }
0x1025   :  { %v3901_v21 = vadd.f32 1e-05, %v3893_v44  ;;  %v11880_v44 = vld [vmem:[%s13852_s10] ss:$0 sm:$0xff] }
0x1027   :  { %10442 = vrsqrt.f32 %v3901_v21 }
0x102c   :  { %v10437_v12 = vpop.eup %10436 }
0x102d   :  { %v3914_v25 = vmul.f32 %v10437_v12, %v11764_v0 }
0x102f   :  { %v3928_v7 = vmul.f32 %v11817_v56, %v3914_v25 }
0x1030   :  { %v10439_v34 = vpop.eup %10438 }
0x1031   :  { %v10441_v2 = vpop.eup %10440  ;;  %v3915_v13 = vmul.f32 %v10439_v34, %v11768_v9  ;;  %v11828_v41 = vadd.f32 %v11823_v59, %v3928_v7 }
0x1032   :  { %v3916_v19 = vmul.f32 %v10441_v2, %v11770_v27 }
0x1033   :  { %v3929_v45 = vmul.f32 %v11817_v56, %v3915_v13  ;;  %9921 = vmatprep.mubr.msk.f32.mxu1 %vm122_vm0, %v11828_v41 }
0x1034   :  { %v10443_v0 = vpop.eup %10442  ;;  %v3930_v60 = vmul.f32 %v11817_v56, %v3916_v19 }
0x1035   :  { %v11836_v46 = vadd.f32 %v11823_v59, %v3929_v45  ;;  %v3917_v4 = vmul.f32 %v10443_v0, %v3853_v30 }
0x1036   :  { %v11839_v8 = vadd.f32 %v11823_v59, %v3930_v60 }
0x1037   :  { %9922 = vmatmul.mubr.msk.f32.vlgmr.msra.gmra.mxu1 %vm122_vm0, %v11836_v46  ;;  %v3931_v9 = vmul.f32 %v11817_v56, %v3917_v4 }
0x1038   :  { %9924 = vmatprep.mubr.msk.f32.mxu1 %vm122_vm0, %v11839_v8 }
0x1039   :  { %v11847_v27 = vadd.f32 %v11823_v59, %v3931_v9 }
0x103b   :  { %9925 = vmatmul.mubr.msk.f32.gmra.mxu1 %vm122_vm0, %v11847_v27 }
0x1053   :  { %v9901_v48 = vpop.f32.mrf.mxu1 }
0x1055   :  { %v3672_v30 = vpop.f32.mrf.mxu1 }
0x1056   :  { %9907 = vmatprep.mubr.msk.f32.mxu0 %vm448_vm2, %v3672_v30 }
0x1057   :  { %9908 = vmatmul.mubr.msk.f32.vlgmr.msra.gmra.mxu0 %vm448_vm2, %v9901_v48 }
0x1058   :  { %9934 = vmatpush3.msra.mxu0 %v4105_v61  ;;  %v4101_v61 = vld [vmem:[%s13853_s11 + $0x18] sm:$0xff] }
0x1059   :  { %9935 = vmatprep.subr.mxu0 %v4104_v11 }
0x105a   :  { %v9904_v42 = vpop.f32.mrf.mxu1  ;;  %9936 = vmatpush3.msra.mxu0 %v4104_v11 }
0x105b   :  { %9937 = vmatprep.subr.mxu0 %v4103_v36 }
0x105c   :  { %v3682_v15 = vpop.f32.mrf.mxu1  ;;  %9938 = vmatpush3.msra.mxu0 %v4103_v36 }
0x105d   :  { %9910 = vmatprep.mubr.msk.f32.mxu0 %vm448_vm2, %v3682_v15  ;;  %9939 = vmatprep.subr.mxu0 %v4102_v6 }
0x105e   :  { %9911 = vmatmul.mubr.msk.f32.gmra.mxu0 %vm448_vm2, %v9904_v42 }
0x105f   :  { %9940 = vmatpush3.msra.mxu0 %v4102_v6  ;;  %v10808_v6 = vld [vmem:[%s13929_s26 + $0x28] sm:$0xff] }
0x1060   :  { %9941 = vmatprep.subr.mxu0 %v4101_v61 }
0x1061   :  { %9942 = vmatpush3.msra.mxu0 %v4101_v61 }
0x1062   :  { %9943 = vmatprep.subr.mxu0 %v4100_v17 }
0x1063   :  { %9944 = vmatpush3.msra.mxu0 %v4100_v17 }
0x1064   :  { %9945 = vmatprep.subr.mxu0 %v4099_v35 }
0x1065   :  { %9946 = vmatpush3.msra.mxu0 %v4099_v35  ;;  %v10809_v35 = vld [vmem:[%s13929_s26 + $0x20] sm:$0xff] }
0x1066   :  { %9947 = vmatprep.subr.mxu0 %v4098_v32 }
0x1067   :  { %9948 = vmatpush3.msra.mxu0 %v4098_v32  ;;  %v3380_v32 = vadd.f32 %v3369_v33, %v11695_v31  ;;  %v10811_v31 = vld [vmem:[%s13929_s26 + $0x30] sm:$0xff] }
0x1068   :  { %9981 = vmatprep.subr.mxu0 %v13954_v24 }
0x10f7   :  { %v9923_v21 = vpop.f32.mrf.mxu1 }
0x10f8   :  { %v4057_v12 = vadd.f32 %v9923_v21, %v11880_v44 }
0x10f9   :  { %v4051_v25 = vpop.f32.mrf.mxu1 }
0x10fa   :  { %v4052_v7 = vadd.f32 %v11880_v44, %v4051_v25  ;;  %v4091_v13 = vmax.f32 %v4057_v12, 0.0 }
0x10fb   :  { %v9926_v34 = vpop.f32.mrf.mxu1 }
0x10fc   :  { %v4090_v2 = vmax.f32 %v4052_v7, 0.0  ;;  %v4067_v19 = vadd.f32 %v9926_v34, %v11880_v44 }
0x10fd   :  { %v4061_v45 = vpop.f32.mrf.mxu1 }
0x10fe   :  { %v4062_v0 = vadd.f32 %v11880_v44, %v4061_v45  ;;  %9949 = vmatprep.mubr.msk.f32.mxu0 %vm4113_vm3, %v4090_v2  ;;  %v4093_v4 = vmax.f32 %v4067_v19, 0.0  ;;  %v10810_v2 = vld [vmem:[%s13929_s26 + $0x38] sm:$0xff]  ;;  %s13960_s26 = smov 104  }
0x10ff   :  { %9950 = vmatmul.mubr.msk.f32.vlgmr.msra.gmra.mxu0 %vm4113_vm3, %v4091_v13 }
0x1100   :  { %v4092_v60 = vmax.f32 %v4062_v0, 0.0 }
0x1102   :  { %9952 = vmatprep.mubr.msk.f32.mxu0 %vm4113_vm3, %v4092_v60 }
0x1103   :  { %9953 = vmatmul.mubr.msk.f32.gmra.mxu0 %vm4113_vm3, %v4093_v4 }
0x1117   :  { %v9909_v9 = vpop.f32.mrf.mxu0 }
0x1118   :  { %v3789_v48 = vadd.f32 %v9909_v9, %v11756_v37 }
0x1119   :  { %v3769_v30 = vpop.f32.mrf.mxu0 }
0x111a   :  { %v3804_v11 = vadd.f32 %v11721_v20, %v3789_v48  ;;  %v3788_v36 = vadd.f32 %v3769_v30, %v11759_v18 }
0x111c   :  { %v3803_v42 = vadd.f32 %v11721_v20, %v3788_v36  ;;  %v3812_v15 = vadd.f32 %v10808_v6, %v3804_v11 }
0x111e   :  { %v9912_v61 = vpop.f32.mrf.mxu0  ;;  %v3832_v17 = vsel %vm122_vm0, %v3812_v15, 0.0  ;;  %v3811_v37 = vadd.f32 %v10809_v35, %v3803_v42 }
0x111f   :  { %v3791_v21 = vadd.f32 %v9912_v61, %v11762_v23  ;;  %3833 = vadd.xlane.f32.xlu0 %v3832_v17 }
0x1120   :  { %v3779_v18 = vpop.f32.mrf.mxu0  ;;  %v3829_v12 = vsel %vm122_vm0, %v3811_v37, 0.0 }
0x1121   :  { %v3806_v25 = vadd.f32 %v11721_v20, %v3791_v21  ;;  %v3790_v7 = vadd.f32 %v3779_v18, %v3380_v32  ;;  %3830 = vadd.xlane.f32.xlu1 %v3829_v12 }
0x1123   :  { %v3805_v34 = vadd.f32 %v11721_v20, %v3790_v7  ;;  %v3814_v13 = vadd.f32 %v10810_v2, %v3806_v25  ;;  %v11921_v25 = vld [vmem:[%s13854_s12] ss:$0 sm:$0xff] }
0x1125   :  { %v3838_v19 = vsel %vm122_vm0, %v3814_v13, 0.0  ;;  %v3813_v23 = vadd.f32 %v10811_v31, %v3805_v34 }
0x1126   :  { %3839 = vadd.xlane.f32.xlu0 %v3838_v19 }
0x1127   :  { %v3835_v33 = vsel %vm122_vm0, %v3813_v23, 0.0 }
0x1128   :  { %3836 = vadd.xlane.f32.xlu1 %v3835_v33 }
0x11a8   :  { %v3834_v45 = vpop.xlane.xlu0 %3833 }
0x11a9   :  { %v3847_v0 = vmul.f32 0.03125, %v3834_v45 }
0x11aa   :  { %v3831_v60 = vpop.xlane.xlu1 %3830 }
0x11ab   :  { %v3855_v20 = vsub.f32 %v3812_v15, %v3847_v0  ;;  %v3846_v4 = vmul.f32 0.03125, %v3831_v60 }
0x11ad   :  { %v3854_v9 = vsub.f32 %v3811_v37, %v3846_v4  ;;  %v3863_v48 = vmul.f32 %v3855_v20, %v3855_v20 }
0x11af   :  { %v3840_v30 = vpop.xlane.xlu0 %3839  ;;  %v3881_v11 = vsel %vm122_vm0, %v3863_v48, 0.0  ;;  %v3862_v36 = vmul.f32 %v3854_v9, %v3854_v9 }
0x11b0   :  { %v3849_v42 = vmul.f32 0.03125, %v3840_v30  ;;  %3882 = vadd.xlane.f32.xlu0 %v3881_v11 }
0x11b1   :  { %v3837_v6 = vpop.xlane.xlu1 %3836  ;;  %v3878_v61 = vsel %vm122_vm0, %v3862_v36, 0.0 }
0x11b2   :  { %v3857_v17 = vsub.f32 %v3814_v13, %v3849_v42  ;;  %v3848_v35 = vmul.f32 0.03125, %v3837_v6  ;;  %3879 = vadd.xlane.f32.xlu1 %v3878_v61 }
0x11b4   :  { %v3856_v32 = vsub.f32 %v3813_v23, %v3848_v35  ;;  %v3865_v21 = vmul.f32 %v3857_v17, %v3857_v17 }
0x11b6   :  { %v3887_v18 = vsel %vm122_vm0, %v3865_v21, 0.0  ;;  %v3864_v15 = vmul.f32 %v3856_v32, %v3856_v32 }
0x11b7   :  { %3888 = vadd.xlane.f32.xlu0 %v3887_v18 }
0x11b8   :  { %v3884_v37 = vsel %vm122_vm0, %v3864_v15, 0.0 }
0x11b9   :  { %3885 = vadd.xlane.f32.xlu1 %v3884_v37 }
0x11bf   :  { %v9951_v12 = vpop.f32.mrf.mxu0 }
0x11c0   :  { %v4210_v2 = vadd.f32 %v9951_v12, %v11921_v25 }
0x11c1   :  { %v4204_v7 = vpop.f32.mrf.mxu0 }
0x11c2   :  { %v4205_v31 = vadd.f32 %v11921_v25, %v4204_v7  ;;  %v4244_v45 = vadd.f32 %v4210_v2, %v11836_v46 }
0x11c3   :  { %v9954_v34 = vpop.f32.mrf.mxu0 }
0x11c4   :  { %v4220_v13 = vadd.f32 %v9954_v34, %v11921_v25  ;;  %v4243_v4 = vadd.f32 %v4205_v31, %v11828_v41  ;;  %v4256_v30 = vsel %vm122_vm0, %v4244_v45, 0.0 }
0x11c5   :  { %v4214_v19 = vpop.f32.mrf.mxu0 }
0x11c6   :  { %v4215_v23 = vadd.f32 %v11921_v25, %v4214_v19  ;;  %v4246_v33 = vadd.f32 %v4220_v13, %v11847_v27  ;;  %v4253_v11 = vsel %vm122_vm0, %v4243_v4, 0.0 }
0x11c8   :  { %v4245_v0 = vadd.f32 %v4215_v23, %v11839_v8  ;;  %v4262_v60 = vsel %vm122_vm0, %v4246_v33, 0.0 }
0x11c9   :  { %4263 = vadd.xlane.f32.xlu1 %v4262_v60 }
0x11ca   :  { %v4259_v48 = vsel %vm122_vm0, %v4245_v0, 0.0 }
0x11cb   :  { %4260 = vadd.xlane.f32.xlu0 %v4259_v48 }
0x11cd   :  { %4257 = vadd.xlane.f32.xlu1 %v4256_v30 }
0x11cf   :  { %4254 = vadd.xlane.f32.xlu0 %v4253_v11 }
0x1239   :  { %v3883_v36 = vpop.xlane.xlu0 %3882 }
0x123a   :  { %v3895_v27 = vmul.f32 0.03125, %v3883_v36 }
0x123b   :  { %v3880_v42 = vpop.xlane.xlu1 %3879 }
0x123c   :  { %v3903_v46 = vadd.f32 1e-05, %v3895_v27  ;;  %v3894_v6 = vmul.f32 0.03125, %v3880_v42 }
0x123e   :  { %10444 = vrsqrt.f32 %v3903_v46  ;;  %v3902_v8 = vadd.f32 1e-05, %v3894_v6 }
0x1240   :  { %10446 = vrsqrt.f32 %v3902_v8  ;;  %v3889_v61 = vpop.xlane.xlu0 %3888 }
0x1241   :  { %v3897_v35 = vmul.f32 0.03125, %v3889_v61 }
0x1242   :  { %v3886_v41 = vpop.xlane.xlu1 %3885 }
0x1243   :  { %v3905_v21 = vadd.f32 1e-05, %v3897_v35  ;;  %v3896_v18 = vmul.f32 0.03125, %v3886_v41 }
0x1245   :  { %10448 = vrsqrt.f32 %v3905_v21  ;;  %v3904_v15 = vadd.f32 1e-05, %v3896_v18 }
0x1247   :  { %10450 = vrsqrt.f32 %v3904_v15 }
0x124b   :  { %v10445_v37 = vpop.eup %10444 }
0x124c   :  { %v3919_v12 = vmul.f32 %v10445_v37, %v3855_v20 }
0x124d   :  { %v10447_v7 = vpop.eup %10446 }
0x124e   :  { %v3918_v34 = vmul.f32 %v10447_v7, %v3854_v9  ;;  %v3933_v2 = vmul.f32 %v11817_v56, %v3919_v12 }
0x1250   :  { %v3932_v13 = vmul.f32 %v11817_v56, %v3918_v34  ;;  %v11941_v48 = vadd.f32 %v11823_v59, %v3933_v2  ;;  %v9046_v34 = vld [vmem:[%s13928_s23 + $0x28] sm:$0xff]  ;;  %v9045_v2 = vld [vmem:[%s13928_s23 + $0x20] sm:$0xff] }
0x1252   :  { %v10449_v19 = vpop.eup %10448  ;;  %v4264_v31 = vpop.xlane.xlu1 %4263  ;;  %v11938_v23 = vadd.f32 %v11823_v59, %v3932_v13 }
0x1253   :  { %v4280_v60 = vmul.f32 0.03125, %v4264_v31  ;;  %v3921_v30 = vmul.f32 %v10449_v19, %v3857_v17 }
0x1254   :  { %v10451_v11 = vpop.eup %10450  ;;  %v4261_v36 = vpop.xlane.xlu0 %4260  ;;  %9927 = vmatprep.mubr.msk.f32.mxu1 %vm122_vm0, %v11938_v23 }
0x1255   :  { %v4288_v20 = vsub.f32 %v4246_v33, %v4280_v60  ;;  %v4279_v9 = vmul.f32 0.03125, %v4261_v36  ;;  %9928 = vmatmul.mubr.msk.f32.gmra.mxu1 %vm122_vm0, %v11941_v48  ;;  %v3920_v27 = vmul.f32 %v10451_v11, %v3856_v32  ;;  %v3935_v46 = vmul.f32 %v11817_v56, %v3921_v30 }
0x1256   :  { %v4258_v42 = vpop.xlane.xlu1 %4257 }
0x1257   :  { %v4287_v6 = vsub.f32 %v4245_v0, %v4279_v9  ;;  %v4278_v8 = vmul.f32 0.03125, %v4258_v42  ;;  %v4296_v61 = vmul.f32 %v4288_v20, %v4288_v20  ;;  %v3934_v35 = vmul.f32 %v11817_v56, %v3920_v27 }
0x1258   :  { %v4255_v17 = vpop.xlane.xlu0 %4254  ;;  %v11954_v32 = vadd.f32 %v11823_v59, %v3935_v46 }
0x1259   :  { %v4286_v41 = vsub.f32 %v4244_v45, %v4278_v8  ;;  %v4277_v21 = vmul.f32 0.03125, %v4255_v17  ;;  %v4310_v18 = vsel %vm122_vm0, %v4296_v61, 0.0  ;;  %v11951_v33 = vadd.f32 %v11823_v59, %v3934_v35  ;;  %v9048_v59 = vld [vmem:[%s13928_s23 + $0x38] sm:$0xff]  ;;  %v11978_v35 = vld [vmem:[%s13855_s13] ss:$0 sm:$0xff] }
0x125a   :  { %4311 = vadd.xlane.f32.xlu1 %v4310_v18  ;;  %v4295_v15 = vmul.f32 %v4287_v6, %v4287_v6  ;;  %9961 = vmatprep.subr.mxu1 %v9048_v59 }
0x125b   :  { %v4285_v37 = vsub.f32 %v4243_v4, %v4277_v21  ;;  %9930 = vmatprep.mubr.msk.f32.mxu1 %vm122_vm0, %v11951_v33  ;;  %v4294_v0 = vmul.f32 %v4286_v41, %v4286_v41  ;;  %v9047_v4 = vld [vmem:[%s13928_s23 + $0x30] sm:$0xff]  ;;  %9962 = vmatpush3.msra.mxu1 %v9048_v59  ;;  %v11983_v21 = vld [vmem:[%s13856_s14] ss:$0 sm:$0xff] }
0x125c   :  { %v4307_v56 = vsel %vm122_vm0, %v4295_v15, 0.0  ;;  %9931 = vmatmul.mubr.msk.f32.gmra.mxu1 %vm122_vm0, %v11954_v32  ;;  %9963 = vmatprep.subr.mxu1 %v9047_v4 }
0x125d   :  { %4308 = vadd.xlane.f32.xlu0 %v4307_v56  ;;  %v4304_v45 = vsel %vm122_vm0, %v4294_v0, 0.0  ;;  %v4293_v12 = vmul.f32 %v4285_v37, %v4285_v37  ;;  %9964 = vmatpush3.msra.mxu1 %v9047_v4 }
0x125e   :  { %4305 = vadd.xlane.f32.xlu1 %v4304_v45  ;;  %9965 = vmatprep.subr.mxu1 %v9046_v34 }
0x125f   :  { %v4301_v7 = vsel %vm122_vm0, %v4293_v12, 0.0  ;;  %9966 = vmatpush3.msra.mxu1 %v9046_v34 }
0x1260   :  { %9967 = vmatprep.subr.mxu1 %v9045_v2 }
0x1261   :  { %4302 = vadd.xlane.f32.xlu0 %v4301_v7  ;;  %9968 = vmatpush3.msra.mxu1 %v9045_v2 }
0x12e3   :  { %v4312_v13 = vpop.xlane.xlu1 %4311 }
0x12e4   :  { %v4328_v19 = vmul.f32 0.03125, %v4312_v13 }
0x12e6   :  { %v4336_v31 = vadd.f32 1e-05, %v4328_v19  ;;  %v4309_v60 = vpop.xlane.xlu0 %4308 }
0x12e7   :  { %v4327_v30 = vmul.f32 0.03125, %v4309_v60  ;;  %v4306_v11 = vpop.xlane.xlu1 %4305 }
0x12e8   :  { %10452 = vrsqrt.f32 %v4336_v31  ;;  %v4326_v36 = vmul.f32 0.03125, %v4306_v11 }
0x12e9   :  { %v4335_v9 = vadd.f32 1e-05, %v4327_v30 }
0x12ea   :  { %v4334_v27 = vadd.f32 1e-05, %v4326_v36  ;;  %v4303_v42 = vpop.xlane.xlu0 %4302 }
0x12eb   :  { %10454 = vrsqrt.f32 %v4335_v9  ;;  %v4325_v46 = vmul.f32 0.03125, %v4303_v42 }
0x12ec   :  { %10456 = vrsqrt.f32 %v4334_v27 }
0x12ed   :  { %v4333_v8 = vadd.f32 1e-05, %v4325_v46 }
0x12ef   :  { %10458 = vrsqrt.f32 %v4333_v8  ;;  %v9053_v8 = vld [vmem:[%s13931_s25 + $0x48] sm:$0xff] }
0x12f5   :  { %v10453_v61 = vpop.eup %10452 }
0x12f6   :  { %v4352_v17 = vmul.f32 %v10453_v61, %v4288_v20 }
0x12f8   :  { %v10455_v18 = vpop.eup %10454  ;;  %v4366_v15 = vmul.f32 %v11978_v35, %v4352_v17 }
0x12f9   :  { %v10457_v0 = vpop.eup %10456  ;;  %v4351_v56 = vmul.f32 %v10455_v18, %v4287_v6 }
0x12fa   :  { %v4350_v45 = vmul.f32 %v10457_v0, %v4286_v41  ;;  %v11987_v12 = vadd.f32 %v11983_v21, %v4366_v15 }
0x12fb   :  { %v4365_v7 = vmul.f32 %v11978_v35, %v4351_v56 }
0x12fc   :  { %v10459_v59 = vpop.eup %10458  ;;  %9982 = vmatpush3.xpose.msk.msra.mxu0 %vm122_vm0, %v11987_v12  ;;  %v4364_v4 = vmul.f32 %v11978_v35, %v4350_v45 }
0x12fd   :  { %9983 = vmatprep.subr.mxu0 %v13954_v24  ;;  %v4349_v20 = vmul.f32 %v10459_v59, %v4285_v37  ;;  %v11995_v34 = vadd.f32 %v11983_v21, %v4365_v7 }
0x12fe   :  { %v12005_v2 = vadd.f32 %v11983_v21, %v4364_v4 }
0x12ff   :  { %v4363_v6 = vmul.f32 %v11978_v35, %v4349_v20 }
0x1300   :  { %9984 = vmatpush3.xpose.msk.msra.mxu0 %vm122_vm0, %v11995_v34 }
0x1301   :  { %v12001_v41 = vadd.f32 %v11983_v21, %v4363_v6  ;;  %9985 = vmatprep.subr.mxu0 %v13954_v24 }
0x1303   :  { %9969 = vmatprep.mubr.msk.f32.mxu1 %vm122_vm0, %v12001_v41 }
0x1304   :  { %9970 = vmatmul.mubr.msk.f32.vlgmr.msra.gmra.mxu1 %vm122_vm0, %v12005_v2  ;;  %9986 = vmatpush3.xpose.msk.msra.mxu0 %vm122_vm0, %v12005_v2 }
0x1305   :  { %9972 = vmatprep.mubr.msk.f32.mxu1 %vm122_vm0, %v11995_v34  ;;  %9987 = vmatprep.subr.mxu0 %v13954_v24 }
0x1308   :  { %9973 = vmatmul.mubr.msk.f32.gmra.mxu1 %vm122_vm0, %v11987_v12  ;;  %9988 = vmatpush3.xpose.msk.msra.mxu0 %vm122_vm0, %v12001_v41 }
0x1315   :  { %v9929_v37 = vpop.f32.mrf.mxu1 }
0x1316   :  { %v4077_v13 = vadd.f32 %v9929_v37, %v11880_v44 }
0x1317   :  { %v4071_v19 = vpop.f32.mrf.mxu1 }
0x1318   :  { %v4072_v31 = vadd.f32 %v11880_v44, %v4071_v19  ;;  %v4095_v30 = vmax.f32 %v4077_v13, 0.0 }
0x131a   :  { %v4094_v60 = vmax.f32 %v4072_v31, 0.0 }
0x131c   :  { %v9932_v11 = vpop.f32.mrf.mxu1  ;;  %9955 = vmatprep.mubr.msk.f32.mxu0 %vm4113_vm3, %v4094_v60 }
0x131d   :  { %9956 = vmatmul.mubr.msk.f32.gmra.mxu0 %vm4113_vm3, %v4095_v30  ;;  %v4087_v36 = vadd.f32 %v9932_v11, %v11880_v44 }
0x131e   :  { %v4081_v9 = vpop.f32.mrf.mxu1 }
0x131f   :  { %v4082_v27 = vadd.f32 %v11880_v44, %v4081_v9  ;;  %v4097_v46 = vmax.f32 %v4087_v36, 0.0 }
0x1321   :  { %v4096_v42 = vmax.f32 %v4082_v27, 0.0 }
0x1323   :  { %9958 = vmatprep.mubr.msk.f32.mxu0 %vm4113_vm3, %v4096_v42 }
0x1324   :  { %9959 = vmatmul.mubr.msk.f32.gmra.mxu0 %vm4113_vm3, %v4097_v46 }
0x1325   :  { %9989 = vmatprep.mubr.msk.f32.mxu0 %vm10881_vm1, %v13954_v24 }
0x1328   :  { %9990 = vmatmul.mubr.msk.f32.vlgmr.msra.gmra.mxu0 %vm122_vm0, %v9053_v8 }
0x1329   :  { %9992 = vmatprep.mubr.msk.f32.mxu0 %vm10881_vm1, %v13954_v24 }
0x13dd   :  { %v9957_v61 = vpop.f32.mrf.mxu0 }
0x13de   :  { %v4230_v44 = vadd.f32 %v9957_v61, %v11921_v25 }
0x13df   :  { %v4224_v17 = vpop.f32.mrf.mxu0 }
0x13e0   :  { %v4248_v18 = vadd.f32 %v4230_v44, %v11941_v48  ;;  %v4225_v15 = vadd.f32 %v11921_v25, %v4224_v17 }
0x13e2   :  { %v4247_v0 = vadd.f32 %v4225_v15, %v11938_v23  ;;  %v4268_v56 = vsel %vm122_vm0, %v4248_v18, 0.0 }
0x13e3   :  { %4269 = vadd.xlane.f32.xlu0 %v4268_v56 }
0x13e4   :  { %v9960_v45 = vpop.f32.mrf.mxu0  ;;  %v4265_v7 = vsel %vm122_vm0, %v4247_v0, 0.0 }
0x13e5   :  { %v4240_v59 = vadd.f32 %v9960_v45, %v11921_v25  ;;  %4266 = vadd.xlane.f32.xlu1 %v4265_v7  ;;  %v12058_v7 = vld [vmem:[%s13931_s25 + $0x50] sm:$0xff] }
0x13e6   :  { %v4234_v20 = vpop.f32.mrf.mxu0  ;;  %9993 = vmatmul.mubr.msk.f32.gmra.mxu0 %vm122_vm0, %v12058_v7 }
0x13e7   :  { %v4250_v4 = vadd.f32 %v4240_v59, %v11954_v32  ;;  %v4235_v6 = vadd.f32 %v11921_v25, %v4234_v20  ;;  %9995 = vmatprep.mubr.msk.f32.mxu0 %vm10881_vm1, %v13954_v24  ;;  %v12067_v59 = vld [vmem:[%s13931_s25 + $0x58] sm:$0xff]  ;;  %v12076_v20 = vld [vmem:[%s13931_s25 + $0x60] sm:$0xff] }
0x13e8   :  { %v4690_v56 = vpop.f32.mrf.mxu0 }
0x13e9   :  { %v4249_v48 = vadd.f32 %v4235_v6, %v11951_v33  ;;  %v4274_v37 = vsel %vm122_vm0, %v4250_v4, 0.0 }
0x13ea   :  { %4275 = vadd.xlane.f32.xlu0 %v4274_v37  ;;  %v9991_v45 = vpop.f32.mrf.mxu0  ;;  %9996 = vmatmul.mubr.msk.f32.gmra.mxu0 %vm122_vm0, %v12067_v59 }
0x13eb   :  { %v4271_v23 = vsel %vm122_vm0, %v4249_v48, 0.0  ;;  %9998 = vmatprep.mubr.msk.f32.mxu0 %vm10881_vm1, %v13954_v24 }
0x13ec   :  { %4272 = vadd.xlane.f32.xlu1 %v4271_v23 }
0x13ee   :  { %9999 = vmatmul.mubr.msk.f32.gmra.mxu0 %vm122_vm0, %v12076_v20 }
0x13ef   :  { %10001 = vmatprep.mubr.msk.f32.mxu0 %vm10881_vm1, %v13954_v24 }
0x146c   :  { %v4270_v13 = vpop.xlane.xlu0 %4269 }
0x146d   :  { %v4282_v19 = vmul.f32 0.03125, %v4270_v13 }
0x146e   :  { %v4267_v31 = vpop.xlane.xlu1 %4266 }
0x146f   :  { %v4290_v60 = vsub.f32 %v4248_v18, %v4282_v19  ;;  %v4281_v30 = vmul.f32 0.03125, %v4267_v31 }
0x1471   :  { %v4289_v11 = vsub.f32 %v4247_v0, %v4281_v30  ;;  %v4298_v36 = vmul.f32 %v4290_v60, %v4290_v60  ;;  %v9062_v0 = vld [vmem:[%s13930_s21 + $0x48] sm:$0xff] }
0x1473   :  { %v4276_v9 = vpop.xlane.xlu0 %4275  ;;  %v4316_v32 = vsel %vm122_vm0, %v4298_v36, 0.0  ;;  %v4297_v27 = vmul.f32 %v4289_v11, %v4289_v11 }
0x1474   :  { %v4284_v25 = vmul.f32 0.03125, %v4276_v9  ;;  %4317 = vadd.xlane.f32.xlu0 %v4316_v32 }
0x1475   :  { %v4273_v33 = vpop.xlane.xlu1 %4272  ;;  %v4313_v42 = vsel %vm122_vm0, %v4297_v27, 0.0 }
0x1476   :  { %v4292_v46 = vsub.f32 %v4250_v4, %v4284_v25  ;;  %v4283_v8 = vmul.f32 0.03125, %v4273_v33  ;;  %4314 = vadd.xlane.f32.xlu1 %v4313_v42  ;;  %v12085_v4 = vld [vmem:[%s13931_s25 + $0x68] sm:$0xff] }
0x1477   :  { %10002 = vmatmul.mubr.msk.f32.gmra.mxu0 %vm122_vm0, %v12085_v4 }
0x1478   :  { %v4291_v61 = vsub.f32 %v4249_v48, %v4283_v8  ;;  %v4300_v44 = vmul.f32 %v4292_v46, %v4292_v46  ;;  %10004 = vmatprep.mubr.msk.f32.mxu0 %vm10881_vm1, %v13954_v24 }
0x147a   :  { %v4322_v17 = vsel %vm122_vm0, %v4300_v44, 0.0  ;;  %v4299_v18 = vmul.f32 %v4291_v61, %v4291_v61 }
0x147b   :  { %4323 = vadd.xlane.f32.xlu0 %v4322_v17 }
0x147c   :  { %v4319_v15 = vsel %vm122_vm0, %v4299_v18, 0.0 }
0x147d   :  { %4320 = vadd.xlane.f32.xlu1 %v4319_v15  ;;  %v9971_v15 = vpop.f32.mrf.mxu1 }
0x148e   :  { %4554 = vperm.xlu1 %10307, %v9062_v0  }
0x14fd   :  { %v4318_v6 = vpop.xlane.xlu0 %4317 }
0x14fe   :  { %v4330_v48 = vmul.f32 0.03125, %v4318_v6 }
0x14ff   :  { %v4315_v37 = vpop.xlane.xlu1 %4314 }
0x1500   :  { %v4338_v23 = vadd.f32 1e-05, %v4330_v48  ;;  %v4329_v13 = vmul.f32 0.03125, %v4315_v37 }
0x1502   :  { %10460 = vrsqrt.f32 %v4338_v23  ;;  %v4337_v19 = vadd.f32 1e-05, %v4329_v13  ;;  %v4513_v23 = vpop.f32.mrf.mxu1 }
0x1504   :  { %10462 = vrsqrt.f32 %v4337_v19  ;;  %v4324_v31 = vpop.xlane.xlu0 %4323  ;;  %v9974_v19 = vpop.f32.mrf.mxu1 }
0x1505   :  { %v4332_v30 = vmul.f32 0.03125, %v4324_v31 }
0x1506   :  { %v4321_v36 = vpop.xlane.xlu1 %4320 }
0x1507   :  { %v4340_v9 = vadd.f32 1e-05, %v4332_v30  ;;  %v4331_v32 = vmul.f32 0.03125, %v4321_v36 }
0x1509   :  { %10464 = vrsqrt.f32 %v4340_v9  ;;  %v4339_v27 = vadd.f32 1e-05, %v4331_v32 }
0x150a   :  { %v12091_v25 = vpop.permute.xlu1 %4554 }
0x150b   :  { %10466 = vrsqrt.f32 %v4339_v27  ;;  %v4691_v33 = vadd.f32 %v4690_v56, %v12091_v25 }
0x150d   :  { %10016 = vmatprep.subr.mxu1 %v4691_v33 }
0x150e   :  { %10017 = vmatpush3.msra.mxu1 %v4691_v33 }
0x150f   :  { %v10461_v42 = vpop.eup %10460 }
0x1510   :  { %v4354_v8 = vmul.f32 %v10461_v42, %v4290_v60 }
0x1511   :  { %v10463_v44 = vpop.eup %10462 }
0x1512   :  { %v4353_v17 = vmul.f32 %v10463_v44, %v4289_v11  ;;  %v4368_v18 = vmul.f32 %v11978_v35, %v4354_v8 }
0x1514   :  { %v4367_v0 = vmul.f32 %v11978_v35, %v4353_v17  ;;  %v12100_v48 = vadd.f32 %v11983_v21, %v4368_v18 }
0x1516   :  { %v10465_v45 = vpop.eup %10464  ;;  %v12097_v6 = vadd.f32 %v11983_v21, %v4367_v0 }
0x1517   :  { %v4356_v37 = vmul.f32 %v10465_v45, %v4292_v46  ;;  %v12114_v46 = vld [vmem:[%s13932_s2 + $0x1] ss:$0 sm:$0xff] }
0x1518   :  { %v10467_v56 = vpop.eup %10466  ;;  %9975 = vmatprep.mubr.msk.f32.mxu1 %vm122_vm0, %v12097_v6  ;;  %v12120_v36 = vadd.f32 %v12114_v46, %v4513_v23 }
0x1519   :  { %9976 = vmatmul.mubr.msk.f32.gmra.mxu1 %vm122_vm0, %v12100_v48  ;;  %v4355_v60 = vmul.f32 %v10467_v56, %v4291_v61  ;;  %v4370_v11 = vmul.f32 %v11978_v35, %v4356_v37  ;;  %v4523_v61 = vpop.f32.mrf.mxu1 }
0x151a   :  { %v12132_v9 = vadd.f32 %v12114_v46, %v4523_v61 }
0x151b   :  { %v4369_v13 = vmul.f32 %v11978_v35, %v4355_v60  ;;  %v12117_v30 = vadd.f32 %v11983_v21, %v4370_v11  ;;  %v12129_v35 = vadd.f32 %v9971_v15, %v12114_v46 }
0x151d   :  { %v12109_v31 = vadd.f32 %v11983_v21, %v4369_v13  ;;  %v12139_v21 = vadd.f32 %v9974_v19, %v12114_v46  ;;  %v4695_v13 = vpop.f32.mrf.mxu0 }
0x151f   :  { %9978 = vmatprep.mubr.msk.f32.mxu1 %vm122_vm0, %v12109_v31  ;;  %v9994_v19 = vpop.f32.mrf.mxu0 }
0x1520   :  { %9979 = vmatmul.mubr.msk.f32.gmra.mxu1 %vm122_vm0, %v12117_v30 }
0x1521   :  { %10018 = vmatprep.mubr.msk.f32.mxu1 %vm448_vm2, %v12120_v36  ;;  %v12155_v61 = vpop.f32.mrf.mxu0 }
0x1524   :  { %10019 = vmatmul.mubr.msk.f32.vlgmr.msra.gmra.mxu1 %vm448_vm2, %v12129_v35 }
0x1525   :  { %10021 = vmatprep.mubr.msk.f32.mxu1 %vm448_vm2, %v12132_v9 }
0x1528   :  { %10022 = vmatmul.mubr.msk.f32.gmra.mxu1 %vm448_vm2, %v12139_v21 }
0x15d9   :  { %v12143_v32 = vpop.f32.mrf.mxu1 }
0x15db   :  { %v12145_v27 = vpop.f32.mrf.mxu1 }
0x15e0   :  { %v12147_v33 = vpop.f32.mrf.mxu1 }
0x15e2   :  { %v12149_v42 = vpop.f32.mrf.mxu1 }
0x15e4   :  { %v10020_v8 = vpop.f32.mrf.mxu1 }
0x15e5   :  { %v4846_v44 = vmul.f32 0.35355338, %v10020_v8  ;;  %v9997_v8 = vpop.f32.mrf.mxu0 }
0x15e6   :  { %v4826_v17 = vpop.f32.mrf.mxu1 }
0x15e7   :  { %v4845_v18 = vmul.f32 0.35355338, %v4826_v17  ;;  %v4852_v15 = vsel %vm122_vm0, %v4846_v44, -inf  ;;  %v12157_v17 = vpop.f32.mrf.mxu0 }
0x15e8   :  { %4853 = vmax.xlane.f32.xlu0 %v4852_v15  ;;  %v10023_v0 = vpop.f32.mrf.mxu1 }
0x15e9   :  { %v4849_v56 = vsel %vm122_vm0, %v4845_v18, -inf  ;;  %v4848_v23 = vmul.f32 0.35355338, %v10023_v0  ;;  %v10000_v15 = vpop.f32.mrf.mxu0 }
0x15ea   :  { %v4836_v45 = vpop.f32.mrf.mxu1 }
0x15eb   :  { %v4847_v37 = vmul.f32 0.35355338, %v4836_v45  ;;  %v4858_v11 = vsel %vm122_vm0, %v4848_v23, -inf  ;;  %v4710_v39 = vpop.f32.mrf.mxu0  ;;  %v9066_v45 = vld [vmem:[%s13930_s21 + $0x68] sm:$0xff] }
0x15ec   :  { %4850 = vmax.xlane.f32.xlu0 %v4849_v56  ;;  %v9063_v56 = vld [vmem:[%s13930_s21 + $0x50] sm:$0xff] }
0x15ed   :  { %v4855_v60 = vsel %vm122_vm0, %v4847_v37, -inf  ;;  %v10003_v0 = vpop.f32.mrf.mxu0 }
0x15f0   :  { %4856 = vmax.xlane.f32.xlu0 %v4855_v60 }
0x15f4   :  { %4859 = vmax.xlane.f32.xlu0 %v4858_v11 }
0x160a   :  { %4574 = vperm.xlu0 %10306, %v9066_v45  }
0x160e   :  { %4559 = vperm.xlu0 %10306, %v9063_v56  }
0x1671   :  { %v4854_v60 = vpop.xlane.xlu0 %4853 }
0x1672   :  { %v4862_v11 = vsub.f32 %v4846_v44, %v4854_v60 }
0x1674   :  { %v4867_v19 = vmul.f32 1.442695, %v4862_v11 }
0x1675   :  { %v4851_v55 = vpop.xlane.xlu0 %4850 }
0x1676   :  { %10468 = vpow2.f32 %v4867_v19  ;;  %v4861_v8 = vsub.f32 %v4845_v18, %v4851_v55  ;;  %v12197_v18 = vld [vmem:[%s13931_s25 + $0x78] sm:$0xff] }
0x1678   :  { %v4865_v16 = vmul.f32 1.442695, %v4861_v8 }
0x1679   :  { %v4857_v15 = vpop.xlane.xlu0 %4856 }
0x167a   :  { %10470 = vpow2.f32 %v4865_v16  ;;  %v4863_v50 = vsub.f32 %v4847_v37, %v4857_v15  ;;  %v12206_v37 = vld [vmem:[%s13931_s25 + $0x80] sm:$0xff] }
0x167c   :  { %v4869_v53 = vmul.f32 1.442695, %v4863_v50 }
0x167d   :  { %v4860_v38 = vpop.xlane.xlu0 %4859 }
0x167e   :  { %v4864_v1 = vsub.f32 %v4848_v23, %v4860_v38  ;;  %v12215_v23 = vld [vmem:[%s13931_s25 + $0x88] sm:$0xff] }
0x1680   :  { %v4871_v0 = vmul.f32 1.442695, %v4864_v1 }
0x1682   :  { %10472 = vpow2.f32 %v4871_v0 }
0x1683   :  { %v10469_v45 = vpop.eup %10468  ;;  %10474 = vpow2.f32 %v4869_v53 }
0x1684   :  { %v4876_v22 = vsel %vm122_vm0, %v10469_v45, 0.0 }
0x1685   :  { %4877 = vadd.xlane.f32.xlu1 %v4876_v22  ;;  %v12166_v56 = vpop.permute.xlu0 %4574 }
0x1686   :  { %v4711_v44 = vadd.f32 %v4710_v39, %v12166_v56  ;;  %v12188_v39 = vld [vmem:[%s13931_s25 + $0x70] sm:$0xff] }
0x1687   :  { %v10471_v60 = vpop.eup %10470  ;;  %10005 = vmatmul.mubr.msk.f32.gmra.mxu0 %vm122_vm0, %v12188_v39 }
0x1688   :  { %10024 = vmatprep.subr.msk.mxu1 %vm122_vm0, %v4711_v44  ;;  %v4873_v55 = vsel %vm122_vm0, %v10471_v60, 0.0  ;;  %10007 = vmatprep.mubr.msk.f32.mxu0 %vm10881_vm1, %v13954_v24 }
0x1689   :  { %4874 = vadd.xlane.f32.xlu0 %v4873_v55  ;;  %10025 = vmatpush3.xpose.msk.msra.mxu1 %vm122_vm0, %v4711_v44  ;;  %v12172_v38 = vpop.permute.xlu0 %4559 }
0x168a   :  { %v4696_v1 = vadd.f32 %v4695_v13, %v12172_v38 }
0x168b   :  { %10008 = vmatmul.mubr.msk.f32.gmra.mxu0 %vm122_vm0, %v12197_v18 }
0x168c   :  { %10032 = vmatprep.subr.mxu1 %v4696_v1  ;;  %10010 = vmatprep.mubr.msk.f32.mxu0 %vm10881_vm1, %v13954_v24 }
0x168f   :  { %v10473_v53 = vpop.eup %10472  ;;  %10011 = vmatmul.mubr.msk.f32.gmra.mxu0 %vm122_vm0, %v12206_v37 }
0x1690   :  { %v4882_v22 = vsel %vm122_vm0, %v10473_v53, 0.0  ;;  %v10475_v50 = vpop.eup %10474  ;;  %10013 = vmatprep.mubr.msk.f32.mxu0 %vm10881_vm1, %v13954_v24 }
0x1691   :  { %4883 = vadd.xlane.f32.xlu0 %v4882_v22  ;;  %v4879_v16 = vsel %vm122_vm0, %v10475_v50, 0.0 }
0x1693   :  { %10014 = vmatmul.mubr.msk.f32.gmra.mxu0 %vm122_vm0, %v12215_v23 }
0x1695   :  { %4880 = vadd.xlane.f32.xlu0 %v4879_v16 }
0x1696   :  { %5032 = vrot.lane.b32.xlu1 %v12120_v36, %s10882_s28 }
0x16ab   :  { %5034 = vrot.lane.b32.xlu0 %v12129_v35, %s10882_s28 }
0x16af   :  { %5036 = vrot.lane.b32.xlu0 %v12132_v9, %s10882_s28 }
0x16b3   :  { %5038 = vrot.lane.b32.xlu0 %v12139_v21, %s10882_s28 }
0x170e   :  { %v4878_v13 = vpop.xlane.xlu1 %4877 }
0x170f   :  { %10476 = vrcp.f32 %v4878_v13 }
0x1712   :  { %v4875_v11 = vpop.xlane.xlu0 %4874 }
0x1713   :  { %10478 = vrcp.f32 %v4875_v11 }
0x171a   :  { %v4884_v19 = vpop.xlane.xlu0 %4883 }
0x171b   :  { %10480 = vrcp.f32 %v4884_v19  ;;  %v5033_v19 = vpop.permute.xlu1 %5032 }
0x171c   :  { %v10477_v8 = vpop.eup %10476 }
0x171d   :  { %v4888_v15 = vmul.f32 %v10477_v8, %v10469_v45 }
0x171e   :  { %v4881_v0 = vpop.xlane.xlu0 %4880 }
0x171f   :  { %4924 = vst.msk [vmem:[#allocation2 + $0x28] sm:$0xff] %vm122_vm0, %v4888_v15  ;;  %10482 = vrcp.f32 %v4881_v0 }
0x1720   :  { %v10479_v44 = vpop.eup %10478 }
0x1721   :  { %v4886_v55 = vmul.f32 %v10479_v44, %v10471_v60 }
0x1722   :  { %v5035_v13 = vpop.permute.xlu0 %5034 }
0x1723   :  { %10026 = vmatprep.mubr.msk.f32.mxu1 %vm122_vm0, %v4886_v55  ;;  %4923 = vst.msk [vmem:[#allocation2 + $0x20] sm:$0xff] %vm122_vm0, %v4886_v55 }
0x1724   :  { %10027 = vmatmul.mubr.msk.f32.vlgmr.msra.gmra.mxu1 %vm122_vm0, %v4888_v15 }
0x1725   :  { %10033 = vmatpush3.msra.mxu1 %v4696_v1 }
0x1726   :  { %v5037_v60 = vpop.permute.xlu0 %5036 }
0x1728   :  { %v10481_v22 = vpop.eup %10480 }
0x1729   :  { %v4892_v16 = vmul.f32 %v10481_v22, %v10473_v53  ;;  %v9049_v53 = vld [vmem:[%s13847_s5 + $0x20] sm:$0xff] }
0x172a   :  { %v5039_v1 = vpop.permute.xlu0 %5038  ;;  %10056 = vmatprep.subr.mxu0 %v9049_v53 }
0x172b   :  { %4926 = vst.msk [vmem:[#allocation2 + $0x38] sm:$0xff] %vm122_vm0, %v4892_v16  ;;  %10057 = vmatpush3.msra.mxu0 %v9049_v53 }
0x172c   :  { %v10483_v11 = vpop.eup %10482 }
0x172d   :  { %v4890_v45 = vmul.f32 %v10483_v11, %v10475_v50 }
0x172f   :  { %10029 = vmatprep.mubr.msk.f32.mxu1 %vm122_vm0, %v4890_v45  ;;  %4925 = vst.msk [vmem:[#allocation2 + $0x30] sm:$0xff] %vm122_vm0, %v4890_v45 }
0x1730   :  { %10030 = vmatmul.mubr.msk.f32.gmra.mxu1 %vm122_vm0, %v4892_v16 }
0x1731   :  { %10034 = vmatprep.mubr.msk.f32.mxu1 %vm448_vm2, %v5033_v19 }
0x1734   :  { %10035 = vmatmul.mubr.msk.f32.vlgmr.msra.gmra.mxu1 %vm448_vm2, %v5035_v13 }
0x1735   :  { %10037 = vmatprep.mubr.msk.f32.mxu1 %vm448_vm2, %v5037_v60 }
0x1738   :  { %10038 = vmatmul.mubr.msk.f32.gmra.mxu1 %vm448_vm2, %v5039_v1 }
0x17e4   :  { %v10028_v50 = vpop.f32.mrf.mxu1 }
0x17e6   :  { %v5013_v8 = vpop.f32.mrf.mxu1 }
0x17e7   :  { %10058 = vmatprep.mubr.msk.f32.mxu0 %vm448_vm2, %v5013_v8  ;;  %v4715_v8 = vpop.f32.mrf.mxu0 }
0x17e8   :  { %10059 = vmatmul.mubr.msk.f32.vlgmr.msra.gmra.mxu0 %vm448_vm2, %v10028_v50 }
0x17f0   :  { %v10031_v15 = vpop.f32.mrf.mxu1 }
0x17f2   :  { %v5023_v0 = vpop.f32.mrf.mxu1 }
0x17f3   :  { %10061 = vmatprep.mubr.msk.f32.mxu0 %vm448_vm2, %v5023_v0 }
0x17f4   :  { %v10036_v44 = vpop.f32.mrf.mxu1  ;;  %10062 = vmatmul.mubr.msk.f32.gmra.mxu0 %vm448_vm2, %v10031_v15  ;;  %v10006_v15 = vpop.f32.mrf.mxu0 }
0x17f5   :  { %v5134_v55 = vmul.f32 0.35355338, %v10036_v44 }
0x17f6   :  { %v5114_v22 = vpop.f32.mrf.mxu1  ;;  %v12242_v0 = vpop.f32.mrf.mxu0 }
0x17f7   :  { %v5133_v16 = vmul.f32 0.35355338, %v5114_v22  ;;  %v5140_v13 = vsel %vm122_vm0, %v5134_v55, -inf }
0x17f8   :  { %5141 = vmax.xlane.f32.xlu1 %v5140_v13  ;;  %v10039_v11 = vpop.f32.mrf.mxu1  ;;  %v10009_v44 = vpop.f32.mrf.mxu0 }
0x17f9   :  { %v5137_v45 = vsel %vm122_vm0, %v5133_v16, -inf  ;;  %v5136_v1 = vmul.f32 0.35355338, %v10039_v11 }
0x17fa   :  { %5138 = vmax.xlane.f32.xlu0 %v5137_v45  ;;  %v5124_v19 = vpop.f32.mrf.mxu1  ;;  %v12244_v22 = vpop.f32.mrf.mxu0 }
0x17fb   :  { %v5135_v60 = vmul.f32 0.35355338, %v5124_v19  ;;  %v5146_v50 = vsel %vm122_vm0, %v5136_v1, -inf }
0x17fc   :  { %v10012_v13 = vpop.f32.mrf.mxu0 }
0x17fd   :  { %v5143_v53 = vsel %vm122_vm0, %v5135_v60, -inf }
0x17fe   :  { %5144 = vmax.xlane.f32.xlu0 %v5143_v53  ;;  %v12246_v29 = vpop.f32.mrf.mxu0 }
0x17ff   :  { %13955 = vst [vmem:[#allocation30_spill] sm:$0xff] %v12246_v29 }
0x1800   :  { %v10015_v45 = vpop.f32.mrf.mxu0 }
0x1802   :  { %5147 = vmax.xlane.f32.xlu0 %v5146_v50 }
0x1881   :  { %v5142_v28 = vpop.xlane.xlu1 %5141 }
0x1882   :  { %v5150_v19 = vsub.f32 %v5134_v55, %v5142_v28 }
0x1883   :  { %v5139_v11 = vpop.xlane.xlu0 %5138 }
0x1884   :  { %v5155_v10 = vmul.f32 1.442695, %v5150_v19  ;;  %v5149_v14 = vsub.f32 %v5133_v16, %v5139_v11 }
0x1886   :  { %10484 = vpow2.f32 %v5155_v10  ;;  %v5153_v53 = vmul.f32 1.442695, %v5149_v14 }
0x1887   :  { %v5145_v52 = vpop.xlane.xlu0 %5144 }
0x1888   :  { %10486 = vpow2.f32 %v5153_v53  ;;  %v5151_v50 = vsub.f32 %v5135_v60, %v5145_v52 }
0x188a   :  { %v5157_v15 = vmul.f32 1.442695, %v5151_v50 }
0x188b   :  { %v5148_v40 = vpop.xlane.xlu0 %5147 }
0x188c   :  { %10488 = vpow2.f32 %v5157_v15  ;;  %v5152_v44 = vsub.f32 %v5136_v1, %v5148_v40  ;;  %v9067_v40 = vld [vmem:[%s13930_s21 + $0x70] sm:$0xff]  ;;  %v12272_v15 = vld [vmem:[%s13847_s5 + $0x28] sm:$0xff] }
0x188e   :  { %v5159_v51 = vmul.f32 1.442695, %v5152_v44 }
0x1890   :  { %10490 = vpow2.f32 %v5159_v51  ;;  %v9064_v51 = vld [vmem:[%s13930_s21 + $0x58] sm:$0xff] }
0x1893   :  { %v10485_v13 = vpop.eup %10484 }
0x1894   :  { %v5164_v49 = vsel %vm122_vm0, %v10485_v13, 0.0 }
0x1895   :  { %v10487_v45 = vpop.eup %10486  ;;  %5165 = vadd.xlane.f32.xlu1 %v5164_v49 }
0x1896   :  { %v5161_v28 = vsel %vm122_vm0, %v10487_v45, 0.0 }
0x1897   :  { %5162 = vadd.xlane.f32.xlu0 %v5161_v28 }
0x1899   :  { %v10489_v55 = vpop.eup %10488 }
0x189a   :  { %v5167_v10 = vsel %vm122_vm0, %v10489_v55, 0.0 }
0x189b   :  { %5168 = vadd.xlane.f32.xlu0 %v5167_v10 }
0x189d   :  { %v10491_v14 = vpop.eup %10490 }
0x189e   :  { %v5170_v52 = vsel %vm122_vm0, %v10491_v14, 0.0 }
0x189f   :  { %5171 = vadd.xlane.f32.xlu1 %v5170_v52 }
0x18b0   :  { %4564 = vperm.xlu1 %10307, %v9064_v51  }
0x18b1   :  { %4579 = vperm.xlu0 %10306, %v9067_v40  }
0x18b4   :  { %5535 = vrot.lane.b32.xlu1 %v12120_v36, %s10883_s4 }
0x18b5   :  { %5539 = vrot.lane.b32.xlu0 %v12132_v9, %s10883_s4 }
0x18b8   :  { %5537 = vrot.lane.b32.xlu1 %v12129_v35, %s10883_s4 }
0x18bc   :  { %5541 = vrot.lane.b32.xlu1 %v12139_v21, %s10883_s4 }
0x191e   :  { %v5166_v49 = vpop.xlane.xlu1 %5165 }
0x191f   :  { %10492 = vrcp.f32 %v5166_v49 }
0x1920   :  { %v5163_v16 = vpop.xlane.xlu0 %5162 }
0x1921   :  { %10494 = vrcp.f32 %v5163_v16 }
0x1924   :  { %v5169_v60 = vpop.xlane.xlu0 %5168 }
0x1925   :  { %10496 = vrcp.f32 %v5169_v60 }
0x1928   :  { %v5172_v1 = vpop.xlane.xlu1 %5171 }
0x1929   :  { %10498 = vrcp.f32 %v5172_v1 }
0x192c   :  { %v12266_v19 = vpop.permute.xlu0 %4579  ;;  %v10493_v11 = vpop.eup %10492 }
0x192d   :  { %v4716_v53 = vadd.f32 %v4715_v8, %v12266_v19  ;;  %v12277_v28 = vpop.permute.xlu1 %4564  ;;  %v12280_v10 = vmul.f32 %v10493_v11, %v10485_v13 }
0x192e   :  { %v10495_v50 = vpop.eup %10494  ;;  %v4701_v52 = vadd.f32 %v12155_v61, %v12277_v28 }
0x192f   :  { %10040 = vmatprep.subr.msk.mxu1 %vm122_vm0, %v4716_v53  ;;  %v12275_v44 = vmul.f32 %v10495_v50, %v10487_v45  ;;  %13957 = vst [vmem:[#allocation32_spill] sm:$0xff] %v12280_v10 }
0x1930   :  { %10041 = vmatpush3.xpose.msk.msra.mxu1 %vm122_vm0, %v4716_v53 }
0x1931   :  { %13956 = vst [vmem:[#allocation31_spill] sm:$0xff] %v12275_v44  ;;  %10042 = vmatprep.mubr.msk.f32.mxu1 %vm122_vm0, %v12275_v44  ;;  %10048 = vmatprep.subr.mxu1 %v12272_v15  ;;  %v5536_v61 = vpop.permute.xlu1 %5535 }
0x1932   :  { %v10497_v8 = vpop.eup %10496 }
0x1933   :  { %10043 = vmatmul.mubr.msk.f32.vlgmr.msra.gmra.mxu1 %vm122_vm0, %v12280_v10  ;;  %v12289_v45 = vmul.f32 %v10497_v8, %v10489_v55 }
0x1934   :  { %10049 = vmatpush3.msra.mxu1 %v12272_v15 }
0x1935   :  { %13958 = vst [vmem:[#allocation33_spill] sm:$0xff] %v12289_v45  ;;  %10045 = vmatprep.mubr.msk.f32.mxu1 %vm122_vm0, %v12289_v45  ;;  %10064 = vmatprep.subr.mxu1 %v4701_v52  ;;  %v5538_v60 = vpop.permute.xlu1 %5537 }
0x1936   :  { %v10499_v13 = vpop.eup %10498 }
0x1937   :  { %v12294_v51 = vmul.f32 %v10499_v13, %v10491_v14  ;;  %v5540_v14 = vpop.permute.xlu0 %5539 }
0x1939   :  { %13959 = vst [vmem:[#allocation34_spill] sm:$0xff] %v12294_v51  ;;  %10046 = vmatmul.mubr.msk.f32.gmra.mxu1 %vm122_vm0, %v12294_v51  ;;  %v5542_v1 = vpop.permute.xlu1 %5541 }
0x19f3   :  { %v10044_v40 = vpop.f32.mrf.mxu1 }
0x19f5   :  { %v5322_v49 = vpop.f32.mrf.mxu1 }
0x19f6   :  { %10050 = vmatprep.mubr.msk.f32.mxu1 %vm448_vm2, %v5322_v49 }
0x19f7   :  { %10051 = vmatmul.mubr.msk.f32.vlgmr.msra.gmra.mxu1 %vm448_vm2, %v10044_v40 }
0x19f8   :  { %10065 = vmatpush3.msra.mxu1 %v4701_v52 }
0x19f9   :  { %v10047_v55 = vpop.f32.mrf.mxu1 }
0x19fb   :  { %v5332_v16 = vpop.f32.mrf.mxu1 }
0x19fc   :  { %10053 = vmatprep.mubr.msk.f32.mxu1 %vm448_vm2, %v5332_v16 }
0x19fd   :  { %10054 = vmatmul.mubr.msk.f32.gmra.mxu1 %vm448_vm2, %v10047_v55 }
0x19fe   :  { %10066 = vmatprep.mubr.msk.f32.mxu1 %vm448_vm2, %v5536_v61 }
0x1a01   :  { %10067 = vmatmul.mubr.msk.f32.vlgmr.msra.gmra.mxu1 %vm448_vm2, %v5538_v60 }
0x1a02   :  { %10069 = vmatprep.mubr.msk.f32.mxu1 %vm448_vm2, %v5540_v14 }
0x1a05   :  { %10070 = vmatmul.mubr.msk.f32.gmra.mxu1 %vm448_vm2, %v5542_v1 }
0x1ab7   :  { %v12306_v11 = vpop.f32.mrf.mxu1 }
0x1ab9   :  { %v12308_v53 = vpop.f32.mrf.mxu1 }
0x1abd   :  { %v12310_v50 = vpop.f32.mrf.mxu1 }
0x1abf   :  { %v12312_v8 = vpop.f32.mrf.mxu1 }
0x1ac1   :  { %v10068_v52 = vpop.f32.mrf.mxu1 }
0x1ac2   :  { %v5637_v13 = vmul.f32 0.35355338, %v10068_v52 }
0x1ac3   :  { %v5617_v40 = vpop.f32.mrf.mxu1 }
0x1ac4   :  { %v5636_v49 = vmul.f32 0.35355338, %v5617_v40  ;;  %v5643_v61 = vsel %vm122_vm0, %v5637_v13, -inf }
0x1ac5   :  { %5644 = vmax.xlane.f32.xlu1 %v5643_v61  ;;  %v10071_v55 = vpop.f32.mrf.mxu1 }
0x1ac6   :  { %v5640_v16 = vsel %vm122_vm0, %v5636_v49, -inf  ;;  %v5639_v1 = vmul.f32 0.35355338, %v10071_v55 }
0x1ac7   :  { %5641 = vmax.xlane.f32.xlu0 %v5640_v16  ;;  %v5627_v60 = vpop.f32.mrf.mxu1 }
0x1ac8   :  { %v5638_v14 = vmul.f32 0.35355338, %v5627_v60  ;;  %v5649_v45 = vsel %vm122_vm0, %v5639_v1, -inf }
0x1aca   :  { %v5646_v51 = vsel %vm122_vm0, %v5638_v14, -inf }
0x1acb   :  { %5647 = vmax.xlane.f32.xlu0 %v5646_v51 }
0x1acf   :  { %5650 = vmax.xlane.f32.xlu0 %v5649_v45 }
0x1b4e   :  { %v5645_v44 = vpop.xlane.xlu1 %5644 }
0x1b4f   :  { %v5653_v52 = vsub.f32 %v5637_v13, %v5645_v44 }
0x1b50   :  { %v5642_v10 = vpop.xlane.xlu0 %5641 }
0x1b51   :  { %v5658_v40 = vmul.f32 1.442695, %v5653_v52  ;;  %v5652_v43 = vsub.f32 %v5636_v49, %v5642_v10 }
0x1b53   :  { %10500 = vpow2.f32 %v5658_v40  ;;  %v5656_v61 = vmul.f32 1.442695, %v5652_v43 }
0x1b54   :  { %v5648_v57 = vpop.xlane.xlu0 %5647 }
0x1b55   :  { %10502 = vpow2.f32 %v5656_v61  ;;  %v5654_v5 = vsub.f32 %v5638_v14, %v5648_v57 }
0x1b57   :  { %v5660_v16 = vmul.f32 1.442695, %v5654_v5  ;;  %v9068_v5 = vld [vmem:[%s13930_s21 + $0x78] sm:$0xff] }
0x1b58   :  { %v5651_v58 = vpop.xlane.xlu0 %5650 }
0x1b59   :  { %10504 = vpow2.f32 %v5660_v16  ;;  %v5655_v55 = vsub.f32 %v5639_v1, %v5651_v58  ;;  %v9065_v58 = vld [vmem:[%s13930_s21 + $0x60] sm:$0xff] }
0x1b5b   :  { %v5662_v60 = vmul.f32 1.442695, %v5655_v55 }
0x1b5d   :  { %10506 = vpow2.f32 %v5662_v60 }
0x1b60   :  { %v10501_v51 = vpop.eup %10500 }
0x1b61   :  { %v5667_v29 = vsel %vm122_vm0, %v10501_v51, 0.0 }
0x1b62   :  { %v10503_v45 = vpop.eup %10502  ;;  %5668 = vadd.xlane.f32.xlu1 %v5667_v29 }
0x1b63   :  { %v5664_v44 = vsel %vm122_vm0, %v10503_v45, 0.0 }
0x1b64   :  { %5665 = vadd.xlane.f32.xlu0 %v5664_v44 }
0x1b66   :  { %v10505_v10 = vpop.eup %10504 }
0x1b67   :  { %v5670_v43 = vsel %vm122_vm0, %v10505_v10, 0.0 }
0x1b68   :  { %5671 = vadd.xlane.f32.xlu0 %v5670_v43  ;;  %v12369_v43 = vld [vmem:[%s13847_s5 + $0x30] sm:$0xff] }
0x1b69   :  { %10080 = vmatprep.subr.mxu1 %v12369_v43 }
0x1b6a   :  { %v10507_v13 = vpop.eup %10506  ;;  %10081 = vmatpush3.msra.mxu1 %v12369_v43 }
0x1b6b   :  { %v5673_v57 = vsel %vm122_vm0, %v10507_v13, 0.0 }
0x1b6c   :  { %5674 = vadd.xlane.f32.xlu1 %v5673_v57 }
0x1b7d   :  { %4569 = vperm.xlu1 %10307, %v9065_v58  }
0x1b7e   :  { %4584 = vperm.xlu0 %10306, %v9068_v5  }
0x1b81   :  { %5945 = vrot.lane.b32.xlu1 %v12120_v36, %s13960_s26 }
0x1b82   :  { %5949 = vrot.lane.b32.xlu0 %v12132_v9, %s13960_s26 }
0x1b85   :  { %5947 = vrot.lane.b32.xlu1 %v12129_v35, %s13960_s26 }
0x1b89   :  { %5951 = vrot.lane.b32.xlu1 %v12139_v21, %s13960_s26 }
0x1beb   :  { %v5669_v29 = vpop.xlane.xlu1 %5668 }
0x1bec   :  { %10508 = vrcp.f32 %v5669_v29 }
0x1bed   :  { %v5666_v49 = vpop.xlane.xlu0 %5665 }
0x1bee   :  { %10510 = vrcp.f32 %v5666_v49 }
0x1bf1   :  { %v5672_v14 = vpop.xlane.xlu0 %5671 }
0x1bf2   :  { %10512 = vrcp.f32 %v5672_v14 }
0x1bf5   :  { %v5675_v1 = vpop.xlane.xlu1 %5674 }
0x1bf6   :  { %10514 = vrcp.f32 %v5675_v1 }
0x1bf9   :  { %v12336_v52 = vpop.permute.xlu1 %4569  ;;  %v12338_v36 = vpop.permute.xlu0 %4584 }
0x1bfa   :  { %v10509_v40 = vpop.eup %10508  ;;  %v4721_v9 = vadd.f32 %v12242_v0, %v12338_v36  ;;  %v4706_v21 = vadd.f32 %v12157_v17, %v12336_v52 }
0x1bfb   :  { %v10511_v35 = vpop.eup %10510  ;;  %v12348_v16 = vmul.f32 %v10509_v40, %v10501_v51 }
0x1bfc   :  { %10072 = vmatprep.subr.msk.mxu0 %vm122_vm0, %v4721_v9  ;;  %v12345_v61 = vmul.f32 %v10511_v35, %v10503_v45 }
0x1bfd   :  { %10073 = vmatpush3.xpose.msk.msra.mxu0 %vm122_vm0, %v4721_v9  ;;  %13962 = vst [vmem:[#allocation36_spill] sm:$0xff] %v12348_v16  ;;  %v5946_v60 = vpop.permute.xlu1 %5945  ;;  %v5950_v44 = vpop.permute.xlu0 %5949 }
0x1bfe   :  { %13961 = vst [vmem:[#allocation35_spill] sm:$0xff] %v12345_v61  ;;  %10074 = vmatprep.mubr.msk.f32.mxu0 %vm122_vm0, %v12345_v61  ;;  %10088 = vmatprep.subr.mxu0 %v4706_v21 }
0x1bff   :  { %v10513_v55 = vpop.eup %10512 }
0x1c00   :  { %10075 = vmatmul.mubr.msk.f32.vlgmr.msra.gmra.mxu0 %vm122_vm0, %v12348_v16  ;;  %v12354_v0 = vmul.f32 %v10513_v55, %v10505_v10 }
0x1c01   :  { %10089 = vmatpush3.msra.mxu0 %v4706_v21  ;;  %v5948_v51 = vpop.permute.xlu1 %5947 }
0x1c02   :  { %13963 = vst [vmem:[#allocation37_spill] sm:$0xff] %v12354_v0  ;;  %10077 = vmatprep.mubr.msk.f32.mxu0 %vm122_vm0, %v12354_v0 }
0x1c03   :  { %v10515_v17 = vpop.eup %10514 }
0x1c04   :  { %v12358_v45 = vmul.f32 %v10515_v17, %v10507_v13  ;;  %v10060_v13 = vpop.f32.mrf.mxu0 }
0x1c05   :  { %v5952_v10 = vpop.permute.xlu1 %5951 }
0x1c06   :  { %13964 = vst [vmem:[#allocation38_spill] sm:$0xff] %v12358_v45  ;;  %10078 = vmatmul.mubr.msk.f32.gmra.mxu0 %vm122_vm0, %v12358_v45  ;;  %v5516_v57 = vpop.f32.mrf.mxu0 }
0x1c07   :  { %10090 = vmatprep.mubr.msk.f32.mxu0 %vm448_vm2, %v5946_v60 }
0x1c08   :  { %v10063_v58 = vpop.f32.mrf.mxu0 }
0x1c0a   :  { %10091 = vmatmul.mubr.msk.f32.vlgmr.msra.gmra.mxu0 %vm448_vm2, %v5948_v51  ;;  %v12373_v5 = vpop.f32.mrf.mxu0 }
0x1c0b   :  { %10093 = vmatprep.mubr.msk.f32.mxu0 %vm448_vm2, %v5950_v44 }
0x1c0e   :  { %10094 = vmatmul.mubr.msk.f32.gmra.mxu0 %vm448_vm2, %v5952_v10 }
0x1cc0   :  { %v10076_v29 = vpop.f32.mrf.mxu0 }
0x1cc2   :  { %v5825_v49 = vpop.f32.mrf.mxu0 }
0x1cc3   :  { %10082 = vmatprep.mubr.msk.f32.mxu1 %vm448_vm2, %v5825_v49 }
0x1cc4   :  { %10083 = vmatmul.mubr.msk.f32.vlgmr.msra.gmra.mxu1 %vm448_vm2, %v10076_v29 }
0x1cc6   :  { %v10079_v14 = vpop.f32.mrf.mxu0 }
0x1cc8   :  { %v5835_v1 = vpop.f32.mrf.mxu0 }
0x1cc9   :  { %10085 = vmatprep.mubr.msk.f32.mxu1 %vm448_vm2, %v5835_v1 }
0x1cca   :  { %10086 = vmatmul.mubr.msk.f32.gmra.mxu1 %vm448_vm2, %v10079_v14  ;;  %v10092_v40 = vpop.f32.mrf.mxu0 }
0x1ccb   :  { %v6047_v9 = vmul.f32 0.35355338, %v10092_v40 }
0x1ccc   :  { %v6027_v35 = vpop.f32.mrf.mxu0 }
0x1ccd   :  { %v6046_v21 = vmul.f32 0.35355338, %v6027_v35  ;;  %v6053_v55 = vsel %vm122_vm0, %v6047_v9, -inf }
0x1cce   :  { %6054 = vmax.xlane.f32.xlu1 %v6053_v55  ;;  %v10095_v60 = vpop.f32.mrf.mxu0 }
0x1ccf   :  { %v6050_v17 = vsel %vm122_vm0, %v6046_v21, -inf  ;;  %v6049_v10 = vmul.f32 0.35355338, %v10095_v60 }
0x1cd0   :  { %6051 = vmax.xlane.f32.xlu0 %v6050_v17  ;;  %v6037_v51 = vpop.f32.mrf.mxu0 }
0x1cd1   :  { %v6048_v44 = vmul.f32 0.35355338, %v6037_v51  ;;  %v6059_v49 = vsel %vm122_vm0, %v6049_v10, -inf }
0x1cd3   :  { %v6056_v29 = vsel %vm122_vm0, %v6048_v44, -inf }
0x1cd4   :  { %6057 = vmax.xlane.f32.xlu0 %v6056_v29 }
0x1cd8   :  { %6060 = vmax.xlane.f32.xlu0 %v6059_v49 }
0x1d57   :  { %v6055_v14 = vpop.xlane.xlu1 %6054 }
0x1d58   :  { %v6063_v1 = vsub.f32 %v6047_v9, %v6055_v14 }
0x1d59   :  { %v6052_v40 = vpop.xlane.xlu0 %6051 }
0x1d5a   :  { %v6068_v35 = vmul.f32 1.442695, %v6063_v1  ;;  %v6062_v45 = vsub.f32 %v6046_v21, %v6052_v40 }
0x1d5c   :  { %10516 = vpow2.f32 %v6068_v35  ;;  %v6066_v55 = vmul.f32 1.442695, %v6062_v45  ;;  %v5532_v35 = vadd.f32 %v10063_v58, %v12310_v50 }
0x1d5d   :  { %v6058_v16 = vpop.xlane.xlu0 %6057 }
0x1d5e   :  { %10518 = vpow2.f32 %v6066_v55  ;;  %v6064_v0 = vsub.f32 %v6048_v44, %v6058_v16  ;;  %v9069_v44 = vld [vmem:[%s13930_s21 + $0x80] sm:$0xff] }
0x1d60   :  { %v6070_v17 = vmul.f32 1.442695, %v6064_v0 }
0x1d61   :  { %v6061_v61 = vpop.xlane.xlu0 %6060 }
0x1d62   :  { %10520 = vpow2.f32 %v6070_v17  ;;  %v6065_v60 = vsub.f32 %v6049_v10, %v6061_v61  ;;  %v5522_v61 = vadd.f32 %v10060_v13, %v12306_v11 }
0x1d64   :  { %v6072_v51 = vmul.f32 1.442695, %v6065_v60 }
0x1d66   :  { %10522 = vpow2.f32 %v6072_v51 }
0x1d69   :  { %v10517_v29 = vpop.eup %10516 }
0x1d6a   :  { %v6077_v62 = vsel %vm122_vm0, %v10517_v29, 0.0 }
0x1d6b   :  { %v10519_v49 = vpop.eup %10518  ;;  %6078 = vadd.xlane.f32.xlu1 %v6077_v62  ;;  %v5517_v62 = vadd.f32 %v5516_v57, %v12308_v53 }
0x1d6c   :  { %v6074_v9 = vsel %vm122_vm0, %v10519_v49, 0.0 }
0x1d6d   :  { %6075 = vadd.xlane.f32.xlu0 %v6074_v9 }
0x1d6f   :  { %v10521_v21 = vpop.eup %10520 }
0x1d70   :  { %v6080_v45 = vsel %vm122_vm0, %v10521_v21, 0.0 }
0x1d71   :  { %6081 = vadd.xlane.f32.xlu0 %v6080_v45 }
0x1d73   :  { %v10523_v14 = vpop.eup %10522 }
0x1d74   :  { %v6083_v16 = vsel %vm122_vm0, %v10523_v14, 0.0 }
0x1d75   :  { %6084 = vadd.xlane.f32.xlu1 %v6083_v16 }
0x1d84   :  { %v10084_v0 = vpop.f32.mrf.mxu1 }
0x1d85   :  { %v12392_v10 = vadd.f32 %v10084_v0, %v5522_v61 }
0x1d86   :  { %v5922_v1 = vpop.f32.mrf.mxu1 }
0x1d87   :  { %v12394_v40 = vadd.f32 %v5922_v1, %v5517_v62  ;;  %4589 = vperm.xlu0 %10306, %v9069_v44  }
0x1d8a   :  { %v10087_v55 = vpop.f32.mrf.mxu1 }
0x1d8b   :  { %v12397_v17 = vadd.f32 %v10087_v55, %v5532_v35 }
0x1df4   :  { %v6079_v60 = vpop.xlane.xlu1 %6078 }
0x1df5   :  { %10524 = vrcp.f32 %v6079_v60 }
0x1df6   :  { %v6076_v11 = vpop.xlane.xlu0 %6075 }
0x1df7   :  { %10526 = vrcp.f32 %v6076_v11 }
0x1dfa   :  { %v6082_v13 = vpop.xlane.xlu0 %6081 }
0x1dfb   :  { %10528 = vrcp.f32 %v6082_v13 }
0x1dfe   :  { %v6085_v51 = vpop.xlane.xlu1 %6084 }
0x1dff   :  { %10530 = vrcp.f32 %v6085_v51 }
0x1e02   :  { %v12399_v53 = vpop.permute.xlu0 %4589  ;;  %v10525_v57 = vpop.eup %10524 }
0x1e03   :  { %v4726_v9 = vadd.f32 %v12244_v22, %v12399_v53  ;;  %v12407_v58 = vmul.f32 %v10525_v57, %v10517_v29 }
0x1e04   :  { %v10527_v45 = vpop.eup %10526 }
0x1e05   :  { %10096 = vmatprep.subr.msk.mxu1 %vm122_vm0, %v4726_v9  ;;  %v12404_v50 = vmul.f32 %v10527_v45, %v10519_v49  ;;  %13966 = vst [vmem:[#allocation40_spill] sm:$0xff] %v12407_v58  ;;  %v10812_v49 = vld [vmem:[%s13931_s25 + $0x48] sm:$0xff] }
0x1e06   :  { %10097 = vmatpush3.xpose.msk.msra.mxu1 %vm122_vm0, %v4726_v9 }
0x1e07   :  { %13965 = vst [vmem:[#allocation39_spill] sm:$0xff] %v12404_v50  ;;  %10098 = vmatprep.mubr.msk.f32.mxu1 %vm122_vm0, %v12404_v50  ;;  %10112 = vmatprep.subr.mxu1 %v13954_v24 }
0x1e08   :  { %v10529_v16 = vpop.eup %10528 }
0x1e09   :  { %10099 = vmatmul.mubr.msk.f32.vlgmr.msra.gmra.mxu1 %vm122_vm0, %v12407_v58  ;;  %v12414_v61 = vmul.f32 %v10529_v16, %v10521_v21 }
0x1e0a   :  { %10113 = vmatpush3.xpose.msk.msra.mxu1 %vm122_vm0, %v12117_v30 }
0x1e0b   :  { %13967 = vst [vmem:[#allocation41_spill] sm:$0xff] %v12414_v61  ;;  %10101 = vmatprep.mubr.msk.f32.mxu1 %vm122_vm0, %v12414_v61  ;;  %10114 = vmatprep.subr.mxu1 %v13954_v24 }
0x1e0c   :  { %v10531_v22 = vpop.eup %10530 }
0x1e0d   :  { %v12421_v29 = vmul.f32 %v10531_v22, %v10523_v14  ;;  %v12491_v14 = vadd.f32 %v12143_v32, %v12114_v46  ;;  %v5527_v22 = vadd.f32 %v12373_v5, %v12312_v8 }
0x1e0e   :  { %10115 = vmatpush3.xpose.msk.msra.mxu1 %vm122_vm0, %v12109_v31 }
0x1e0f   :  { %13968 = vst [vmem:[#allocation42_spill] sm:$0xff] %v12421_v29  ;;  %10102 = vmatmul.mubr.msk.f32.gmra.mxu1 %vm122_vm0, %v12421_v29  ;;  %10116 = vmatprep.subr.mxu1 %v13954_v24 }
0x1e10   :  { %10120 = vmatprep.mubr.msk.f32.mxu1 %vm10881_vm1, %v13954_v24 }
0x1e12   :  { %10117 = vmatpush3.xpose.msk.msra.mxu1 %vm122_vm0, %v12100_v48 }
0x1e13   :  { %10118 = vmatprep.subr.mxu1 %v13954_v24 }
0x1e16   :  { %10119 = vmatpush3.xpose.msk.msra.mxu1 %vm122_vm0, %v12097_v6 }
0x1e19   :  { %10121 = vmatmul.mubr.msk.f32.vlgmr.msra.gmra.mxu1 %vm122_vm0, %v10812_v49 }
0x1e1a   :  { %10123 = vmatprep.mubr.msk.f32.mxu1 %vm10881_vm1, %v13954_v24 }
0x1e1d   :  { %10124 = vmatmul.mubr.msk.f32.gmra.mxu1 %vm122_vm0, %v12058_v7  ;;  %v12474_v7 = vld [vmem:[%s13847_s5 + $0x38] sm:$0xff] }
0x1e1e   :  { %10126 = vmatprep.mubr.msk.f32.mxu1 %vm10881_vm1, %v13954_v24  ;;  %10104 = vmatprep.subr.mxu0 %v12474_v7 }
0x1e1f   :  { %10105 = vmatpush3.msra.mxu0 %v12474_v7 }
0x1e21   :  { %10127 = vmatmul.mubr.msk.f32.gmra.mxu1 %vm122_vm0, %v12067_v59  ;;  %v5932_v59 = vpop.f32.mrf.mxu1 }
0x1e22   :  { %10129 = vmatprep.mubr.msk.f32.mxu1 %vm10881_vm1, %v13954_v24 }
0x1e25   :  { %10130 = vmatmul.mubr.msk.f32.gmra.mxu1 %vm122_vm0, %v12076_v20 }
0x1e26   :  { %10132 = vmatprep.mubr.msk.f32.mxu1 %vm10881_vm1, %v13954_v24 }
0x1e29   :  { %10133 = vmatmul.mubr.msk.f32.gmra.mxu1 %vm122_vm0, %v12085_v4 }
0x1e2a   :  { %10135 = vmatprep.mubr.msk.f32.mxu1 %vm10881_vm1, %v13954_v24 }
0x1e2d   :  { %10136 = vmatmul.mubr.msk.f32.gmra.mxu1 %vm122_vm0, %v12188_v39 }
0x1e2e   :  { %10138 = vmatprep.mubr.msk.f32.mxu1 %vm10881_vm1, %v13954_v24 }
0x1e31   :  { %10139 = vmatmul.mubr.msk.f32.gmra.mxu1 %vm122_vm0, %v12197_v18  ;;  %v12482_v18 = vadd.f32 %v12114_v46, %v12145_v27  ;;  %v12495_v27 = vadd.f32 %v12114_v46, %v12149_v42 }
0x1e32   :  { %10141 = vmatprep.mubr.msk.f32.mxu1 %vm10881_vm1, %v13954_v24 }
0x1e35   :  { %10142 = vmatmul.mubr.msk.f32.gmra.mxu1 %vm122_vm0, %v12206_v37 }
0x1e36   :  { %10144 = vmatprep.mubr.msk.f32.mxu1 %vm10881_vm1, %v13954_v24 }
0x1e39   :  { %10145 = vmatmul.mubr.msk.f32.gmra.mxu1 %vm122_vm0, %v12215_v23 }
0x1ec9   :  { %v10100_v20 = vpop.f32.mrf.mxu1 }
0x1ecb   :  { %v6235_v4 = vpop.f32.mrf.mxu1 }
0x1ecc   :  { %10106 = vmatprep.mubr.msk.f32.mxu0 %vm448_vm2, %v6235_v4 }
0x1ecd   :  { %10107 = vmatmul.mubr.msk.f32.vlgmr.msra.gmra.mxu0 %vm448_vm2, %v10100_v20  ;;  %v5943_v20 = vadd.f32 %v5932_v59, %v5527_v22 }
0x1ecf   :  { %v10103_v24 = vpop.f32.mrf.mxu1 }
0x1ed1   :  { %v6245_v39 = vpop.f32.mrf.mxu1 }
0x1ed2   :  { %10109 = vmatprep.mubr.msk.f32.mxu0 %vm448_vm2, %v6245_v39 }
0x1ed3   :  { %10110 = vmatmul.mubr.msk.f32.gmra.mxu0 %vm448_vm2, %v10103_v24 }
0x1ed4   :  { %10149 = vmatprep.mubr.msk.f32.mxu0 %vm448_vm2, %v12482_v18 }
0x1ed9   :  { %v6421_v37 = vpop.f32.mrf.mxu1 }
0x1eda   :  { %v6422_v23 = vadd.f32 %v6421_v37, %v12091_v25  ;;  %v12503_v25 = vadd.f32 %v12147_v33, %v12114_v46 }
0x1edb   :  { %v10122_v21 = vpop.f32.mrf.mxu1 }
0x1edc   :  { %10147 = vmatprep.subr.mxu0 %v6422_v23 }
0x1edd   :  { %v6426_v0 = vpop.f32.mrf.mxu1  ;;  %10148 = vmatpush3.msra.mxu0 %v6422_v23 }
0x1ede   :  { %10150 = vmatmul.mubr.msk.f32.vlgmr.msra.gmra.mxu0 %vm448_vm2, %v12491_v14  ;;  %v12513_v46 = vadd.f32 %v6426_v0, %v12172_v38 }
0x1edf   :  { %v10125_v44 = vpop.f32.mrf.mxu1  ;;  %10152 = vmatprep.mubr.msk.f32.mxu0 %vm448_vm2, %v12495_v27 }
0x1ee1   :  { %v6431_v32 = vpop.f32.mrf.mxu1 }
0x1ee2   :  { %v6432_v62 = vadd.f32 %v6431_v32, %v12277_v28  ;;  %10153 = vmatmul.mubr.msk.f32.gmra.mxu0 %vm448_vm2, %v12503_v25 }
0x1ee3   :  { %v10128_v42 = vpop.f32.mrf.mxu1 }
0x1ee4   :  { %10195 = vmatprep.subr.mxu1 %v6432_v62 }
0x1ee5   :  { %v12508_v1 = vpop.f32.mrf.mxu1  ;;  %10196 = vmatpush3.msra.mxu1 %v6432_v62 }
0x1ee6   :  { %10211 = vmatprep.subr.mxu1 %v12369_v43 }
0x1ee7   :  { %v10131_v35 = vpop.f32.mrf.mxu1 }
0x1ee9   :  { %v6441_v55 = vpop.f32.mrf.mxu1 }
0x1eea   :  { %v6442_v60 = vadd.f32 %v6441_v55, %v12166_v56 }
0x1eeb   :  { %v10134_v11 = vpop.f32.mrf.mxu1 }
0x1eec   :  { %10155 = vmatprep.subr.msk.mxu0 %vm122_vm0, %v6442_v60 }
0x1eed   :  { %v12516_v33 = vpop.f32.mrf.mxu1  ;;  %10156 = vmatpush3.xpose.msk.msra.mxu0 %vm122_vm0, %v6442_v60 }
0x1eee   :  { %10163 = vmatprep.subr.mxu0 %v12513_v46 }
0x1eef   :  { %v10137_v28 = vpop.f32.mrf.mxu1 }
0x1ef1   :  { %v12520_v13 = vpop.f32.mrf.mxu1 }
0x1ef3   :  { %v10140_v51 = vpop.f32.mrf.mxu1 }
0x1ef5   :  { %v12522_v57 = vpop.f32.mrf.mxu1 }
0x1ef7   :  { %v10143_v9 = vpop.f32.mrf.mxu1 }
0x1f8d   :  { %v10108_v56 = vpop.f32.mrf.mxu0 }
0x1f8e   :  { %v12525_v45 = vadd.f32 %v10108_v56, %v12392_v10 }
0x1f8f   :  { %v6332_v38 = vpop.f32.mrf.mxu0 }
0x1f90   :  { %v12528_v16 = vadd.f32 %v6332_v38, %v12394_v40 }
0x1f93   :  { %v10111_v49 = vpop.f32.mrf.mxu0 }
0x1f94   :  { %v12533_v4 = vadd.f32 %v10111_v49, %v12397_v17 }
0x1f95   :  { %v6342_v24 = vpop.f32.mrf.mxu0 }
0x1f96   :  { %v12535_v39 = vadd.f32 %v6342_v24, %v5943_v20 }
0x1f9e   :  { %v10151_v37 = vpop.f32.mrf.mxu0 }
0x1f9f   :  { %v6577_v23 = vmul.f32 0.35355338, %v10151_v37 }
0x1fa0   :  { %v6557_v21 = vpop.f32.mrf.mxu0 }
0x1fa1   :  { %v6576_v10 = vmul.f32 0.35355338, %v6557_v21  ;;  %v6583_v0 = vsel %vm122_vm0, %v6577_v23, -inf }
0x1fa2   :  { %6584 = vmax.xlane.f32.xlu1 %v6583_v0  ;;  %v10154_v40 = vpop.f32.mrf.mxu0 }
0x1fa3   :  { %v6580_v8 = vsel %vm122_vm0, %v6576_v10, -inf  ;;  %v6579_v5 = vmul.f32 0.35355338, %v10154_v40 }
0x1fa4   :  { %v6567_v44 = vpop.f32.mrf.mxu0 }
0x1fa5   :  { %v6578_v32 = vmul.f32 0.35355338, %v6567_v44  ;;  %v6589_v59 = vsel %vm122_vm0, %v6579_v5, -inf }
0x1fa6   :  { %6581 = vmax.xlane.f32.xlu1 %v6580_v8 }
0x1fa7   :  { %v6586_v17 = vsel %vm122_vm0, %v6578_v32, -inf }
0x1faa   :  { %6587 = vmax.xlane.f32.xlu1 %v6586_v17 }
0x1fae   :  { %6590 = vmax.xlane.f32.xlu1 %v6589_v59 }
0x202b   :  { %v6585_v62 = vpop.xlane.xlu1 %6584 }
0x202c   :  { %v6593_v42 = vsub.f32 %v6577_v23, %v6585_v62 }
0x202e   :  { %v6598_v35 = vmul.f32 1.442695, %v6593_v42 }
0x202f   :  { %v6582_v55 = vpop.xlane.xlu1 %6581 }
0x2030   :  { %10532 = vpow2.f32 %v6598_v35  ;;  %v6592_v60 = vsub.f32 %v6576_v10, %v6582_v55 }
0x2032   :  { %v6596_v11 = vmul.f32 1.442695, %v6592_v60  ;;  %v6447_v60 = vadd.f32 %v12516_v33, %v12266_v19 }
0x2033   :  { %v6588_v28 = vpop.xlane.xlu1 %6587 }
0x2034   :  { %10534 = vpow2.f32 %v6596_v11  ;;  %v6594_v51 = vsub.f32 %v6578_v32, %v6588_v28 }
0x2036   :  { %v6600_v9 = vmul.f32 1.442695, %v6594_v51 }
0x2037   :  { %v6591_v56 = vpop.xlane.xlu1 %6590 }
0x2038   :  { %10536 = vpow2.f32 %v6600_v9  ;;  %v6595_v38 = vsub.f32 %v6579_v5, %v6591_v56 }
0x203a   :  { %v6602_v22 = vmul.f32 1.442695, %v6595_v38 }
0x203c   :  { %10538 = vpow2.f32 %v6602_v22 }
0x203d   :  { %v10533_v49 = vpop.eup %10532 }
0x203e   :  { %v6607_v20 = vsel %vm122_vm0, %v10533_v49, 0.0 }
0x203f   :  { %6608 = vadd.xlane.f32.xlu1 %v6607_v20 }
0x2041   :  { %v10535_v24 = vpop.eup %10534 }
0x2042   :  { %v6604_v37 = vsel %vm122_vm0, %v10535_v24, 0.0 }
0x2043   :  { %6605 = vadd.xlane.f32.xlu1 %v6604_v37 }
0x2045   :  { %v10537_v23 = vpop.eup %10536 }
0x2046   :  { %v6610_v21 = vsel %vm122_vm0, %v10537_v23, 0.0 }
0x2047   :  { %6611 = vadd.xlane.f32.xlu0 %v6610_v21 }
0x2049   :  { %v10539_v10 = vpop.eup %10538 }
0x204a   :  { %v6613_v0 = vsel %vm122_vm0, %v10539_v10, 0.0 }
0x204b   :  { %6614 = vadd.xlane.f32.xlu1 %v6613_v0 }
0x205c   :  { %6763 = vrot.lane.b32.xlu1 %v12482_v18, %s10882_s28 }
0x205d   :  { %6769 = vrot.lane.b32.xlu0 %v12503_v25, %s10882_s28 }
0x2060   :  { %6765 = vrot.lane.b32.xlu1 %v12491_v14, %s10882_s28 }
0x2064   :  { %6767 = vrot.lane.b32.xlu1 %v12495_v27, %s10882_s28  ;;  %s10885_s28 = smov 32  }
0x2068   :  { %7266 = vrot.lane.b32.xlu1 %v12482_v18, %s10883_s4 }
0x206c   :  { %7268 = vrot.lane.b32.xlu1 %v12491_v14, %s10883_s4 }
0x2070   :  { %7270 = vrot.lane.b32.xlu1 %v12495_v27, %s10883_s4 }
0x2074   :  { %7272 = vrot.lane.b32.xlu1 %v12503_v25, %s10883_s4  ;;  %s10887_s4 = smov 96  }
0x20c8   :  { %v6609_v40 = vpop.xlane.xlu1 %6608 }
0x20c9   :  { %10540 = vrcp.f32 %v6609_v40 }
0x20cc   :  { %v6606_v44 = vpop.xlane.xlu1 %6605 }
0x20cd   :  { %10542 = vrcp.f32 %v6606_v44 }
0x20d0   :  { %v6612_v32 = vpop.xlane.xlu0 %6611 }
0x20d1   :  { %10544 = vrcp.f32 %v6612_v32 }
0x20d4   :  { %v6615_v8 = vpop.xlane.xlu1 %6614  ;;  %v6770_v33 = vpop.permute.xlu0 %6769 }
0x20d5   :  { %10546 = vrcp.f32 %v6615_v8 }
0x20d6   :  { %v10541_v5 = vpop.eup %10540 }
0x20d7   :  { %v6619_v17 = vmul.f32 %v10541_v5, %v10533_v49 }
0x20d8   :  { %v6764_v59 = vpop.permute.xlu1 %6763 }
0x20d9   :  { %6655 = vst.msk [vmem:[#allocation2 + $0x68] sm:$0xff] %vm122_vm0, %v6619_v17 }
0x20da   :  { %v10543_v62 = vpop.eup %10542 }
0x20db   :  { %v6617_v42 = vmul.f32 %v10543_v62, %v10535_v24 }
0x20dc   :  { %v6766_v35 = vpop.permute.xlu1 %6765 }
0x20dd   :  { %10157 = vmatprep.mubr.msk.f32.mxu0 %vm122_vm0, %v6617_v42  ;;  %6654 = vst.msk [vmem:[#allocation2 + $0x60] sm:$0xff] %vm122_vm0, %v6617_v42 }
0x20de   :  { %v10545_v55 = vpop.eup %10544  ;;  %10158 = vmatmul.mubr.msk.f32.vlgmr.msra.gmra.mxu0 %vm122_vm0, %v6619_v17 }
0x20df   :  { %10164 = vmatpush3.msra.mxu0 %v12513_v46  ;;  %v6621_v11 = vmul.f32 %v10545_v55, %v10537_v23  ;;  %v12577_v46 = vadd.f32 %v12522_v57, %v12399_v53  ;;  %v12590_v57 = vpop.f32.mrf.mxu1 }
0x20e0   :  { %10171 = vmatprep.subr.msk.mxu0 %vm122_vm0, %v6447_v60  ;;  %v6768_v28 = vpop.permute.xlu1 %6767 }
0x20e1   :  { %10160 = vmatprep.mubr.msk.f32.mxu0 %vm122_vm0, %v6621_v11  ;;  %6656 = vst.msk [vmem:[#allocation2 + $0x70] sm:$0xff] %vm122_vm0, %v6621_v11  ;;  %v10146_v22 = vpop.f32.mrf.mxu1 }
0x20e2   :  { %v10547_v51 = vpop.eup %10546 }
0x20e3   :  { %v6623_v9 = vmul.f32 %v10547_v51, %v10539_v10 }
0x20e4   :  { %v7267_v56 = vpop.permute.xlu1 %7266 }
0x20e5   :  { %10161 = vmatmul.mubr.msk.f32.gmra.mxu0 %vm122_vm0, %v6623_v9  ;;  %6657 = vst.msk [vmem:[#allocation2 + $0x78] sm:$0xff] %vm122_vm0, %v6623_v9  ;;  %10197 = vmatprep.mubr.msk.f32.mxu1 %vm448_vm2, %v7267_v56 }
0x20e6   :  { %10165 = vmatprep.mubr.msk.f32.mxu0 %vm448_vm2, %v6764_v59 }
0x20e8   :  { %v7269_v19 = vpop.permute.xlu1 %7268 }
0x20e9   :  { %10166 = vmatmul.mubr.msk.f32.vlgmr.msra.gmra.mxu0 %vm448_vm2, %v6766_v35  ;;  %10198 = vmatmul.mubr.msk.f32.vlgmr.msra.gmra.mxu1 %vm448_vm2, %v7269_v19 }
0x20ea   :  { %10172 = vmatpush3.xpose.msk.msra.mxu0 %vm122_vm0, %v6447_v60  ;;  %10212 = vmatpush3.msra.mxu1 %v12369_v43 }
0x20eb   :  { %10168 = vmatprep.mubr.msk.f32.mxu0 %vm448_vm2, %v6768_v28  ;;  %10227 = vmatprep.subr.msk.mxu1 %vm122_vm0, %v12577_v46 }
0x20ec   :  { %v7271_v38 = vpop.permute.xlu1 %7270  ;;  %10179 = vmatprep.subr.mxu0 %v12272_v15 }
0x20ed   :  { %10169 = vmatmul.mubr.msk.f32.gmra.mxu0 %vm448_vm2, %v6770_v33  ;;  %10200 = vmatprep.mubr.msk.f32.mxu1 %vm448_vm2, %v7271_v38 }
0x20f0   :  { %v7273_v53 = vpop.permute.xlu1 %7272 }
0x20f1   :  { %10201 = vmatmul.mubr.msk.f32.gmra.mxu1 %vm448_vm2, %v7273_v53 }
0x219e   :  { %v12592_v43 = vpop.f32.mrf.mxu0 }
0x21a0   :  { %v12594_v49 = vpop.f32.mrf.mxu0 }
0x21a5   :  { %v12596_v20 = vpop.f32.mrf.mxu0 }
0x21a7   :  { %v12598_v24 = vpop.f32.mrf.mxu0 }
0x21a9   :  { %v10167_v37 = vpop.f32.mrf.mxu0  ;;  %v10199_v38 = vpop.f32.mrf.mxu1 }
0x21aa   :  { %v6865_v23 = vmul.f32 0.35355338, %v10167_v37 }
0x21ab   :  { %v6845_v21 = vpop.f32.mrf.mxu0 }
0x21ac   :  { %v6864_v10 = vmul.f32 0.35355338, %v6845_v21  ;;  %v6871_v0 = vsel %vm122_vm0, %v6865_v23, -inf }
0x21ad   :  { %6872 = vmax.xlane.f32.xlu0 %v6871_v0  ;;  %v10170_v40 = vpop.f32.mrf.mxu0 }
0x21ae   :  { %v6867_v44 = vmul.f32 0.35355338, %v10170_v40  ;;  %v6868_v32 = vsel %vm122_vm0, %v6864_v10, -inf  ;;  %v7368_v40 = vmul.f32 0.35355338, %v10199_v38 }
0x21af   :  { %6869 = vmax.xlane.f32.xlu1 %v6868_v32  ;;  %v6855_v8 = vpop.f32.mrf.mxu0 }
0x21b0   :  { %v6866_v5 = vmul.f32 0.35355338, %v6855_v8  ;;  %v6877_v17 = vsel %vm122_vm0, %v6867_v44, -inf }
0x21b1   :  { %6878 = vmax.xlane.f32.xlu0 %v6877_v17 }
0x21b2   :  { %v6874_v59 = vsel %vm122_vm0, %v6866_v5, -inf }
0x21b3   :  { %6875 = vmax.xlane.f32.xlu1 %v6874_v59 }
0x2236   :  { %v6873_v62 = vpop.xlane.xlu0 %6872 }
0x2237   :  { %v6881_v42 = vsub.f32 %v6865_v23, %v6873_v62  ;;  %v7348_v23 = vpop.f32.mrf.mxu1  ;;  %v7374_v62 = vsel %vm122_vm0, %v7368_v40, -inf }
0x2238   :  { %v6870_v35 = vpop.xlane.xlu1 %6869  ;;  %v7367_v8 = vmul.f32 0.35355338, %v7348_v23 }
0x2239   :  { %v6886_v55 = vmul.f32 1.442695, %v6881_v42  ;;  %v6880_v60 = vsub.f32 %v6864_v10, %v6870_v35  ;;  %v10202_v0 = vpop.f32.mrf.mxu1 }
0x223a   :  { %v6879_v11 = vpop.xlane.xlu0 %6878  ;;  %v7370_v59 = vmul.f32 0.35355338, %v10202_v0  ;;  %v7371_v35 = vsel %vm122_vm0, %v7367_v8, -inf }
0x223b   :  { %10548 = vpow2.f32 %v6886_v55  ;;  %v6884_v28 = vmul.f32 1.442695, %v6880_v60  ;;  %v6883_v51 = vsub.f32 %v6867_v44, %v6879_v11  ;;  %v7358_v17 = vpop.f32.mrf.mxu1 }
0x223c   :  { %v6876_v9 = vpop.xlane.xlu1 %6875  ;;  %v7369_v42 = vmul.f32 0.35355338, %v7358_v17  ;;  %v7380_v55 = vsel %vm122_vm0, %v7370_v59, -inf }
0x223d   :  { %10550 = vpow2.f32 %v6884_v28  ;;  %v6890_v56 = vmul.f32 1.442695, %v6883_v51  ;;  %v6882_v19 = vsub.f32 %v6866_v5, %v6876_v9 }
0x223e   :  { %v7377_v60 = vsel %vm122_vm0, %v7369_v42, -inf }
0x223f   :  { %10552 = vpow2.f32 %v6890_v56  ;;  %v6888_v33 = vmul.f32 1.442695, %v6882_v19 }
0x2241   :  { %10554 = vpow2.f32 %v6888_v33 }
0x2248   :  { %v10549_v53 = vpop.eup %10548 }
0x2249   :  { %v6895_v22 = vsel %vm122_vm0, %v10549_v53, 0.0 }
0x224a   :  { %v10551_v37 = vpop.eup %10550  ;;  %6896 = vadd.xlane.f32.xlu0 %v6895_v22 }
0x224b   :  { %v6892_v21 = vsel %vm122_vm0, %v10551_v37, 0.0 }
0x224c   :  { %v10553_v10 = vpop.eup %10552  ;;  %6893 = vadd.xlane.f32.xlu1 %v6892_v21 }
0x224d   :  { %v6901_v44 = vsel %vm122_vm0, %v10553_v10, 0.0 }
0x224e   :  { %v10555_v32 = vpop.eup %10554  ;;  %6902 = vadd.xlane.f32.xlu0 %v6901_v44 }
0x224f   :  { %v6898_v5 = vsel %vm122_vm0, %v10555_v32, 0.0 }
0x2250   :  { %6899 = vadd.xlane.f32.xlu1 %v6898_v5 }
0x2252   :  { %7375 = vmax.xlane.f32.xlu0 %v7374_v62 }
0x2254   :  { %7372 = vmax.xlane.f32.xlu1 %v7371_v35 }
0x2256   :  { %7381 = vmax.xlane.f32.xlu0 %v7380_v55 }
0x2258   :  { %7378 = vmax.xlane.f32.xlu1 %v7377_v60 }
0x22d3   :  { %v6897_v11 = vpop.xlane.xlu0 %6896 }
0x22d4   :  { %10556 = vrcp.f32 %v6897_v11 }
0x22d5   :  { %v6894_v28 = vpop.xlane.xlu1 %6893 }
0x22d6   :  { %10558 = vrcp.f32 %v6894_v28 }
0x22d7   :  { %v6903_v51 = vpop.xlane.xlu0 %6902 }
0x22d8   :  { %10560 = vrcp.f32 %v6903_v51 }
0x22d9   :  { %v6900_v9 = vpop.xlane.xlu1 %6899 }
0x22da   :  { %10562 = vrcp.f32 %v6900_v9 }
0x22db   :  { %v7376_v56 = vpop.xlane.xlu0 %7375 }
0x22dc   :  { %v7384_v19 = vsub.f32 %v7368_v40, %v7376_v56 }
0x22dd   :  { %v7373_v33 = vpop.xlane.xlu1 %7372 }
0x22de   :  { %v7389_v38 = vmul.f32 1.442695, %v7384_v19  ;;  %v7383_v22 = vsub.f32 %v7367_v8, %v7373_v33 }
0x22df   :  { %v7382_v23 = vpop.xlane.xlu0 %7381 }
0x22e0   :  { %10564 = vpow2.f32 %v7389_v38  ;;  %v7387_v21 = vmul.f32 1.442695, %v7383_v22  ;;  %v7386_v0 = vsub.f32 %v7370_v59, %v7382_v23 }
0x22e1   :  { %v7379_v44 = vpop.xlane.xlu1 %7378  ;;  %v10557_v5 = vpop.eup %10556 }
0x22e2   :  { %10566 = vpow2.f32 %v7387_v21  ;;  %v7393_v17 = vmul.f32 1.442695, %v7386_v0  ;;  %v7385_v62 = vsub.f32 %v7369_v42, %v7379_v44  ;;  %v12614_v11 = vmul.f32 %v10557_v5, %v10549_v53  ;;  %v10813_v53 = vld [vmem:[%s13847_s5 + $0x20] sm:$0xff] }
0x22e3   :  { %v10559_v35 = vpop.eup %10558  ;;  %v6437_v0 = vadd.f32 %v12508_v1, %v12336_v52 }
0x22e4   :  { %10568 = vpow2.f32 %v7393_v17  ;;  %v7391_v55 = vmul.f32 1.442695, %v7385_v62  ;;  %v12612_v60 = vmul.f32 %v10559_v35, %v10551_v37  ;;  %13970 = vst [vmem:[#allocation44_spill] sm:$0xff] %v12614_v11 }
0x22e5   :  { %v10561_v40 = vpop.eup %10560 }
0x22e6   :  { %13969 = vst [vmem:[#allocation43_spill] sm:$0xff] %v12612_v60  ;;  %10570 = vpow2.f32 %v7391_v55  ;;  %10173 = vmatprep.mubr.msk.f32.mxu0 %vm122_vm0, %v12612_v60  ;;  %v12623_v42 = vmul.f32 %v10561_v40, %v10553_v10  ;;  %v13996_v60 = vld [vmem:[#allocation12_spill] sm:$0xff] }
0x22e7   :  { %v10563_v8 = vpop.eup %10562  ;;  %10174 = vmatmul.mubr.msk.f32.vlgmr.msra.gmra.mxu0 %vm122_vm0, %v12614_v11 }
0x22e8   :  { %v12620_v59 = vmul.f32 %v10563_v8, %v10555_v32  ;;  %10180 = vmatpush3.msra.mxu0 %v12272_v15  ;;  %13972 = vst [vmem:[#allocation46_spill] sm:$0xff] %v12623_v42 }
0x22e9   :  { %10187 = vmatprep.subr.mxu0 %v10813_v53 }
0x22ea   :  { %13971 = vst [vmem:[#allocation45_spill] sm:$0xff] %v12620_v59  ;;  %10176 = vmatprep.mubr.msk.f32.mxu0 %vm122_vm0, %v12620_v59 }
0x22eb   :  { %10177 = vmatmul.mubr.msk.f32.gmra.mxu0 %vm122_vm0, %v12623_v42 }
0x22ed   :  { %v10565_v37 = vpop.eup %10564 }
0x22ee   :  { %v7398_v28 = vsel %vm122_vm0, %v10565_v37, 0.0 }
0x22ef   :  { %v10567_v32 = vpop.eup %10566  ;;  %7399 = vadd.xlane.f32.xlu0 %v7398_v28 }
0x22f0   :  { %v7395_v15 = vsel %vm122_vm0, %v10567_v32, 0.0 }
0x22f1   :  { %v10569_v10 = vpop.eup %10568  ;;  %7396 = vadd.xlane.f32.xlu1 %v7395_v15 }
0x22f2   :  { %v7404_v51 = vsel %vm122_vm0, %v10569_v10, 0.0 }
0x22f3   :  { %v10571_v9 = vpop.eup %10570  ;;  %7405 = vadd.xlane.f32.xlu0 %v7404_v51 }
0x22f4   :  { %v7401_v56 = vsel %vm122_vm0, %v10571_v9, 0.0 }
0x22f5   :  { %7402 = vadd.xlane.f32.xlu1 %v7401_v56 }
0x2306   :  { %7676 = vrot.lane.b32.xlu1 %v12482_v18, %s13960_s26  ;;  %v6452_v18 = vadd.f32 %v12520_v13, %v12338_v36 }
0x2309   :  { %7678 = vrot.lane.b32.xlu0 %v12491_v14, %s13960_s26 }
0x230a   :  { %7680 = vrot.lane.b32.xlu1 %v12495_v27, %s13960_s26 }
0x230e   :  { %7682 = vrot.lane.b32.xlu1 %v12503_v25, %s13960_s26 }
0x2378   :  { %v7400_v33 = vpop.xlane.xlu0 %7399 }
0x237a   :  { %v7397_v19 = vpop.xlane.xlu1 %7396 }
0x237b   :  { %10572 = vrcp.f32 %v7397_v19 }
0x237c   :  { %10574 = vrcp.f32 %v7400_v33  ;;  %v7406_v21 = vpop.xlane.xlu0 %7405 }
0x237e   :  { %v7403_v38 = vpop.xlane.xlu1 %7402 }
0x237f   :  { %10576 = vrcp.f32 %v7403_v38 }
0x2380   :  { %10578 = vrcp.f32 %v7406_v21  ;;  %v7679_v5 = vpop.permute.xlu0 %7678 }
0x2388   :  { %v10573_v25 = vpop.eup %10572 }
0x2389   :  { %v10575_v36 = vpop.eup %10574  ;;  %v12660_v13 = vmul.f32 %v10573_v25, %v10567_v32 }
0x238a   :  { %v12666_v52 = vmul.f32 %v10575_v36, %v10565_v37 }
0x238b   :  { %13973 = vst [vmem:[#allocation47_spill] sm:$0xff] %v12660_v13 }
0x238c   :  { %v10577_v44 = vpop.eup %10576  ;;  %13974 = vst [vmem:[#allocation48_spill] sm:$0xff] %v12666_v52 }
0x238d   :  { %v10579_v1 = vpop.eup %10578 }
0x23a7   :  { %v10175_v22 = vpop.f32.mrf.mxu0 }
0x23a9   :  { %v7053_v23 = vpop.f32.mrf.mxu0 }
0x23aa   :  { %10181 = vmatprep.mubr.msk.f32.mxu0 %vm448_vm2, %v7053_v23 }
0x23ab   :  { %v10178_v14 = vpop.f32.mrf.mxu0  ;;  %10182 = vmatmul.mubr.msk.f32.vlgmr.msra.gmra.mxu0 %vm448_vm2, %v10175_v22 }
0x23ac   :  { %10188 = vmatpush3.msra.mxu0 %v10813_v53 }
0x23ad   :  { %10203 = vmatprep.subr.msk.mxu0 %vm122_vm0, %v6452_v18  ;;  %v7063_v27 = vpop.f32.mrf.mxu0 }
0x23ae   :  { %10184 = vmatprep.mubr.msk.f32.mxu0 %vm448_vm2, %v7063_v27 }
0x23af   :  { %10185 = vmatmul.mubr.msk.f32.gmra.mxu0 %vm448_vm2, %v10178_v14 }
0x23b0   :  { %10189 = vmatprep.mubr.msk.f32.mxu0 %vm448_vm2, %v12594_v49  ;;  %v12668_v49 = vmul.f32 %v10577_v44, %v10571_v9 }
0x23b2   :  { %13975 = vst [vmem:[#allocation49_spill] sm:$0xff] %v12668_v49 }
0x23b3   :  { %10190 = vmatmul.mubr.msk.f32.vlgmr.msra.gmra.mxu0 %vm448_vm2, %v12592_v43  ;;  %v7677_v43 = vpop.permute.xlu1 %7676 }
0x23b4   :  { %10204 = vmatpush3.xpose.msk.msra.mxu0 %vm122_vm0, %v6452_v18  ;;  %10192 = vmatprep.mubr.msk.f32.mxu0 %vm448_vm2, %v12598_v24  ;;  %v12674_v24 = vmul.f32 %v10579_v1, %v10569_v10 }
0x23b5   :  { %10219 = vmatprep.subr.mxu0 %v6437_v0 }
0x23b6   :  { %13976 = vst [vmem:[#allocation50_spill] sm:$0xff] %v12674_v24 }
0x23b7   :  { %10193 = vmatmul.mubr.msk.f32.gmra.mxu0 %vm448_vm2, %v12596_v20  ;;  %v7681_v20 = vpop.permute.xlu1 %7680 }
0x23b8   :  { %10205 = vmatprep.mubr.msk.f32.mxu0 %vm122_vm0, %v12660_v13 }
0x23bb   :  { %10206 = vmatmul.mubr.msk.f32.vlgmr.msra.gmra.mxu0 %vm122_vm0, %v12666_v52  ;;  %v7683_v17 = vpop.permute.xlu1 %7682 }
0x23bc   :  { %10220 = vmatpush3.msra.mxu0 %v6437_v0  ;;  %10208 = vmatprep.mubr.msk.f32.mxu0 %vm122_vm0, %v12668_v49 }
0x23bd   :  { %10235 = vmatprep.subr.mxu0 %v12474_v7 }
0x23bf   :  { %10209 = vmatmul.mubr.msk.f32.gmra.mxu0 %vm122_vm0, %v12674_v24 }
0x23c0   :  { %10221 = vmatprep.mubr.msk.f32.mxu0 %vm448_vm2, %v7677_v43 }
0x23c3   :  { %10222 = vmatmul.mubr.msk.f32.vlgmr.msra.gmra.mxu0 %vm448_vm2, %v7679_v5 }
0x23c4   :  { %10224 = vmatprep.mubr.msk.f32.mxu0 %vm448_vm2, %v7681_v20  ;;  %10236 = vmatpush3.msra.mxu0 %v12474_v7 }
0x23c7   :  { %10225 = vmatmul.mubr.msk.f32.gmra.mxu0 %vm448_vm2, %v7683_v17 }
0x246b   :  { %v10183_v62 = vpop.f32.mrf.mxu0 }
0x246d   :  { %v7150_v35 = vpop.f32.mrf.mxu0 }
0x246f   :  { %v10186_v55 = vpop.f32.mrf.mxu0 }
0x2471   :  { %v7160_v40 = vpop.f32.mrf.mxu0 }
0x2473   :  { %v10191_v8 = vpop.f32.mrf.mxu0 }
0x2474   :  { %v12684_v53 = vadd.f32 %v10191_v8, %v10183_v62 }
0x2475   :  { %v7247_v37 = vpop.f32.mrf.mxu0 }
0x2476   :  { %v12686_v28 = vadd.f32 %v7247_v37, %v7150_v35 }
0x2477   :  { %v10194_v32 = vpop.f32.mrf.mxu0 }
0x2478   :  { %v12688_v15 = vadd.f32 %v10194_v32, %v10186_v55 }
0x2479   :  { %v7257_v10 = vpop.f32.mrf.mxu0 }
0x247a   :  { %v12690_v51 = vadd.f32 %v7257_v10, %v7160_v40 }
0x247b   :  { %v10207_v7 = vpop.f32.mrf.mxu0 }
0x247d   :  { %v7556_v9 = vpop.f32.mrf.mxu0 }
0x247e   :  { %10213 = vmatprep.mubr.msk.f32.mxu1 %vm448_vm2, %v7556_v9  ;;  %v12706_v9 = vld [vmem:[%s13848_s6 + $0x1] ss:$0 sm:$0xff] }
0x247f   :  { %v10210_v56 = vpop.f32.mrf.mxu0  ;;  %10214 = vmatmul.mubr.msk.f32.vlgmr.msra.gmra.mxu1 %vm448_vm2, %v10207_v7 }
0x2480   :  { %10228 = vmatpush3.xpose.msk.msra.mxu1 %vm122_vm0, %v12577_v46 }
0x2481   :  { %v7566_v19 = vpop.f32.mrf.mxu0 }
0x2482   :  { %10216 = vmatprep.mubr.msk.f32.mxu1 %vm448_vm2, %v7566_v19 }
0x2483   :  { %10217 = vmatmul.mubr.msk.f32.gmra.mxu1 %vm448_vm2, %v10210_v56  ;;  %v10223_v33 = vpop.f32.mrf.mxu0  ;;  %v8094_v56 = vadd.f32 %v12706_v9, %v12528_v16  ;;  %v8097_v16 = vadd.f32 %v12706_v9, %v12533_v4 }
0x2484   :  { %v7778_v38 = vmul.f32 0.35355338, %v10223_v33 }
0x2485   :  { %v7758_v22 = vpop.f32.mrf.mxu0 }
0x2486   :  { %v7777_v23 = vmul.f32 0.35355338, %v7758_v22  ;;  %v7784_v21 = vsel %vm122_vm0, %v7778_v38, -inf  ;;  %v8096_v22 = vadd.f32 %v12706_v9, %v12535_v39 }
0x2487   :  { %7785 = vmax.xlane.f32.xlu1 %v7784_v21  ;;  %v10226_v18 = vpop.f32.mrf.mxu0  ;;  %v12717_v21 = vadd.f32 %v8094_v56, %v12001_v41 }
0x2488   :  { %v7781_v14 = vsel %vm122_vm0, %v7777_v23, -inf  ;;  %v7780_v0 = vmul.f32 0.35355338, %v10226_v18  ;;  %v12728_v39 = vadd.f32 %v8096_v22, %v11995_v34 }
0x2489   :  { %7782 = vmax.xlane.f32.xlu0 %v7781_v14  ;;  %v7768_v27 = vpop.f32.mrf.mxu0 }
0x248a   :  { %v7779_v25 = vmul.f32 0.35355338, %v7768_v27  ;;  %v7790_v36 = vsel %vm122_vm0, %v7780_v0, -inf  ;;  %v8114_v27 = vsel %vm122_vm0, %v12717_v21, 0.0 }
0x248c   :  { %v7787_v46 = vsel %vm122_vm0, %v7779_v25, -inf }
0x248d   :  { %7788 = vmax.xlane.f32.xlu0 %v7787_v46 }
0x2491   :  { %7791 = vmax.xlane.f32.xlu0 %v7790_v36 }
0x2510   :  { %v7786_v44 = vpop.xlane.xlu1 %7785 }
0x2511   :  { %v7794_v1 = vsub.f32 %v7778_v38, %v7786_v44  ;;  %v8095_v38 = vadd.f32 %v12706_v9, %v12525_v45 }
0x2512   :  { %v7783_v43 = vpop.xlane.xlu0 %7782 }
0x2513   :  { %v7799_v20 = vmul.f32 1.442695, %v7794_v1  ;;  %v7793_v5 = vsub.f32 %v7777_v23, %v7783_v43  ;;  %v12720_v14 = vadd.f32 %v8095_v38, %v12005_v2  ;;  %v8120_v2 = vsel %vm122_vm0, %v12728_v39, 0.0 }
0x2515   :  { %10580 = vpow2.f32 %v7799_v20  ;;  %v7797_v17 = vmul.f32 1.442695, %v7793_v5  ;;  %v8117_v41 = vsel %vm122_vm0, %v12720_v14, 0.0 }
0x2516   :  { %v7789_v62 = vpop.xlane.xlu0 %7788 }
0x2517   :  { %10582 = vpow2.f32 %v7797_v17  ;;  %v7795_v35 = vsub.f32 %v7779_v25, %v7789_v62  ;;  %v12735_v25 = vadd.f32 %v8097_v16, %v11987_v12 }
0x2519   :  { %v7801_v55 = vmul.f32 1.442695, %v7795_v35  ;;  %v8123_v4 = vsel %vm122_vm0, %v12735_v25, 0.0 }
0x251a   :  { %v7792_v40 = vpop.xlane.xlu0 %7791 }
0x251b   :  { %10584 = vpow2.f32 %v7801_v55  ;;  %v7796_v8 = vsub.f32 %v7780_v0, %v7792_v40 }
0x251d   :  { %v7803_v37 = vmul.f32 1.442695, %v7796_v8 }
0x251f   :  { %10586 = vpow2.f32 %v7803_v37 }
0x2522   :  { %v10581_v32 = vpop.eup %10580 }
0x2523   :  { %v7808_v10 = vsel %vm122_vm0, %v10581_v32, 0.0 }
0x2524   :  { %v10583_v7 = vpop.eup %10582  ;;  %7809 = vadd.xlane.f32.xlu0 %v7808_v10 }
0x2525   :  { %v7805_v19 = vsel %vm122_vm0, %v10583_v7, 0.0 }
0x2526   :  { %7806 = vadd.xlane.f32.xlu1 %v7805_v19 }
0x2528   :  { %v10585_v33 = vpop.eup %10584 }
0x2529   :  { %v7811_v23 = vsel %vm122_vm0, %v10585_v33, 0.0 }
0x252a   :  { %7812 = vadd.xlane.f32.xlu1 %v7811_v23 }
0x252c   :  { %v10587_v18 = vpop.eup %10586 }
0x252d   :  { %v7814_v45 = vsel %vm122_vm0, %v10587_v18, 0.0 }
0x252e   :  { %8115 = vadd.xlane.f32.xlu1 %v8114_v27  ;;  %7815 = vadd.xlane.f32.xlu0 %v7814_v45 }
0x2532   :  { %8118 = vadd.xlane.f32.xlu0 %v8117_v41  ;;  %8121 = vadd.xlane.f32.xlu1 %v8120_v2 }
0x2536   :  { %8124 = vadd.xlane.f32.xlu0 %v8123_v4 }
0x253f   :  { %v10215_v0 = vpop.f32.mrf.mxu1 }
0x2540   :  { %v7673_v34 = vadd.f32 %v10215_v0, %v12684_v53 }
0x2541   :  { %v7653_v46 = vpop.f32.mrf.mxu1 }
0x2542   :  { %v7672_v36 = vadd.f32 %v7653_v46, %v12686_v28 }
0x2543   :  { %v10218_v44 = vpop.f32.mrf.mxu1 }
0x2544   :  { %v7675_v1 = vadd.f32 %v10218_v44, %v12688_v15 }
0x2545   :  { %v7663_v8 = vpop.f32.mrf.mxu1 }
0x2546   :  { %v7674_v46 = vadd.f32 %v7663_v8, %v12690_v51 }
0x25ad   :  { %v7810_v43 = vpop.xlane.xlu0 %7809 }
0x25ae   :  { %10588 = vrcp.f32 %v7810_v43 }
0x25af   :  { %v7807_v20 = vpop.xlane.xlu1 %7806 }
0x25b0   :  { %10590 = vrcp.f32 %v7807_v20 }
0x25b3   :  { %v7813_v12 = vpop.xlane.xlu1 %7812 }
0x25b4   :  { %10592 = vrcp.f32 %v7813_v12 }
0x25b7   :  { %v7816_v5 = vpop.xlane.xlu0 %7815  ;;  %v8116_v22 = vpop.xlane.xlu1 %8115 }
0x25b8   :  { %10594 = vrcp.f32 %v7816_v5  ;;  %v8138_v44 = vmul.f32 0.03125, %v8116_v22 }
0x25bb   :  { %v10589_v17 = vpop.eup %10588  ;;  %v8119_v19 = vpop.xlane.xlu0 %8118 }
0x25bc   :  { %v12744_v55 = vmul.f32 %v10589_v17, %v10581_v32  ;;  %v8139_v45 = vmul.f32 0.03125, %v8119_v19  ;;  %v8122_v43 = vpop.xlane.xlu1 %8121  ;;  %v9222_v19 = vld [vmem:[%s13851_s9 + $0x28] sm:$0xff] }
0x25bd   :  { %v10591_v62 = vpop.eup %10590 }
0x25be   :  { %v12742_v35 = vmul.f32 %v10591_v62, %v10583_v7  ;;  %13978 = vst [vmem:[#allocation52_spill] sm:$0xff] %v12744_v55  ;;  %v12770_v12 = vsub.f32 %v12720_v14, %v8139_v45  ;;  %v12774_v62 = vsub.f32 %v12717_v21, %v8138_v44 }
0x25bf   :  { %v8125_v41 = vpop.xlane.xlu0 %8124 }
0x25c0   :  { %13977 = vst [vmem:[#allocation51_spill] sm:$0xff] %v12742_v35  ;;  %10229 = vmatprep.mubr.msk.f32.mxu1 %vm122_vm0, %v12742_v35  ;;  %v8155_v8 = vmul.f32 %v12770_v12, %v12770_v12 }
0x25c1   :  { %v10593_v53 = vpop.eup %10592  ;;  %10230 = vmatmul.mubr.msk.f32.vlgmr.msra.gmra.mxu1 %vm122_vm0, %v12744_v55 }
0x25c2   :  { %v12750_v28 = vmul.f32 %v10593_v53, %v10585_v33 }
0x25c4   :  { %13979 = vst [vmem:[#allocation53_spill] sm:$0xff] %v12750_v28  ;;  %10232 = vmatprep.mubr.msk.f32.mxu1 %vm122_vm0, %v12750_v28 }
0x25c5   :  { %v10595_v15 = vpop.eup %10594 }
0x25c6   :  { %v12754_v40 = vmul.f32 %v10595_v15, %v10587_v18 }
0x25c8   :  { %13980 = vst [vmem:[#allocation54_spill] sm:$0xff] %v12754_v40  ;;  %10233 = vmatmul.mubr.msk.f32.gmra.mxu1 %vm122_vm0, %v12754_v40 }
0x2681   :  { %v10231_v37 = vpop.f32.mrf.mxu1 }
0x2683   :  { %v7966_v32 = vpop.f32.mrf.mxu1 }
0x2684   :  { %10237 = vmatprep.mubr.msk.f32.mxu0 %vm448_vm2, %v7966_v32 }
0x2685   :  { %10238 = vmatmul.mubr.msk.f32.vlgmr.msra.gmra.mxu0 %vm448_vm2, %v10231_v37 }
0x2688   :  { %v10234_v10 = vpop.f32.mrf.mxu1 }
0x268a   :  { %v7976_v7 = vpop.f32.mrf.mxu1 }
0x268b   :  { %10240 = vmatprep.mubr.msk.f32.mxu0 %vm448_vm2, %v7976_v7  ;;  %v9224_v7 = vld [vmem:[%s13851_s9 + $0x38] sm:$0xff] }
0x268c   :  { %10241 = vmatmul.mubr.msk.f32.gmra.mxu0 %vm448_vm2, %v10234_v10  ;;  %10243 = vmatprep.subr.mxu1 %v9224_v7 }
0x268d   :  { %10244 = vmatpush3.msra.mxu1 %v9224_v7 }
0x2745   :  { %v10239_v56 = vpop.f32.mrf.mxu0 }
0x2746   :  { %v8083_v33 = vadd.f32 %v10239_v56, %v7673_v34  ;;  %v9223_v56 = vld [vmem:[%s13851_s9 + $0x30] sm:$0xff] }
0x2747   :  { %v8063_v38 = vpop.f32.mrf.mxu0  ;;  %10245 = vmatprep.subr.mxu1 %v9223_v56 }
0x2748   :  { %v8099_v23 = vadd.f32 %v12706_v9, %v8083_v33  ;;  %v8082_v18 = vadd.f32 %v8063_v38, %v7672_v36  ;;  %10246 = vmatpush3.msra.mxu1 %v9223_v56  ;;  %v9221_v33 = vld [vmem:[%s13851_s9 + $0x20] sm:$0xff] }
0x2749   :  { %10247 = vmatprep.subr.mxu1 %v9222_v19 }
0x274a   :  { %v8098_v16 = vadd.f32 %v12706_v9, %v8082_v18  ;;  %v8107_v27 = vadd.f32 %v8099_v23, %v12100_v48  ;;  %v8141_v48 = vmul.f32 0.03125, %v8125_v41  ;;  %10248 = vmatpush3.msra.mxu1 %v9222_v19 }
0x274b   :  { %10249 = vmatprep.subr.mxu1 %v9221_v33 }
0x274c   :  { %v10242_v2 = vpop.f32.mrf.mxu0  ;;  %v8129_v4 = vsel %vm122_vm0, %v8107_v27, 0.0  ;;  %v8106_v0 = vadd.f32 %v8098_v16, %v12097_v6  ;;  %v8140_v6 = vmul.f32 0.03125, %v8122_v43  ;;  %v12779_v53 = vsub.f32 %v12735_v25, %v8141_v48  ;;  %10250 = vmatpush3.msra.mxu1 %v9221_v33 }
0x274d   :  { %v8085_v34 = vadd.f32 %v10242_v2, %v7675_v1  ;;  %8130 = vadd.xlane.f32.xlu0 %v8129_v4 }
0x274e   :  { %v8073_v20 = vpop.f32.mrf.mxu0  ;;  %v8126_v36 = vsel %vm122_vm0, %v8106_v0, 0.0  ;;  %v12786_v37 = vsub.f32 %v12728_v39, %v8140_v6  ;;  %v8157_v25 = vmul.f32 %v12779_v53, %v12779_v53 }
0x274f   :  { %v8101_v5 = vadd.f32 %v12706_v9, %v8085_v34  ;;  %v8084_v17 = vadd.f32 %v8073_v20, %v7674_v46  ;;  %8127 = vadd.xlane.f32.xlu1 %v8126_v36 }
0x2750   :  { %v8156_v32 = vmul.f32 %v12786_v37, %v12786_v37  ;;  %v8171_v39 = vsel %vm122_vm0, %v8157_v25, 0.0 }
0x2751   :  { %v8100_v51 = vadd.f32 %v12706_v9, %v8084_v17  ;;  %v8109_v1 = vadd.f32 %v8101_v5, %v12117_v30  ;;  %v8154_v9 = vmul.f32 %v12774_v62, %v12774_v62  ;;  %v8165_v30 = vsel %vm122_vm0, %v8155_v8, 0.0 }
0x2752   :  { %v8168_v10 = vsel %vm122_vm0, %v8156_v32, 0.0 }
0x2753   :  { %v8135_v15 = vsel %vm122_vm0, %v8109_v1, 0.0  ;;  %v8108_v14 = vadd.f32 %v8100_v51, %v12109_v31  ;;  %v8162_v31 = vsel %vm122_vm0, %v8154_v9, 0.0 }
0x2754   :  { %8136 = vadd.xlane.f32.xlu0 %v8135_v15 }
0x2755   :  { %v8132_v21 = vsel %vm122_vm0, %v8108_v14, 0.0 }
0x2756   :  { %8133 = vadd.xlane.f32.xlu1 %v8132_v21 }
0x2758   :  { %8166 = vadd.xlane.f32.xlu0 %v8165_v30 }
0x275a   :  { %8163 = vadd.xlane.f32.xlu1 %v8162_v31 }
0x275c   :  { %8172 = vadd.xlane.f32.xlu0 %v8171_v39 }
0x275e   :  { %8169 = vadd.xlane.f32.xlu1 %v8168_v10  ;;  %v12834_v10 = vld [vmem:[%s13849_s7 + $0x1] ss:$0 sm:$0xff] }
0x27d6   :  { %v8131_v38 = vpop.xlane.xlu0 %8130 }
0x27d7   :  { %v8143_v22 = vmul.f32 0.03125, %v8131_v38 }
0x27d8   :  { %v8128_v23 = vpop.xlane.xlu1 %8127 }
0x27d9   :  { %v12811_v18 = vsub.f32 %v8107_v27, %v8143_v22  ;;  %v8142_v16 = vmul.f32 0.03125, %v8128_v23  ;;  %v12842_v22 = vld [vmem:[%s13850_s8 + $0x1] ss:$0 sm:$0xff] }
0x27db   :  { %v12813_v45 = vsub.f32 %v8106_v0, %v8142_v16  ;;  %v8159_v41 = vmul.f32 %v12811_v18, %v12811_v18 }
0x27dd   :  { %v8137_v2 = vpop.xlane.xlu0 %8136  ;;  %v8177_v4 = vsel %vm122_vm0, %v8159_v41, 0.0  ;;  %v8158_v46 = vmul.f32 %v12813_v45, %v12813_v45 }
0x27de   :  { %v8145_v44 = vmul.f32 0.03125, %v8137_v2  ;;  %8178 = vadd.xlane.f32.xlu0 %v8177_v4 }
0x27df   :  { %v8134_v34 = vpop.xlane.xlu1 %8133  ;;  %v8174_v43 = vsel %vm122_vm0, %v8158_v46, 0.0 }
0x27e0   :  { %v12821_v20 = vsub.f32 %v8109_v1, %v8145_v44  ;;  %v8144_v27 = vmul.f32 0.03125, %v8134_v34  ;;  %8175 = vadd.xlane.f32.xlu1 %v8174_v43  ;;  %v9241_v34 = vld [vmem:[%s13853_s11 + $0x70] sm:$0xff]  ;;  %v9240_v43 = vld [vmem:[%s13853_s11 + $0x68] sm:$0xff] }
0x27e1   :  { %v8167_v0 = vpop.xlane.xlu0 %8166 }
0x27e2   :  { %v12823_v36 = vsub.f32 %v8108_v14, %v8144_v27  ;;  %v8187_v48 = vmul.f32 0.03125, %v8167_v0  ;;  %v8161_v5 = vmul.f32 %v12821_v20, %v12821_v20  ;;  %v9239_v27 = vld [vmem:[%s13853_s11 + $0x60] sm:$0xff]  ;;  %v9238_v0 = vld [vmem:[%s13853_s11 + $0x58] sm:$0xff] }
0x27e3   :  { %v8164_v17 = vpop.xlane.xlu1 %8163 }
0x27e4   :  { %v8195_v6 = vadd.f32 1e-05, %v8187_v48  ;;  %v8186_v51 = vmul.f32 0.03125, %v8164_v17  ;;  %v8183_v15 = vsel %vm122_vm0, %v8161_v5, 0.0  ;;  %v8160_v8 = vmul.f32 %v12823_v36, %v12823_v36  ;;  %v9237_v48 = vld [vmem:[%s13853_s11 + $0x50] sm:$0xff]  ;;  %v9236_v5 = vld [vmem:[%s13853_s11 + $0x48] sm:$0xff] }
0x27e5   :  { %8184 = vadd.xlane.f32.xlu0 %v8183_v15  ;;  %v8173_v1 = vpop.xlane.xlu0 %8172  ;;  %v9235_v17 = vld [vmem:[%s13853_s11 + $0x40] sm:$0xff] }
0x27e6   :  { %10596 = vrsqrt.f32 %v8195_v6  ;;  %v8194_v21 = vadd.f32 1e-05, %v8186_v51  ;;  %v8189_v9 = vmul.f32 0.03125, %v8173_v1  ;;  %v8180_v14 = vsel %vm122_vm0, %v8160_v8, 0.0 }
0x27e7   :  { %8181 = vadd.xlane.f32.xlu1 %v8180_v14  ;;  %v8170_v30 = vpop.xlane.xlu1 %8169 }
0x27e8   :  { %10598 = vrsqrt.f32 %v8194_v21  ;;  %v8197_v25 = vadd.f32 1e-05, %v8189_v9  ;;  %v8188_v31 = vmul.f32 0.03125, %v8170_v30 }
0x27ea   :  { %10600 = vrsqrt.f32 %v8197_v25  ;;  %v8196_v32 = vadd.f32 1e-05, %v8188_v31 }
0x27ec   :  { %10602 = vrsqrt.f32 %v8196_v32 }
0x27f3   :  { %v10597_v39 = vpop.eup %10596 }
0x27f4   :  { %v8211_v7 = vmul.f32 %v10597_v39, %v12770_v12 }
0x27f5   :  { %v10599_v56 = vpop.eup %10598 }
0x27f6   :  { %v8210_v19 = vmul.f32 %v10599_v56, %v12774_v62  ;;  %v8225_v38 = vmul.f32 %v12834_v10, %v8211_v7 }
0x27f7   :  { %v10601_v33 = vpop.eup %10600 }
0x27f8   :  { %v8224_v23 = vmul.f32 %v12834_v10, %v8210_v19  ;;  %v8213_v16 = vmul.f32 %v10601_v33, %v12779_v53  ;;  %v12851_v62 = vadd.f32 %v12842_v22, %v8225_v38 }
0x27f9   :  { %v10603_v41 = vpop.eup %10602 }
0x27fa   :  { %v12847_v2 = vadd.f32 %v12842_v22, %v8224_v23  ;;  %v8212_v12 = vmul.f32 %v10603_v41, %v12786_v37  ;;  %v8227_v4 = vmul.f32 %v12834_v10, %v8213_v16  ;;  %v9242_v37 = vld [vmem:[%s13853_s11 + $0x78] sm:$0xff] }
0x27fb   :  { %10263 = vmatprep.subr.mxu0 %v9242_v37 }
0x27fc   :  { %10251 = vmatprep.mubr.msk.f32.mxu1 %vm122_vm0, %v12847_v2  ;;  %v8226_v46 = vmul.f32 %v12834_v10, %v8212_v12  ;;  %v12863_v44 = vadd.f32 %v12842_v22, %v8227_v4  ;;  %10264 = vmatpush3.msra.mxu0 %v9242_v37 }
0x27fd   :  { %10252 = vmatmul.mubr.msk.f32.vlgmr.msra.gmra.mxu1 %vm122_vm0, %v12851_v62  ;;  %10265 = vmatprep.subr.mxu0 %v9241_v34 }
0x27fe   :  { %v12860_v53 = vadd.f32 %v12842_v22, %v8226_v46  ;;  %10266 = vmatpush3.msra.mxu0 %v9241_v34 }
0x27ff   :  { %10267 = vmatprep.subr.mxu0 %v9240_v43 }
0x2800   :  { %10254 = vmatprep.mubr.msk.f32.mxu1 %vm122_vm0, %v12860_v53  ;;  %10268 = vmatpush3.msra.mxu0 %v9240_v43 }
0x2801   :  { %10255 = vmatmul.mubr.msk.f32.gmra.mxu1 %vm122_vm0, %v12863_v44  ;;  %10269 = vmatprep.subr.mxu0 %v9239_v27 }
0x2802   :  { %10270 = vmatpush3.msra.mxu0 %v9239_v27 }
0x2803   :  { %10271 = vmatprep.subr.mxu0 %v9238_v0 }
0x2804   :  { %10272 = vmatpush3.msra.mxu0 %v9238_v0 }
0x2805   :  { %10273 = vmatprep.subr.mxu0 %v9237_v48 }
0x2806   :  { %10274 = vmatpush3.msra.mxu0 %v9237_v48 }
0x2807   :  { %10275 = vmatprep.subr.mxu0 %v9236_v5 }
0x2808   :  { %10276 = vmatpush3.msra.mxu0 %v9236_v5 }
0x2809   :  { %10277 = vmatprep.subr.mxu0 %v9235_v17 }
0x280a   :  { %10278 = vmatpush3.msra.mxu0 %v9235_v17 }
0x2867   :  { %v8179_v6 = vpop.xlane.xlu0 %8178 }
0x2868   :  { %v8191_v51 = vmul.f32 0.03125, %v8179_v6 }
0x2869   :  { %v8176_v15 = vpop.xlane.xlu1 %8175 }
0x286a   :  { %v8199_v8 = vadd.f32 1e-05, %v8191_v51  ;;  %v8190_v1 = vmul.f32 0.03125, %v8176_v15 }
0x286c   :  { %10604 = vrsqrt.f32 %v8199_v8  ;;  %v8198_v21 = vadd.f32 1e-05, %v8190_v1 }
0x286e   :  { %10606 = vrsqrt.f32 %v8198_v21  ;;  %v8185_v9 = vpop.xlane.xlu0 %8184 }
0x286f   :  { %v8193_v14 = vmul.f32 0.03125, %v8185_v9 }
0x2870   :  { %v8182_v30 = vpop.xlane.xlu1 %8181 }
0x2871   :  { %v8201_v25 = vadd.f32 1e-05, %v8193_v14  ;;  %v8192_v31 = vmul.f32 0.03125, %v8182_v30 }
0x2873   :  { %10608 = vrsqrt.f32 %v8201_v25  ;;  %v8200_v32 = vadd.f32 1e-05, %v8192_v31 }
0x2875   :  { %10610 = vrsqrt.f32 %v8200_v32 }
0x2879   :  { %v10605_v39 = vpop.eup %10604 }
0x287a   :  { %v8215_v7 = vmul.f32 %v10605_v39, %v12811_v18 }
0x287b   :  { %v10607_v56 = vpop.eup %10606 }
0x287c   :  { %v8214_v19 = vmul.f32 %v10607_v56, %v12813_v45  ;;  %v8229_v33 = vmul.f32 %v12834_v10, %v8215_v7 }
0x287e   :  { %v8228_v38 = vmul.f32 %v12834_v10, %v8214_v19  ;;  %v12901_v41 = vadd.f32 %v12842_v22, %v8229_v33  ;;  %v9244_v19 = vld [vmem:[%s13854_s12 + $0x1] ss:$0 sm:$0xff] }
0x2880   :  { %v10609_v23 = vpop.eup %10608  ;;  %v12898_v16 = vadd.f32 %v12842_v22, %v8228_v38  ;;  %13982 = vst [vmem:[#allocation56_spill] sm:$0xff] %v12901_v41 }
0x2881   :  { %v8217_v12 = vmul.f32 %v10609_v23, %v12821_v20  ;;  %v9226_v20 = vld [vmem:[%s13852_s10 + $0x1] ss:$0 sm:$0xff]  ;;  %s10888_s10 = smov [#allocation4]  }
0x2882   :  { %13981 = vst [vmem:[#allocation55_spill] sm:$0xff] %v12898_v16  ;;  %v10611_v4 = vpop.eup %10610  ;;  %10257 = vmatprep.mubr.msk.f32.mxu1 %vm122_vm0, %v12898_v16  ;;  %v13997_v16 = vld [vmem:[#allocation14_spill] sm:$0xff]  ;;  %s8847_s22 = sshll.u32 %s10888_s10, 4  ;;  %s8848_s22 = int_to_ptr.vmem [resolvable:$true] %s8847_s22 }
0x2883   :  { %10258 = vmatmul.mubr.msk.f32.gmra.mxu1 %vm122_vm0, %v12901_v41  ;;  %v8216_v18 = vmul.f32 %v10611_v4, %v12823_v36  ;;  %v8231_v45 = vmul.f32 %v12834_v10, %v8217_v12  ;;  %s10815_s25 = scalar_lea.vmem %s8848_s22, 2048  ;;  %p10820_p1 = scmp.lt.s32.totalorder %s8848_s22, %s8848_s22 }
0x2884   :  { %p10816_p0 = scmp.ne.s32.totalorder %s8848_s22, %s10815_s25  ;;  %p10821_p2 = scmp.lt.s32.totalorder %s10815_s25, %s10815_s25 }
0x2885   :  { %v8230_v46 = vmul.f32 %v12834_v10, %v8216_v18  ;;  %v12915_v34 = vadd.f32 %v12842_v22, %v8231_v45 }
0x2886   :  { %p10822_p3 = por %p10821_p2, %p10820_p1 }
0x2887   :  { %v12912_v37 = vadd.f32 %v12842_v22, %v8230_v46  ;;  %13984 = vst [vmem:[#allocation58_spill] sm:$0xff] %v12915_v34 }
0x2888   :  { %p10823_p4 = pnand %p10822_p3, %p10816_p0 }
0x2889   :  { %13983 = vst [vmem:[#allocation57_spill] sm:$0xff] %v12912_v37  ;;  %10260 = vmatprep.mubr.msk.f32.mxu1 %vm122_vm0, %v12912_v37 }
0x288a   :  { %10261 = vmatmul.mubr.msk.f32.gmra.mxu1 %vm122_vm0, %v12915_v34 }
0x28bd   :  { %v10253_v36 = vpop.f32.mrf.mxu1 }
0x28be   :  { %v8355_v43 = vadd.f32 %v10253_v36, %v9226_v20 }
0x28bf   :  { %v8349_v27 = vpop.f32.mrf.mxu1 }
0x28c0   :  { %v8350_v10 = vadd.f32 %v9226_v20, %v8349_v27  ;;  %v8389_v5 = vmax.f32 %v8355_v43, 0.0 }
0x28c1   :  { %v10256_v0 = vpop.f32.mrf.mxu1 }
0x28c2   :  { %v8388_v48 = vmax.f32 %v8350_v10, 0.0  ;;  %v8365_v17 = vadd.f32 %v10256_v0, %v9226_v20 }
0x28c3   :  { %v8359_v22 = vpop.f32.mrf.mxu1 }
0x28c4   :  { %v8360_v6 = vadd.f32 %v9226_v20, %v8359_v22  ;;  %10279 = vmatprep.mubr.msk.f32.mxu0 %vm4113_vm3, %v8388_v48  ;;  %v8391_v15 = vmax.f32 %v8365_v17, 0.0  ;;  %v9070_v48 = vld [vmem:[%s13930_s21 + $0x88] sm:$0xff] }
0x28c5   :  { %10280 = vmatmul.mubr.msk.f32.vlgmr.msra.gmra.mxu0 %vm4113_vm3, %v8389_v5 }
0x28c6   :  { %v8390_v51 = vmax.f32 %v8360_v6, 0.0 }
0x28c8   :  { %10282 = vmatprep.mubr.msk.f32.mxu0 %vm4113_vm3, %v8390_v51  ;;  %v13991_v51 = vld [vmem:[#allocation17_spill] sm:$0xff] }
0x28c9   :  { %10283 = vmatmul.mubr.msk.f32.gmra.mxu0 %vm4113_vm3, %v8391_v15 }
0x2943   :  { %v10259_v8 = vpop.f32.mrf.mxu1 }
0x2944   :  { %v8375_v1 = vadd.f32 %v10259_v8, %v9226_v20 }
0x2945   :  { %v8369_v21 = vpop.f32.mrf.mxu1 }
0x2946   :  { %v8370_v9 = vadd.f32 %v9226_v20, %v8369_v21  ;;  %v8393_v30 = vmax.f32 %v8375_v1, 0.0  ;;  %v13992_v1 = vld [vmem:[#allocation30_spill] sm:$0xff] }
0x2948   :  { %v8392_v14 = vmax.f32 %v8370_v9, 0.0 }
0x294a   :  { %v10262_v25 = vpop.f32.mrf.mxu1  ;;  %10285 = vmatprep.mubr.msk.f32.mxu0 %vm4113_vm3, %v8392_v14 }
0x294b   :  { %10286 = vmatmul.mubr.msk.f32.gmra.mxu0 %vm4113_vm3, %v8393_v30  ;;  %v8385_v31 = vadd.f32 %v10262_v25, %v9226_v20 }
0x294c   :  { %v8379_v32 = vpop.f32.mrf.mxu1 }
0x294d   :  { %v8380_v39 = vadd.f32 %v9226_v20, %v8379_v32  ;;  %v8395_v56 = vmax.f32 %v8385_v31, 0.0 }
0x294f   :  { %v8394_v7 = vmax.f32 %v8380_v39, 0.0 }
0x2951   :  { %10288 = vmatprep.mubr.msk.f32.mxu0 %vm4113_vm3, %v8394_v7 }
0x2952   :  { %10289 = vmatmul.mubr.msk.f32.gmra.mxu0 %vm4113_vm3, %v8395_v56 }
0x2985   :  { %v10281_v33 = vpop.f32.mrf.mxu0 }
0x2986   :  { %v8509_v38 = vadd.f32 %v10281_v33, %v9244_v19 }
0x2987   :  { %v8503_v23 = vpop.f32.mrf.mxu0 }
0x2988   :  { %v12936_v12 = vadd.f32 %v8509_v38, %v12851_v62  ;;  %v8504_v4 = vadd.f32 %v9244_v19, %v8503_v23 }
0x2989   :  { %v10284_v18 = vpop.f32.mrf.mxu0 }
0x298a   :  { %v12939_v45 = vadd.f32 %v8504_v4, %v12847_v2  ;;  %v8519_v46 = vadd.f32 %v10284_v18, %v9244_v19  ;;  %v8557_v20 = vsel %vm122_vm0, %v12936_v12, 0.0 }
0x298b   :  { %8558 = vadd.xlane.f32.xlu0 %v8557_v20  ;;  %v8513_v36 = vpop.f32.mrf.mxu0 }
0x298c   :  { %13985 = vst [vmem:[#allocation59_spill] sm:$0xff] %v12939_v45  ;;  %v12944_v43 = vadd.f32 %v8519_v46, %v12863_v44  ;;  %v8514_v27 = vadd.f32 %v9244_v19, %v8513_v36  ;;  %v8554_v10 = vsel %vm122_vm0, %v12939_v45, 0.0  ;;  %v114_v44 = vld [vmem:[%s13930_s21 + $0x40] sm:$0xff]  ;;  %s10886_s21 = smov 64  }
0x298d   :  { %8555 = vadd.xlane.f32.xlu1 %v8554_v10  ;;  %v14000_v45 = vld [vmem:[#allocation15_spill] sm:$0xff] }
0x298e   :  { %13986 = vst [vmem:[#allocation60_spill] sm:$0xff] %v12944_v43  ;;  %v12949_v62 = vadd.f32 %v8514_v27, %v12860_v53  ;;  %v8563_v2 = vsel %vm122_vm0, %v12944_v43, 0.0 }
0x298f   :  { %8564 = vadd.xlane.f32.xlu0 %v8563_v2 }
0x2990   :  { %13987 = vst [vmem:[#allocation61_spill] sm:$0xff] %v12949_v62  ;;  %v8560_v0 = vsel %vm122_vm0, %v12949_v62, 0.0 }
0x2991   :  { %8561 = vadd.xlane.f32.xlu1 %v8560_v0 }
0x29a2   :  { %294 = vperm.xlu1 %10307, %v114_v44  }
0x29a5   :  { %4594 = vperm.xlu0 %10306, %v9070_v48  }
0x29a6   :  { %914 = vrot.lane.b32.xlu1 %v11292_v26, %s10885_s28 }
0x29a9   :  { %912 = vrot.lane.b32.xlu0 %v11290_v47, %s10885_s28 }
0x29ad   :  { %916 = vrot.lane.b32.xlu0 %v11298_v63, %s10885_s28 }
0x29b1   :  { %918 = vrot.lane.b32.xlu0 %v11302_v3, %s10885_s28 }
0x2a14   :  { %v12969_v53 = vpop.xlane.xlu0 %8558 }
0x2a16   :  { %v12971_v5 = vpop.xlane.xlu1 %8555 }
0x2a17   :  { %13988 = vst [vmem:[#allocation62_spill] sm:$0xff] %v12971_v5 }
0x2a18   :  { %v12975_v22 = vpop.xlane.xlu0 %8564 }
0x2a19   :  { %13990 = vst [vmem:[#allocation64_spill] sm:$0xff] %v12975_v22 }
0x2a1a   :  { %v12973_v17 = vpop.xlane.xlu1 %8561 }
0x2a1b   :  { %13989 = vst [vmem:[#allocation63_spill] sm:$0xff] %v12973_v17 }
0x2a1e   :  { %v295_v6 = vpop.permute.xlu1 %294 }
0x2a1f   :  { %v431_v26 = vadd.f32 %v11259_v54, %v295_v6  ;;  %v2168_v15 = vadd.f32 %v13991_v51, %v295_v6 }
0x2a20   :  { %v4595_v47 = vpop.permute.xlu0 %4594 }
0x2a21   :  { %v8901_v8 = vmul.f32 -5.0, %v431_v26  ;;  %v8968_v63 = vmul.f32 -5.0, %v2168_v15  ;;  %v4731_v21 = vadd.f32 %v13992_v1, %v4595_v47  ;;  %v6462_v3 = vadd.f32 %v12590_v57, %v4595_v47 }
0x2a22   :  { %v915_v9 = vpop.permute.xlu1 %914 }
0x2a23   :  { %v436_v14 = vmul.f32 1.442695, %v8901_v8  ;;  %v2173_v30 = vmul.f32 1.442695, %v8968_v63  ;;  %v9094_v25 = vmul.f32 -5.0, %v4731_v21  ;;  %v9161_v31 = vmul.f32 -5.0, %v6462_v3 }
0x2a24   :  { %926 = vst.msk [vmem:[#allocation2 + $0x8] sm:$0xff] %vm924_vm4, %v915_v9  ;;  %v913_v32 = vpop.permute.xlu0 %912  ;;  %v62_v21 = vlaneseq }
0x2a25   :  { %10612 = vpow2.f32 %v436_v14  ;;  %v4736_v54 = vmul.f32 1.442695, %v9094_v25  ;;  %v6467_v39 = vmul.f32 1.442695, %v9161_v31  ;;  %925 = vst.msk [vmem:[#allocation2] sm:$0xff] %vm924_vm4, %v913_v32 }
0x2a26   :  { %10614 = vpow2.f32 %v2173_v30  ;;  %v63_v3 = vshrl.u32 %v62_v21, 7  ;;  %v68_v32 = vand.u32 127, %v62_v21 }
0x2a27   :  { %10616 = vpow2.f32 %v4736_v54 }
0x2a28   :  { %10618 = vpow2.f32 %v6467_v39  ;;  %v917_v7 = vpop.permute.xlu0 %916  ;;  %v64_v54 = vadd.s32 8, %v63_v3 }
0x2a29   :  { %927 = vst.msk [vmem:[#allocation2 + $0x10] sm:$0xff] %vm924_vm4, %v917_v7 }
0x2a2c   :  { %v919_v57 = vpop.permute.xlu0 %918 }
0x2a2d   :  { %928 = vst.msk [vmem:[#allocation2 + $0x18] sm:$0xff] %vm924_vm4, %v919_v57  ;;  %v65_v57 = vadd.s32 16, %v63_v3 }
0x2a32   :  { %v10613_v56 = vpop.eup %10612 }
0x2a33   :  { %v10615_v19 = vpop.eup %10614  ;;  %v438_v33 = vadd.f32 1.0, %v10613_v56  ;;  %v66_v56 = vadd.s32 24, %v63_v3 }
0x2a34   :  { %v10617_v38 = vpop.eup %10616  ;;  %v2175_v23 = vadd.f32 1.0, %v10615_v19 }
0x2a35   :  { %v10619_v4 = vpop.eup %10618  ;;  %10620 = vrcp.f32 %v438_v33  ;;  %v4738_v18 = vadd.f32 1.0, %v10617_v38  ;;  %v69_v33 = vsub.s32 %v63_v3, %v68_v32  ;;  %v70_v38 = vsub.s32 %v64_v54, %v68_v32 }
0x2a36   :  { %10622 = vrcp.f32 %v2175_v23  ;;  %v6469_v46 = vadd.f32 1.0, %v10619_v4  ;;  %v71_v23 = vsub.s32 %v65_v57, %v68_v32  ;;  %v72_v4 = vsub.s32 %v66_v56, %v68_v32 }
0x2a37   :  { %10624 = vrcp.f32 %v4738_v18  ;;  %v73_v18 = vcvt.s32.f32 %v69_v33 }
0x2a38   :  { %10626 = vrcp.f32 %v6469_v46  ;;  %v74_v46 = vcvt.s32.f32 %v70_v38 }
0x2a42   :  { %v10621_v20 = vpop.eup %10620 }
0x2a43   :  { %v10623_v36 = vpop.eup %10622  ;;  %v441_v27 = vadd.f32 1e-05, %v10621_v20  ;;  %v75_v20 = vcvt.s32.f32 %v71_v23 }
0x2a44   :  { %v10625_v10 = vpop.eup %10624  ;;  %v2178_v2 = vadd.f32 1e-05, %v10623_v36  ;;  %v76_v36 = vcvt.s32.f32 %v72_v4 }
0x2a45   :  { %v10627_v0 = vpop.eup %10626  ;;  %v442_v44 = vmul.f32 1.0986123, %v441_v27  ;;  %v4741_v48 = vadd.f32 1e-05, %v10625_v10  ;;  %v77_v27 = vmul.f32 %v73_v18, %v73_v18  ;;  %v78_v10 = vmul.f32 %v74_v46, %v74_v46 }
0x2a46   :  { %v2179_v6 = vmul.f32 1.0986123, %v2178_v2  ;;  %v6472_v26 = vadd.f32 1e-05, %v10627_v0  ;;  %v79_v2 = vmul.f32 %v75_v20, %v75_v20  ;;  %v80_v0 = vmul.f32 %v76_v36, %v76_v36 }
0x2a47   :  { %v443_v51 = vmul.f32 1.442695, %v442_v44  ;;  %v4742_v15 = vmul.f32 1.0986123, %v4741_v48 }
0x2a48   :  { %v2180_v47 = vmul.f32 1.442695, %v2179_v6  ;;  %v6473_v8 = vmul.f32 1.0986123, %v6472_v26  ;;  %v12989_v26 = vsub.f32 0.0, %v77_v27  ;;  %v13001_v21 = vsub.f32 0.0, %v80_v0 }
0x2a49   :  { %10628 = vpow2.f32 %v443_v51  ;;  %v4743_v63 = vmul.f32 1.442695, %v4742_v15  ;;  %v12991_v51 = vsub.s32 1, %v63_v3  ;;  %v12993_v15 = vsub.s32 2, %v63_v3 }
0x2a4a   :  { %10630 = vpow2.f32 %v2180_v47  ;;  %v6474_v1 = vmul.f32 1.442695, %v6473_v8 }
0x2a4b   :  { %10632 = vpow2.f32 %v4743_v63  ;;  %v12997_v63 = vsub.f32 0.0, %v78_v10 }
0x2a4c   :  { %10634 = vpow2.f32 %v6474_v1  ;;  %v12999_v1 = vsub.f32 0.0, %v79_v2 }
0x2a56   :  { %v10629_v9 = vpop.eup %10628 }
0x2a57   :  { %v10631_v14 = vpop.eup %10630  ;;  %v8902_v30 = vadd.f32 -1.0, %v10629_v9  ;;  %v13003_v9 = vsub.s32 3, %v63_v3 }
0x2a58   :  { %v10633_v25 = vpop.eup %10632  ;;  %v8969_v31 = vadd.f32 -1.0, %v10631_v14 }
0x2a59   :  { %v10635_v39 = vpop.eup %10634  ;;  %10636 = vrcp.f32 %v8902_v30  ;;  %v9095_v7 = vadd.f32 -1.0, %v10633_v25  ;;  %447 = vst.msk [vmem:[#allocation6] sm:$0xf] %vm446_vm5, %v8902_v30 }
0x2a5a   :  { %10638 = vrcp.f32 %v8969_v31  ;;  %v9162_v19 = vadd.f32 -1.0, %v10635_v39  ;;  %2184 = vst.msk [vmem:[#allocation6 + $0x8] sm:$0xf] %vm446_vm5, %v8969_v31  ;;  %v13015_v39 = vsub.s32 0, %v63_v3 }
0x2a5b   :  { %4747 = vst.msk [vmem:[#allocation6 + $0x4] sm:$0xf] %vm446_vm5, %v9095_v7  ;;  %10640 = vrcp.f32 %v9095_v7 }
0x2a5c   :  { %6478 = vst.msk [vmem:[#allocation6 + $0xc] sm:$0xf] %vm446_vm5, %v9162_v19  ;;  %10642 = vrcp.f32 %v9162_v19 }
0x2a66   :  { %v10637_v44 = vpop.eup %10636 }
0x2a67   :  { %v10639_v48 = vpop.eup %10638  ;;  %v601_v6 = vmul.f32 0.5, %v10637_v44  ;;  %v13009_v31 = vmul.f32 0.3989423, %v10637_v44 }
0x2a68   :  { %v2333_v47 = vmul.f32 0.5, %v10639_v48  ;;  %v10641_v14 = vpop.eup %10640  ;;  %v13023_v23 = vmul.f32 0.3989423, %v10639_v48 }
0x2a69   :  { %v12995_v8 = vmul.f32 %v10637_v44, %v601_v6  ;;  %v4896_v4 = vmul.f32 0.5, %v10641_v14  ;;  %v10643_v18 = vpop.eup %10642  ;;  %v13028_v27 = vrot.slane %v13009_v31, %v12991_v51 }
0x2a6a   :  { %v13013_v54 = vmul.f32 %v10639_v48, %v2333_v47 }
0x2a6b   :  { %v887_v30 = vrot.slane %v12995_v8, %v12991_v51  ;;  %v1391_v25 = vrot.slane %v12995_v8, %v12993_v15  ;;  %v1802_v32 = vrot.slane %v12995_v8, %v13003_v9 }
0x2a6c   :  { %v2621_v0 = vrot.slane %v13013_v54, %v12991_v51 }
0x2a6d   :  { %v888_v7 = vmul.f32 %v887_v30, %v12989_v26  ;;  %v890_v57 = vmul.f32 %v887_v30, %v12999_v1  ;;  %v889_v56 = vmul.f32 %v887_v30, %v12997_v63  ;;  %v891_v19 = vmul.f32 %v887_v30, %v13001_v21 }
0x2a6e   :  { %v1392_v33 = vmul.f32 %v1391_v25, %v12989_v26  ;;  %v1394_v38 = vmul.f32 %v1391_v25, %v12999_v1  ;;  %v1395_v36 = vmul.f32 %v1391_v25, %v13001_v21  ;;  %v1393_v2 = vmul.f32 %v1391_v25, %v12997_v63 }
0x2a6f   :  { %v892_v46 = vmul.f32 1.442695, %v888_v7  ;;  %v896_v20 = vmul.f32 1.442695, %v890_v57  ;;  %v894_v3 = vmul.f32 1.442695, %v889_v56  ;;  %v1803_v48 = vmul.f32 %v1802_v32, %v12989_v26 }
0x2a70   :  { %v898_v10 = vmul.f32 1.442695, %v891_v19  ;;  %v1396_v44 = vmul.f32 1.442695, %v1392_v33  ;;  %v1804_v6 = vmul.f32 %v1802_v32, %v12997_v63  ;;  %v1400_v47 = vmul.f32 1.442695, %v1394_v38 }
0x2a71   :  { %10644 = vpow2.f32 %v892_v46  ;;  %v13035_v30 = vmul.f32 %v10641_v14, %v4896_v4  ;;  %v6627_v7 = vmul.f32 0.5, %v10643_v18  ;;  %v1402_v57 = vmul.f32 1.442695, %v1395_v36 }
0x2a72   :  { %10646 = vpow2.f32 %v896_v20  ;;  %v1805_v56 = vmul.f32 %v1802_v32, %v12999_v1  ;;  %v1806_v25 = vmul.f32 %v1802_v32, %v13001_v21  ;;  %v13041_v19 = vrot.slane %v13009_v31, %v12993_v15 }
0x2a73   :  { %10648 = vpow2.f32 %v894_v3  ;;  %v1398_v33 = vmul.f32 1.442695, %v1393_v2  ;;  %v2622_v46 = vmul.f32 %v2621_v0, %v12989_v26  ;;  %v1807_v20 = vmul.f32 1.442695, %v1803_v48 }
0x2a74   :  { %10650 = vpow2.f32 %v898_v10  ;;  %v1809_v38 = vmul.f32 1.442695, %v1804_v6  ;;  %v13044_v4 = vmul.f32 0.3989423, %v10641_v14  ;;  %v2623_v3 = vmul.f32 %v2621_v0, %v12997_v63 }
0x2a75   :  { %10652 = vpow2.f32 %v1396_v44  ;;  %v5184_v36 = vrot.slane %v13035_v30, %v12991_v51  ;;  %v13049_v32 = vmul.f32 %v10643_v18, %v6627_v7  ;;  %v1811_v10 = vmul.f32 1.442695, %v1805_v56 }
0x2a76   :  { %10654 = vpow2.f32 %v1400_v47  ;;  %v1813_v40 = vmul.f32 1.442695, %v1806_v25  ;;  %v2624_v2 = vmul.f32 %v2621_v0, %v12999_v1  ;;  %v2626_v55 = vmul.f32 1.442695, %v2622_v46 }
0x2a77   :  { %10656 = vpow2.f32 %v1402_v57  ;;  %v2625_v44 = vmul.f32 %v2621_v0, %v13001_v21  ;;  %v3124_v14 = vrot.slane %v13013_v54, %v12993_v15  ;;  %v5185_v48 = vmul.f32 %v5184_v36, %v12989_v26 }
0x2a78   :  { %10658 = vpow2.f32 %v1398_v33  ;;  %v5188_v6 = vmul.f32 %v5184_v36, %v13001_v21  ;;  %v6915_v47 = vrot.slane %v13049_v32, %v12991_v51  ;;  %v13061_v7 = vrot.slane %v13009_v31, %v13003_v9 }
0x2a79   :  { %10660 = vpow2.f32 %v1807_v20  ;;  %v2628_v57 = vmul.f32 1.442695, %v2623_v3  ;;  %v5186_v56 = vmul.f32 %v5184_v36, %v12997_v63  ;;  %v2630_v0 = vmul.f32 1.442695, %v2624_v2 }
0x2a7a   :  { %10662 = vpow2.f32 %v1809_v38  ;;  %v13064_v25 = vmul.f32 0.3989423, %v10643_v18  ;;  %v6917_v33 = vmul.f32 %v6915_v47, %v12997_v63  ;;  %v2632_v46 = vmul.f32 1.442695, %v2625_v44 }
0x2a7b   :  { %10664 = vpow2.f32 %v1811_v10  ;;  %v13069_v20 = vrot.slane %v13044_v4, %v12991_v51  ;;  %v5187_v28 = vmul.f32 %v5184_v36, %v12999_v1  ;;  %v5189_v29 = vmul.f32 1.442695, %v5185_v48 }
0x2a7c   :  { %10666 = vpow2.f32 %v1813_v40  ;;  %v5195_v38 = vmul.f32 1.442695, %v5188_v6  ;;  %v3126_v3 = vmul.f32 %v3124_v14, %v12997_v63  ;;  %v5191_v10 = vmul.f32 1.442695, %v5186_v56 }
0x2a7d   :  { %10668 = vpow2.f32 %v2626_v55  ;;  %v6919_v18 = vmul.f32 %v6915_v47, %v13001_v21  ;;  %v6916_v2 = vmul.f32 %v6915_v47, %v12989_v26  ;;  %v6922_v58 = vmul.f32 1.442695, %v6917_v33 }
0x2a7e   :  { %v10645_v35 = vpop.eup %10644  ;;  %10670 = vpow2.f32 %v2628_v57  ;;  %v6918_v61 = vmul.f32 %v6915_v47, %v12999_v1  ;;  %v3128_v48 = vmul.f32 %v3124_v14, %v13001_v21  ;;  %v606_v6 = vrot.slane %v12995_v8, %v13015_v39 }
0x2a7f   :  { %v10647_v40 = vpop.eup %10646  ;;  %v904_v44 = vmul.f32 %v10645_v35, %v13028_v27  ;;  %10672 = vpow2.f32 %v2630_v0  ;;  %v5193_v56 = vmul.f32 1.442695, %v5187_v28  ;;  %v3125_v35 = vmul.f32 %v3124_v14, %v12989_v26 }
0x2a80   :  { %v10649_v36 = vpop.eup %10648  ;;  %v906_v55 = vmul.f32 %v10647_v40, %v13028_v27  ;;  %10674 = vpow2.f32 %v2632_v46  ;;  %v3127_v0 = vmul.f32 %v3124_v14, %v12999_v1  ;;  %v13087_v47 = vrot.slane %v13064_v25, %v12991_v51 }
0x2a81   :  { %v10651_v57 = vpop.eup %10650  ;;  %933 = vrot.lane.b32.xlu0 %v904_v44, %s10885_s28  ;;  %10676 = vpow2.f32 %v5189_v29  ;;  %v6926_v46 = vmul.f32 1.442695, %v6919_v18  ;;  %v13091_v8 = vrot.slane %v13023_v23, %v12993_v15  ;;  %v905_v29 = vmul.f32 %v10649_v36, %v13028_v27 }
0x2a82   :  { %v10653_v33 = vpop.eup %10652  ;;  %937 = vrot.lane.b32.xlu1 %v906_v55, %s10885_s28  ;;  %10678 = vpow2.f32 %v5195_v38  ;;  %v6920_v28 = vmul.f32 1.442695, %v6916_v2  ;;  %v3131_v44 = vmul.f32 1.442695, %v3126_v3  ;;  %v6924_v50 = vmul.f32 1.442695, %v6918_v61 }
0x2a83   :  { %v10655_v40 = vpop.eup %10654  ;;  %10680 = vpow2.f32 %v5191_v10  ;;  %v3135_v55 = vmul.f32 1.442695, %v3128_v48  ;;  %v607_v38 = vmul.f32 %v606_v6, %v12989_v26  ;;  %v3129_v18 = vmul.f32 1.442695, %v3125_v35  ;;  %v13993_v10 = vld [vmem:[#allocation9_spill] sm:$0xff] }
0x2a84   :  { %v10657_v14 = vpop.eup %10656  ;;  %10682 = vpow2.f32 %v6922_v58  ;;  %v3133_v52 = vmul.f32 1.442695, %v3127_v0  ;;  %v609_v49 = vmul.f32 %v606_v6, %v12999_v1  ;;  %v13101_v58 = vrot.slane %v13009_v31, %v13015_v39 }
0x2a85   :  { %v10659_v24 = vpop.eup %10658  ;;  %935 = vrot.lane.b32.xlu0 %v905_v29, %s10885_s28  ;;  %10684 = vpow2.f32 %v5193_v56  ;;  %v608_v61 = vmul.f32 %v606_v6, %v12997_v63  ;;  %v2338_v3 = vrot.slane %v13013_v54, %v13015_v39  ;;  %v907_v36 = vmul.f32 %v10651_v57, %v13028_v27 }
0x2a86   :  { %v10661_v13 = vpop.eup %10660  ;;  %1416 = vrot.lane.b32.xlu1 %v13993_v10, %s10886_s21  ;;  %10686 = vpow2.f32 %v6926_v46  ;;  %v1408_v48 = vmul.f32 %v10653_v33, %v13041_v19  ;;  %v1410_v56 = vmul.f32 %v10655_v40, %v13041_v19  ;;  %v611_v0 = vmul.f32 1.442695, %v607_v38  ;;  %v13994_v40 = vld [vmem:[#allocation11_spill] sm:$0xff] }
0x2a87   :  { %v10663_v2 = vpop.eup %10662  ;;  %10688 = vpow2.f32 %v6920_v28  ;;  %v610_v46 = vmul.f32 %v606_v6, %v13001_v21  ;;  %v4901_v31 = vrot.slane %v13035_v30, %v13015_v39  ;;  %v13114_v10 = vmul.f32 %v10657_v14, %v13041_v19 }
0x2a88   :  { %v10665_v35 = vpop.eup %10664  ;;  %10690 = vpow2.f32 %v3131_v44  ;;  %v615_v27 = vmul.f32 1.442695, %v609_v49  ;;  %v2339_v57 = vmul.f32 %v2338_v3, %v12989_v26  ;;  %v1409_v6 = vmul.f32 %v10659_v24, %v13041_v19 }
0x2a89   :  { %v10667_v29 = vpop.eup %10666  ;;  %939 = vrot.lane.b32.xlu0 %v907_v36, %s10885_s28  ;;  %10692 = vpow2.f32 %v6924_v50  ;;  %v613_v28 = vmul.f32 1.442695, %v608_v61  ;;  %v2340_v44 = vmul.f32 %v2338_v3, %v12997_v63  ;;  %v13126_v14 = vmul.f32 %v10661_v13, %v13061_v7  ;;  %v13995_v13 = vld [vmem:[#allocation10_spill] sm:$0xff] }
0x2a8a   :  { %v13117_v33 = vpop.eup %10668  ;;  %1420 = vrot.lane.b32.xlu1 %v13994_v40, %s10886_s21  ;;  %10694 = vpow2.f32 %v3135_v55  ;;  %v13130_v50 = vrot.slane %v13023_v23, %v13015_v39  ;;  %v2341_v49 = vmul.f32 %v2338_v3, %v12999_v1  ;;  %v617_v24 = vmul.f32 1.442695, %v610_v46 }
0x2a8b   :  { %v13123_v38 = vpop.eup %10670  ;;  %10696 = vpow2.f32 %v3129_v18  ;;  %v2342_v19 = vmul.f32 %v2338_v3, %v13001_v21  ;;  %v4902_v55 = vmul.f32 %v4901_v31, %v12989_v26  ;;  %v13142_v18 = vmul.f32 %v10663_v2, %v13061_v7 }
0x2a8c   :  { %v13133_v36 = vpop.eup %10672  ;;  %10698 = vpow2.f32 %v3133_v52  ;;  %v2343_v40 = vmul.f32 1.442695, %v2339_v57  ;;  %v4905_v42 = vmul.f32 %v4901_v31, %v13001_v21  ;;  %v13149_v52 = vmul.f32 %v10665_v35, %v13061_v7 }
0x2a8d   :  { %v13137_v61 = vpop.eup %10674  ;;  %1418 = vrot.lane.b32.xlu0 %v13995_v13, %s10886_s21  ;;  %10700 = vpow2.f32 %v611_v0  ;;  %v2345_v3 = vmul.f32 1.442695, %v2340_v44  ;;  %v4903_v46 = vmul.f32 %v4901_v31, %v12997_v63  ;;  %v13155_v2 = vmul.f32 %v10667_v29, %v13061_v7 }
0x2a8e   :  { %v13145_v11 = vpop.eup %10676  ;;  %1437 = vrot.lane.b32.xlu1 %v1408_v48, %s10886_s21  ;;  %10702 = vpow2.f32 %v615_v27  ;;  %v2347_v0 = vmul.f32 1.442695, %v2341_v49  ;;  %v6632_v57 = vrot.slane %v13049_v32, %v13015_v39  ;;  %v2349_v48 = vmul.f32 1.442695, %v2342_v19 }
0x2a8f   :  { %v13152_v59 = vpop.eup %10678  ;;  %10704 = vpow2.f32 %v613_v28  ;;  %v4906_v35 = vmul.f32 1.442695, %v4902_v55  ;;  %v13163_v27 = vrot.slane %v13044_v4, %v13015_v39  ;;  %v4912_v7 = vmul.f32 1.442695, %v4905_v42 }
0x2a90   :  { %v13159_v13 = vpop.eup %10680  ;;  %10706 = vpow2.f32 %v617_v24  ;;  %v6634_v29 = vmul.f32 %v6632_v57, %v12997_v63  ;;  %v4904_v28 = vmul.f32 %v4901_v31, %v12999_v1  ;;  %v4908_v24 = vmul.f32 1.442695, %v4903_v46 }
0x2a91   :  { %v13165_v44 = vpop.eup %10682  ;;  %1422 = vrot.lane.b32.xlu0 %v13996_v60, %s10886_s21  ;;  %10708 = vpow2.f32 %v2343_v40  ;;  %v6636_v19 = vmul.f32 %v6632_v57, %v13001_v21  ;;  %v6633_v55 = vmul.f32 %v6632_v57, %v12989_v26  ;;  %v13181_v42 = vrot.slane %v13064_v25, %v13015_v39 }
0x2a92   :  { %v10685_v49 = vpop.eup %10684  ;;  %1441 = vrot.lane.b32.xlu1 %v1410_v56, %s10886_s21  ;;  %10710 = vpow2.f32 %v2345_v3  ;;  %v6639_v60 = vmul.f32 1.442695, %v6634_v29  ;;  %v4910_v56 = vmul.f32 1.442695, %v4904_v28 }
0x2a93   :  { %v13174_v34 = vpop.eup %10686  ;;  %v13177_v41 = vmul.f32 %v10685_v49, %v13069_v20  ;;  %10712 = vpow2.f32 %v2347_v0  ;;  %v6643_v40 = vmul.f32 1.442695, %v6636_v19  ;;  %v6637_v3 = vmul.f32 1.442695, %v6633_v55 }
0x2a94   :  { %v10689_v31 = vpop.eup %10688  ;;  %10714 = vpow2.f32 %v2349_v48  ;;  %v6635_v49 = vmul.f32 %v6632_v57, %v12999_v1  ;;  %v5687_v0 = vrot.slane %v13035_v30, %v12993_v15  ;;  %v7418_v48 = vrot.slane %v13049_v32, %v12993_v15 }
0x2a95   :  { %v10691_v46 = vpop.eup %10690  ;;  %1439 = vrot.lane.b32.xlu0 %v1409_v6, %s10886_s21  ;;  %v13185_v37 = vmul.f32 %v10689_v31, %v13087_v47  ;;  %10716 = vpow2.f32 %v4906_v35  ;;  %v13197_v6 = vrot.slane %v13044_v4, %v12993_v15 }
0x2a96   :  { %v10693_v29 = vpop.eup %10692  ;;  %1443 = vrot.lane.b32.xlu1 %v13114_v10, %s10886_s21  ;;  %v13193_v39 = vmul.f32 %v10691_v46, %v13091_v8  ;;  %10718 = vpow2.f32 %v4912_v7  ;;  %v6641_v28 = vmul.f32 1.442695, %v6635_v49  ;;  %v5688_v19 = vmul.f32 %v5687_v0, %v12989_v26 }
0x2a97   :  { %v10695_v35 = vpop.eup %10694  ;;  %v13202_v57 = vmul.f32 %v10693_v29, %v13087_v47  ;;  %10720 = vpow2.f32 %v4908_v24  ;;  %v5690_v7 = vmul.f32 %v5687_v0, %v12999_v1  ;;  %v7419_v31 = vmul.f32 %v7418_v48, %v12989_v26 }
0x2a98   :  { %v10697_v10 = vpop.eup %10696  ;;  %v13206_v55 = vmul.f32 %v10695_v35, %v13091_v8  ;;  %10722 = vpow2.f32 %v6639_v60  ;;  %v5692_v24 = vmul.f32 1.442695, %v5688_v19  ;;  %v13217_v49 = vrot.slane %v13064_v25, %v12993_v15  ;;  %v13998_v60 = vld [vmem:[#allocation13_spill] sm:$0xff] }
0x2a99   :  { %v10699_v46 = vpop.eup %10698  ;;  %1829 = vrot.lane.b32.xlu0 %v13997_v16, %s10887_s4  ;;  %v13213_v29 = vmul.f32 %v10697_v10, %v13091_v8  ;;  %10724 = vpow2.f32 %v4910_v56  ;;  %v5696_v17 = vmul.f32 1.442695, %v5690_v7  ;;  %v7423_v43 = vmul.f32 1.442695, %v7419_v31 }
0x2a9a   :  { %v10701_v35 = vpop.eup %10700  ;;  %1827 = vrot.lane.b32.xlu1 %v13998_v60, %s10887_s4  ;;  %v13222_v62 = vmul.f32 %v10699_v46, %v13091_v8  ;;  %10726 = vpow2.f32 %v6643_v40  ;;  %v5689_v56 = vmul.f32 %v5687_v0, %v12997_v63  ;;  %v7421_v19 = vmul.f32 %v7418_v48, %v12999_v1  ;;  %v13999_v40 = vld [vmem:[#allocation16_spill] sm:$0xff] }
0x2a9b   :  { %v10703_v16 = vpop.eup %10702  ;;  %v623_v10 = vmul.f32 %v10701_v35, %v13101_v58  ;;  %10728 = vpow2.f32 %v6637_v3  ;;  %v5691_v60 = vmul.f32 %v5687_v0, %v13001_v21  ;;  %v7420_v8 = vmul.f32 %v7418_v48, %v12997_v63 }
0x2a9c   :  { %v10705_v15 = vpop.eup %10704  ;;  %v625_v22 = vmul.f32 %v10703_v16, %v13101_v58  ;;  %10730 = vpow2.f32 %v6641_v28  ;;  %v5694_v7 = vmul.f32 1.442695, %v5689_v56  ;;  %v7427_v31 = vmul.f32 1.442695, %v7421_v19 }
0x2a9d   :  { %v10707_v46 = vpop.eup %10706  ;;  %1833 = vrot.lane.b32.xlu0 %v13999_v40, %s10887_s4  ;;  %631 = vst.msk [vmem:[#allocation4] sm:$0xff] %vm122_vm0, %v623_v10  ;;  %v624_v3 = vmul.f32 %v10705_v15, %v13101_v58  ;;  %10732 = vpow2.f32 %v5692_v24  ;;  %v5698_v28 = vmul.f32 1.442695, %v5691_v60  ;;  %v7425_v16 = vmul.f32 1.442695, %v7420_v8 }
0x2a9e   :  { %v10709_v35 = vpop.eup %10708  ;;  %1831 = vrot.lane.b32.xlu1 %v14000_v45, %s10887_s4  ;;  %633 = vst.msk [vmem:[#allocation4 + $0x10] sm:$0xff] %vm122_vm0, %v625_v22  ;;  %v626_v0 = vmul.f32 %v10707_v46, %v13101_v58  ;;  %10734 = vpow2.f32 %v5696_v17  ;;  %v3534_v24 = vrot.slane %v13013_v54, %v13003_v9  ;;  %v13244_v56 = vrot.slane %v13023_v23, %v13003_v9 }
0x2a9f   :  { %v10711_v5 = vpop.eup %10710  ;;  %632 = vst.msk [vmem:[#allocation4 + $0x8] sm:$0xff] %vm122_vm0, %v624_v3  ;;  %v2355_v10 = vmul.f32 %v10709_v35, %v13130_v50  ;;  %10736 = vpow2.f32 %v7423_v43  ;;  %v7422_v22 = vmul.f32 %v7418_v48, %v13001_v21  ;;  %v6097_v58 = vrot.slane %v13035_v30, %v13003_v9 }
0x2aa0   :  { %v10713_v45 = vpop.eup %10712  ;;  %634 = vst.msk [vmem:[#allocation4 + $0x18] sm:$0xff] %vm122_vm0, %v626_v0  ;;  %v2356_v17 = vmul.f32 %v10711_v5, %v13130_v50  ;;  %10738 = vpow2.f32 %v5694_v7  ;;  %v3535_v54 = vmul.f32 %v3534_v24, %v12989_v26  ;;  %v3537_v15 = vmul.f32 %v3534_v24, %v12999_v1 }
0x2aa1   :  { %v10715_v19 = vpop.eup %10714  ;;  %1850 = vrot.lane.b32.xlu0 %v13142_v18, %s10887_s4  ;;  %2365 = vst.msk [vmem:[#allocation4 + $0x40] sm:$0xff] %vm122_vm0, %v2355_v10  ;;  %v2357_v43 = vmul.f32 %v10713_v45, %v13130_v50  ;;  %10740 = vpow2.f32 %v7427_v31  ;;  %v7429_v48 = vmul.f32 1.442695, %v7422_v22  ;;  %v6098_v18 = vmul.f32 %v6097_v58, %v12989_v26 }
0x2aa2   :  { %v10717_v5 = vpop.eup %10716  ;;  %1848 = vrot.lane.b32.xlu1 %v13126_v14, %s10887_s4  ;;  %2366 = vst.msk [vmem:[#allocation4 + $0x48] sm:$0xff] %vm122_vm0, %v2356_v17  ;;  %v2358_v30 = vmul.f32 %v10715_v19, %v13130_v50  ;;  %10742 = vpow2.f32 %v5698_v28  ;;  %v3539_v46 = vmul.f32 1.442695, %v3535_v54  ;;  %v3543_v40 = vmul.f32 1.442695, %v3537_v15 }
0x2aa3   :  { %v10719_v60 = vpop.eup %10718  ;;  %2367 = vst.msk [vmem:[#allocation4 + $0x50] sm:$0xff] %vm122_vm0, %v2357_v43  ;;  %v4918_v8 = vmul.f32 %v10717_v5, %v13163_v27  ;;  %10744 = vpow2.f32 %v7425_v16  ;;  %v6102_v7 = vmul.f32 1.442695, %v6098_v18  ;;  %v13268_v50 = vrot.slane %v13044_v4, %v13003_v9  ;;  %v14001_v5 = vld [vmem:[#allocation19_spill] sm:$0xff] }
0x2aa4   :  { %v10721_v3 = vpop.eup %10720  ;;  %2368 = vst.msk [vmem:[#allocation4 + $0x58] sm:$0xff] %vm122_vm0, %v2358_v30  ;;  %v4921_v14 = vmul.f32 %v10719_v60, %v13163_v27  ;;  %10746 = vpow2.f32 %v7429_v48  ;;  %v3536_v0 = vmul.f32 %v3534_v24, %v12997_v63  ;;  %v6100_v28 = vmul.f32 %v6097_v58, %v12999_v1 }
0x2aa5   :  { %v10723_v31 = vpop.eup %10722  ;;  %1854 = vrot.lane.b32.xlu0 %v13155_v2, %s10887_s4  ;;  %4928 = vst.msk [vmem:[#allocation4 + $0x20] sm:$0xff] %vm122_vm0, %v4918_v8  ;;  %v4919_v35 = vmul.f32 %v10721_v3, %v13163_v27  ;;  %10748 = vpow2.f32 %v3539_v46  ;;  %v3538_v2 = vmul.f32 %v3534_v24, %v13001_v21  ;;  %v7828_v10 = vrot.slane %v13049_v32, %v13003_v9 }
0x2aa6   :  { %v10725_v16 = vpop.eup %10724  ;;  %1852 = vrot.lane.b32.xlu1 %v13149_v52, %s10887_s4  ;;  %4931 = vst.msk [vmem:[#allocation4 + $0x38] sm:$0xff] %vm122_vm0, %v4921_v14  ;;  %v6650_v4 = vmul.f32 %v10723_v31, %v13181_v42  ;;  %10750 = vpow2.f32 %v3543_v40  ;;  %v3541_v22 = vmul.f32 1.442695, %v3536_v0  ;;  %v6106_v19 = vmul.f32 1.442695, %v6100_v28  ;;  %v14003_v31 = vld [vmem:[#allocation21_spill] sm:$0xff] }
0x2aa7   :  { %v10727_v45 = vpop.eup %10726  ;;  %4929 = vst.msk [vmem:[#allocation4 + $0x28] sm:$0xff] %vm122_vm0, %v4919_v35  ;;  %v4920_v17 = vmul.f32 %v10725_v16, %v13163_v27  ;;  %10752 = vpow2.f32 %v6102_v7  ;;  %v3545_v54 = vmul.f32 1.442695, %v3538_v2  ;;  %v7829_v15 = vmul.f32 %v7828_v10, %v12989_v26  ;;  %v14002_v26 = vld [vmem:[#allocation18_spill] sm:$0xff] }
0x2aa8   :  { %v10729_v43 = vpop.eup %10728  ;;  %6660 = vst.msk [vmem:[#allocation4 + $0x68] sm:$0xff] %vm122_vm0, %v6650_v4  ;;  %v6652_v52 = vmul.f32 %v10727_v45, %v13181_v42  ;;  %v13290_v24 = vrot.slane %v13064_v25, %v13003_v9  ;;  %10754 = vpow2.f32 %v3541_v22  ;;  %v6099_v30 = vmul.f32 %v6097_v58, %v12997_v63  ;;  %v14004_v4 = vld [vmem:[#allocation20_spill] sm:$0xff] }
0x2aa9   :  { %v10731_v32 = vpop.eup %10730  ;;  %2648 = vrot.lane.b32.xlu0 %v14001_v5, %s10885_s28  ;;  %4930 = vst.msk [vmem:[#allocation4 + $0x30] sm:$0xff] %vm122_vm0, %v4920_v17  ;;  %v6649_v27 = vmul.f32 %v10729_v43, %v13181_v42  ;;  %v6101_v48 = vmul.f32 %v6097_v58, %v13001_v21  ;;  %10756 = vpow2.f32 %v6106_v19  ;;  %v7833_v25 = vmul.f32 1.442695, %v7829_v15 }
0x2aaa   :  { %v10733_v18 = vpop.eup %10732  ;;  %2646 = vrot.lane.b32.xlu1 %v14002_v26, %s10885_s28  ;;  %6662 = vst.msk [vmem:[#allocation4 + $0x78] sm:$0xff] %vm122_vm0, %v6652_v52  ;;  %v6651_v9 = vmul.f32 %v10731_v32, %v13181_v42  ;;  %v7831_v60 = vmul.f32 %v7828_v10, %v12999_v1  ;;  %10758 = vpow2.f32 %v3545_v54  ;;  %v6104_v58 = vmul.f32 1.442695, %v6099_v30 }
0x2aab   :  { %v10735_v8 = vpop.eup %10734  ;;  %6659 = vst.msk [vmem:[#allocation4 + $0x60] sm:$0xff] %vm122_vm0, %v6649_v27  ;;  %v13305_v46 = vmul.f32 %v10733_v18, %v13197_v6  ;;  %v6108_v40 = vmul.f32 1.442695, %v6101_v48  ;;  %10760 = vpow2.f32 %v7833_v25  ;;  %v7830_v7 = vmul.f32 %v7828_v10, %v12997_v63 }
0x2aac   :  { %v10737_v3 = vpop.eup %10736  ;;  %6661 = vst.msk [vmem:[#allocation4 + $0x70] sm:$0xff] %vm122_vm0, %v6651_v9  ;;  %v13309_v14 = vmul.f32 %v10735_v8, %v13197_v6  ;;  %v7837_v42 = vmul.f32 1.442695, %v7831_v60  ;;  %v2637_v35 = vrot.slane %v13023_v23, %v12991_v51  ;;  %10762 = vpow2.f32 %v6104_v58 }
0x2aad   :  { %v10739_v1 = vpop.eup %10738  ;;  %2652 = vrot.lane.b32.xlu0 %v14003_v31, %s10885_s28  ;;  %v13317_v0 = vmul.f32 %v10737_v3, %v13217_v49  ;;  %v7832_v28 = vmul.f32 %v7828_v10, %v13001_v21  ;;  %10764 = vpow2.f32 %v6108_v40  ;;  %v7835_v63 = vmul.f32 1.442695, %v7830_v7 }
0x2aae   :  { %v10741_v16 = vpop.eup %10740  ;;  %2650 = vrot.lane.b32.xlu1 %v14004_v4, %s10885_s28  ;;  %v13323_v2 = vmul.f32 %v10739_v1, %v13197_v6  ;;  %v2639_v17 = vmul.f32 %v13123_v38, %v2637_v35  ;;  %10766 = vpow2.f32 %v7837_v42  ;;  %v2638_v21 = vmul.f32 %v13117_v33, %v2637_v35  ;;  %v14012_v4 = vld [vmem:[#allocation61_spill] sm:$0xff] }
0x2aaf   :  { %v10743_v45 = vpop.eup %10742  ;;  %v13327_v51 = vmul.f32 %v10741_v16, %v13217_v49  ;;  %v7839_v23 = vmul.f32 1.442695, %v7832_v28  ;;  %10768 = vpow2.f32 %v7835_v63  ;;  %v2641_v33 = vmul.f32 %v13137_v61, %v2637_v35  ;;  %v14011_v28 = vld [vmem:[#allocation63_spill] sm:$0xff] }
0x2ab0   :  { %v10745_v22 = vpop.eup %10744  ;;  %v13331_v10 = vmul.f32 %v10743_v45, %v13197_v6  ;;  %v2640_v32 = vmul.f32 %v13133_v36, %v2637_v35  ;;  %v5204_v61 = vmul.f32 %v13152_v59, %v13069_v20  ;;  %v5201_v36 = vmul.f32 %v13145_v11, %v13069_v20  ;;  %v14010_v35 = vld [vmem:[#allocation60_spill] sm:$0xff] }
0x2ab1   :  { %v10747_v19 = vpop.eup %10746  ;;  %2668 = vrot.lane.b32.xlu0 %v2639_v17, %s10885_s28  ;;  %v13335_v43 = vmul.f32 %v10745_v22, %v13217_v49  ;;  %10770 = vpow2.f32 %v7839_v23  ;;  %v6933_v58 = vmul.f32 %v13165_v44, %v13087_v47  ;;  %v5202_v3 = vmul.f32 %v13159_v13, %v13069_v20  ;;  %v14007_v13 = vld [vmem:[#allocation62_spill] sm:$0xff] }
0x2ab2   :  { %v10749_v38 = vpop.eup %10748  ;;  %2666 = vrot.lane.b32.xlu1 %v2638_v21, %s10885_s28  ;;  %v13339_v52 = vmul.f32 %v10747_v19, %v13217_v49  ;;  %v6935_v31 = vmul.f32 %v13174_v34, %v13087_v47  ;;  %v14005_v34 = vld [vmem:[#allocation32_spill] sm:$0xff]  ;;  %v8580_v16 = vmul.f32 0.03125, %v14011_v28 }
0x2ab3   :  { %v10751_v54 = vpop.eup %10750  ;;  %v13343_v6 = vmul.f32 %v10749_v38, %v13244_v56 }
0x2ab4   :  { %v10753_v15 = vpop.eup %10752  ;;  %v13347_v5 = vmul.f32 %v10751_v54, %v13244_v56  ;;  %v13433_v63 = vsub.f32 %v14012_v4, %v8580_v16 }
0x2ab5   :  { %2672 = vrot.lane.b32.xlu0 %v2641_v33, %s10885_s28  ;;  %v13351_v27 = vmul.f32 %v10753_v15, %v13268_v50  ;;  %v10755_v30 = vpop.eup %10754 }
0x2ab6   :  { %2670 = vrot.lane.b32.xlu1 %v2640_v32, %s10885_s28  ;;  %v10757_v49 = vpop.eup %10756  ;;  %v13357_v48 = vmul.f32 %v10755_v30, %v13244_v56  ;;  %v8596_v21 = vmul.f32 %v13433_v63, %v13433_v63 }
0x2ab7   :  { %v10759_v18 = vpop.eup %10758  ;;  %v13362_v26 = vmul.f32 %v10757_v49, %v13268_v50 }
0x2ab8   :  { %v10761_v9 = vpop.eup %10760  ;;  %v13366_v25 = vmul.f32 %v10759_v18, %v13244_v56  ;;  %v8608_v54 = vsel %vm122_vm0, %v8596_v21, 0.0 }
0x2ab9   :  { %5235 = vrot.lane.b32.xlu0 %v5204_v61, %s10885_s28  ;;  %v10763_v60 = vpop.eup %10762  ;;  %v13370_v59 = vmul.f32 %v10761_v9, %v13290_v24 }
0x2aba   :  { %5229 = vrot.lane.b32.xlu1 %v5201_v36, %s10885_s28  ;;  %v10765_v8 = vpop.eup %10764  ;;  %v13375_v11 = vmul.f32 %v10763_v60, %v13268_v50 }
0x2abb   :  { %v10767_v40 = vpop.eup %10766  ;;  %v13380_v56 = vmul.f32 %v10765_v8, %v13268_v50  ;;  %v14009_v50 = vld [vmem:[#allocation64_spill] sm:$0xff] }
0x2abc   :  { %v10769_v42 = vpop.eup %10768  ;;  %v13384_v7 = vmul.f32 %v10767_v40, %v13290_v24 }
0x2abd   :  { %6962 = vrot.lane.b32.xlu0 %v6933_v58, %s10885_s28  ;;  %v13388_v44 = vmul.f32 %v10769_v42, %v13290_v24 }
0x2abe   :  { %v10771_v1 = vpop.eup %10770  ;;  %5231 = vrot.lane.b32.xlu1 %v5202_v3, %s10885_s28 }
0x2abf   :  { %v13393_v20 = vmul.f32 %v10771_v1, %v13290_v24  ;;  %v8581_v24 = vmul.f32 0.03125, %v14009_v50 }
0x2ac1   :  { %6966 = vrot.lane.b32.xlu0 %v6935_v31, %s10885_s28 }
0x2ac2   :  { %5233 = vrot.lane.b32.xlu1 %v13177_v41, %s10885_s28  ;;  %v14006_v41 = vld [vmem:[#allocation31_spill] sm:$0xff] }
0x2ac5   :  { %3171 = vrot.lane.b32.xlu0 %v13193_v39, %s10886_s21  ;;  %v8578_v39 = vmul.f32 0.03125, %v14007_v13 }
0x2ac6   :  { %6960 = vrot.lane.b32.xlu1 %v13185_v37, %s10885_s28  ;;  %v8579_v37 = vmul.f32 0.03125, %v12969_v53 }
0x2ac8   :  { %v13416_v47 = vsub.f32 %v12936_v12, %v8579_v37 }
0x2ac9   :  { %3175 = vrot.lane.b32.xlu0 %v13206_v55, %s10886_s21 }
0x2aca   :  { %6964 = vrot.lane.b32.xlu1 %v13202_v57, %s10885_s28  ;;  %v14008_v57 = vld [vmem:[#allocation59_spill] sm:$0xff] }
0x2acb   :  { %v13420_v55 = vsub.f32 %v14008_v57, %v8578_v39 }
0x2acd   :  { %5211 = vrot.lane.b32.xlu0 %v14005_v34, %s10885_s28  ;;  %v8594_v12 = vmul.f32 %v13420_v55, %v13420_v55 }
0x2ace   :  { %3169 = vrot.lane.b32.xlu1 %v13213_v29, %s10886_s21  ;;  %v8595_v29 = vmul.f32 %v13416_v47, %v13416_v47 }
0x2acf   :  { %v8602_v45 = vsel %vm122_vm0, %v8594_v12, 0.0 }
0x2ad0   :  { %v8605_v53 = vsel %vm122_vm0, %v8595_v29, 0.0 }
0x2ad2   :  { %3173 = vrot.lane.b32.xlu1 %v13222_v62, %s10886_s21  ;;  %v13426_v62 = vsub.f32 %v14010_v35, %v8581_v24 }
0x2ad4   :  { %v8597_v17 = vmul.f32 %v13426_v62, %v13426_v62 }
0x2ad6   :  { %5209 = vrot.lane.b32.xlu1 %v14006_v41, %s10885_s28  ;;  %v8611_v22 = vsel %vm122_vm0, %v8597_v17, 0.0 }
0x2aec   :  { %8606 = vadd.xlane.f32.xlu0 %v8605_v53 }
0x2af0   :  { %8603 = vadd.xlane.f32.xlu0 %v8602_v45 }
0x2af3   :  { %v934_v23 = vpop.permute.xlu0 %933 }
0x2af4   :  { %945 = vst.msk [vmem:[#allocation4] sm:$0xff] %vm924_vm4, %v934_v23  ;;  %v938_v19 = vpop.permute.xlu1 %937  ;;  %8612 = vadd.xlane.f32.xlu0 %v8611_v22 }
0x2af5   :  { %947 = vst.msk [vmem:[#allocation4 + $0x10] sm:$0xff] %vm924_vm4, %v938_v19 }
0x2af7   :  { %v936_v38 = vpop.permute.xlu0 %935 }
0x2af8   :  { %v1417_v33 = vpop.permute.xlu1 %1416  ;;  %946 = vst.msk [vmem:[#allocation4 + $0x8] sm:$0xff] %vm924_vm4, %v936_v38  ;;  %8609 = vadd.xlane.f32.xlu0 %v8608_v54 }
0x2af9   :  { %1429 = vst.msk [vmem:[#allocation2] sm:$0xff] %vm1428_vm6, %v1417_v33 }
0x2afb   :  { %v940_v15 = vpop.permute.xlu0 %939 }
0x2afc   :  { %v1421_v32 = vpop.permute.xlu1 %1420  ;;  %948 = vst.msk [vmem:[#allocation4 + $0x18] sm:$0xff] %vm924_vm4, %v940_v15 }
0x2afd   :  { %1431 = vst.msk [vmem:[#allocation2 + $0x10] sm:$0xff] %vm1428_vm6, %v1421_v32 }
0x2aff   :  { %v1419_v30 = vpop.permute.xlu0 %1418 }
0x2b00   :  { %v1438_v49 = vpop.permute.xlu1 %1437  ;;  %1430 = vst.msk [vmem:[#allocation2 + $0x8] sm:$0xff] %vm1428_vm6, %v1419_v30 }
0x2b01   :  { %1449 = vst.msk [vmem:[#allocation4] sm:$0xff] %vm1428_vm6, %v1438_v49 }
0x2b03   :  { %v1423_v61 = vpop.permute.xlu0 %1422 }
0x2b04   :  { %v1442_v18 = vpop.permute.xlu1 %1441  ;;  %1432 = vst.msk [vmem:[#allocation2 + $0x18] sm:$0xff] %vm1428_vm6, %v1423_v61 }
0x2b05   :  { %1451 = vst.msk [vmem:[#allocation4 + $0x10] sm:$0xff] %vm1428_vm6, %v1442_v18 }
0x2b07   :  { %v1440_v36 = vpop.permute.xlu0 %1439 }
0x2b08   :  { %v1444_v9 = vpop.permute.xlu1 %1443  ;;  %1450 = vst.msk [vmem:[#allocation4 + $0x8] sm:$0xff] %vm1428_vm6, %v1440_v36 }
0x2b09   :  { %1452 = vst.msk [vmem:[#allocation4 + $0x18] sm:$0xff] %vm1428_vm6, %v1444_v9 }
0x2b0b   :  { %v1830_v60 = vpop.permute.xlu0 %1829 }
0x2b0c   :  { %v1828_v8 = vpop.permute.xlu1 %1827  ;;  %1841 = vst.msk [vmem:[#allocation2 + $0x8] sm:$0xff] %vm1839_vm7, %v1830_v60 }
0x2b0d   :  { %1840 = vst.msk [vmem:[#allocation2] sm:$0xff] %vm1839_vm7, %v1828_v8 }
0x2b0f   :  { %v1834_v58 = vpop.permute.xlu0 %1833 }
0x2b10   :  { %v1832_v40 = vpop.permute.xlu1 %1831  ;;  %1843 = vst.msk [vmem:[#allocation2 + $0x18] sm:$0xff] %vm1839_vm7, %v1834_v58 }
0x2b11   :  { %1842 = vst.msk [vmem:[#allocation2 + $0x10] sm:$0xff] %vm1839_vm7, %v1832_v40  ;;  %v13487_v40 = vld [vmem:[%s13855_s13 + $0x1] ss:$0 sm:$0xff] }
0x2b13   :  { %v1851_v3 = vpop.permute.xlu0 %1850 }
0x2b14   :  { %v1849_v42 = vpop.permute.xlu1 %1848  ;;  %1861 = vst.msk [vmem:[#allocation4 + $0x8] sm:$0xff] %vm1839_vm7, %v1851_v3 }
0x2b15   :  { %1860 = vst.msk [vmem:[#allocation4] sm:$0xff] %vm1839_vm7, %v1849_v42  ;;  %v13493_v42 = vld [vmem:[%s13856_s14 + $0x1] ss:$0 sm:$0xff] }
0x2b17   :  { %v1855_v1 = vpop.permute.xlu0 %1854 }
0x2b18   :  { %v1853_v31 = vpop.permute.xlu1 %1852  ;;  %1863 = vst.msk [vmem:[#allocation4 + $0x18] sm:$0xff] %vm1839_vm7, %v1855_v1 }
0x2b19   :  { %1862 = vst.msk [vmem:[#allocation4 + $0x10] sm:$0xff] %vm1839_vm7, %v1853_v31 }
0x2b1b   :  { %v2649_v34 = vpop.permute.xlu0 %2648 }
0x2b1c   :  { %v2647_v41 = vpop.permute.xlu1 %2646  ;;  %2659 = vst.msk [vmem:[#allocation2 + $0x48] sm:$0xff] %vm924_vm4, %v2649_v34 }
0x2b1d   :  { %2658 = vst.msk [vmem:[#allocation2 + $0x40] sm:$0xff] %vm924_vm4, %v2647_v41 }
0x2b1f   :  { %v2653_v37 = vpop.permute.xlu0 %2652 }
0x2b20   :  { %v2651_v13 = vpop.permute.xlu1 %2650  ;;  %2661 = vst.msk [vmem:[#allocation2 + $0x58] sm:$0xff] %vm924_vm4, %v2653_v37 }
0x2b21   :  { %2660 = vst.msk [vmem:[#allocation2 + $0x50] sm:$0xff] %vm924_vm4, %v2651_v13 }
0x2b23   :  { %v2669_v39 = vpop.permute.xlu0 %2668 }
0x2b24   :  { %v2667_v57 = vpop.permute.xlu1 %2666  ;;  %2679 = vst.msk [vmem:[#allocation4 + $0x48] sm:$0xff] %vm924_vm4, %v2669_v39 }
0x2b25   :  { %2678 = vst.msk [vmem:[#allocation4 + $0x40] sm:$0xff] %vm924_vm4, %v2667_v57 }
0x2b27   :  { %v2673_v50 = vpop.permute.xlu0 %2672 }
0x2b28   :  { %v2671_v24 = vpop.permute.xlu1 %2670  ;;  %2681 = vst.msk [vmem:[#allocation4 + $0x58] sm:$0xff] %vm924_vm4, %v2673_v50 }
0x2b29   :  { %2680 = vst.msk [vmem:[#allocation4 + $0x50] sm:$0xff] %vm924_vm4, %v2671_v24 }
0x2b2b   :  { %v5236_v29 = vpop.permute.xlu0 %5235 }
0x2b2c   :  { %v5230_v35 = vpop.permute.xlu1 %5229  ;;  %5244 = vst.msk [vmem:[#allocation4 + $0x38] sm:$0xff] %vm924_vm4, %v5236_v29 }
0x2b2d   :  { %5241 = vst.msk [vmem:[#allocation4 + $0x20] sm:$0xff] %vm924_vm4, %v5230_v35 }
0x2b2f   :  { %v6963_v28 = vpop.permute.xlu0 %6962 }
0x2b30   :  { %v5232_v16 = vpop.permute.xlu1 %5231  ;;  %6973 = vst.msk [vmem:[#allocation4 + $0x68] sm:$0xff] %vm924_vm4, %v6963_v28 }
0x2b31   :  { %5242 = vst.msk [vmem:[#allocation4 + $0x28] sm:$0xff] %vm924_vm4, %v5232_v16 }
0x2b33   :  { %v6967_v53 = vpop.permute.xlu0 %6966 }
0x2b34   :  { %v5234_v12 = vpop.permute.xlu1 %5233  ;;  %6975 = vst.msk [vmem:[#allocation4 + $0x78] sm:$0xff] %vm924_vm4, %v6967_v53 }
0x2b35   :  { %5243 = vst.msk [vmem:[#allocation4 + $0x30] sm:$0xff] %vm924_vm4, %v5234_v12 }
0x2b37   :  { %v3172_v4 = vpop.permute.xlu0 %3171 }
0x2b38   :  { %v6961_v45 = vpop.permute.xlu1 %6960  ;;  %3182 = vst.msk [vmem:[#allocation4 + $0x48] sm:$0xff] %vm1428_vm6, %v3172_v4 }
0x2b39   :  { %6972 = vst.msk [vmem:[#allocation4 + $0x60] sm:$0xff] %vm924_vm4, %v6961_v45 }
0x2b3b   :  { %v3176_v17 = vpop.permute.xlu0 %3175 }
0x2b3c   :  { %v6965_v23 = vpop.permute.xlu1 %6964  ;;  %3184 = vst.msk [vmem:[#allocation4 + $0x58] sm:$0xff] %vm1428_vm6, %v3176_v17 }
0x2b3d   :  { %6974 = vst.msk [vmem:[#allocation4 + $0x70] sm:$0xff] %vm924_vm4, %v6965_v23 }
0x2b3f   :  { %v5212_v22 = vpop.permute.xlu0 %5211 }
0x2b40   :  { %v3170_v21 = vpop.permute.xlu1 %3169  ;;  %5222 = vst.msk [vmem:[#allocation2 + $0x28] sm:$0xff] %vm924_vm4, %v5212_v22  ;;  %v10814_v22 = vld [vmem:[%s13854_s12 + $0x1] ss:$0 sm:$0xff] }
0x2b41   :  { %3181 = vst.msk [vmem:[#allocation4 + $0x40] sm:$0xff] %vm1428_vm6, %v3170_v21 }
0x2b44   :  { %v3174_v19 = vpop.permute.xlu1 %3173 }
0x2b45   :  { %3183 = vst.msk [vmem:[#allocation4 + $0x50] sm:$0xff] %vm1428_vm6, %v3174_v19 }
0x2b48   :  { %v5210_v38 = vpop.permute.xlu1 %5209 }
0x2b49   :  { %5221 = vst.msk [vmem:[#allocation2 + $0x20] sm:$0xff] %vm924_vm4, %v5210_v38 }
0x2b75   :  { %v8607_v54 = vpop.xlane.xlu0 %8606 }
0x2b76   :  { %v8627_v33 = vmul.f32 0.03125, %v8607_v54 }
0x2b78   :  { %v8635_v15 = vadd.f32 1e-05, %v8627_v33 }
0x2b79   :  { %v8604_v32 = vpop.xlane.xlu0 %8603 }
0x2b7a   :  { %10772 = vrsqrt.f32 %v8635_v15  ;;  %v8626_v30 = vmul.f32 0.03125, %v8604_v32  ;;  %v14013_v15 = vld [vmem:[#allocation55_spill] sm:$0xff] }
0x2b7c   :  { %v8634_v49 = vadd.f32 1e-05, %v8626_v30 }
0x2b7d   :  { %v8613_v61 = vpop.xlane.xlu0 %8612 }
0x2b7e   :  { %10774 = vrsqrt.f32 %v8634_v49  ;;  %v8629_v18 = vmul.f32 0.03125, %v8613_v61 }
0x2b80   :  { %v8637_v36 = vadd.f32 1e-05, %v8629_v18 }
0x2b81   :  { %v8610_v9 = vpop.xlane.xlu0 %8609 }
0x2b82   :  { %10776 = vrsqrt.f32 %v8637_v36  ;;  %v8628_v60 = vmul.f32 0.03125, %v8610_v9 }
0x2b84   :  { %v8636_v8 = vadd.f32 1e-05, %v8628_v60  ;;  %v14014_v60 = vld [vmem:[#allocation57_spill] sm:$0xff] }
0x2b86   :  { %10778 = vrsqrt.f32 %v8636_v8 }
0x2b87   :  { %v10773_v58 = vpop.eup %10772 }
0x2b88   :  { %v8651_v3 = vmul.f32 %v10773_v58, %v13416_v47 }
0x2b8a   :  { %v8665_v1 = vmul.f32 %v13487_v40, %v8651_v3 }
0x2b8b   :  { %v10775_v31 = vpop.eup %10774 }
0x2b8c   :  { %v8679_v34 = vadd.f32 %v13493_v42, %v8665_v1  ;;  %v8650_v41 = vmul.f32 %v10775_v31, %v13420_v55 }
0x2b8e   :  { %v8691_v37 = vsel %vm122_vm0, %v8679_v34, 0.0  ;;  %v8664_v13 = vmul.f32 %v13487_v40, %v8650_v41 }
0x2b8f   :  { %v10777_v39 = vpop.eup %10776  ;;  %8692 = vadd.xlane.f32.xlu0 %v8691_v37 }
0x2b90   :  { %v8678_v47 = vadd.f32 %v13493_v42, %v8664_v13  ;;  %v8653_v57 = vmul.f32 %v10777_v39, %v13426_v62  ;;  %v10287_v62 = vpop.f32.mrf.mxu0 }
0x2b91   :  { %v8529_v37 = vadd.f32 %v10814_v22, %v10287_v62  ;;  %v14018_v62 = vld [vmem:[#allocation43_spill] sm:$0xff] }
0x2b92   :  { %v8688_v50 = vsel %vm122_vm0, %v8678_v47, 0.0  ;;  %v8667_v24 = vmul.f32 %v13487_v40, %v8653_v57  ;;  %v8523_v4 = vpop.f32.mrf.mxu0 }
0x2b93   :  { %v10779_v29 = vpop.eup %10778  ;;  %8689 = vadd.xlane.f32.xlu1 %v8688_v50  ;;  %v14015_v50 = vld [vmem:[#allocation56_spill] sm:$0xff] }
0x2b94   :  { %v8681_v35 = vadd.f32 %v13493_v42, %v8667_v24  ;;  %v8652_v55 = vmul.f32 %v10779_v29, %v13433_v63  ;;  %v10290_v45 = vpop.f32.mrf.mxu0  ;;  %v8524_v63 = vadd.f32 %v10814_v22, %v8523_v4  ;;  %v8547_v24 = vadd.f32 %v8529_v37, %v14015_v50  ;;  %v14019_v4 = vld [vmem:[#allocation45_spill] sm:$0xff] }
0x2b95   :  { %v8539_v29 = vadd.f32 %v10814_v22, %v10290_v45  ;;  %v14020_v45 = vld [vmem:[#allocation34_spill] sm:$0xff] }
0x2b96   :  { %v8697_v28 = vsel %vm122_vm0, %v8681_v35, 0.0  ;;  %v8666_v16 = vmul.f32 %v13487_v40, %v8652_v55  ;;  %v8533_v19 = vpop.f32.mrf.mxu0  ;;  %v8546_v32 = vadd.f32 %v8524_v63, %v14013_v15  ;;  %v14016_v55 = vld [vmem:[#allocation58_spill] sm:$0xff] }
0x2b97   :  { %8698 = vadd.xlane.f32.xlu0 %v8697_v28  ;;  %v8534_v30 = vadd.f32 %v10814_v22, %v8533_v19  ;;  %v13542_v28 = vadd.f32 %v8539_v29, %v14016_v55 }
0x2b98   :  { %v8680_v53 = vadd.f32 %v13493_v42, %v8666_v16  ;;  %v8566_v1 = vsel %vm122_vm0, %v8546_v32, 0.0  ;;  %v8569_v16 = vsel %vm122_vm0, %v8547_v24, 0.0 }
0x2b99   :  { %v13524_v8 = vadd.f32 %v8534_v30, %v14014_v60 }
0x2b9a   :  { %v8694_v12 = vsel %vm122_vm0, %v8680_v53, 0.0 }
0x2b9b   :  { %8695 = vadd.xlane.f32.xlu0 %v8694_v12  ;;  %v8572_v39 = vsel %vm122_vm0, %v13524_v8, 0.0  ;;  %v14017_v12 = vld [vmem:[#allocation33_spill] sm:$0xff] }
0x2c18   :  { %v8693_v17 = vpop.xlane.xlu0 %8692 }
0x2c19   :  { %v8713_v23 = vmul.f32 0.03125, %v8693_v17 }
0x2c1b   :  { %v13513_v21 = vsub.f32 %v8679_v34, %v8713_v23 }
0x2c1c   :  { %v8690_v38 = vpop.xlane.xlu1 %8689 }
0x2c1d   :  { %v8712_v54 = vmul.f32 0.03125, %v8690_v38  ;;  %v8729_v33 = vmul.f32 %v13513_v21, %v13513_v21 }
0x2c1f   :  { %v13518_v49 = vsub.f32 %v8678_v47, %v8712_v54  ;;  %v8739_v61 = vsel %vm122_vm0, %v8729_v33, 0.0 }
0x2c20   :  { %8740 = vadd.xlane.f32.xlu1 %v8739_v61  ;;  %v8699_v18 = vpop.xlane.xlu0 %8698 }
0x2c21   :  { %v8715_v36 = vmul.f32 0.03125, %v8699_v18  ;;  %v8728_v9 = vmul.f32 %v13518_v49, %v13518_v49 }
0x2c23   :  { %v13526_v58 = vsub.f32 %v8681_v35, %v8715_v36  ;;  %v8736_v3 = vsel %vm122_vm0, %v8728_v9, 0.0 }
0x2c24   :  { %8737 = vadd.xlane.f32.xlu0 %v8736_v3  ;;  %8567 = vadd.xlane.f32.xlu1 %v8566_v1  ;;  %v8696_v31 = vpop.xlane.xlu0 %8695 }
0x2c25   :  { %v8714_v34 = vmul.f32 0.03125, %v8696_v31  ;;  %v8731_v41 = vmul.f32 %v13526_v58, %v13526_v58  ;;  %v13583_v31 = vld [vmem:[%s13857_s15] ss:$0 sm:$0xff] }
0x2c27   :  { %v13532_v13 = vsub.f32 %v8680_v53, %v8714_v34  ;;  %v8745_v47 = vsel %vm122_vm0, %v8731_v41, 0.0  ;;  %v8575_v53 = vsel %vm122_vm0, %v13542_v28, 0.0 }
0x2c28   :  { %8573 = vadd.xlane.f32.xlu1 %v8572_v39  ;;  %8746 = vadd.xlane.f32.xlu0 %v8745_v47  ;;  %v13591_v39 = vld [vmem:[%s13858_s16] ss:$0 sm:$0xff] }
0x2c29   :  { %v8730_v57 = vmul.f32 %v13532_v13, %v13532_v13 }
0x2c2b   :  { %v8742_v35 = vsel %vm122_vm0, %v8730_v57, 0.0 }
0x2c2c   :  { %8743 = vadd.xlane.f32.xlu0 %v8742_v35 }
0x2c30   :  { %8570 = vadd.xlane.f32.xlu0 %v8569_v16 }
0x2c34   :  { %8576 = vadd.xlane.f32.xlu0 %v8575_v53 }
0x2c39   :  { %5213 = vrot.lane.b32.xlu1 %v14017_v12, %s10885_s28 }
0x2c3d   :  { %5732 = vrot.lane.b32.xlu1 %v13305_v46, %s10886_s21  ;;  %v14021_v46 = vld [vmem:[#allocation44_spill] sm:$0xff] }
0x2c41   :  { %5736 = vrot.lane.b32.xlu1 %v13309_v14, %s10886_s21  ;;  %v14022_v14 = vld [vmem:[#allocation46_spill] sm:$0xff] }
0x2c45   :  { %6940 = vrot.lane.b32.xlu1 %v14018_v62, %s10885_s28 }
0x2c49   :  { %6944 = vrot.lane.b32.xlu1 %v14019_v4, %s10885_s28 }
0x2c4a   :  { %5215 = vrot.lane.b32.xlu0 %v14020_v45, %s10885_s28 }
0x2c4d   :  { %7463 = vrot.lane.b32.xlu1 %v13317_v0, %s10886_s21 }
0x2c4e   :  { %5734 = vrot.lane.b32.xlu0 %v13323_v2, %s10886_s21 }
0x2c51   :  { %7467 = vrot.lane.b32.xlu1 %v13327_v51, %s10886_s21 }
0x2c52   :  { %5738 = vrot.lane.b32.xlu0 %v13331_v10, %s10886_s21 }
0x2c56   :  { %6942 = vrot.lane.b32.xlu0 %v14021_v46, %s10885_s28 }
0x2c5a   :  { %6946 = vrot.lane.b32.xlu0 %v14022_v14, %s10885_s28 }
0x2c5e   :  { %7465 = vrot.lane.b32.xlu0 %v13335_v43, %s10886_s21 }
0x2ca9   :  { %v8741_v17 = vpop.xlane.xlu1 %8740 }
0x2caa   :  { %v8761_v0 = vmul.f32 0.03125, %v8741_v17 }
0x2cac   :  { %v8769_v23 = vadd.f32 1e-05, %v8761_v0 }
0x2cad   :  { %v8568_v22 = vpop.xlane.xlu1 %8567  ;;  %v8738_v2 = vpop.xlane.xlu0 %8737 }
0x2cae   :  { %10780 = vrsqrt.f32 %v8769_v23  ;;  %v8582_v63 = vmul.f32 0.03125, %v8568_v22  ;;  %v8760_v51 = vmul.f32 0.03125, %v8738_v2 }
0x2cb0   :  { %v13573_v19 = vsub.f32 %v8546_v32, %v8582_v63  ;;  %v8768_v10 = vadd.f32 1e-05, %v8760_v51 }
0x2cb1   :  { %v8574_v38 = vpop.xlane.xlu1 %8573  ;;  %v8747_v54 = vpop.xlane.xlu0 %8746 }
0x2cb2   :  { %10782 = vrsqrt.f32 %v8768_v10  ;;  %v8763_v33 = vmul.f32 0.03125, %v8747_v54  ;;  %v8598_v15 = vmul.f32 %v13573_v19, %v13573_v19  ;;  %v8584_v34 = vmul.f32 0.03125, %v8574_v38 }
0x2cb4   :  { %v8771_v30 = vadd.f32 1e-05, %v8763_v33  ;;  %v8614_v43 = vsel %vm122_vm0, %v8598_v15, 0.0 }
0x2cb5   :  { %v5214_v61 = vpop.permute.xlu1 %5213  ;;  %8615 = vadd.xlane.f32.xlu0 %v8614_v43  ;;  %v8744_v18 = vpop.xlane.xlu0 %8743  ;;  %v14023_v43 = vld [vmem:[#allocation22_spill] sm:$0xff] }
0x2cb6   :  { %10784 = vrsqrt.f32 %v8771_v30  ;;  %5223 = vst.msk [vmem:[#allocation2 + $0x30] sm:$0xff] %vm924_vm4, %v5214_v61  ;;  %v8762_v36 = vmul.f32 0.03125, %v8744_v18  ;;  %v14024_v18 = vld [vmem:[#allocation24_spill] sm:$0xff] }
0x2cb8   :  { %v8770_v32 = vadd.f32 1e-05, %v8762_v36  ;;  %v14025_v36 = vld [vmem:[#allocation35_spill] sm:$0xff] }
0x2cb9   :  { %v5733_v9 = vpop.permute.xlu1 %5732  ;;  %v8571_v60 = vpop.xlane.xlu0 %8570 }
0x2cba   :  { %10786 = vrsqrt.f32 %v8770_v32  ;;  %5744 = vst.msk [vmem:[#allocation4 + $0x20] sm:$0xff] %vm1428_vm6, %v5733_v9  ;;  %v8583_v3 = vmul.f32 0.03125, %v8571_v60  ;;  %v14026_v32 = vld [vmem:[#allocation23_spill] sm:$0xff]  ;;  %v14027_v9 = vld [vmem:[#allocation37_spill] sm:$0xff] }
0x2cbb   :  { %v10781_v1 = vpop.eup %10780  ;;  %v14028_v60 = vld [vmem:[#allocation25_spill] sm:$0xff] }
0x2cbc   :  { %v8785_v41 = vmul.f32 %v10781_v1, %v13513_v21  ;;  %v13586_v37 = vsub.f32 %v8547_v24, %v8583_v3  ;;  %v13598_v21 = vsub.f32 %v13524_v8, %v8584_v34 }
0x2cbd   :  { %v5737_v47 = vpop.permute.xlu1 %5736  ;;  %v8577_v57 = vpop.xlane.xlu0 %8576 }
0x2cbe   :  { %v8799_v50 = vmul.f32 %v13583_v31, %v8785_v41  ;;  %5746 = vst.msk [vmem:[#allocation4 + $0x30] sm:$0xff] %vm1428_vm6, %v5737_v47  ;;  %v8585_v29 = vmul.f32 0.03125, %v8577_v57  ;;  %v8599_v35 = vmul.f32 %v13586_v37, %v13586_v37  ;;  %v8600_v17 = vmul.f32 %v13598_v21, %v13598_v21 }
0x2cbf   :  { %v10783_v55 = vpop.eup %10782 }
0x2cc0   :  { %v8813_v24 = vadd.f32 %v13591_v39, %v8799_v50  ;;  %v8784_v16 = vmul.f32 %v10783_v55, %v13518_v49  ;;  %v13603_v53 = vsub.f32 %v13542_v28, %v8585_v29  ;;  %v8617_v12 = vsel %vm122_vm0, %v8599_v35, 0.0 }
0x2cc1   :  { %v6941_v62 = vpop.permute.xlu1 %6940  ;;  %8618 = vadd.xlane.f32.xlu1 %v8617_v12  ;;  %v5216_v4 = vpop.permute.xlu0 %5215  ;;  %v8620_v51 = vsel %vm122_vm0, %v8600_v17, 0.0 }
0x2cc2   :  { %8821 = vst.msk [vmem:[%s13859_s17 + $0x8] sm:$0xff] %vm122_vm0, %v8813_v24  ;;  %v8798_v8 = vmul.f32 %v13583_v31, %v8784_v16  ;;  %v8601_v49 = vmul.f32 %v13603_v53, %v13603_v53 }
0x2cc3   :  { %6952 = vst.msk [vmem:[#allocation2 + $0x60] sm:$0xff] %vm924_vm4, %v6941_v62  ;;  %5224 = vst.msk [vmem:[#allocation2 + $0x38] sm:$0xff] %vm924_vm4, %v5216_v4  ;;  %v10785_v28 = vpop.eup %10784 }
0x2cc4   :  { %v8812_v45 = vadd.f32 %v13591_v39, %v8798_v8  ;;  %v8787_v46 = vmul.f32 %v10785_v28, %v13526_v58  ;;  %v8623_v14 = vsel %vm122_vm0, %v8601_v49, 0.0 }
0x2cc5   :  { %v6945_v0 = vpop.permute.xlu1 %6944  ;;  %8624 = vadd.xlane.f32.xlu0 %v8623_v14  ;;  %v5735_v23 = vpop.permute.xlu0 %5734 }
0x2cc6   :  { %8820 = vst.msk [vmem:[%s13859_s17] sm:$0xff] %vm122_vm0, %v8812_v45  ;;  %v8801_v22 = vmul.f32 %v13583_v31, %v8787_v46 }
0x2cc7   :  { %6954 = vst.msk [vmem:[#allocation2 + $0x70] sm:$0xff] %vm924_vm4, %v6945_v0  ;;  %v10787_v58 = vpop.eup %10786 }
0x2cc8   :  { %5745 = vst.msk [vmem:[#allocation4 + $0x28] sm:$0xff] %vm1428_vm6, %v5735_v23  ;;  %v8815_v2 = vadd.f32 %v13591_v39, %v8801_v22  ;;  %v8786_v63 = vmul.f32 %v10787_v58, %v13532_v13 }
0x2cc9   :  { %v7464_v10 = vpop.permute.xlu1 %7463  ;;  %8621 = vadd.xlane.f32.xlu0 %v8620_v51  ;;  %v5739_v38 = vpop.permute.xlu0 %5738 }
0x2cca   :  { %8823 = vst.msk [vmem:[%s13859_s17 + $0x18] sm:$0xff] %vm122_vm0, %v8815_v2  ;;  %v8800_v54 = vmul.f32 %v13583_v31, %v8786_v63 }
0x2ccb   :  { %7475 = vst.msk [vmem:[#allocation4 + $0x60] sm:$0xff] %vm1428_vm6, %v7464_v10  ;;  %5747 = vst.msk [vmem:[#allocation4 + $0x38] sm:$0xff] %vm1428_vm6, %v5739_v38 }
0x2ccc   :  { %v8814_v33 = vadd.f32 %v13591_v39, %v8800_v54 }
0x2ccd   :  { %v7468_v15 = vpop.permute.xlu1 %7467  ;;  %v6943_v13 = vpop.permute.xlu0 %6942 }
0x2cce   :  { %8822 = vst.msk [vmem:[%s13859_s17 + $0x10] sm:$0xff] %vm122_vm0, %v8814_v33 }
0x2ccf   :  { %7477 = vst.msk [vmem:[#allocation4 + $0x70] sm:$0xff] %vm1428_vm6, %v7468_v15 }
0x2cd0   :  { %6953 = vst.msk [vmem:[#allocation2 + $0x68] sm:$0xff] %vm924_vm4, %v6943_v13 }
0x2cd1   :  { %v6947_v30 = vpop.permute.xlu0 %6946 }
0x2cd2   :  { %6955 = vst.msk [vmem:[#allocation2 + $0x78] sm:$0xff] %vm924_vm4, %v6947_v30  ;;  %3149 = vrot.lane.b32.xlu1 %v14023_v43, %s10886_s21 }
0x2cd5   :  { %v7466_v61 = vpop.permute.xlu0 %7465 }
0x2cd6   :  { %7476 = vst.msk [vmem:[#allocation4 + $0x68] sm:$0xff] %vm1428_vm6, %v7466_v61  ;;  %3153 = vrot.lane.b32.xlu1 %v14024_v18, %s10886_s21 }
0x2cda   :  { %3579 = vrot.lane.b32.xlu1 %v13343_v6, %s10887_s4  ;;  %v14030_v6 = vld [vmem:[#allocation36_spill] sm:$0xff] }
0x2cde   :  { %3583 = vrot.lane.b32.xlu1 %v13347_v5, %s10887_s4  ;;  %v14031_v5 = vld [vmem:[#allocation49_spill] sm:$0xff] }
0x2cdf   :  { %7469 = vrot.lane.b32.xlu0 %v13339_v52, %s10886_s21  ;;  %v14029_v52 = vld [vmem:[#allocation47_spill] sm:$0xff] }
0x2ce2   :  { %5712 = vrot.lane.b32.xlu1 %v14025_v36, %s10886_s21 }
0x2ce3   :  { %3151 = vrot.lane.b32.xlu0 %v14026_v32, %s10886_s21 }
0x2ce6   :  { %5716 = vrot.lane.b32.xlu1 %v14027_v9, %s10886_s21 }
0x2ce7   :  { %3155 = vrot.lane.b32.xlu0 %v14028_v60, %s10886_s21 }
0x2cea   :  { %6142 = vrot.lane.b32.xlu1 %v13351_v27, %s10887_s4  ;;  %v14032_v27 = vld [vmem:[#allocation38_spill] sm:$0xff] }
0x2ceb   :  { %3581 = vrot.lane.b32.xlu0 %v13357_v48, %s10887_s4  ;;  %v14033_v48 = vld [vmem:[#allocation48_spill] sm:$0xff] }
0x2cee   :  { %6146 = vrot.lane.b32.xlu1 %v13362_v26, %s10887_s4  ;;  %v14034_v26 = vld [vmem:[#allocation50_spill] sm:$0xff] }
0x2cef   :  { %3585 = vrot.lane.b32.xlu0 %v13366_v25, %s10887_s4 }
0x2cf2   :  { %7443 = vrot.lane.b32.xlu1 %v14029_v52, %s10886_s21 }
0x2cf3   :  { %5714 = vrot.lane.b32.xlu0 %v14030_v6, %s10886_s21  ;;  %v14035_v6 = vld [vmem:[#allocation26_spill] sm:$0xff] }
0x2cf6   :  { %7447 = vrot.lane.b32.xlu1 %v14031_v5, %s10886_s21  ;;  %v14036_v5 = vld [vmem:[#allocation28_spill] sm:$0xff] }
0x2cf7   :  { %5718 = vrot.lane.b32.xlu0 %v14032_v27, %s10886_s21  ;;  %v14037_v27 = vld [vmem:[#allocation27_spill] sm:$0xff] }
0x2cfa   :  { %7873 = vrot.lane.b32.xlu1 %v13370_v59, %s10887_s4 }
0x2cfb   :  { %6144 = vrot.lane.b32.xlu0 %v13375_v11, %s10887_s4 }
0x2cff   :  { %6148 = vrot.lane.b32.xlu0 %v13380_v56, %s10887_s4 }
0x2d03   :  { %7445 = vrot.lane.b32.xlu0 %v14033_v48, %s10886_s21  ;;  %v14040_v48 = vld [vmem:[#allocation41_spill] sm:$0xff] }
0x2d07   :  { %7449 = vrot.lane.b32.xlu0 %v14034_v26, %s10886_s21  ;;  %v14041_v26 = vld [vmem:[#allocation40_spill] sm:$0xff] }
0x2d3e   :  { %v8616_v25 = vpop.xlane.xlu0 %8615 }
0x2d3f   :  { %v8630_v3 = vmul.f32 0.03125, %v8616_v25  ;;  %v14043_v25 = vld [vmem:[#allocation42_spill] sm:$0xff] }
0x2d41   :  { %v8638_v1 = vadd.f32 1e-05, %v8630_v3 }
0x2d43   :  { %10788 = vrsqrt.f32 %v8638_v1 }
0x2d4a   :  { %v8619_v34 = vpop.xlane.xlu1 %8618 }
0x2d4b   :  { %v8631_v41 = vmul.f32 0.03125, %v8619_v34 }
0x2d4d   :  { %v8639_v47 = vadd.f32 1e-05, %v8631_v41 }
0x2d4e   :  { %v3150_v59 = vpop.permute.xlu1 %3149  ;;  %v8625_v57 = vpop.xlane.xlu0 %8624 }
0x2d4f   :  { %10790 = vrsqrt.f32 %v8639_v47  ;;  %3161 = vst.msk [vmem:[#allocation2 + $0x40] sm:$0xff] %vm1428_vm6, %v3150_v59  ;;  %v8633_v11 = vmul.f32 0.03125, %v8625_v57 }
0x2d50   :  { %v10789_v56 = vpop.eup %10788 }
0x2d51   :  { %v8641_v50 = vadd.f32 1e-05, %v8633_v11  ;;  %v8654_v29 = vmul.f32 %v10789_v56, %v13573_v19 }
0x2d52   :  { %v3154_v35 = vpop.permute.xlu1 %3153  ;;  %v8622_v55 = vpop.xlane.xlu0 %8621 }
0x2d53   :  { %10792 = vrsqrt.f32 %v8641_v50  ;;  %3163 = vst.msk [vmem:[#allocation2 + $0x50] sm:$0xff] %vm1428_vm6, %v3154_v35  ;;  %v8632_v24 = vmul.f32 0.03125, %v8622_v55  ;;  %v8668_v16 = vmul.f32 %v13487_v40, %v8654_v29 }
0x2d55   :  { %v8640_v12 = vadd.f32 1e-05, %v8632_v24  ;;  %v13695_v62 = vadd.f32 %v13493_v42, %v8668_v16 }
0x2d56   :  { %v3580_v4 = vpop.permute.xlu1 %3579  ;;  %v7470_v8 = vpop.permute.xlu0 %7469 }
0x2d57   :  { %10794 = vrsqrt.f32 %v8640_v12  ;;  %3591 = vst.msk [vmem:[#allocation4 + $0x40] sm:$0xff] %vm1839_vm7, %v3580_v4  ;;  %v8700_v19 = vsel %vm122_vm0, %v13695_v62, 0.0 }
0x2d58   :  { %7478 = vst.msk [vmem:[#allocation4 + $0x78] sm:$0xff] %vm1428_vm6, %v7470_v8  ;;  %8701 = vadd.xlane.f32.xlu1 %v8700_v19 }
0x2d5a   :  { %v3584_v49 = vpop.permute.xlu1 %3583  ;;  %v3152_v28 = vpop.permute.xlu0 %3151 }
0x2d5b   :  { %3593 = vst.msk [vmem:[#allocation4 + $0x50] sm:$0xff] %vm1839_vm7, %v3584_v49 }
0x2d5c   :  { %3162 = vst.msk [vmem:[#allocation2 + $0x48] sm:$0xff] %vm1428_vm6, %v3152_v28  ;;  %v10791_v45 = vpop.eup %10790 }
0x2d5d   :  { %v8655_v46 = vmul.f32 %v10791_v45, %v13586_v37 }
0x2d5e   :  { %v5713_v14 = vpop.permute.xlu1 %5712  ;;  %v3156_v17 = vpop.permute.xlu0 %3155 }
0x2d5f   :  { %5724 = vst.msk [vmem:[#allocation2 + $0x20] sm:$0xff] %vm1428_vm6, %v5713_v14  ;;  %3164 = vst.msk [vmem:[#allocation2 + $0x58] sm:$0xff] %vm1428_vm6, %v3156_v17  ;;  %v8669_v0 = vmul.f32 %v13487_v40, %v8655_v46 }
0x2d60   :  { %v10793_v23 = vpop.eup %10792 }
0x2d61   :  { %v8683_v22 = vadd.f32 %v13493_v42, %v8669_v0  ;;  %v8657_v58 = vmul.f32 %v10793_v23, %v13603_v53 }
0x2d62   :  { %v5717_v2 = vpop.permute.xlu1 %5716  ;;  %v3582_v63 = vpop.permute.xlu0 %3581 }
0x2d63   :  { %5726 = vst.msk [vmem:[#allocation2 + $0x30] sm:$0xff] %vm1428_vm6, %v5717_v2  ;;  %v8703_v37 = vsel %vm122_vm0, %v8683_v22, 0.0  ;;  %v8671_v51 = vmul.f32 %v13487_v40, %v8657_v58 }
0x2d64   :  { %3592 = vst.msk [vmem:[#allocation4 + $0x48] sm:$0xff] %vm1839_vm7, %v3582_v63  ;;  %v10795_v10 = vpop.eup %10794  ;;  %8704 = vadd.xlane.f32.xlu0 %v8703_v37  ;;  %v14044_v63 = vld [vmem:[#allocation53_spill] sm:$0xff] }
0x2d65   :  { %v8685_v38 = vadd.f32 %v13493_v42, %v8671_v51  ;;  %v8656_v54 = vmul.f32 %v10795_v10, %v13598_v21  ;;  %v14045_v51 = vld [vmem:[#allocation52_spill] sm:$0xff]  ;;  %v14046_v10 = vld [vmem:[#allocation54_spill] sm:$0xff] }
0x2d66   :  { %v6143_v33 = vpop.permute.xlu1 %6142  ;;  %v3586_v15 = vpop.permute.xlu0 %3585 }
0x2d67   :  { %6154 = vst.msk [vmem:[#allocation4 + $0x20] sm:$0xff] %vm1839_vm7, %v6143_v33  ;;  %3594 = vst.msk [vmem:[#allocation4 + $0x58] sm:$0xff] %vm1839_vm7, %v3586_v15  ;;  %v8709_v53 = vsel %vm122_vm0, %v8685_v38, 0.0  ;;  %v8670_v13 = vmul.f32 %v13487_v40, %v8656_v54 }
0x2d68   :  { %8710 = vadd.xlane.f32.xlu0 %v8709_v53 }
0x2d69   :  { %v8684_v30 = vadd.f32 %v13493_v42, %v8670_v13 }
0x2d6a   :  { %v6147_v43 = vpop.permute.xlu1 %6146  ;;  %v5715_v61 = vpop.permute.xlu0 %5714 }
0x2d6b   :  { %6156 = vst.msk [vmem:[#allocation4 + $0x30] sm:$0xff] %vm1839_vm7, %v6147_v43  ;;  %v8706_v21 = vsel %vm122_vm0, %v8684_v30, 0.0 }
0x2d6c   :  { %5725 = vst.msk [vmem:[#allocation2 + $0x28] sm:$0xff] %vm1428_vm6, %v5715_v61  ;;  %8707 = vadd.xlane.f32.xlu1 %v8706_v21 }
0x2d6e   :  { %v7444_v18 = vpop.permute.xlu1 %7443  ;;  %v5719_v36 = vpop.permute.xlu0 %5718 }
0x2d6f   :  { %7455 = vst.msk [vmem:[#allocation2 + $0x60] sm:$0xff] %vm1428_vm6, %v7444_v18  ;;  %5727 = vst.msk [vmem:[#allocation2 + $0x38] sm:$0xff] %vm1428_vm6, %v5719_v36 }
0x2d72   :  { %v7448_v32 = vpop.permute.xlu1 %7447  ;;  %v6145_v40 = vpop.permute.xlu0 %6144 }
0x2d73   :  { %7457 = vst.msk [vmem:[#allocation2 + $0x70] sm:$0xff] %vm1428_vm6, %v7448_v32 }
0x2d74   :  { %6155 = vst.msk [vmem:[#allocation4 + $0x28] sm:$0xff] %vm1839_vm7, %v6145_v40 }
0x2d76   :  { %v7874_v42 = vpop.permute.xlu1 %7873  ;;  %v6149_v9 = vpop.permute.xlu0 %6148 }
0x2d77   :  { %7885 = vst.msk [vmem:[#allocation4 + $0x60] sm:$0xff] %vm1839_vm7, %v7874_v42  ;;  %6157 = vst.msk [vmem:[#allocation4 + $0x38] sm:$0xff] %vm1839_vm7, %v6149_v9 }
0x2d7a   :  { %v7446_v60 = vpop.permute.xlu0 %7445 }
0x2d7b   :  { %7456 = vst.msk [vmem:[#allocation2 + $0x68] sm:$0xff] %vm1428_vm6, %v7446_v60 }
0x2d7d   :  { %7877 = vrot.lane.b32.xlu1 %v13384_v7, %s10887_s4  ;;  %v14038_v7 = vld [vmem:[#allocation39_spill] sm:$0xff] }
0x2d7e   :  { %7875 = vrot.lane.b32.xlu0 %v13388_v44, %s10887_s4  ;;  %v7450_v52 = vpop.permute.xlu0 %7449  ;;  %v14039_v44 = vld [vmem:[#allocation29_spill] sm:$0xff] }
0x2d7f   :  { %7458 = vst.msk [vmem:[#allocation2 + $0x78] sm:$0xff] %vm1428_vm6, %v7450_v52 }
0x2d81   :  { %3559 = vrot.lane.b32.xlu1 %v14035_v6, %s10887_s4 }
0x2d82   :  { %7879 = vrot.lane.b32.xlu0 %v13393_v20, %s10887_s4  ;;  %v14042_v20 = vld [vmem:[#allocation51_spill] sm:$0xff] }
0x2d85   :  { %3563 = vrot.lane.b32.xlu1 %v14036_v5, %s10887_s4 }
0x2d86   :  { %3561 = vrot.lane.b32.xlu0 %v14037_v27, %s10887_s4 }
0x2d89   :  { %6122 = vrot.lane.b32.xlu1 %v14038_v7, %s10887_s4 }
0x2d8a   :  { %3565 = vrot.lane.b32.xlu0 %v14039_v44, %s10887_s4 }
0x2d8d   :  { %6126 = vrot.lane.b32.xlu1 %v14040_v48, %s10887_s4 }
0x2d8e   :  { %6124 = vrot.lane.b32.xlu0 %v14041_v26, %s10887_s4 }
0x2d91   :  { %7853 = vrot.lane.b32.xlu1 %v14042_v20, %s10887_s4 }
0x2d92   :  { %6128 = vrot.lane.b32.xlu0 %v14043_v25, %s10887_s4 }
0x2de1   :  { %v8702_v3 = vpop.xlane.xlu1 %8701 }
0x2de2   :  { %v8716_v1 = vmul.f32 0.03125, %v8702_v3 }
0x2de4   :  { %v13756_v34 = vsub.f32 %v13695_v62, %v8716_v1 }
0x2de6   :  { %v8732_v41 = vmul.f32 %v13756_v34, %v13756_v34 }
0x2de8   :  { %v8748_v47 = vsel %vm122_vm0, %v8732_v41, 0.0 }
0x2de9   :  { %8749 = vadd.xlane.f32.xlu0 %v8748_v47 }
0x2ded   :  { %v8705_v59 = vpop.xlane.xlu0 %8704 }
0x2dee   :  { %v8717_v57 = vmul.f32 0.03125, %v8705_v59 }
0x2df0   :  { %v13761_v11 = vsub.f32 %v8683_v22, %v8717_v57 }
0x2df1   :  { %v8711_v56 = vpop.xlane.xlu0 %8710 }
0x2df2   :  { %v8719_v50 = vmul.f32 0.03125, %v8711_v56  ;;  %v8733_v29 = vmul.f32 %v13761_v11, %v13761_v11 }
0x2df4   :  { %v13765_v35 = vsub.f32 %v8685_v38, %v8719_v50  ;;  %v8751_v55 = vsel %vm122_vm0, %v8733_v29, 0.0 }
0x2df5   :  { %v8708_v24 = vpop.xlane.xlu1 %8707  ;;  %8752 = vadd.xlane.f32.xlu1 %v8751_v55  ;;  %v7876_v16 = vpop.permute.xlu0 %7875 }
0x2df6   :  { %v8718_v12 = vmul.f32 0.03125, %v8708_v24  ;;  %7886 = vst.msk [vmem:[#allocation4 + $0x68] sm:$0xff] %vm1839_vm7, %v7876_v16  ;;  %v8735_v62 = vmul.f32 %v13765_v35, %v13765_v35 }
0x2df8   :  { %v13771_v4 = vsub.f32 %v8684_v30, %v8718_v12  ;;  %v8757_v8 = vsel %vm122_vm0, %v8735_v62, 0.0 }
0x2df9   :  { %v7878_v19 = vpop.permute.xlu1 %7877  ;;  %8758 = vadd.xlane.f32.xlu1 %v8757_v8  ;;  %v7880_v49 = vpop.permute.xlu0 %7879 }
0x2dfa   :  { %7887 = vst.msk [vmem:[#allocation4 + $0x70] sm:$0xff] %vm1839_vm7, %v7878_v19  ;;  %7888 = vst.msk [vmem:[#allocation4 + $0x78] sm:$0xff] %vm1839_vm7, %v7880_v49  ;;  %v8734_v28 = vmul.f32 %v13771_v4, %v13771_v4 }
0x2dfc   :  { %v8754_v45 = vsel %vm122_vm0, %v8734_v28, 0.0 }
0x2dfd   :  { %8755 = vadd.xlane.f32.xlu0 %v8754_v45  ;;  %v3560_v46 = vpop.permute.xlu1 %3559  ;;  %v3562_v14 = vpop.permute.xlu0 %3561 }
0x2dfe   :  { %3571 = vst.msk [vmem:[#allocation2 + $0x40] sm:$0xff] %vm1839_vm7, %v3560_v46  ;;  %3572 = vst.msk [vmem:[#allocation2 + $0x48] sm:$0xff] %vm1839_vm7, %v3562_v14 }
0x2e01   :  { %v3564_v17 = vpop.permute.xlu1 %3563  ;;  %v3566_v0 = vpop.permute.xlu0 %3565 }
0x2e02   :  { %3573 = vst.msk [vmem:[#allocation2 + $0x50] sm:$0xff] %vm1839_vm7, %v3564_v17  ;;  %3574 = vst.msk [vmem:[#allocation2 + $0x58] sm:$0xff] %vm1839_vm7, %v3566_v0 }
0x2e05   :  { %v6123_v23 = vpop.permute.xlu1 %6122  ;;  %v6125_v22 = vpop.permute.xlu0 %6124 }
0x2e06   :  { %6134 = vst.msk [vmem:[#allocation2 + $0x20] sm:$0xff] %vm1839_vm7, %v6123_v23  ;;  %6135 = vst.msk [vmem:[#allocation2 + $0x28] sm:$0xff] %vm1839_vm7, %v6125_v22 }
0x2e09   :  { %v6127_v58 = vpop.permute.xlu1 %6126  ;;  %v6129_v2 = vpop.permute.xlu0 %6128 }
0x2e0a   :  { %6136 = vst.msk [vmem:[#allocation2 + $0x30] sm:$0xff] %vm1839_vm7, %v6127_v58  ;;  %6137 = vst.msk [vmem:[#allocation2 + $0x38] sm:$0xff] %vm1839_vm7, %v6129_v2  ;;  %7857 = vrot.lane.b32.xlu1 %v14044_v63, %s10887_s4 }
0x2e0d   :  { %v7854_v37 = vpop.permute.xlu1 %7853 }
0x2e0e   :  { %7865 = vst.msk [vmem:[#allocation2 + $0x60] sm:$0xff] %vm1839_vm7, %v7854_v37 }
0x2e13   :  { %7855 = vrot.lane.b32.xlu0 %v14045_v51, %s10887_s4 }
0x2e17   :  { %7859 = vrot.lane.b32.xlu0 %v14046_v10, %s10887_s4 }
0x2e18   :  { %10826 = shalt.err (!%p10823_p4)
}
0x2e19   :  { %s10889_s7 = smov 128   ;;  %s10890_s8 = smov 8  }
0x2e1a   :  { %8853 = dma.vmem_to_hbm [thread:$0]  %s8848_s22, 2048, %s13861_s19, [#allocation5], %s10889_s7, %s10889_s7, %s10890_s8  }
0x2e1b   :  { %s10891_s4 = smov [#allocation6]  }
0x2e1c   :  { %s8859_s5 = sshll.u32 %s10891_s4, 4  ;;  %s8860_s5 = int_to_ptr.vmem [resolvable:$true] %s8859_s5 }
0x2e1d   :  { %s10835_s1 = scalar_lea.vmem %s8860_s5, 256  ;;  %p10840_p6 = scmp.lt.s32.totalorder %s8860_s5, %s8860_s5 }
0x2e1e   :  { %p10836_p5 = scmp.ne.s32.totalorder %s8860_s5, %s10835_s1  ;;  %p10841_p7 = scmp.lt.s32.totalorder %s10835_s1, %s10835_s1 }
0x2e20   :  { %p10842_p8 = por %p10841_p7, %p10840_p6 }
0x2e22   :  { %p10843_p9 = pnand %p10842_p8, %p10836_p5 }
0x2e24   :  { %10846 = shalt.err (!%p10843_p9)
}
0x2e25   :  { %s10892_s6 = smov 4   ;;  %s10893_s19 = smov [#allocation2]  }
0x2e26   :  { %8865 = dma.vmem_to_hbm [thread:$0]  %s8860_s5, 256, %s13862_s20, [#allocation5], %s10886_s21, %s10886_s21, %s10892_s6  }
0x2e27   :  { %s8835_s20 = sshll.u32 %s10893_s19, 4  ;;  %s8836_s20 = int_to_ptr.vmem [resolvable:$true] %s8835_s20 }
0x2e28   :  { %s10855_s12 = scalar_lea.vmem %s8836_s20, 2048  ;;  %p10860_p11 = scmp.lt.s32.totalorder %s8836_s20, %s8836_s20 }
0x2e29   :  { %p10856_p10 = scmp.ne.s32.totalorder %s8836_s20, %s10855_s12  ;;  %p10861_p12 = scmp.lt.s32.totalorder %s10855_s12, %s10855_s12 }
0x2e2b   :  { %p10862_p13 = por %p10861_p12, %p10860_p11 }
0x2e2d   :  { %p10863_p0 = pnand %p10862_p13, %p10856_p10 }
0x2e72   :  { %v8750_v38 = vpop.xlane.xlu0 %8749 }
0x2e73   :  { %v8764_v54 = vmul.f32 0.03125, %v8750_v38 }
0x2e75   :  { %v8772_v33 = vadd.f32 1e-05, %v8764_v54 }
0x2e77   :  { %10796 = vrsqrt.f32 %v8772_v33 }
0x2e7e   :  { %v8753_v15 = vpop.xlane.xlu1 %8752 }
0x2e7f   :  { %v8765_v53 = vmul.f32 0.03125, %v8753_v15 }
0x2e81   :  { %v8773_v13 = vadd.f32 1e-05, %v8765_v53 }
0x2e82   :  { %v8759_v30 = vpop.xlane.xlu1 %8758 }
0x2e83   :  { %10798 = vrsqrt.f32 %v8773_v13  ;;  %v8767_v43 = vmul.f32 0.03125, %v8759_v30 }
0x2e84   :  { %v10797_v61 = vpop.eup %10796 }
0x2e85   :  { %v8788_v21 = vmul.f32 %v10797_v61, %v13756_v34  ;;  %v8775_v18 = vadd.f32 1e-05, %v8767_v43 }
0x2e86   :  { %v7858_v36 = vpop.permute.xlu1 %7857  ;;  %v8756_v32 = vpop.xlane.xlu0 %8755 }
0x2e87   :  { %v8802_v40 = vmul.f32 %v13583_v31, %v8788_v21  ;;  %10800 = vrsqrt.f32 %v8775_v18  ;;  %7867 = vst.msk [vmem:[#allocation2 + $0x70] sm:$0xff] %vm1839_vm7, %v7858_v36  ;;  %v8766_v42 = vmul.f32 0.03125, %v8756_v32 }
0x2e89   :  { %v8816_v9 = vadd.f32 %v13591_v39, %v8802_v40  ;;  %v8774_v60 = vadd.f32 1e-05, %v8766_v42 }
0x2e8a   :  { %v7856_v52 = vpop.permute.xlu0 %7855 }
0x2e8b   :  { %8824 = vst.msk [vmem:[%s13859_s17 + $0x20] sm:$0xff] %vm122_vm0, %v8816_v9  ;;  %10802 = vrsqrt.f32 %v8774_v60 }
0x2e8c   :  { %7866 = vst.msk [vmem:[#allocation2 + $0x68] sm:$0xff] %vm1839_vm7, %v7856_v52 }
0x2e8e   :  { %v7860_v6 = vpop.permute.xlu0 %7859 }
0x2e8f   :  { %7868 = vst.msk [vmem:[#allocation2 + $0x78] sm:$0xff] %vm1839_vm7, %v7860_v6 }
0x2e90   :  { %v10799_v5 = vpop.eup %10798 }
0x2e91   :  { %10866 = shalt.err (!%p10863_p0)
}
0x2e92   :  { %8841 = dma.vmem_to_hbm [thread:$0]  %s8836_s20, 2048, %s13860_s18, [#allocation3], %s10889_s7, %s10889_s7, %s10890_s8   ;;  %v8789_v27 = vmul.f32 %v10799_v5, %v13761_v11 }
0x2e94   :  { %v8803_v7 = vmul.f32 %v13583_v31, %v8789_v27  ;;  %v10801_v44 = vpop.eup %10800 }
0x2e95   :  { %v8791_v26 = vmul.f32 %v10801_v44, %v13765_v35 }
0x2e96   :  { %v8817_v48 = vadd.f32 %v13591_v39, %v8803_v7 }
0x2e97   :  { %v8805_v20 = vmul.f32 %v13583_v31, %v8791_v26 }
0x2e98   :  { %8825 = vst.msk [vmem:[%s13859_s17 + $0x28] sm:$0xff] %vm122_vm0, %v8817_v48  ;;  %v10803_v25 = vpop.eup %10802 }
0x2e99   :  { %v8819_v3 = vadd.f32 %v13591_v39, %v8805_v20  ;;  %v8790_v1 = vmul.f32 %v10803_v25, %v13771_v4 }
0x2e9b   :  { %8827 = vst.msk [vmem:[%s13859_s17 + $0x38] sm:$0xff] %vm122_vm0, %v8819_v3  ;;  %v8804_v34 = vmul.f32 %v13583_v31, %v8790_v1 }
0x2e9d   :  { %v8818_v41 = vadd.f32 %v13591_v39, %v8804_v34 }
0x2e9f   :  { %8826 = vst.msk [vmem:[%s13859_s17 + $0x30] sm:$0xff] %vm122_vm0, %v8818_v41 }
0x2ea0   :  { %10875 = dma.done.wait [#allocation3], 2048  }
0x2ea1   :  { %10876 = vsyncadd [#allocation3], 4294965248 }
0x2ea2   :  { %10877 = dma.done.wait [#allocation5], 2304  }
0x2ea3   :  { %10878 = vsyncadd [#allocation5], 4294964992 }
0x2ea4   :  { %8877 = vsyncpa [#allocation3], 1 }
0x2ea5   :  { %8878 = vsyncpa [#allocation5], 1 }

</bundles_post_ra>
